<compile_context>
chip_gen: v7x
topology: tpu7x:2x2x1
jax: 0.10.0
libtpu: 0.0.40
codegen_flags: <defaults>
</compile_context>

<pallas_src>
import jax
import jax.numpy as jnp
from jax.experimental import pallas as pl
from jax.experimental.pallas import tpu as pltpu

BN_EPS = 1e-5
HIDDEN = (1300, 700, 300)  # fixed hidden widths from the module __init__


def _round_up(n, m):
    return ((n + m - 1) // m) * m


# --------------------------------------------------------------------------- #
# Kernel: fused (Linear+BN folded) -> bias -> ReLU, four times.
# --------------------------------------------------------------------------- #
def cnvnet_kernel(x_ref, w1, b1, w2, b2, w3, b3, w4, b4, o_ref):
    def layer(h_bf16, w_ref, b_ref, out_dtype):
        # bf16 x bf16 MXU matmul with f32 accumulation; bias + ReLU in f32,
        # then cast once to the dtype the next consumer wants.
        y = jnp.dot(h_bf16, w_ref[...], preferred_element_type=jnp.float32)
        return jnp.maximum(y + b_ref[...], 0.0).astype(out_dtype)

    h = layer(x_ref[...].astype(jnp.bfloat16), w1, b1, jnp.bfloat16)  # dropout p=0.3 -> identity (eval)
    h = layer(h, w2, b2, jnp.bfloat16)
    h = layer(h, w3, b3, jnp.bfloat16)                                # dropout p=0.3 -> identity (eval)
    h = layer(h, w4, b4, o_ref.dtype)                                 # dropout p=0.4 -> identity (eval)
    o_ref[...] = h
    # TODO(synk): training-mode dropout (pltpu.prng_*) and batch-statistics BN
    # are not implemented; this kernel reproduces the deterministic eval forward.


# --------------------------------------------------------------------------- #
# Parameter prep: fold eval BN into Linear, pad feature dims to 128, cast bf16.
# --------------------------------------------------------------------------- #
def prepare_params(params):
    """params: list of 4 tuples (W[fin,fout], b, gamma, beta, running_mean, running_var).

    Returns list of (W_bf16[fin_p, fout_p], b_f32[1, fout_p]) with BN folded in.
    Output dims are zero-padded to multiples of 128 (padded cols give ReLU(0)=0
    and feed zero rows of the next weight, so results are unchanged).  Layer 1
    keeps the raw cnv_length input rows so the unpadded activation can be fed
    straight from HBM (full-array block => no (8,128) constraint).
    """
    prepared = []
    for li, (W, b, g, be, mu, var) in enumerate(params):
        fin, fout = W.shape
        scale = g * jax.lax.rsqrt(var + BN_EPS)                      # (fout,)
        Wf = W * scale[None, :]
        bf = (b - mu) * scale + be
        fin_p = fin if li == 0 else _round_up(fin, 128)
        fout_p = _round_up(fout, 128)
        Wp = jnp.zeros((fin_p, fout_p), jnp.float32).at[:fin, :fout].set(Wf)
        bp = jnp.zeros((1, fout_p), jnp.float32).at[:, :fout].set(bf)
        prepared.append((Wp.astype(jnp.bfloat16), bp))
    return prepared


# --------------------------------------------------------------------------- #
# Batch-tile selection
# --------------------------------------------------------------------------- #
def _choose_bm(B, bm_max=512, small_batch_threshold=256, prefer_even_grid=True):
    """Pick the batch tile.

    * B <= threshold: grid=1 (small-batch regime is weight-DMA bound; splitting
      across TensorCores would double that HBM traffic).
    * Large B: n_steps = cdiv(B, bm_max), bumped to an even count so v7x's two
      TensorCores both stay busy; bm = round_up(cdiv(B, n_steps), 8) so the last
      tile is nearly full (minimal batch-pad waste).
    """
    if B <= small_batch_threshold:
        return _round_up(B, 8)
    n_steps = pl.cdiv(B, bm_max)
    if prefer_even_grid and n_steps > 1 and (n_steps % 2 == 1):
        n_steps += 1
    return _round_up(pl.cdiv(B, n_steps), 8)


# --------------------------------------------------------------------------- #
# Wrapper
# --------------------------------------------------------------------------- #
def cnvnet_forward(x, prepared, m_length, *, bm_max=512):
    """x: (B, cnv_length) f32; prepared: output of prepare_params."""
    B, C = x.shape
    assert prepared[0][0].shape[0] == C, "cnv_length mismatch with prepared params"
    Mp = prepared[-1][0].shape[1]

    bm = _choose_bm(B, bm_max)
    grid = pl.cdiv(B, bm)
    Bp = grid * bm

    # Only the (small, often zero) batch pad happens outside the kernel; the
    # feature-dim pad and f32->bf16 cast happen in-kernel / in the weights.
    xp = x if Bp == B else jnp.pad(x, ((0, Bp - B), (0, 0)))
    # Padded batch rows produce ReLU(bias') != 0 in hidden layers; they are
    # sliced off below (wasted compute on <8 rows per call, not a bug).

    flat_args = [xp] + [t for wb in prepared for t in wb]

    def build(single_buffer_weights):
        # Weights/biases use constant block indices -> fetched once, resident in
        # VMEM across grid steps.  Buffered(1) drops their dead second buffer.
        wkw = {"pipeline_mode": pl.Buffered(1)} if single_buffer_weights else {}
        in_specs = [pl.BlockSpec((bm, C), lambda i: (i, 0))]
        for (W, _b) in prepared:
            fin_p, fout_p = W.shape
            in_specs.append(pl.BlockSpec((fin_p, fout_p), lambda i: (0, 0), **wkw))
            in_specs.append(pl.BlockSpec((1, fout_p), lambda i: (0, 0), **wkw))
        return pl.pallas_call(
            cnvnet_kernel,
            out_shape=jax.ShapeDtypeStruct((Bp, Mp), jnp.float32),
            grid_spec=pltpu.PrefetchScalarGridSpec(
                num_scalar_prefetch=0,
                grid=(grid,),
                in_specs=in_specs,
                out_specs=pl.BlockSpec((bm, Mp), lambda i: (i, 0)),
            ),
            compiler_params=pltpu.CompilerParams(
                # Batch axis is independent -> megacore / 2-TC sharding when grid >= 2.
                dimension_semantics=("parallel",),
                # Working set at bm=512: ~3.6 MB bf16 weights (single-buffered),
                # ~5 MB f32/bf16 intermediates, small in/out tiles (<1 MB x2).
                # 32 MiB fits all gens incl. v7x (64 MiB physical VMEM).
                # TODO(synk): very large cnv_length (>~10k) would need K-tiling
                # of layer 1 instead of a single resident weight block.
                vmem_limit_bytes=32 << 20,
            ),
        )

    try:
        out = jax.block_until_ready(build(True)(*flat_args))
    except Exception:
        # Fallback if this jax version rejects single-buffered input blocks.
        out = jax.block_until_ready(build(False)(*flat_args))

    return out[:B, :m_length]


# --------------------------------------------------------------------------- #
# Pure-JAX reference (mirrors the PyTorch eval forward, full f32 precision).
# --------------------------------------------------------------------------- #
def cnvnet_reference(x, params):
    h = x.astype(jnp.float32)
    for (W, b, g, be, mu, var) in params:
        y = h @ W + b
        y = (y - mu) * (g * jax.lax.rsqrt(var + BN_EPS)) + be
        h = jnp.maximum(y, 0.0)
    return h


def init_params(key, cnv_length, m_length):
    dims = [cnv_length, *HIDDEN, m_length]
    params = []
    for li in range(4):
        fin, fout = dims[li], dims[li + 1]
        key, kw, kb, kg, kbe, km, kv = jax.random.split(key, 7)
        bound = 1.0 / jnp.sqrt(fin)
        W = jax.random.uniform(kw, (fin, fout), jnp.float32, -bound, bound)
        b = jax.random.uniform(kb, (fout,), jnp.float32, -bound, bound)
        gamma = 1.0 + 0.1 * jax.random.normal(kg, (fout,), jnp.float32)
        beta = 0.1 * jax.random.normal(kbe, (fout,), jnp.float32)
        running_mean = 0.1 * jax.random.normal(km, (fout,), jnp.float32)
        running_var = jax.random.uniform(kv, (fout,), jnp.float32, 0.5, 1.5)
        params.append((W, b, gamma, beta, running_mean, running_var))
    return params


if __name__ == "__main__":
    CNV_LENGTH = 200   # deliberately not a multiple of 128 to exercise in-kernel padding
    M_LENGTH = 64

    key = jax.random.PRNGKey(0)
    kx1, kx2, kp = jax.random.split(key, 3)
    params = init_params(kp, CNV_LENGTH, M_LENGTH)
    prepared = prepare_params(params)          # fold BN, pad out-dims to 128, cast bf16 (once)

    # Test 1: tiny batch -> grid=1 path (no batch split; weight-DMA bound regime).
    x1 = jax.random.normal(kx1, (16, CNV_LENGTH), jnp.float32)
    out1 = jax.block_until_ready(cnvnet_forward(x1, prepared, M_LENGTH))
    ref1 = cnvnet_reference(x1, params)
    assert out1.shape == ref1.shape == (16, M_LENGTH)
    err1 = float(jnp.max(jnp.abs(out1 - ref1)))
    assert jnp.allclose(out1, ref1, atol=5e-2, rtol=5e-2), err1

    # Test 2: multi-step grid with batch padding (bm_max lowered to exercise the
    # adaptive-bm / even-grid / pad-and-slice path at small shapes).
    x2 = jax.random.normal(kx2, (300, CNV_LENGTH), jnp.float32)
    out2 = jax.block_until_ready(cnvnet_forward(x2, prepared, M_LENGTH, bm_max=128))
    ref2 = cnvnet_reference(x2, params)
    assert out2.shape == ref2.shape == (300, M_LENGTH)
    err2 = float(jnp.max(jnp.abs(out2 - ref2)))
    assert jnp.allclose(out2, ref2, atol=5e-2, rtol=5e-2), err2

    print("KERNEL_OK")
</pallas_src>

<mosaic_0001>
module attributes {stable_mosaic.version = 11 : i64} {
  func.func @cnvnet_kernel(%arg0: i32, %arg1: memref<16x200xf32, #tpu.memory_space<vmem>>, %arg2: memref<200x1408xbf16, #tpu.memory_space<vmem>>, %arg3: memref<1x1408xf32, #tpu.memory_space<vmem>>, %arg4: memref<1408x768xbf16, #tpu.memory_space<vmem>>, %arg5: memref<1x768xf32, #tpu.memory_space<vmem>>, %arg6: memref<768x384xbf16, #tpu.memory_space<vmem>>, %arg7: memref<1x384xf32, #tpu.memory_space<vmem>>, %arg8: memref<384x128xbf16, #tpu.memory_space<vmem>>, %arg9: memref<1x128xf32, #tpu.memory_space<vmem>>, %arg10: memref<16x128xf32, #tpu.memory_space<vmem>>) attributes {dimension_semantics = [#tpu.dimension_semantics<parallel>], iteration_bounds = array<i64: 1>, scalar_prefetch = 0 : i64, scratch_operands = 0 : i64, tpu.core_type = #tpu.core_type<tc>, window_params = [{transform_indices = @transform_0, window_bounds = array<i64: 16, 200>}, {pipeline_mode = #tpu.pipeline_mode<synchronous>, transform_indices = @transform_1, window_bounds = array<i64: 200, 1408>}, {pipeline_mode = #tpu.pipeline_mode<synchronous>, transform_indices = @transform_2, window_bounds = array<i64: 1, 1408>}, {pipeline_mode = #tpu.pipeline_mode<synchronous>, transform_indices = @transform_3, window_bounds = array<i64: 1408, 768>}, {pipeline_mode = #tpu.pipeline_mode<synchronous>, transform_indices = @transform_4, window_bounds = array<i64: 1, 768>}, {pipeline_mode = #tpu.pipeline_mode<synchronous>, transform_indices = @transform_5, window_bounds = array<i64: 768, 384>}, {pipeline_mode = #tpu.pipeline_mode<synchronous>, transform_indices = @transform_6, window_bounds = array<i64: 1, 384>}, {pipeline_mode = #tpu.pipeline_mode<synchronous>, transform_indices = @transform_7, window_bounds = array<i64: 384, 128>}, {pipeline_mode = #tpu.pipeline_mode<synchronous>, transform_indices = @transform_8, window_bounds = array<i64: 1, 128>}, {transform_indices = @transform_9, window_bounds = array<i64: 16, 128>}]} {
    %c0 = arith.constant 0 : index
    %c0_0 = arith.constant 0 : index
    %0 = vector.load %arg1[%c0, %c0_0] : memref<16x200xf32, #tpu.memory_space<vmem>>, vector<16x200xf32>
    %1 = arith.truncf %0 : vector<16x200xf32> to vector<16x200xbf16>
    %c0_1 = arith.constant 0 : index
    %c0_2 = arith.constant 0 : index
    %2 = vector.load %arg2[%c0_1, %c0_2] : memref<200x1408xbf16, #tpu.memory_space<vmem>>, vector<200x1408xbf16>
    %cst = arith.constant dense<0.000000e+00> : vector<16x1408xf32>
    %3 = tpu.matmul %1, %2, %cst {dimension_numbers = #tpu.dot_dimension_numbers<[1], [0], [0], [1], [0, 0, 1, 1], [], []>} : vector<16x200xbf16>, vector<200x1408xbf16>, vector<16x1408xf32> -> vector<16x1408xf32>
    %c0_3 = arith.constant 0 : index
    %c0_4 = arith.constant 0 : index
    %4 = vector.load %arg3[%c0_3, %c0_4] : memref<1x1408xf32, #tpu.memory_space<vmem>>, vector<1x1408xf32>
    %5 = vector.broadcast %4 : vector<1x1408xf32> to vector<16x1408xf32>
    %6 = arith.addf %3, %5 : vector<16x1408xf32>
    %cst_5 = arith.constant 0.000000e+00 : f32
    %7 = vector.broadcast %cst_5 : f32 to vector<16x1408xf32>
    %8 = arith.maximumf %6, %7 : vector<16x1408xf32>
    %9 = arith.truncf %8 : vector<16x1408xf32> to vector<16x1408xbf16>
    %c0_6 = arith.constant 0 : index
    %c0_7 = arith.constant 0 : index
    %10 = vector.load %arg4[%c0_6, %c0_7] : memref<1408x768xbf16, #tpu.memory_space<vmem>>, vector<1408x768xbf16>
    %cst_8 = arith.constant dense<0.000000e+00> : vector<16x768xf32>
    %11 = tpu.matmul %9, %10, %cst_8 {dimension_numbers = #tpu.dot_dimension_numbers<[1], [0], [0], [1], [0, 0, 1, 1], [], []>} : vector<16x1408xbf16>, vector<1408x768xbf16>, vector<16x768xf32> -> vector<16x768xf32>
    %c0_9 = arith.constant 0 : index
    %c0_10 = arith.constant 0 : index
    %12 = vector.load %arg5[%c0_9, %c0_10] : memref<1x768xf32, #tpu.memory_space<vmem>>, vector<1x768xf32>
    %13 = vector.broadcast %12 : vector<1x768xf32> to vector<16x768xf32>
    %14 = arith.addf %11, %13 : vector<16x768xf32>
    %cst_11 = arith.constant 0.000000e+00 : f32
    %15 = vector.broadcast %cst_11 : f32 to vector<16x768xf32>
    %16 = arith.maximumf %14, %15 : vector<16x768xf32>
    %17 = arith.truncf %16 : vector<16x768xf32> to vector<16x768xbf16>
    %c0_12 = arith.constant 0 : index
    %c0_13 = arith.constant 0 : index
    %18 = vector.load %arg6[%c0_12, %c0_13] : memref<768x384xbf16, #tpu.memory_space<vmem>>, vector<768x384xbf16>
    %cst_14 = arith.constant dense<0.000000e+00> : vector<16x384xf32>
    %19 = tpu.matmul %17, %18, %cst_14 {dimension_numbers = #tpu.dot_dimension_numbers<[1], [0], [0], [1], [0, 0, 1, 1], [], []>} : vector<16x768xbf16>, vector<768x384xbf16>, vector<16x384xf32> -> vector<16x384xf32>
    %c0_15 = arith.constant 0 : index
    %c0_16 = arith.constant 0 : index
    %20 = vector.load %arg7[%c0_15, %c0_16] : memref<1x384xf32, #tpu.memory_space<vmem>>, vector<1x384xf32>
    %21 = vector.broadcast %20 : vector<1x384xf32> to vector<16x384xf32>
    %22 = arith.addf %19, %21 : vector<16x384xf32>
    %cst_17 = arith.constant 0.000000e+00 : f32
    %23 = vector.broadcast %cst_17 : f32 to vector<16x384xf32>
    %24 = arith.maximumf %22, %23 : vector<16x384xf32>
    %25 = arith.truncf %24 : vector<16x384xf32> to vector<16x384xbf16>
    %c0_18 = arith.constant 0 : index
    %c0_19 = arith.constant 0 : index
    %26 = vector.load %arg8[%c0_18, %c0_19] : memref<384x128xbf16, #tpu.memory_space<vmem>>, vector<384x128xbf16>
    %cst_20 = arith.constant dense<0.000000e+00> : vector<16x128xf32>
    %27 = tpu.matmul %25, %26, %cst_20 {dimension_numbers = #tpu.dot_dimension_numbers<[1], [0], [0], [1], [0, 0, 1, 1], [], []>} : vector<16x384xbf16>, vector<384x128xbf16>, vector<16x128xf32> -> vector<16x128xf32>
    %c0_21 = arith.constant 0 : index
    %c0_22 = arith.constant 0 : index
    %28 = vector.load %arg9[%c0_21, %c0_22] : memref<1x128xf32, #tpu.memory_space<vmem>>, vector<1x128xf32>
    %29 = vector.broadcast %28 : vector<1x128xf32> to vector<16x128xf32>
    %30 = arith.addf %27, %29 : vector<16x128xf32>
    %cst_23 = arith.constant 0.000000e+00 : f32
    %31 = vector.broadcast %cst_23 : f32 to vector<16x128xf32>
    %32 = arith.maximumf %30, %31 : vector<16x128xf32>
    %c0_24 = arith.constant 0 : index
    %c0_25 = arith.constant 0 : index
    %33 = vector.load %arg10[%c0_24, %c0_25] : memref<16x128xf32, #tpu.memory_space<vmem>>, vector<16x128xf32>
    tpu.vector_store %arg10[%c0_24, %c0_25], %32 {strides = array<i32>} : memref<16x128xf32, #tpu.memory_space<vmem>>, vector<16x128xf32>,
    return
  }
  func.func @transform_0(%arg0: i32) -> (i32, i32) {
    %c0_i32 = arith.constant 0 : i32
    %c0_i32_0 = arith.constant 0 : i32
    return %arg0, %c0_i32 : i32, i32
  }
  func.func @transform_1(%arg0: i32) -> (i32, i32) {
    %c0_i32 = arith.constant 0 : i32
    %c0_i32_0 = arith.constant 0 : i32
    %c0_i32_1 = arith.constant 0 : i32
    return %c0_i32, %c0_i32_0 : i32, i32
  }
  func.func @transform_2(%arg0: i32) -> (i32, i32) {
    %c0_i32 = arith.constant 0 : i32
    %c0_i32_0 = arith.constant 0 : i32
    %c0_i32_1 = arith.constant 0 : i32
    return %c0_i32, %c0_i32_0 : i32, i32
  }
  func.func @transform_3(%arg0: i32) -> (i32, i32) {
    %c0_i32 = arith.constant 0 : i32
    %c0_i32_0 = arith.constant 0 : i32
    %c0_i32_1 = arith.constant 0 : i32
    return %c0_i32, %c0_i32_0 : i32, i32
  }
  func.func @transform_4(%arg0: i32) -> (i32, i32) {
    %c0_i32 = arith.constant 0 : i32
    %c0_i32_0 = arith.constant 0 : i32
    %c0_i32_1 = arith.constant 0 : i32
    return %c0_i32, %c0_i32_0 : i32, i32
  }
  func.func @transform_5(%arg0: i32) -> (i32, i32) {
    %c0_i32 = arith.constant 0 : i32
    %c0_i32_0 = arith.constant 0 : i32
    %c0_i32_1 = arith.constant 0 : i32
    return %c0_i32, %c0_i32_0 : i32, i32
  }
  func.func @transform_6(%arg0: i32) -> (i32, i32) {
    %c0_i32 = arith.constant 0 : i32
    %c0_i32_0 = arith.constant 0 : i32
    %c0_i32_1 = arith.constant 0 : i32
    return %c0_i32, %c0_i32_0 : i32, i32
  }
  func.func @transform_7(%arg0: i32) -> (i32, i32) {
    %c0_i32 = arith.constant 0 : i32
    %c0_i32_0 = arith.constant 0 : i32
    %c0_i32_1 = arith.constant 0 : i32
    return %c0_i32, %c0_i32_0 : i32, i32
  }
  func.func @transform_8(%arg0: i32) -> (i32, i32) {
    %c0_i32 = arith.constant 0 : i32
    %c0_i32_0 = arith.constant 0 : i32
    %c0_i32_1 = arith.constant 0 : i32
    return %c0_i32, %c0_i32_0 : i32, i32
  }
  func.func @transform_9(%arg0: i32) -> (i32, i32) {
    %c0_i32 = arith.constant 0 : i32
    %c0_i32_0 = arith.constant 0 : i32
    return %arg0, %c0_i32 : i32, i32
  }
}

module attributes {stable_mosaic.version = 11 : i64} {
  func.func @cnvnet_kernel(%arg0: i32, %arg1: memref<16x200xf32, #tpu.memory_space<vmem>>, %arg2: memref<200x1408xbf16, #tpu.memory_space<vmem>>, %arg3: memref<1x1408xf32, #tpu.memory_space<vmem>>, %arg4: memref<1408x768xbf16, #tpu.memory_space<vmem>>, %arg5: memref<1x768xf32, #tpu.memory_space<vmem>>, %arg6: memref<768x384xbf16, #tpu.memory_space<vmem>>, %arg7: memref<1x384xf32, #tpu.memory_space<vmem>>, %arg8: memref<384x128xbf16, #tpu.memory_space<vmem>>, %arg9: memref<1x128xf32, #tpu.memory_space<vmem>>, %arg10: memref<16x128xf32, #tpu.memory_space<vmem>>) attributes {dimension_semantics = [#tpu.dimension_semantics<parallel>], iteration_bounds = array<i64: 1>, scalar_prefetch = 0 : i64, scratch_operands = 0 : i64, tpu.core_type = #tpu.core_type<tc>, window_params = [{transform_indices = @transform_0, window_bounds = array<i64: 16, 200>}, {pipeline_mode = #tpu.pipeline_mode<synchronous>, transform_indices = @transform_1, window_bounds = array<i64: 200, 1408>}, {pipeline_mode = #tpu.pipeline_mode<synchronous>, transform_indices = @transform_2, window_bounds = array<i64: 1, 1408>}, {pipeline_mode = #tpu.pipeline_mode<synchronous>, transform_indices = @transform_3, window_bounds = array<i64: 1408, 768>}, {pipeline_mode = #tpu.pipeline_mode<synchronous>, transform_indices = @transform_4, window_bounds = array<i64: 1, 768>}, {pipeline_mode = #tpu.pipeline_mode<synchronous>, transform_indices = @transform_5, window_bounds = array<i64: 768, 384>}, {pipeline_mode = #tpu.pipeline_mode<synchronous>, transform_indices = @transform_6, window_bounds = array<i64: 1, 384>}, {pipeline_mode = #tpu.pipeline_mode<synchronous>, transform_indices = @transform_7, window_bounds = array<i64: 384, 128>}, {pipeline_mode = #tpu.pipeline_mode<synchronous>, transform_indices = @transform_8, window_bounds = array<i64: 1, 128>}, {transform_indices = @transform_9, window_bounds = array<i64: 16, 128>}]} {
    %c0 = arith.constant 0 : index
    %c0_0 = arith.constant 0 : index
    %0 = vector.load %arg1[%c0, %c0_0] : memref<16x200xf32, #tpu.memory_space<vmem>>, vector<16x200xf32>
    %1 = arith.truncf %0 : vector<16x200xf32> to vector<16x200xbf16>
    %c0_1 = arith.constant 0 : index
    %c0_2 = arith.constant 0 : index
    %2 = vector.load %arg2[%c0_1, %c0_2] : memref<200x1408xbf16, #tpu.memory_space<vmem>>, vector<200x1408xbf16>
    %cst = arith.constant dense<0.000000e+00> : vector<16x1408xf32>
    %3 = tpu.matmul %1, %2, %cst {dimension_numbers = #tpu.dot_dimension_numbers<[1], [0], [0], [1], [0, 0, 1, 1], [], []>} : vector<16x200xbf16>, vector<200x1408xbf16>, vector<16x1408xf32> -> vector<16x1408xf32>
    %c0_3 = arith.constant 0 : index
    %c0_4 = arith.constant 0 : index
    %4 = vector.load %arg3[%c0_3, %c0_4] : memref<1x1408xf32, #tpu.memory_space<vmem>>, vector<1x1408xf32>
    %5 = vector.broadcast %4 : vector<1x1408xf32> to vector<16x1408xf32>
    %6 = arith.addf %3, %5 : vector<16x1408xf32>
    %cst_5 = arith.constant 0.000000e+00 : f32
    %7 = vector.broadcast %cst_5 : f32 to vector<16x1408xf32>
    %8 = arith.maximumf %6, %7 : vector<16x1408xf32>
    %9 = arith.truncf %8 : vector<16x1408xf32> to vector<16x1408xbf16>
    %c0_6 = arith.constant 0 : index
    %c0_7 = arith.constant 0 : index
    %10 = vector.load %arg4[%c0_6, %c0_7] : memref<1408x768xbf16, #tpu.memory_space<vmem>>, vector<1408x768xbf16>
    %cst_8 = arith.constant dense<0.000000e+00> : vector<16x768xf32>
    %11 = tpu.matmul %9, %10, %cst_8 {dimension_numbers = #tpu.dot_dimension_numbers<[1], [0], [0], [1], [0, 0, 1, 1], [], []>} : vector<16x1408xbf16>, vector<1408x768xbf16>, vector<16x768xf32> -> vector<16x768xf32>
    %c0_9 = arith.constant 0 : index
    %c0_10 = arith.constant 0 : index
    %12 = vector.load %arg5[%c0_9, %c0_10] : memref<1x768xf32, #tpu.memory_space<vmem>>, vector<1x768xf32>
    %13 = vector.broadcast %12 : vector<1x768xf32> to vector<16x768xf32>
    %14 = arith.addf %11, %13 : vector<16x768xf32>
    %cst_11 = arith.constant 0.000000e+00 : f32
    %15 = vector.broadcast %cst_11 : f32 to vector<16x768xf32>
    %16 = arith.maximumf %14, %15 : vector<16x768xf32>
    %17 = arith.truncf %16 : vector<16x768xf32> to vector<16x768xbf16>
    %c0_12 = arith.constant 0 : index
    %c0_13 = arith.constant 0 : index
    %18 = vector.load %arg6[%c0_12, %c0_13] : memref<768x384xbf16, #tpu.memory_space<vmem>>, vector<768x384xbf16>
    %cst_14 = arith.constant dense<0.000000e+00> : vector<16x384xf32>
    %19 = tpu.matmul %17, %18, %cst_14 {dimension_numbers = #tpu.dot_dimension_numbers<[1], [0], [0], [1], [0, 0, 1, 1], [], []>} : vector<16x768xbf16>, vector<768x384xbf16>, vector<16x384xf32> -> vector<16x384xf32>
    %c0_15 = arith.constant 0 : index
    %c0_16 = arith.constant 0 : index
    %20 = vector.load %arg7[%c0_15, %c0_16] : memref<1x384xf32, #tpu.memory_space<vmem>>, vector<1x384xf32>
    %21 = vector.broadcast %20 : vector<1x384xf32> to vector<16x384xf32>
    %22 = arith.addf %19, %21 : vector<16x384xf32>
    %cst_17 = arith.constant 0.000000e+00 : f32
    %23 = vector.broadcast %cst_17 : f32 to vector<16x384xf32>
    %24 = arith.maximumf %22, %23 : vector<16x384xf32>
    %25 = arith.truncf %24 : vector<16x384xf32> to vector<16x384xbf16>
    %c0_18 = arith.constant 0 : index
    %c0_19 = arith.constant 0 : index
    %26 = vector.load %arg8[%c0_18, %c0_19] : memref<384x128xbf16, #tpu.memory_space<vmem>>, vector<384x128xbf16>
    %cst_20 = arith.constant dense<0.000000e+00> : vector<16x128xf32>
    %27 = tpu.matmul %25, %26, %cst_20 {dimension_numbers = #tpu.dot_dimension_numbers<[1], [0], [0], [1], [0, 0, 1, 1], [], []>} : vector<16x384xbf16>, vector<384x128xbf16>, vector<16x128xf32> -> vector<16x128xf32>
    %c0_21 = arith.constant 0 : index
    %c0_22 = arith.constant 0 : index
    %28 = vector.load %arg9[%c0_21, %c0_22] : memref<1x128xf32, #tpu.memory_space<vmem>>, vector<1x128xf32>
    %29 = vector.broadcast %28 : vector<1x128xf32> to vector<16x128xf32>
    %30 = arith.addf %27, %29 : vector<16x128xf32>
    %cst_23 = arith.constant 0.000000e+00 : f32
    %31 = vector.broadcast %cst_23 : f32 to vector<16x128xf32>
    %32 = arith.maximumf %30, %31 : vector<16x128xf32>
    %c0_24 = arith.constant 0 : index
    %c0_25 = arith.constant 0 : index
    %33 = vector.load %arg10[%c0_24, %c0_25] : memref<16x128xf32, #tpu.memory_space<vmem>>, vector<16x128xf32>
    tpu.vector_store %arg10[%c0_24, %c0_25], %32 {strides = array<i32>} : memref<16x128xf32, #tpu.memory_space<vmem>>, vector<16x128xf32>,
    return
  }
  func.func @transform_0(%arg0: i32) -> (i32, i32) {
    %c0_i32 = arith.constant 0 : i32
    %c0_i32_0 = arith.constant 0 : i32
    return %arg0, %c0_i32 : i32, i32
  }
  func.func @transform_1(%arg0: i32) -> (i32, i32) {
    %c0_i32 = arith.constant 0 : i32
    %c0_i32_0 = arith.constant 0 : i32
    %c0_i32_1 = arith.constant 0 : i32
    return %c0_i32, %c0_i32_0 : i32, i32
  }
  func.func @transform_2(%arg0: i32) -> (i32, i32) {
    %c0_i32 = arith.constant 0 : i32
    %c0_i32_0 = arith.constant 0 : i32
    %c0_i32_1 = arith.constant 0 : i32
    return %c0_i32, %c0_i32_0 : i32, i32
  }
  func.func @transform_3(%arg0: i32) -> (i32, i32) {
    %c0_i32 = arith.constant 0 : i32
    %c0_i32_0 = arith.constant 0 : i32
    %c0_i32_1 = arith.constant 0 : i32
    return %c0_i32, %c0_i32_0 : i32, i32
  }
  func.func @transform_4(%arg0: i32) -> (i32, i32) {
    %c0_i32 = arith.constant 0 : i32
    %c0_i32_0 = arith.constant 0 : i32
    %c0_i32_1 = arith.constant 0 : i32
    return %c0_i32, %c0_i32_0 : i32, i32
  }
  func.func @transform_5(%arg0: i32) -> (i32, i32) {
    %c0_i32 = arith.constant 0 : i32
    %c0_i32_0 = arith.constant 0 : i32
    %c0_i32_1 = arith.constant 0 : i32
    return %c0_i32, %c0_i32_0 : i32, i32
  }
  func.func @transform_6(%arg0: i32) -> (i32, i32) {
    %c0_i32 = arith.constant 0 : i32
    %c0_i32_0 = arith.constant 0 : i32
    %c0_i32_1 = arith.constant 0 : i32
    return %c0_i32, %c0_i32_0 : i32, i32
  }
  func.func @transform_7(%arg0: i32) -> (i32, i32) {
    %c0_i32 = arith.constant 0 : i32
    %c0_i32_0 = arith.constant 0 : i32
    %c0_i32_1 = arith.constant 0 : i32
    return %c0_i32, %c0_i32_0 : i32, i32
  }
  func.func @transform_8(%arg0: i32) -> (i32, i32) {
    %c0_i32 = arith.constant 0 : i32
    %c0_i32_0 = arith.constant 0 : i32
    %c0_i32_1 = arith.constant 0 : i32
    return %c0_i32, %c0_i32_0 : i32, i32
  }
  func.func @transform_9(%arg0: i32) -> (i32, i32) {
    %c0_i32 = arith.constant 0 : i32
    %c0_i32_0 = arith.constant 0 : i32
    return %arg0, %c0_i32 : i32, i32
  }
}

</mosaic_0001>

<bundles_post_ra>
// kernel: tpu_custom_call.1
= control target key start
LH: loop header
LB: loop body
LE: loop exit
PB: predicated region body
PF: predicated region fallthrough
CT: control target
= control target key end

     0   :  { %14 = vsyncpa [#allocation3], 0  ;;  %s9832_s0 = inlined_call_operand.hbm [shape: f32[16,200], index: 0, kind: input, shape index: {}]   ;;  %s9833_s1 = inlined_call_operand.hbm [shape: bf16[200,1408], index: 1, kind: input, shape index: {}]   ;;  %s9834_s2 = inlined_call_operand.hbm [shape: f32[1,1408], index: 2, kind: input, shape index: {}]   ;;  %s9835_s3 = inlined_call_operand.hbm [shape: bf16[1408,768], index: 3, kind: input, shape index: {}]   ;;  %s9836_s4 = inlined_call_operand.hbm [shape: f32[1,768], index: 4, kind: input, shape index: {}]   ;;  %s9837_s5 = inlined_call_operand.hbm [shape: bf16[768,384], index: 5, kind: input, shape index: {}]   ;;  %s9838_s6 = inlined_call_operand.hbm [shape: f32[1,384], index: 6, kind: input, shape index: {}]   ;;  %s9839_s7 = inlined_call_operand.hbm [shape: bf16[384,128], index: 7, kind: input, shape index: {}]   ;;  %s9840_s8 = inlined_call_operand.hbm [shape: f32[1,128], index: 8, kind: input, shape index: {}]   ;;  %s9841_s9 = inlined_call_operand.hbm [shape: f32[16,128], index: 9, kind: output, shape index: {}]  }
   0x1   :  { %15 = vsyncpa [#allocation6], 0 }
   0x2   :  { %16 = vsyncpa [#allocation9], 0 }
   0x3   :  { %17 = vsyncpa [#allocation12], 0 }
   0x4   :  { %18 = vsyncpa [#allocation15], 0 }
   0x5   :  { %19 = vsyncpa [#allocation4], 0  ;;  %s9446_s30 = smov [#allocation5]   ;;  %s9214_s13 = scalar_lea.hbm %s9833_s1, 17600 }
   0x6   :  { %s37_s10 = sshll.u32 %s9446_s30, 4  ;;  %p9215_p0 = scmp.ne.s32.totalorder %s9833_s1, %s9214_s13  ;;  %s38_s10 = int_to_ptr.vmem [resolvable:$true] %s37_s10 }
   0x7   :  { %p9218_p1 = scmp.lt.u32.totalorder %s9214_s13, %s9833_s1 }
   0x9   :  { %p9220_p2 = pnand %p9218_p1, %p9215_p0 }
   0xb   :  { %9223 = shalt.err (!%p9220_p2)
}
   0xc   :  { %s9224_s18 = scalar_lea.vmem %s38_s10, 17600  ;;  %p9229_p4 = scmp.lt.s32.totalorder %s38_s10, %s38_s10 }
   0xd   :  { %p9225_p3 = scmp.ne.s32.totalorder %s38_s10, %s9224_s18  ;;  %p9230_p5 = scmp.lt.s32.totalorder %s9224_s18, %s9224_s18 }
   0xf   :  { %p9231_p6 = por %p9230_p5, %p9229_p4 }
  0x11   :  { %p9232_p7 = pnand %p9231_p6, %p9225_p3 }
  0x13   :  { %9235 = shalt.err (!%p9232_p7)
}
  0x14   :  { %s9447_s19 = smov 704   ;;  %s9448_s20 = smov 44  }
  0x15   :  { %43 = dma.hbm_to_vmem [thread:$0]  %s9833_s1, 17600, %s38_s10, [#allocation6], %s9447_s19, %s9447_s19, %s9448_s20  }
  0x16   :  { %s9449_s23 = smov [#allocation8]   ;;  %s9236_s27 = scalar_lea.hbm %s9835_s3, 67584 }
  0x17   :  { %s59_s24 = sshll.u32 %s9449_s23, 4  ;;  %p9237_p8 = scmp.ne.s32.totalorder %s9835_s3, %s9236_s27  ;;  %s60_s24 = int_to_ptr.vmem [resolvable:$true] %s59_s24 }
  0x18   :  { %p9240_p9 = scmp.lt.u32.totalorder %s9236_s27, %s9835_s3 }
  0x1a   :  { %p9242_p10 = pnand %p9240_p9, %p9237_p8 }
  0x1c   :  { %9245 = shalt.err (!%p9242_p10)
}
  0x1d   :  { %s9246_s12 = scalar_lea.vmem %s60_s24, 67584  ;;  %p9251_p12 = scmp.lt.s32.totalorder %s60_s24, %s60_s24 }
  0x1e   :  { %p9247_p11 = scmp.ne.s32.totalorder %s60_s24, %s9246_s12  ;;  %p9252_p13 = scmp.lt.s32.totalorder %s9246_s12, %s9246_s12 }
  0x20   :  { %p9253_p0 = por %p9252_p13, %p9251_p12 }
  0x22   :  { %p9254_p1 = pnand %p9253_p0, %p9247_p11 }
  0x24   :  { %9257 = shalt.err (!%p9254_p1)
}
  0x25   :  { %s9450_s1 = smov 384   ;;  %s9451_s10 = smov 24  }
  0x26   :  { %65 = dma.hbm_to_vmem [thread:$0]  %s9835_s3, 67584, %s60_s24, [#allocation9], %s9450_s1, %s9450_s1, %s9451_s10  }
  0x27   :  { %s9452_s15 = smov [#allocation11]   ;;  %s9258_s19 = scalar_lea.hbm %s9837_s5, 18432 }
  0x28   :  { %s81_s16 = sshll.u32 %s9452_s15, 4  ;;  %p9259_p2 = scmp.ne.s32.totalorder %s9837_s5, %s9258_s19  ;;  %s82_s16 = int_to_ptr.vmem [resolvable:$true] %s81_s16 }
  0x29   :  { %p9262_p3 = scmp.lt.u32.totalorder %s9258_s19, %s9837_s5 }
  0x2b   :  { %p9264_p4 = pnand %p9262_p3, %p9259_p2 }
  0x2d   :  { %9267 = shalt.err (!%p9264_p4)
}
  0x2e   :  { %s9268_s25 = scalar_lea.vmem %s82_s16, 18432  ;;  %p9273_p6 = scmp.lt.s32.totalorder %s82_s16, %s82_s16 }
  0x2f   :  { %p9269_p5 = scmp.ne.s32.totalorder %s82_s16, %s9268_s25  ;;  %p9274_p7 = scmp.lt.s32.totalorder %s9268_s25, %s9268_s25 }
  0x31   :  { %p9275_p8 = por %p9274_p7, %p9273_p6 }
  0x33   :  { %p9276_p9 = pnand %p9275_p8, %p9269_p5 }
  0x35   :  { %9279 = shalt.err (!%p9276_p9)
}
  0x36   :  { %s9453_s3 = smov 192   ;;  %s9454_s24 = smov 12  }
  0x37   :  { %87 = dma.hbm_to_vmem [thread:$0]  %s9837_s5, 18432, %s82_s16, [#allocation12], %s9453_s3, %s9453_s3, %s9454_s24  }
  0x38   :  { %s9455_s28 = smov [#allocation14]   ;;  %s9280_s12 = scalar_lea.hbm %s9839_s7, 3072 }
  0x39   :  { %s103_s29 = sshll.u32 %s9455_s28, 4  ;;  %p9281_p10 = scmp.ne.s32.totalorder %s9839_s7, %s9280_s12  ;;  %s104_s29 = int_to_ptr.vmem [resolvable:$true] %s103_s29 }
  0x3a   :  { %p9284_p11 = scmp.lt.u32.totalorder %s9280_s12, %s9839_s7 }
  0x3c   :  { %p9286_p12 = pnand %p9284_p11, %p9281_p10 }
  0x3e   :  { %9289 = shalt.err (!%p9286_p12)
}
  0x3f   :  { %s9290_s15 = scalar_lea.vmem %s104_s29, 3072  ;;  %p9295_p0 = scmp.lt.s32.totalorder %s104_s29, %s104_s29 }
  0x40   :  { %p9291_p13 = scmp.ne.s32.totalorder %s104_s29, %s9290_s15  ;;  %p9296_p1 = scmp.lt.s32.totalorder %s9290_s15, %s9290_s15 }
  0x42   :  { %p9297_p2 = por %p9296_p1, %p9295_p0 }
  0x44   :  { %p9298_p3 = pnand %p9297_p2, %p9291_p13 }
  0x46   :  { %9301 = shalt.err (!%p9298_p3)
}
  0x47   :  { %s9456_s5 = smov 64   ;;  %s9457_s16 = smov 4  }
  0x48   :  { %109 = dma.hbm_to_vmem [thread:$0]  %s9839_s7, 3072, %s104_s29, [#allocation15], %s9456_s5, %s9456_s5, %s9457_s16  }
  0x49   :  { %s9458_s19 = smov [#allocation2]   ;;  %s9302_s23 = scalar_lea.hbm %s9832_s0, 512 }
  0x4a   :  { %s25_s20 = sshll.u32 %s9458_s19, 4  ;;  %p9303_p4 = scmp.ne.s32.totalorder %s9832_s0, %s9302_s23  ;;  %s26_s20 = int_to_ptr.vmem [resolvable:$true] %s25_s20 }
  0x4b   :  { %p9306_p5 = scmp.lt.u32.totalorder %s9302_s23, %s9832_s0 }
  0x4d   :  { %p9308_p6 = pnand %p9306_p5, %p9303_p4 }
  0x4f   :  { %9311 = shalt.err (!%p9308_p6)
}
  0x50   :  { %s9312_s27 = scalar_lea.vmem %s26_s20, 512  ;;  %p9317_p8 = scmp.lt.s32.totalorder %s26_s20, %s26_s20 }
  0x51   :  { %p9313_p7 = scmp.ne.s32.totalorder %s26_s20, %s9312_s27  ;;  %p9318_p9 = scmp.lt.s32.totalorder %s9312_s27, %s9312_s27 }
  0x53   :  { %p9319_p10 = por %p9318_p9, %p9317_p8 }
  0x55   :  { %p9320_p11 = pnand %p9319_p10, %p9313_p7 }
  0x57   :  { %9323 = shalt.err (!%p9320_p11)
}
  0x58   :  { %s9459_s7 = smov 256   ;;  %s9460_s28 = smov 16  }
  0x59   :  { %31 = dma.hbm_to_vmem [thread:$0]  %s9832_s0, 512, %s26_s20, [#allocation3], %s9459_s7, %s9459_s7, %s9460_s28  }
  0x5a   :  { %s9461_s11 = smov [#allocation7]   ;;  %s9462_s1 = smov [#allocation10]  }
  0x5b   :  { %s50_s12 = sshll.u32 %s9461_s11, 4  ;;  %s72_s10 = sshll.u32 %s9462_s1, 4  ;;  %s51_s12 = int_to_ptr.vmem [resolvable:$true] %s50_s12  ;;  %s73_s10 = int_to_ptr.vmem [resolvable:$true] %s72_s10 }
  0x5c   :  { %s9324_s15 = scalar_lea.hbm %s9834_s2, 176 }
  0x5d   :  { %p9325_p12 = scmp.ne.s32.totalorder %s9834_s2, %s9324_s15  ;;  %p9328_p13 = scmp.lt.u32.totalorder %s9324_s15, %s9834_s2 }
  0x5f   :  { %p9330_p0 = pnand %p9328_p13, %p9325_p12 }
  0x61   :  { %9333 = shalt.err (!%p9330_p0)
}
  0x62   :  { %s9334_s0 = scalar_lea.vmem %s51_s12, 176  ;;  %s9338_s19 = scalar_lea.vmem %s51_s12, 192 }
  0x63   :  { %p9335_p1 = scmp.ne.s32.totalorder %s51_s12, %s9334_s0  ;;  %p9339_p2 = scmp.lt.s32.totalorder %s51_s12, %s51_s12 }
  0x64   :  { %p9340_p3 = scmp.lt.s32.totalorder %s9338_s19, %s9334_s0 }
  0x66   :  { %p9341_p4 = por %p9340_p3, %p9339_p2 }
  0x68   :  { %p9342_p5 = pnand %p9341_p4, %p9335_p1 }
  0x6a   :  { %9345 = shalt.err (!%p9342_p5)
}
  0x6b   :  { %53 = dma.hbm_to_vmem [thread:$0]  %s9834_s2, 176, %s51_s12, [#allocation6]  }
  0x6c   :  { %s9346_s25 = scalar_lea.hbm %s9836_s4, 96 }
  0x6d   :  { %p9347_p6 = scmp.ne.s32.totalorder %s9836_s4, %s9346_s25  ;;  %p9350_p7 = scmp.lt.u32.totalorder %s9346_s25, %s9836_s4 }
  0x6f   :  { %p9352_p8 = pnand %p9350_p7, %p9347_p6 }
  0x71   :  { %9355 = shalt.err (!%p9352_p8)
}
  0x72   :  { %s9356_s7 = scalar_lea.vmem %s73_s10, 96  ;;  %p9361_p10 = scmp.lt.s32.totalorder %s73_s10, %s73_s10 }
  0x73   :  { %p9357_p9 = scmp.ne.s32.totalorder %s73_s10, %s9356_s7  ;;  %p9362_p11 = scmp.lt.s32.totalorder %s9356_s7, %s9356_s7 }
  0x75   :  { %p9363_p12 = por %p9362_p11, %p9361_p10 }
  0x77   :  { %p9364_p13 = pnand %p9363_p12, %p9357_p9 }
  0x79   :  { %9367 = shalt.err (!%p9364_p13)
}
  0x7a   :  { %75 = dma.hbm_to_vmem [thread:$0]  %s9836_s4, 96, %s73_s10, [#allocation9]  }
  0x7b   :  { %s9463_s29 = smov [#allocation13]   ;;  %s9464_s11 = smov [#allocation16]  }
  0x7c   :  { %s94_s30 = sshll.u32 %s9463_s29, 4  ;;  %s116_s12 = sshll.u32 %s9464_s11, 4  ;;  %s95_s30 = int_to_ptr.vmem [resolvable:$true] %s94_s30  ;;  %s117_s12 = int_to_ptr.vmem [resolvable:$true] %s116_s12 }
  0x7d   :  { %s9368_s14 = scalar_lea.hbm %s9838_s6, 48 }
  0x7e   :  { %p9369_p0 = scmp.ne.s32.totalorder %s9838_s6, %s9368_s14  ;;  %p9372_p1 = scmp.lt.u32.totalorder %s9368_s14, %s9838_s6 }
  0x80   :  { %p9374_p2 = pnand %p9372_p1, %p9369_p0 }
  0x82   :  { %9377 = shalt.err (!%p9374_p2)
}
  0x83   :  { %s9378_s4 = scalar_lea.vmem %s95_s30, 48  ;;  %s9382_s10 = scalar_lea.vmem %s95_s30, 64 }
  0x84   :  { %p9379_p3 = scmp.ne.s32.totalorder %s95_s30, %s9378_s4  ;;  %p9383_p4 = scmp.lt.s32.totalorder %s95_s30, %s95_s30 }
  0x85   :  { %p9384_p5 = scmp.lt.s32.totalorder %s9382_s10, %s9378_s4 }
  0x87   :  { %p9385_p6 = por %p9384_p5, %p9383_p4 }
  0x89   :  { %p9386_p7 = pnand %p9385_p6, %p9379_p3 }
  0x8b   :  { %9389 = shalt.err (!%p9386_p7)
}
  0x8c   :  { %97 = dma.hbm_to_vmem [thread:$0]  %s9838_s6, 48, %s95_s30, [#allocation12]  }
  0x8d   :  { %s9390_s21 = scalar_lea.hbm %s9840_s8, 16 }
  0x8e   :  { %p9391_p8 = scmp.ne.s32.totalorder %s9840_s8, %s9390_s21  ;;  %p9394_p9 = scmp.lt.u32.totalorder %s9390_s21, %s9840_s8 }
  0x90   :  { %p9396_p10 = pnand %p9394_p9, %p9391_p8 }
  0x92   :  { %9399 = shalt.err (!%p9396_p10)
}
  0x93   :  { %s9400_s24 = scalar_lea.vmem %s117_s12, 16  ;;  %s9404_s26 = scalar_lea.vmem %s117_s12, 32 }
  0x94   :  { %p9401_p11 = scmp.ne.s32.totalorder %s117_s12, %s9400_s24  ;;  %p9405_p12 = scmp.lt.s32.totalorder %s117_s12, %s117_s12 }
  0x95   :  { %p9406_p13 = scmp.lt.s32.totalorder %s9404_s26, %s9400_s24 }
  0x97   :  { %p9407_p0 = por %p9406_p13, %p9405_p12 }
  0x99   :  { %p9408_p1 = pnand %p9407_p0, %p9401_p11 }
  0x9b   :  { %9411 = shalt.err (!%p9408_p1)
}
  0x9c   :  { %119 = dma.hbm_to_vmem [thread:$0]  %s9840_s8, 16, %s117_s12, [#allocation15]  }
  0x9d   :  { %9434 = dma.done.wait [#allocation3], 512  }
  0x9e   :  { %9435 = vsyncadd [#allocation3], 4294966784 }
  0x9f   :  { %9436 = dma.done.wait [#allocation6], 17776  }
  0xa0   :  { %9437 = vsyncadd [#allocation6], 4294949520 }
  0xa1   :  { %9438 = dma.done.wait [#allocation9], 67680  }
  0xa2   :  { %9439 = vsyncadd [#allocation9], 4294899616 }
  0xa3   :  { %9440 = dma.done.wait [#allocation12], 18480  }
  0xa4   :  { %9441 = vsyncadd [#allocation12], 4294948816 }
  0xa5   :  { %9442 = dma.done.wait [#allocation15], 3088  }
  0xa6   :  { %9443 = vsyncadd [#allocation15], 4294964208  ;;  %v8003_v0 = vld [vmem:[#allocation5 + $0x4] ss:$44 sps:$4 sm:$0xff]   ;;  %v8005_v1 = vld [vmem:[#allocation5] ss:$44 sps:$4 sm:$0xff]  }
  0xa7   :  { %1101 = vmatprep.subr.bf16.mxu0 %v8003_v0  ;;  %v8006_v2 = vld [vmem:[#allocation5 + $0x5c] ss:$44 sps:$4 sm:$0xff]   ;;  %v8008_v3 = vld [vmem:[#allocation5 + $0x58] ss:$44 sps:$4 sm:$0xff]   ;;  %v8009_v4 = vld [vmem:[#allocation5 + $0xb4] ss:$44 sps:$4 sm:$0xff]  }
  0xa8   :  { %1102 = vmatpush1.bf16.msra.mxu0 %v8005_v1  ;;  %v8011_v5 = vld [vmem:[#allocation5 + $0xb0] ss:$44 sps:$4 sm:$0xff]   ;;  %v8012_v6 = vld [vmem:[#allocation5 + $0x10c] ss:$44 sps:$4 sm:$0xff]   ;;  %v8014_v7 = vld [vmem:[#allocation5 + $0x108] ss:$44 sps:$4 sm:$0xff]  }
  0xa9   :  { %1103 = vmatprep.subr.bf16.mxu0 %v8006_v2  ;;  %v8015_v8 = vld [vmem:[#allocation5 + $0x164] ss:$44 sps:$4 sm:$0xff]   ;;  %v8017_v9 = vld [vmem:[#allocation5 + $0x160] ss:$44 sps:$4 sm:$0xff]   ;;  %v8018_v10 = vld [vmem:[#allocation5 + $0x1bc] ss:$44 sps:$4 sm:$0xff]  }
  0xaa   :  { %v149_v11 = vld [vmem:[#allocation2 + $0x8] sm:$0xff]  ;;  %v151_v12 = vld [vmem:[#allocation2 + $0x18] sm:$0xff]  ;;  %vm1063_vm0 = vcmask 588800   ;;  %v8044_v17 = vld [vmem:[#allocation5 + $0x64] ss:$44 sps:$4 sm:$0xff]   ;;  %vm1067_vm1 = vcmask 1043456  }
  0xab   :  { %v8020_v13 = vld [vmem:[#allocation5 + $0x1b8] ss:$44 sps:$4 sm:$0xff]   ;;  %v9629_v14 = vpack.c.bf16 %v151_v12, %v149_v11  ;;  %v8043_v16 = vld [vmem:[#allocation5 + $0x8] ss:$44 sps:$4 sm:$0xff]   ;;  %v8046_v19 = vld [vmem:[#allocation5 + $0x60] ss:$44 sps:$4 sm:$0xff]  }
  0xac   :  { %1104 = vmatpush1.bf16.msra.mxu0 %v8008_v3  ;;  %v8041_v15 = vld [vmem:[#allocation5 + $0xc] ss:$44 sps:$4 sm:$0xff]   ;;  %v8021_v18 = vld [vmem:[#allocation5 + $0x214] ss:$44 sps:$4 sm:$0xff]   ;;  %v8047_v20 = vld [vmem:[#allocation5 + $0xbc] ss:$44 sps:$4 sm:$0xff]  }
  0xad   :  { %1105 = vmatprep.subr.bf16.mxu0 %v8009_v4  ;;  %7070 = vmatprep.mubr.msk.bf16.mxu0 %vm1063_vm0, %v9629_v14  ;;  %v8023_v21 = vld [vmem:[#allocation5 + $0x210] ss:$44 sps:$4 sm:$0xff]   ;;  %v8024_v22 = vld [vmem:[#allocation5 + $0x26c] ss:$44 sps:$4 sm:$0xff]   ;;  %v8050_v24 = vld [vmem:[#allocation5 + $0x114] ss:$44 sps:$4 sm:$0xff]  }
  0xae   :  { %1144 = vmatprep.subr.bf16.mxu1 %v8041_v15  ;;  %7072 = vmatprep.mubr.msk.bf16.mxu1 %vm1063_vm0, %v9629_v14  ;;  %v8049_v23 = vld [vmem:[#allocation5 + $0xb8] ss:$44 sps:$4 sm:$0xff]   ;;  %v8026_v25 = vld [vmem:[#allocation5 + $0x268] ss:$44 sps:$4 sm:$0xff]   ;;  %v8052_v27 = vld [vmem:[#allocation5 + $0x110] ss:$44 sps:$4 sm:$0xff]  }
  0xaf   :  { %1145 = vmatpush1.bf16.msra.mxu1 %v8043_v16  ;;  %v8027_v26 = vld [vmem:[#allocation5 + $0x2c4] ss:$44 sps:$4 sm:$0xff]   ;;  %v8053_v28 = vld [vmem:[#allocation5 + $0x16c] ss:$44 sps:$4 sm:$0xff]   ;;  %v8030_v30 = vld [vmem:[#allocation5 + $0x31c] ss:$44 sps:$4 sm:$0xff]  }
  0xb0   :  { %1106 = vmatpush1.bf16.msra.mxu0 %v8011_v5  ;;  %1146 = vmatprep.subr.bf16.mxu1 %v8044_v17  ;;  %v8029_v29 = vld [vmem:[#allocation5 + $0x2c0] ss:$44 sps:$4 sm:$0xff]   ;;  %v8055_v31 = vld [vmem:[#allocation5 + $0x168] ss:$44 sps:$4 sm:$0xff]   ;;  %v8056_v32 = vld [vmem:[#allocation5 + $0x1c4] ss:$44 sps:$4 sm:$0xff]  }
  0xb1   :  { %1107 = vmatprep.subr.bf16.mxu0 %v8012_v6  ;;  %v8032_v33 = vld [vmem:[#allocation5 + $0x318] ss:$44 sps:$4 sm:$0xff]   ;;  %v8033_v34 = vld [vmem:[#allocation5 + $0x374] ss:$44 sps:$4 sm:$0xff]   ;;  %v8059_v36 = vld [vmem:[#allocation5 + $0x21c] ss:$44 sps:$4 sm:$0xff]  }
  0xb2   :  { %v8058_v35 = vld [vmem:[#allocation5 + $0x1c0] ss:$44 sps:$4 sm:$0xff]   ;;  %v8035_v37 = vld [vmem:[#allocation5 + $0x370] ss:$44 sps:$4 sm:$0xff]   ;;  %v8061_v40 = vld [vmem:[#allocation5 + $0x218] ss:$44 sps:$4 sm:$0xff]  }
  0xb3   :  { %1147 = vmatpush1.bf16.msra.mxu1 %v8046_v19  ;;  %v8036_v38 = vld [vmem:[#allocation5 + $0x3cc] ss:$44 sps:$4 sm:$0xff]   ;;  %v298_v39 = vld [vmem:[#allocation5 + $0x420] sm:$0xff]  ;;  %v8038_v42 = vld [vmem:[#allocation5 + $0x3c8] ss:$44 sps:$4 sm:$0xff]   ;;  %vm9467_vm2 = vmmov 0  }
  0xb4   :  { %1108 = vmatpush1.bf16.msra.mxu0 %v8014_v7  ;;  %1148 = vmatprep.subr.bf16.mxu1 %v8047_v20  ;;  %v8062_v41 = vld [vmem:[#allocation5 + $0x274] ss:$44 sps:$4 sm:$0xff]   ;;  %v7059_v43 = vcombine.high %v298_v39, %v298_v39  ;;  %v7058_v44 = vcombine.low %v298_v39, %v298_v39  ;;  %v8064_v46 = vld [vmem:[#allocation5 + $0x270] ss:$44 sps:$4 sm:$0xff]   ;;  %v8065_v47 = vld [vmem:[#allocation5 + $0x2cc] ss:$44 sps:$4 sm:$0xff]  }
  0xb5   :  { %1109 = vmatprep.subr.bf16.mxu0 %v8015_v8  ;;  %v148_v45 = vld [vmem:[#allocation2] sm:$0xff]  ;;  %v150_v48 = vld [vmem:[#allocation2 + $0x10] sm:$0xff]  ;;  %v8087_v55 = vld [vmem:[#allocation5 + $0x6c] ss:$44 sps:$4 sm:$0xff]   ;;  %s9468_s8 = smov [#allocation17]  }
  0xb6   :  { %v1069_v49 = vsel %vm1067_vm1, %v7058_v44, 0  ;;  %v8081_v50 = vld [vmem:[#allocation5 + $0x14] ss:$44 sps:$4 sm:$0xff]   ;;  %v9637_v52 = vpack.c.bf16 %v150_v48, %v148_v45  ;;  %v8068_v53 = vld [vmem:[#allocation5 + $0x324] ss:$44 sps:$4 sm:$0xff]   ;;  %v299_v62 = vld [vmem:[#allocation5 + $0x428] sm:$0xff] }
  0xb7   :  { %1149 = vmatpush1.bf16.msra.mxu1 %v8049_v23  ;;  %v8067_v51 = vld [vmem:[#allocation5 + $0x2c8] ss:$44 sps:$4 sm:$0xff]   ;;  %v8079_v54 = vld [vmem:[#allocation5 + $0x10] ss:$44 sps:$4 sm:$0xff]   ;;  %v8070_v56 = vld [vmem:[#allocation5 + $0x320] ss:$44 sps:$4 sm:$0xff]   ;;  %v7061_v2 = vcombine.high %v299_v62, %v299_v62  ;;  %v7060_v3 = vcombine.low %v299_v62, %v299_v62 }
  0xb8   :  { %1110 = vmatpush1.bf16.msra.mxu0 %v8017_v9  ;;  %1150 = vmatprep.subr.bf16.mxu1 %v8050_v24  ;;  %v8071_v57 = vld [vmem:[#allocation5 + $0x37c] ss:$44 sps:$4 sm:$0xff]   ;;  %v8093_v59 = vld [vmem:[#allocation5 + $0xc4] ss:$44 sps:$4 sm:$0xff]   ;;  %v8074_v61 = vld [vmem:[#allocation5 + $0x3d4] ss:$44 sps:$4 sm:$0xff]  }
  0xb9   :  { %1111 = vmatprep.subr.bf16.mxu0 %v8018_v10  ;;  %v8085_v58 = vld [vmem:[#allocation5 + $0x68] ss:$44 sps:$4 sm:$0xff]   ;;  %v8073_v60 = vld [vmem:[#allocation5 + $0x378] ss:$44 sps:$4 sm:$0xff]   ;;  %v8091_v63 = vld [vmem:[#allocation5 + $0xc0] ss:$44 sps:$4 sm:$0xff]  }
  0xba   :  { %v8099_v0 = vld [vmem:[#allocation5 + $0x11c] ss:$44 sps:$4 sm:$0xff]   ;;  %v8097_v4 = vld [vmem:[#allocation5 + $0x118] ss:$44 sps:$4 sm:$0xff]   ;;  %v8105_v5 = vld [vmem:[#allocation5 + $0x174] ss:$44 sps:$4 sm:$0xff]  }
  0xbb   :  { %1151 = vmatpush1.bf16.msra.mxu1 %v8052_v27  ;;  %v8076_v1 = vld [vmem:[#allocation5 + $0x3d0] ss:$44 sps:$4 sm:$0xff]   ;;  %v1075_v6 = vsel %vm1067_vm1, %v7060_v3, 0  ;;  %v8111_v9 = vld [vmem:[#allocation5 + $0x1cc] ss:$44 sps:$4 sm:$0xff]   ;;  %s6910_s7 = sshll.u32 %s9468_s8, 4  ;;  %s6911_s7 = int_to_ptr.vmem [resolvable:$true] %s6910_s7 }
  0xbc   :  { %1112 = vmatpush1.bf16.msra.mxu0 %v8020_v13  ;;  %1152 = vmatprep.subr.bf16.mxu1 %v8053_v28  ;;  %v8084_v7 = vld [vmem:[#allocation5 + $0x1c] ss:$44 sps:$4 sm:$0xff]   ;;  %v8082_v10 = vld [vmem:[#allocation5 + $0x18] ss:$44 sps:$4 sm:$0xff]   ;;  %v8090_v11 = vld [vmem:[#allocation5 + $0x74] ss:$44 sps:$4 sm:$0xff]   ;;  %p9417_p3 = scmp.lt.s32.totalorder %s6911_s7, %s6911_s7 }
  0xbd   :  { %1113 = vmatprep.subr.bf16.mxu0 %v8021_v18  ;;  %v8103_v8 = vld [vmem:[#allocation5 + $0x170] ss:$44 sps:$4 sm:$0xff]   ;;  %v8109_v12 = vld [vmem:[#allocation5 + $0x1c8] ss:$44 sps:$4 sm:$0xff]   ;;  %v8096_v16 = vld [vmem:[#allocation5 + $0xcc] ss:$44 sps:$4 sm:$0xff]  }
  0xbe   :  { %v8117_v13 = vld [vmem:[#allocation5 + $0x224] ss:$44 sps:$4 sm:$0xff]   ;;  %v8115_v17 = vld [vmem:[#allocation5 + $0x220] ss:$44 sps:$4 sm:$0xff]   ;;  %v8123_v18 = vld [vmem:[#allocation5 + $0x27c] ss:$44 sps:$4 sm:$0xff]  }
  0xbf   :  { %1153 = vmatpush1.bf16.msra.mxu1 %v8055_v31  ;;  %v8088_v15 = vld [vmem:[#allocation5 + $0x70] ss:$44 sps:$4 sm:$0xff]   ;;  %v8094_v19 = vld [vmem:[#allocation5 + $0xc8] ss:$44 sps:$4 sm:$0xff]   ;;  %v8100_v23 = vld [vmem:[#allocation5 + $0x120] ss:$44 sps:$4 sm:$0xff]  }
  0xc0   :  { %1114 = vmatpush1.bf16.msra.mxu0 %v8023_v21  ;;  %1154 = vmatprep.subr.bf16.mxu1 %v8056_v32  ;;  %v8102_v20 = vld [vmem:[#allocation5 + $0x124] ss:$44 sps:$4 sm:$0xff]   ;;  %v8108_v24 = vld [vmem:[#allocation5 + $0x17c] ss:$44 sps:$4 sm:$0xff]   ;;  %v8114_v28 = vld [vmem:[#allocation5 + $0x1d4] ss:$44 sps:$4 sm:$0xff]  }
  0xc1   :  { %1115 = vmatprep.subr.bf16.mxu0 %v8024_v22  ;;  %v8121_v21 = vld [vmem:[#allocation5 + $0x278] ss:$44 sps:$4 sm:$0xff]   ;;  %v8129_v22 = vld [vmem:[#allocation5 + $0x2d4] ss:$44 sps:$4 sm:$0xff]   ;;  %v8112_v31 = vld [vmem:[#allocation5 + $0x1d0] ss:$44 sps:$4 sm:$0xff]  }
  0xc2   :  { %v8106_v27 = vld [vmem:[#allocation5 + $0x178] ss:$44 sps:$4 sm:$0xff]   ;;  %v8161_v48 = vld [vmem:[#allocation5 + $0x7c] ss:$44 sps:$4 sm:$0xff]   ;;  %s9412_s2 = scalar_lea.vmem %s6911_s7, 256 }
  0xc3   :  { %1155 = vmatpush1.bf16.msra.mxu1 %v8058_v35  ;;  %v8120_v32 = vld [vmem:[#allocation5 + $0x22c] ss:$44 sps:$4 sm:$0xff]   ;;  %v8118_v35 = vld [vmem:[#allocation5 + $0x228] ss:$44 sps:$4 sm:$0xff]   ;;  %v8157_v44 = vld [vmem:[#allocation5 + $0x24] ss:$44 sps:$4 sm:$0xff]   ;;  %p9413_p2 = scmp.ne.s32.totalorder %s6911_s7, %s9412_s2  ;;  %p9418_p4 = scmp.lt.s32.totalorder %s9412_s2, %s9412_s2 }
  0xc4   :  { %1116 = vmatpush1.bf16.msra.mxu0 %v8026_v25  ;;  %1156 = vmatprep.subr.bf16.mxu1 %v8059_v36  ;;  %v8127_v25 = vld [vmem:[#allocation5 + $0x2d0] ss:$44 sps:$4 sm:$0xff]   ;;  %v8130_v45 = vld [vmem:[#allocation5 + $0x2d8] ss:$44 sps:$4 sm:$0xff]   ;;  %v8167_v62 = vld [vmem:[#allocation5 + $0x128] ss:$44 sps:$4 sm:$0xff]  }
  0xc5   :  { %1117 = vmatprep.subr.bf16.mxu0 %v8027_v26  ;;  %v8135_v26 = vld [vmem:[#allocation5 + $0x32c] ss:$44 sps:$4 sm:$0xff]   ;;  %v300_v36 = vld [vmem:[#allocation5 + $0x430] sm:$0xff]  ;;  %p9419_p5 = por %p9418_p4, %p9417_p3 }
  0xc6   :  { %v7063_v39 = vcombine.high %v300_v36, %v300_v36  ;;  %v8158_v3 = vld [vmem:[#allocation5 + $0x28] ss:$44 sps:$4 sm:$0xff]  }
  0xc7   :  { %1157 = vmatpush1.bf16.msra.mxu1 %v8061_v40  ;;  %v7062_v40 = vcombine.low %v300_v36, %v300_v36  ;;  %v8198_v36 = vld [vmem:[#allocation5 + $0x398] ss:$44 sps:$4 sm:$0xff]   ;;  %p9420_p6 = pnand %p9419_p5, %p9413_p2 }
  0xc8   :  { %1118 = vmatpush1.bf16.msra.mxu0 %v8029_v29  ;;  %1158 = vmatprep.subr.bf16.mxu1 %v8062_v41  ;;  %v8133_v29 = vld [vmem:[#allocation5 + $0x328] ss:$44 sps:$4 sm:$0xff]   ;;  %v8124_v41 = vld [vmem:[#allocation5 + $0x280] ss:$44 sps:$4 sm:$0xff]  }
  0xc9   :  { %1119 = vmatprep.subr.bf16.mxu0 %v8030_v30  ;;  %v8141_v30 = vld [vmem:[#allocation5 + $0x384] ss:$44 sps:$4 sm:$0xff]  }
  0xcb   :  { %1159 = vmatpush1.bf16.msra.mxu1 %v8064_v46  ;;  %v8138_v46 = vld [vmem:[#allocation5 + $0x334] ss:$44 sps:$4 sm:$0xff]  }
  0xcc   :  { %1120 = vmatpush1.bf16.msra.mxu0 %v8032_v33  ;;  %1160 = vmatprep.subr.bf16.mxu1 %v8065_v47  ;;  %v8139_v33 = vld [vmem:[#allocation5 + $0x380] ss:$44 sps:$4 sm:$0xff]  }
  0xcd   :  { %1121 = vmatprep.subr.bf16.mxu0 %v8033_v34  ;;  %v8147_v34 = vld [vmem:[#allocation5 + $0x3dc] ss:$44 sps:$4 sm:$0xff]   ;;  %v8155_v47 = vld [vmem:[#allocation5 + $0x20] ss:$44 sps:$4 sm:$0xff]  }
  0xcf   :  { %1161 = vmatpush1.bf16.msra.mxu1 %v8067_v51  ;;  %v8159_v51 = vld [vmem:[#allocation5 + $0x78] ss:$44 sps:$4 sm:$0xff]  }
  0xd0   :  { %1122 = vmatpush1.bf16.msra.mxu0 %v8035_v37  ;;  %1162 = vmatprep.subr.bf16.mxu1 %v8068_v53  ;;  %v8126_v37 = vld [vmem:[#allocation5 + $0x284] ss:$44 sps:$4 sm:$0xff]   ;;  %v8165_v53 = vld [vmem:[#allocation5 + $0xd4] ss:$44 sps:$4 sm:$0xff]  }
  0xd1   :  { %1123 = vmatprep.subr.bf16.mxu0 %v8036_v38  ;;  %v8145_v38 = vld [vmem:[#allocation5 + $0x3d8] ss:$44 sps:$4 sm:$0xff]  }
  0xd3   :  { %1163 = vmatpush1.bf16.msra.mxu1 %v8070_v56  ;;  %v301_v56 = vld [vmem:[#allocation5 + $0x438] sm:$0xff] }
  0xd4   :  { %1124 = vmatpush1.bf16.msra.mxu0 %v8038_v42  ;;  %1164 = vmatprep.subr.bf16.mxu1 %v8071_v57  ;;  %v8132_v42 = vld [vmem:[#allocation5 + $0x2dc] ss:$44 sps:$4 sm:$0xff]  }
  0xd5   :  { %7069 = vmatprep.subr.msk.bf16.mxu0 %vm1067_vm1, %v7059_v43  ;;  %v1081_v43 = vsel %vm1067_vm1, %v7062_v40, 0  ;;  %v8163_v57 = vld [vmem:[#allocation5 + $0xd0] ss:$44 sps:$4 sm:$0xff]   ;;  %v8205_v40 = vld [vmem:[#allocation5 + $0x448] ss:$0 sps:$4 sm:$0xff]  }
  0xd7   :  { %1165 = vmatpush1.bf16.msra.mxu1 %v8073_v60  ;;  %v7065_v60 = vcombine.high %v301_v56, %v301_v56 }
  0xd8   :  { %1126 = vmatpush1.bf16.msra.mxu0 %v1069_v49  ;;  %1166 = vmatprep.subr.bf16.mxu1 %v8074_v61  ;;  %v8136_v49 = vld [vmem:[#allocation5 + $0x330] ss:$44 sps:$4 sm:$0xff]   ;;  %v7064_v61 = vcombine.low %v301_v56, %v301_v56  ;;  %v8221_v56 = vld [vmem:[#allocation8 + $0x68] ss:$24 sps:$4 sm:$0xff]  }
  0xd9   :  { %1187 = vmatprep.subr.bf16.mxu0 %v8081_v50  ;;  %v8144_v50 = vld [vmem:[#allocation5 + $0x38c] ss:$44 sps:$4 sm:$0xff]  }
  0xdb   :  { %1134 = vmatmul.mubr.bf16.vlgmr.msra.gmra.mrb[0].mxu0 %v9637_v52  ;;  %1167 = vmatpush1.bf16.msra.mxu1 %v8076_v1  ;;  %v8171_v1 = vld [vmem:[#allocation5 + $0x180] ss:$44 sps:$4 sm:$0xff]  }
  0xdc   :  { %1188 = vmatpush1.bf16.msra.mxu0 %v8079_v54  ;;  %7074 = vmatprep.mubr.msk.bf16.mxu0 %vm1063_vm0, %v9629_v14  ;;  %v8142_v54 = vld [vmem:[#allocation5 + $0x388] ss:$44 sps:$4 sm:$0xff]  }
  0xdd   :  { %1189 = vmatprep.subr.bf16.mxu0 %v8087_v55  ;;  %7071 = vmatprep.subr.msk.bf16.mxu1 %vm1067_vm1, %v7061_v2  ;;  %v8150_v55 = vld [vmem:[#allocation5 + $0x3e4] ss:$44 sps:$4 sm:$0xff]   ;;  %v8177_v2 = vld [vmem:[#allocation5 + $0x1dc] ss:$44 sps:$4 sm:$0xff]  }
  0xdf   :  { %1169 = vmatpush1.bf16.msra.mxu1 %v1075_v6  ;;  %v8181_v6 = vld [vmem:[#allocation5 + $0x234] ss:$44 sps:$4 sm:$0xff]  }
  0xe0   :  { %1190 = vmatpush1.bf16.msra.mxu0 %v8085_v58  ;;  %1230 = vmatprep.subr.bf16.mxu1 %v8084_v7  ;;  %v8169_v58 = vld [vmem:[#allocation5 + $0x12c] ss:$44 sps:$4 sm:$0xff]  }
  0xe1   :  { %1191 = vmatprep.subr.bf16.mxu0 %v8093_v59  ;;  %v8148_v59 = vld [vmem:[#allocation5 + $0x3e0] ss:$44 sps:$4 sm:$0xff]  }
  0xe2   :  { %1177 = vmatmul.mubr.bf16.vlgmr.msra.gmra.mrb[0].mxu1 %v9637_v52  ;;  %v8162_v7 = vld [vmem:[#allocation5 + $0x80] ss:$44 sps:$4 sm:$0xff]  }
  0xe3   :  { %1231 = vmatpush1.bf16.msra.mxu1 %v8082_v10  ;;  %7076 = vmatprep.mubr.msk.bf16.mxu1 %vm1063_vm0, %v9629_v14  ;;  %v8166_v10 = vld [vmem:[#allocation5 + $0xd8] ss:$44 sps:$4 sm:$0xff]  }
  0xe4   :  { %1192 = vmatpush1.bf16.msra.mxu0 %v8091_v63  ;;  %1232 = vmatprep.subr.bf16.mxu1 %v8090_v11  ;;  %v8173_v63 = vld [vmem:[#allocation5 + $0x184] ss:$44 sps:$4 sm:$0xff]   ;;  %v8183_v11 = vld [vmem:[#allocation5 + $0x288] ss:$44 sps:$4 sm:$0xff]  }
  0xe5   :  { %1193 = vmatprep.subr.bf16.mxu0 %v8099_v0  ;;  %v1087_v0 = vsel %vm1067_vm1, %v7064_v61, 0  ;;  %v8254_v61 = vld [vmem:[#allocation8 + $0x180] ss:$24 sps:$4 sm:$0xff]  }
  0xe7   :  { %1233 = vmatpush1.bf16.msra.mxu1 %v8088_v15  ;;  %v8187_v15 = vld [vmem:[#allocation5 + $0x2e0] ss:$44 sps:$4 sm:$0xff]  }
  0xe8   :  { %1194 = vmatpush1.bf16.msra.mxu0 %v8097_v4  ;;  %1234 = vmatprep.subr.bf16.mxu1 %v8096_v16  ;;  %v9465_v4 = vmov 0   ;;  %v8174_v16 = vld [vmem:[#allocation5 + $0x188] ss:$44 sps:$4 sm:$0xff]  }
  0xe9   :  { %1195 = vmatprep.subr.bf16.mxu0 %v8105_v5  ;;  %v8175_v5 = vld [vmem:[#allocation5 + $0x1d8] ss:$44 sps:$4 sm:$0xff]  }
  0xeb   :  { %1235 = vmatpush1.bf16.msra.mxu1 %v8094_v19  ;;  %v8178_v19 = vld [vmem:[#allocation5 + $0x1e0] ss:$44 sps:$4 sm:$0xff]  }
  0xec   :  { %1196 = vmatpush1.bf16.msra.mxu0 %v8103_v8  ;;  %1236 = vmatprep.subr.bf16.mxu1 %v8102_v20  ;;  %v8179_v8 = vld [vmem:[#allocation5 + $0x230] ss:$44 sps:$4 sm:$0xff]  }
  0xed   :  { %1197 = vmatprep.subr.bf16.mxu0 %v8111_v9  ;;  %v8185_v9 = vld [vmem:[#allocation5 + $0x28c] ss:$44 sps:$4 sm:$0xff]   ;;  %v8195_v20 = vld [vmem:[#allocation5 + $0x390] ss:$44 sps:$4 sm:$0xff]  }
  0xef   :  { %1237 = vmatpush1.bf16.msra.mxu1 %v8100_v23  ;;  %v302_v23 = vld [vmem:[#allocation5 + $0x440] sm:$0xff] }
  0xf0   :  { %1198 = vmatpush1.bf16.msra.mxu0 %v8109_v12  ;;  %1238 = vmatprep.subr.bf16.mxu1 %v8108_v24  ;;  %v8170_v12 = vld [vmem:[#allocation5 + $0x130] ss:$44 sps:$4 sm:$0xff]   ;;  %v8199_v24 = vld [vmem:[#allocation5 + $0x3e8] ss:$44 sps:$4 sm:$0xff]  }
  0xf1   :  { %1199 = vmatprep.subr.bf16.mxu0 %v8117_v13  ;;  %v8189_v13 = vld [vmem:[#allocation5 + $0x2e4] ss:$44 sps:$4 sm:$0xff]  }
  0xf3   :  { %1239 = vmatpush1.bf16.msra.mxu1 %v8106_v27  ;;  %v8186_v27 = vld [vmem:[#allocation5 + $0x290] ss:$44 sps:$4 sm:$0xff]  }
  0xf4   :  { %1200 = vmatpush1.bf16.msra.mxu0 %v8115_v17  ;;  %1240 = vmatprep.subr.bf16.mxu1 %v8114_v28  ;;  %v8191_v17 = vld [vmem:[#allocation5 + $0x338] ss:$44 sps:$4 sm:$0xff]   ;;  %v8208_v28 = vld [vmem:[#allocation8 + $0x4] ss:$24 sps:$4 sm:$0xff]  }
  0xf5   :  { %1201 = vmatprep.subr.bf16.mxu0 %v8123_v18  ;;  %v8197_v18 = vld [vmem:[#allocation5 + $0x394] ss:$44 sps:$4 sm:$0xff]  }
  0xf7   :  { %1241 = vmatpush1.bf16.msra.mxu1 %v8112_v31  ;;  %v8206_v31 = vld [vmem:[#allocation8] ss:$24 sps:$4 sm:$0xff]  }
  0xf8   :  { %1202 = vmatpush1.bf16.msra.mxu0 %v8121_v21  ;;  %1242 = vmatprep.subr.bf16.mxu1 %v8120_v32  ;;  %v8201_v21 = vld [vmem:[#allocation5 + $0x3ec] ss:$44 sps:$4 sm:$0xff]  }
  0xf9   :  { %1203 = vmatprep.subr.bf16.mxu0 %v8129_v22  ;;  %v8182_v22 = vld [vmem:[#allocation5 + $0x238] ss:$44 sps:$4 sm:$0xff]  }
  0xfa   :  { %v8214_v32 = vld [vmem:[#allocation8 + $0x34] ss:$24 sps:$4 sm:$0xff]  }
  0xfb   :  { %1243 = vmatpush1.bf16.msra.mxu1 %v8118_v35  ;;  %v8220_v35 = vld [vmem:[#allocation8 + $0x64] ss:$24 sps:$4 sm:$0xff]  }
  0xfc   :  { %1204 = vmatpush1.bf16.msra.mxu0 %v8127_v25  ;;  %1244 = vmatprep.subr.bf16.mxu1 %v8126_v37  ;;  %v7067_v25 = vcombine.high %v302_v23, %v302_v23  ;;  %v8218_v37 = vld [vmem:[#allocation8 + $0x60] ss:$24 sps:$4 sm:$0xff]  }
  0xfd   :  { %1205 = vmatprep.subr.bf16.mxu0 %v8135_v26  ;;  %v7066_v26 = vcombine.low %v302_v23, %v302_v23  ;;  %v8298_v23 = vld [vmem:[#allocation8 + $0x2d4] ss:$24 sps:$4 sm:$0xff]  }
  0xff   :  { %1245 = vmatpush1.bf16.msra.mxu1 %v8124_v41  ;;  %v8224_v41 = vld [vmem:[#allocation8 + $0x90] ss:$24 sps:$4 sm:$0xff]  }
 0x100   :  { %1206 = vmatpush1.bf16.msra.mxu0 %v8133_v29  ;;  %1246 = vmatprep.subr.bf16.mxu1 %v8132_v42  ;;  %v1093_v29 = vsel %vm1067_vm1, %v7066_v26, 0  ;;  %v8232_v42 = vld [vmem:[#allocation8 + $0xc4] ss:$24 sps:$4 sm:$0xff]   ;;  %v8296_v26 = vld [vmem:[#allocation8 + $0x2d0] ss:$24 sps:$4 sm:$0xff]  }
 0x101   :  { %1207 = vmatprep.subr.bf16.mxu0 %v8141_v30  ;;  %v8190_v30 = vld [vmem:[#allocation5 + $0x2e8] ss:$44 sps:$4 sm:$0xff]  }
 0x103   :  { %1247 = vmatpush1.bf16.msra.mxu1 %v8130_v45  ;;  %v8230_v45 = vld [vmem:[#allocation8 + $0xc0] ss:$24 sps:$4 sm:$0xff]  }
 0x104   :  { %1208 = vmatpush1.bf16.msra.mxu0 %v8139_v33  ;;  %1248 = vmatprep.subr.bf16.mxu1 %v8138_v46  ;;  %v8194_v33 = vld [vmem:[#allocation5 + $0x340] ss:$44 sps:$4 sm:$0xff]  }
 0x105   :  { %1209 = vmatprep.subr.bf16.mxu0 %v8147_v34  ;;  %v8212_v34 = vld [vmem:[#allocation8 + $0x30] ss:$24 sps:$4 sm:$0xff]   ;;  %v8238_v46 = vld [vmem:[#allocation8 + $0xf4] ss:$24 sps:$4 sm:$0xff]  }
 0x107   :  { %1249 = vmatpush1.bf16.msra.mxu1 %v8136_v49  ;;  %v8236_v49 = vld [vmem:[#allocation8 + $0xf0] ss:$24 sps:$4 sm:$0xff]  }
 0x108   :  { %1210 = vmatpush1.bf16.msra.mxu0 %v8145_v38  ;;  %1250 = vmatprep.subr.bf16.mxu1 %v8144_v50  ;;  %v8226_v38 = vld [vmem:[#allocation8 + $0x94] ss:$24 sps:$4 sm:$0xff]   ;;  %v8244_v50 = vld [vmem:[#allocation8 + $0x124] ss:$24 sps:$4 sm:$0xff]  }
 0x109   :  { %7073 = vmatprep.subr.msk.bf16.mxu0 %vm1067_vm1, %v7063_v39  ;;  %v8202_v39 = vld [vmem:[#allocation5 + $0x3f0] ss:$44 sps:$4 sm:$0xff]  }
 0x10b   :  { %1251 = vmatpush1.bf16.msra.mxu1 %v8142_v54  ;;  %v8242_v54 = vld [vmem:[#allocation8 + $0x120] ss:$24 sps:$4 sm:$0xff]  }
 0x10c   :  { %1212 = vmatpush1.bf16.msra.mxu0 %v1081_v43  ;;  %1252 = vmatprep.subr.bf16.mxu1 %v8150_v55  ;;  %v8211_v43 = vld [vmem:[#allocation8 + $0xc] ss:$24 sps:$4 sm:$0xff]  }
 0x10d   :  { %1273 = vmatprep.subr.bf16.mxu0 %v8157_v44  ;;  %v1099_v44 = vsel %vm1067_vm1, %v8205_v40, 0  ;;  %v8250_v55 = vld [vmem:[#allocation8 + $0x154] ss:$24 sps:$4 sm:$0xff]  }
 0x10e   :  { %v9677_v40 = vld [vmem:[#allocation7] sm:$0xff] }
 0x10f   :  { %1220 = vmatmul.mubr.bf16.vlgmr.msra.gmra.mrb[4].mxu0 %v9637_v52  ;;  %1253 = vmatpush1.bf16.msra.mxu1 %v8148_v59  ;;  %v8256_v59 = vld [vmem:[#allocation8 + $0x184] ss:$24 sps:$4 sm:$0xff]  }
 0x110   :  { %1274 = vmatpush1.bf16.msra.mxu0 %v8155_v47  ;;  %7078 = vmatprep.mubr.msk.bf16.mxu0 %vm1063_vm0, %v9629_v14  ;;  %v8209_v47 = vld [vmem:[#allocation8 + $0x8] ss:$24 sps:$4 sm:$0xff]  }
 0x111   :  { %1275 = vmatprep.subr.bf16.mxu0 %v8161_v48  ;;  %7075 = vmatprep.subr.msk.bf16.mxu1 %vm1067_vm1, %v7065_v60  ;;  %v8217_v48 = vld [vmem:[#allocation8 + $0x3c] ss:$24 sps:$4 sm:$0xff]   ;;  %v8227_v60 = vld [vmem:[#allocation8 + $0x98] ss:$24 sps:$4 sm:$0xff]  }
 0x113   :  { %1255 = vmatpush1.bf16.msra.mxu1 %v1087_v0  ;;  %v8241_v0 = vld [vmem:[#allocation8 + $0xfc] ss:$24 sps:$4 sm:$0xff]  }
 0x114   :  { %1276 = vmatpush1.bf16.msra.mxu0 %v8159_v51  ;;  %1316 = vmatprep.subr.bf16.mxu1 %v9465_v4  ;;  %v8215_v51 = vld [vmem:[#allocation8 + $0x38] ss:$24 sps:$4 sm:$0xff]  }
 0x115   :  { %1277 = vmatprep.subr.bf16.mxu0 %v8165_v53  ;;  %v8223_v53 = vld [vmem:[#allocation8 + $0x6c] ss:$24 sps:$4 sm:$0xff]  }
 0x116   :  { %1263 = vmatmul.mubr.bf16.vlgmr.msra.gmra.mrb[4].mxu1 %v9637_v52 }
 0x117   :  { %1317 = vmatpush1.bf16.msra.mxu1 %v8158_v3  ;;  %7079 = vmatprep.mubr.msk.bf16.mxu1 %vm1063_vm0, %v9629_v14  ;;  %v8193_v14 = vld [vmem:[#allocation5 + $0x33c] ss:$44 sps:$4 sm:$0xff]  }
 0x118   :  { %1278 = vmatpush1.bf16.msra.mxu0 %v8163_v57  ;;  %1318 = vmatprep.subr.bf16.mxu1 %v9465_v4  ;;  %v8229_v57 = vld [vmem:[#allocation8 + $0x9c] ss:$24 sps:$4 sm:$0xff]   ;;  %v8239_v3 = vld [vmem:[#allocation8 + $0xf8] ss:$24 sps:$4 sm:$0xff]  }
 0x119   :  { %1279 = vmatprep.subr.bf16.mxu0 %v8169_v58  ;;  %v8248_v58 = vld [vmem:[#allocation8 + $0x150] ss:$24 sps:$4 sm:$0xff]  }
 0x11b   :  { %1319 = vmatpush1.bf16.msra.mxu1 %v8162_v7  ;;  %v8274_v7 = vld [vmem:[#allocation8 + $0x214] ss:$24 sps:$4 sm:$0xff]  }
 0x11c   :  { %1280 = vmatpush1.bf16.msra.mxu0 %v8167_v62  ;;  %1320 = vmatprep.subr.bf16.mxu1 %v9465_v4  ;;  %v8262_v62 = vld [vmem:[#allocation8 + $0x1b4] ss:$24 sps:$4 sm:$0xff]  }
 0x11d   :  { %1281 = vmatprep.subr.bf16.mxu0 %v8173_v63  ;;  %v8233_v63 = vld [vmem:[#allocation8 + $0xc8] ss:$24 sps:$4 sm:$0xff]  }
 0x11f   :  { %1321 = vmatpush1.bf16.msra.mxu1 %v8166_v10  ;;  %v8272_v10 = vld [vmem:[#allocation8 + $0x210] ss:$24 sps:$4 sm:$0xff]  }
 0x120   :  { %1282 = vmatpush1.bf16.msra.mxu0 %v8171_v1  ;;  %1322 = vmatprep.subr.bf16.mxu1 %v9465_v4  ;;  %v8260_v1 = vld [vmem:[#allocation8 + $0x1b0] ss:$24 sps:$4 sm:$0xff]  }
 0x121   :  { %1283 = vmatprep.subr.bf16.mxu0 %v8177_v2  ;;  %v8268_v2 = vld [vmem:[#allocation8 + $0x1e4] ss:$24 sps:$4 sm:$0xff]  }
 0x123   :  { %1323 = vmatpush1.bf16.msra.mxu1 %v8170_v12  ;;  %v8251_v12 = vld [vmem:[#allocation8 + $0x158] ss:$24 sps:$4 sm:$0xff]  }
 0x124   :  { %1284 = vmatpush1.bf16.msra.mxu0 %v8175_v5  ;;  %1324 = vmatprep.subr.bf16.mxu1 %v9465_v4  ;;  %v8247_v5 = vld [vmem:[#allocation8 + $0x12c] ss:$24 sps:$4 sm:$0xff]  }
 0x125   :  { %1285 = vmatprep.subr.bf16.mxu0 %v8181_v6  ;;  %v8266_v6 = vld [vmem:[#allocation8 + $0x1e0] ss:$24 sps:$4 sm:$0xff]  }
 0x127   :  { %1325 = vmatpush1.bf16.msra.mxu1 %v8174_v16  ;;  %v8257_v16 = vld [vmem:[#allocation8 + $0x188] ss:$24 sps:$4 sm:$0xff]  }
 0x128   :  { %1286 = vmatpush1.bf16.msra.mxu0 %v8179_v8  ;;  %1326 = vmatprep.subr.bf16.mxu1 %v9465_v4  ;;  %v8245_v8 = vld [vmem:[#allocation8 + $0x128] ss:$24 sps:$4 sm:$0xff]  }
 0x129   :  { %1287 = vmatprep.subr.bf16.mxu0 %v8185_v9  ;;  %v8253_v9 = vld [vmem:[#allocation8 + $0x15c] ss:$24 sps:$4 sm:$0xff]  }
 0x12b   :  { %1327 = vmatpush1.bf16.msra.mxu1 %v8178_v19  ;;  %v8292_v19 = vld [vmem:[#allocation8 + $0x2a4] ss:$24 sps:$4 sm:$0xff]  }
 0x12c   :  { %1288 = vmatpush1.bf16.msra.mxu0 %v8183_v11  ;;  %1328 = vmatprep.subr.bf16.mxu1 %v9465_v4  ;;  %v8280_v11 = vld [vmem:[#allocation8 + $0x244] ss:$24 sps:$4 sm:$0xff]  }
 0x12d   :  { %1289 = vmatprep.subr.bf16.mxu0 %v8189_v13  ;;  %v8259_v13 = vld [vmem:[#allocation8 + $0x18c] ss:$24 sps:$4 sm:$0xff]  }
 0x12f   :  { %1329 = vmatpush1.bf16.msra.mxu1 %v8182_v22  ;;  %v8290_v22 = vld [vmem:[#allocation8 + $0x2a0] ss:$24 sps:$4 sm:$0xff]  }
 0x130   :  { %1290 = vmatpush1.bf16.msra.mxu0 %v8187_v15  ;;  %1330 = vmatprep.subr.bf16.mxu1 %v9465_v4  ;;  %v8278_v15 = vld [vmem:[#allocation8 + $0x240] ss:$24 sps:$4 sm:$0xff]  }
 0x131   :  { %1291 = vmatprep.subr.bf16.mxu0 %v8193_v14  ;;  %v8286_v14 = vld [vmem:[#allocation8 + $0x274] ss:$24 sps:$4 sm:$0xff]  }
 0x133   :  { %1331 = vmatpush1.bf16.msra.mxu1 %v8186_v27  ;;  %v8304_v27 = vld [vmem:[#allocation8 + $0x304] ss:$24 sps:$4 sm:$0xff]  }
 0x134   :  { %1292 = vmatpush1.bf16.msra.mxu0 %v8191_v17  ;;  %1332 = vmatprep.subr.bf16.mxu1 %v9465_v4  ;;  %v8265_v17 = vld [vmem:[#allocation8 + $0x1bc] ss:$24 sps:$4 sm:$0xff]  }
 0x135   :  { %1293 = vmatprep.subr.bf16.mxu0 %v8197_v18  ;;  %v8284_v18 = vld [vmem:[#allocation8 + $0x270] ss:$24 sps:$4 sm:$0xff]  }
 0x137   :  { %1333 = vmatpush1.bf16.msra.mxu1 %v8190_v30  ;;  %v8281_v30 = vld [vmem:[#allocation8 + $0x248] ss:$24 sps:$4 sm:$0xff]  }
 0x138   :  { %1294 = vmatpush1.bf16.msra.mxu0 %v8195_v20  ;;  %1334 = vmatprep.subr.bf16.mxu1 %v9465_v4  ;;  %v8263_v20 = vld [vmem:[#allocation8 + $0x1b8] ss:$24 sps:$4 sm:$0xff]  }
 0x139   :  { %1295 = vmatprep.subr.bf16.mxu0 %v8201_v21  ;;  %v8271_v21 = vld [vmem:[#allocation8 + $0x1ec] ss:$24 sps:$4 sm:$0xff]  }
 0x13b   :  { %1335 = vmatpush1.bf16.msra.mxu1 %v8194_v33  ;;  %v8295_v33 = vld [vmem:[#allocation8 + $0x2ac] ss:$24 sps:$4 sm:$0xff]  }
 0x13c   :  { %1296 = vmatpush1.bf16.msra.mxu0 %v8199_v24  ;;  %1336 = vmatprep.subr.bf16.mxu1 %v9465_v4  ;;  %v8269_v24 = vld [vmem:[#allocation8 + $0x1e8] ss:$24 sps:$4 sm:$0xff]  }
 0x13d   :  { %7077 = vmatprep.subr.msk.bf16.mxu0 %vm1067_vm1, %v7067_v25  ;;  %v8277_v25 = vld [vmem:[#allocation8 + $0x21c] ss:$24 sps:$4 sm:$0xff]  }
 0x13f   :  { %1337 = vmatpush1.bf16.msra.mxu1 %v8198_v36  ;;  %v8299_v36 = vld [vmem:[#allocation8 + $0x2d8] ss:$24 sps:$4 sm:$0xff]  }
 0x140   :  { %1298 = vmatpush1.bf16.msra.mxu0 %v1093_v29  ;;  %1338 = vmatprep.subr.bf16.mxu1 %v9465_v4  ;;  %v8283_v29 = vld [vmem:[#allocation8 + $0x24c] ss:$24 sps:$4 sm:$0xff]  }
 0x141   :  { %4590 = vmatprep.subr.bf16.mxu0 %v8208_v28  ;;  %v8275_v28 = vld [vmem:[#allocation8 + $0x218] ss:$24 sps:$4 sm:$0xff]  }
 0x143   :  { %1306 = vmatmul.mubr.bf16.vlgmr.msra.gmra.mrb[8].mxu0 %v9637_v52  ;;  %1339 = vmatpush1.bf16.msra.mxu1 %v8202_v39 }
 0x144   :  { %4591 = vmatpush1.bf16.msra.mxu0 %v8206_v31  ;;  %1340 = vmatprep.subr.bf16.mxu1 %v9465_v4  ;;  %v8289_v31 = vld [vmem:[#allocation8 + $0x27c] ss:$24 sps:$4 sm:$0xff]  }
 0x145   :  { %4592 = vmatprep.subr.bf16.mxu0 %v8214_v32  ;;  %v8287_v32 = vld [vmem:[#allocation8 + $0x278] ss:$24 sps:$4 sm:$0xff]  }
 0x147   :  { %1341 = vmatpush1.bf16.msra.mxu1 %v1099_v44 }
 0x148   :  { %4593 = vmatpush1.bf16.msra.mxu0 %v8212_v34  ;;  %4848 = vmatprep.subr.bf16.mxu1 %v8211_v43  ;;  %v8293_v34 = vld [vmem:[#allocation8 + $0x2a8] ss:$24 sps:$4 sm:$0xff]  }
 0x149   :  { %4594 = vmatprep.subr.bf16.mxu0 %v8220_v35  ;;  %v8301_v35 = vld [vmem:[#allocation8 + $0x2dc] ss:$24 sps:$4 sm:$0xff]  }
 0x14a   :  { %1349 = vmatmul.mubr.bf16.vlgmr.msra.gmra.mrb[8].mxu1 %v9637_v52  ;;  %v8235_v52 = vld [vmem:[#allocation8 + $0xcc] ss:$24 sps:$4 sm:$0xff]  }
 0x14b   :  { %4849 = vmatpush1.bf16.msra.mxu1 %v8209_v47 }
 0x14c   :  { %4595 = vmatpush1.bf16.msra.mxu0 %v8218_v37  ;;  %4850 = vmatprep.subr.bf16.mxu1 %v8217_v48  ;;  %v8307_v37 = vld [vmem:[#allocation8 + $0x30c] ss:$24 sps:$4 sm:$0xff]  }
 0x14d   :  { %4596 = vmatprep.subr.bf16.mxu0 %v8226_v38  ;;  %v308_v38 = vlaneseq }
 0x14f   :  { %4851 = vmatpush1.bf16.msra.mxu1 %v8215_v51  ;;  %v9675_v39 = vshrl.u32 %v308_v38, 7  ;;  %v8338_v38 = vld [vmem:[#allocation8 + $0x420] ss:$24 sps:$4 sm:$0xff]  }
 0x150   :  { %4597 = vmatpush1.bf16.msra.mxu0 %v8224_v41  ;;  %4852 = vmatprep.subr.bf16.mxu1 %v8223_v53 }
 0x151   :  { %4598 = vmatprep.subr.bf16.mxu0 %v8232_v42  ;;  %v9680_v41 = vsub.s32 0, %v9675_v39  ;;  %v9683_v42 = vsub.s32 1, %v9675_v39 }
 0x153   :  { %4853 = vmatpush1.bf16.msra.mxu1 %v8221_v56  ;;  %v311_v43 = vrot.slane %v9677_v40, %v9680_v41  ;;  %v315_v44 = vrot.slane %v9677_v40, %v9683_v42 }
 0x154   :  { %4599 = vmatpush1.bf16.msra.mxu0 %v8230_v45  ;;  %4854 = vmatprep.subr.bf16.mxu1 %v8229_v57 }
 0x155   :  { %4600 = vmatprep.subr.bf16.mxu0 %v8238_v46 }
 0x157   :  { %4855 = vmatpush1.bf16.msra.mxu1 %v8227_v60 }
 0x158   :  { %4601 = vmatpush1.bf16.msra.mxu0 %v8236_v49  ;;  %4856 = vmatprep.subr.bf16.mxu1 %v8235_v52 }
 0x159   :  { %4602 = vmatprep.subr.bf16.mxu0 %v8244_v50 }
 0x15b   :  { %4857 = vmatpush1.bf16.msra.mxu1 %v8233_v63  ;;  %v9698_v63 = vsub.s32 2, %v9675_v39 }
 0x15c   :  { %4603 = vmatpush1.bf16.msra.mxu0 %v8242_v54  ;;  %4858 = vmatprep.subr.bf16.mxu1 %v8241_v0  ;;  %v8308_v0 = vld [vmem:[#allocation8 + $0x330] ss:$24 sps:$4 sm:$0xff]  }
 0x15d   :  { %4604 = vmatprep.subr.bf16.mxu0 %v8250_v55 }
 0x15f   :  { %4859 = vmatpush1.bf16.msra.mxu1 %v8239_v3  ;;  %v8316_v3 = vld [vmem:[#allocation8 + $0x364] ss:$24 sps:$4 sm:$0xff]  }
 0x160   :  { %4605 = vmatpush1.bf16.msra.mxu0 %v8248_v58  ;;  %4860 = vmatprep.subr.bf16.mxu1 %v8247_v5  ;;  %v8302_v58 = vld [vmem:[#allocation8 + $0x300] ss:$24 sps:$4 sm:$0xff]   ;;  %v8319_v5 = vld [vmem:[#allocation8 + $0x36c] ss:$24 sps:$4 sm:$0xff]  }
 0x161   :  { %4606 = vmatprep.subr.bf16.mxu0 %v8256_v59  ;;  %v8305_v59 = vld [vmem:[#allocation8 + $0x308] ss:$24 sps:$4 sm:$0xff]  }
 0x163   :  { %4861 = vmatpush1.bf16.msra.mxu1 %v8245_v8  ;;  %v8317_v8 = vld [vmem:[#allocation8 + $0x368] ss:$24 sps:$4 sm:$0xff]  }
 0x164   :  { %4607 = vmatpush1.bf16.msra.mxu0 %v8254_v61  ;;  %4862 = vmatprep.subr.bf16.mxu1 %v8253_v9  ;;  %v8310_v61 = vld [vmem:[#allocation8 + $0x334] ss:$24 sps:$4 sm:$0xff]  }
 0x165   :  { %4608 = vmatprep.subr.bf16.mxu0 %v8262_v62  ;;  %v8313_v62 = vld [vmem:[#allocation8 + $0x33c] ss:$24 sps:$4 sm:$0xff]  }
 0x167   :  { %4863 = vmatpush1.bf16.msra.mxu1 %v8251_v12 }
 0x168   :  { %4609 = vmatpush1.bf16.msra.mxu0 %v8260_v1  ;;  %4864 = vmatprep.subr.bf16.mxu1 %v8259_v13  ;;  %v8311_v1 = vld [vmem:[#allocation8 + $0x338] ss:$24 sps:$4 sm:$0xff]  }
 0x169   :  { %4610 = vmatprep.subr.bf16.mxu0 %v8268_v2  ;;  %v322_v2 = vsub.s32 3, %v9675_v39 }
 0x16b   :  { %4865 = vmatpush1.bf16.msra.mxu1 %v8257_v16  ;;  %v323_v9 = vrot.slane %v9677_v40, %v322_v2  ;;  %v8323_v16 = vld [vmem:[#allocation8 + $0x398] ss:$24 sps:$4 sm:$0xff]  }
 0x16c   :  { %4611 = vmatpush1.bf16.msra.mxu0 %v8266_v6  ;;  %4866 = vmatprep.subr.bf16.mxu1 %v8265_v17  ;;  %v319_v6 = vrot.slane %v9677_v40, %v9698_v63 }
 0x16d   :  { %4612 = vmatprep.subr.bf16.mxu0 %v8274_v7  ;;  %v8314_v7 = vld [vmem:[#allocation8 + $0x360] ss:$24 sps:$4 sm:$0xff]  }
 0x16f   :  { %4867 = vmatpush1.bf16.msra.mxu1 %v8263_v20  ;;  %v8331_v20 = vld [vmem:[#allocation8 + $0x3cc] ss:$24 sps:$4 sm:$0xff]  }
 0x170   :  { %4613 = vmatpush1.bf16.msra.mxu0 %v8272_v10  ;;  %4868 = vmatprep.subr.bf16.mxu1 %v8271_v21  ;;  %v8322_v10 = vld [vmem:[#allocation8 + $0x394] ss:$24 sps:$4 sm:$0xff]  }
 0x171   :  { %4614 = vmatprep.subr.bf16.mxu0 %v8280_v11  ;;  %v8325_v11 = vld [vmem:[#allocation8 + $0x39c] ss:$24 sps:$4 sm:$0xff]  }
 0x173   :  { %4869 = vmatpush1.bf16.msra.mxu1 %v8269_v24 }
 0x174   :  { %4615 = vmatpush1.bf16.msra.mxu0 %v8278_v15  ;;  %4870 = vmatprep.subr.bf16.mxu1 %v8277_v25 }
 0x175   :  { %4616 = vmatprep.subr.bf16.mxu0 %v8286_v14  ;;  %v8320_v14 = vld [vmem:[#allocation8 + $0x390] ss:$24 sps:$4 sm:$0xff]  }
 0x177   :  { %4871 = vmatpush1.bf16.msra.mxu1 %v8275_v28  ;;  %v8329_v28 = vld [vmem:[#allocation8 + $0x3c8] ss:$24 sps:$4 sm:$0xff]  }
 0x178   :  { %4617 = vmatpush1.bf16.msra.mxu0 %v8284_v18  ;;  %4872 = vmatprep.subr.bf16.mxu1 %v8283_v29 }
 0x179   :  { %4618 = vmatprep.subr.bf16.mxu0 %v8292_v19  ;;  %v8328_v19 = vld [vmem:[#allocation8 + $0x3c4] ss:$24 sps:$4 sm:$0xff]  }
 0x17b   :  { %4873 = vmatpush1.bf16.msra.mxu1 %v8281_v30  ;;  %v8334_v30 = vld [vmem:[#allocation8 + $0x3f4] ss:$24 sps:$4 sm:$0xff]  }
 0x17c   :  { %4619 = vmatpush1.bf16.msra.mxu0 %v8290_v22  ;;  %4874 = vmatprep.subr.bf16.mxu1 %v8289_v31  ;;  %v8337_v31 = vld [vmem:[#allocation8 + $0x3fc] ss:$24 sps:$4 sm:$0xff]  }
 0x17d   :  { %4620 = vmatprep.subr.bf16.mxu0 %v8298_v23 }
 0x17f   :  { %4875 = vmatpush1.bf16.msra.mxu1 %v8287_v32 }
 0x180   :  { %4621 = vmatpush1.bf16.msra.mxu0 %v8296_v26  ;;  %4876 = vmatprep.subr.bf16.mxu1 %v8295_v33 }
 0x181   :  { %4633 = vmatprep.subr.bf16.mxu0 %v8304_v27  ;;  %v8326_v27 = vld [vmem:[#allocation8 + $0x3c0] ss:$24 sps:$4 sm:$0xff]  }
 0x183   :  { %4877 = vmatpush1.bf16.msra.mxu1 %v8293_v34  ;;  %v8332_v34 = vld [vmem:[#allocation8 + $0x3f0] ss:$24 sps:$4 sm:$0xff]  }
 0x184   :  { %4878 = vmatprep.subr.bf16.mxu1 %v8301_v35  ;;  %v8335_v35 = vld [vmem:[#allocation8 + $0x3f8] ss:$24 sps:$4 sm:$0xff]  }
 0x187   :  { %4879 = vmatpush1.bf16.msra.mxu1 %v8299_v36  ;;  %v8340_v36 = vld [vmem:[#allocation8 + $0x424] ss:$24 sps:$4 sm:$0xff]  }
 0x188   :  { %4891 = vmatprep.subr.bf16.mxu1 %v8307_v37  ;;  %v8343_v37 = vld [vmem:[#allocation8 + $0x42c] ss:$24 sps:$4 sm:$0xff]  }
 0x1ae   :  { %v1135_v45 = vpop.f32.mrb[0].mxu0 }
 0x1af   :  { %v1136_v46 = vadd.f32 %v1135_v45, %v311_v43  ;;  %v1137_v47 = vpop.f32.mrb[1].mxu0  ;;  %v8349_v45 = vld [vmem:[#allocation8 + $0x45c] ss:$24 sps:$4 sm:$0xff]  }
 0x1b0   :  { %v1138_v48 = vadd.f32 %v1137_v47, %v315_v44  ;;  %v1139_v49 = vpop.f32.mrb[2].mxu0  ;;  %v8347_v47 = vld [vmem:[#allocation8 + $0x458] ss:$24 sps:$4 sm:$0xff]  }
 0x1b1   :  { %v1140_v50 = vadd.f32 %v1139_v49, %v311_v43  ;;  %v1141_v51 = vpop.f32.mrb[3].mxu0  ;;  %v1357_v54 = vmax.f32 %v1136_v46, 0.0  ;;  %v8341_v43 = vld [vmem:[#allocation8 + $0x428] ss:$24 sps:$4 sm:$0xff]   ;;  %v8355_v49 = vld [vmem:[#allocation8 + $0x48c] ss:$24 sps:$4 sm:$0xff]  }
 0x1b2   :  { %v1142_v53 = vadd.f32 %v1141_v51, %v315_v44  ;;  %v1358_v56 = vmax.f32 %v1138_v48, 0.0  ;;  %v8346_v44 = vld [vmem:[#allocation8 + $0x454] ss:$24 sps:$4 sm:$0xff]   ;;  %v8344_v46 = vld [vmem:[#allocation8 + $0x450] ss:$24 sps:$4 sm:$0xff]  }
 0x1b3   :  { %v1368_v55 = vmax.f32 %v1140_v50, 0.0  ;;  %v8352_v48 = vld [vmem:[#allocation8 + $0x484] ss:$24 sps:$4 sm:$0xff]   ;;  %v8350_v50 = vld [vmem:[#allocation8 + $0x480] ss:$24 sps:$4 sm:$0xff]  }
 0x1b4   :  { %v1369_v57 = vmax.f32 %v1142_v53, 0.0  ;;  %v8353_v51 = vld [vmem:[#allocation8 + $0x488] ss:$24 sps:$4 sm:$0xff]   ;;  %v8358_v53 = vld [vmem:[#allocation8 + $0x4b4] ss:$24 sps:$4 sm:$0xff]  }
 0x1b5   :  { %v9689_v60 = vpack.c.bf16 %v1368_v55, %v1357_v54  ;;  %v1178_v12 = vpop.f32.mrb[0].mxu1  ;;  %v8361_v54 = vld [vmem:[#allocation8 + $0x4bc] ss:$24 sps:$4 sm:$0xff]   ;;  %v8356_v55 = vld [vmem:[#allocation8 + $0x4b0] ss:$24 sps:$4 sm:$0xff]  }
 0x1b6   :  { %v9691_v52 = vpack.c.bf16 %v1369_v57, %v1358_v56  ;;  %v1179_v13 = vadd.f32 %v1178_v12, %v319_v6  ;;  %v1180_v15 = vpop.f32.mrb[1].mxu1  ;;  %v8359_v56 = vld [vmem:[#allocation8 + $0x4b8] ss:$24 sps:$4 sm:$0xff]   ;;  %v8364_v57 = vld [vmem:[#allocation8 + $0x4e4] ss:$24 sps:$4 sm:$0xff]  }
 0x1b7   :  { %v1181_v17 = vadd.f32 %v1180_v15, %v323_v9  ;;  %v1182_v18 = vpop.f32.mrb[2].mxu1 }
 0x1b8   :  { %4622 = vmatprep.mubr.bf16.mxu0 %v9691_v52  ;;  %4880 = vmatprep.mubr.bf16.mxu1 %v9691_v52  ;;  %v1359_v21 = vmax.f32 %v1179_v13, 0.0  ;;  %v1183_v22 = vadd.f32 %v1182_v18, %v319_v6  ;;  %v1184_v23 = vpop.f32.mrb[3].mxu1 }
 0x1b9   :  { %4623 = vmatmul.mubr.bf16.vlgmr.msra.gmra.mrb[12].mxu0 %v9689_v60  ;;  %4881 = vmatmul.mubr.bf16.vlgmr.msra.gmra.mrb[12].mxu1 %v9689_v60  ;;  %v1360_v24 = vmax.f32 %v1181_v17, 0.0  ;;  %v1185_v25 = vadd.f32 %v1184_v23, %v323_v9  ;;  %v8382_v23 = vld [vmem:[#allocation8 + $0x574] ss:$24 sps:$4 sm:$0xff]  }
 0x1ba   :  { %4634 = vmatpush1.bf16.msra.mxu0 %v8302_v58  ;;  %4892 = vmatpush1.bf16.msra.mxu1 %v8305_v59  ;;  %v1370_v26 = vmax.f32 %v1183_v22, 0.0  ;;  %v8367_v58 = vld [vmem:[#allocation8 + $0x4ec] ss:$24 sps:$4 sm:$0xff]   ;;  %v326_v59 = vsub.s32 4, %v9675_v39 }
 0x1bb   :  { %4635 = vmatprep.subr.bf16.mxu0 %v8310_v61  ;;  %4893 = vmatprep.subr.bf16.mxu1 %v8313_v62  ;;  %v1371_v29 = vmax.f32 %v1185_v25, 0.0  ;;  %v330_v61 = vsub.s32 5, %v9675_v39  ;;  %v8362_v62 = vld [vmem:[#allocation8 + $0x4e0] ss:$24 sps:$4 sm:$0xff]  }
 0x1bc   :  { %v9706_v32 = vpack.c.bf16 %v1370_v26, %v1359_v21 }
 0x1bd   :  { %v9708_v33 = vpack.c.bf16 %v1371_v29, %v1360_v24  ;;  %v331_v6 = vrot.slane %v9677_v40, %v330_v61  ;;  %v8385_v24 = vld [vmem:[#allocation8 + $0x57c] ss:$24 sps:$4 sm:$0xff]   ;;  %v8383_v29 = vld [vmem:[#allocation8 + $0x578] ss:$24 sps:$4 sm:$0xff]  }
 0x1be   :  { %4636 = vmatpush1.bf16.msra.mxu0 %v8308_v0  ;;  %4894 = vmatpush1.bf16.msra.mxu1 %v8311_v1  ;;  %v8365_v0 = vld [vmem:[#allocation8 + $0x4e8] ss:$24 sps:$4 sm:$0xff]   ;;  %v8370_v1 = vld [vmem:[#allocation8 + $0x514] ss:$24 sps:$4 sm:$0xff]  }
 0x1bf   :  { %4637 = vmatprep.subr.bf16.mxu0 %v8316_v3  ;;  %4895 = vmatprep.subr.bf16.mxu1 %v8319_v5  ;;  %v8373_v3 = vld [vmem:[#allocation8 + $0x51c] ss:$24 sps:$4 sm:$0xff]   ;;  %v327_v5 = vrot.slane %v9677_v40, %v326_v59 }
 0x1c0   :  { %4665 = vmatprep.mubr.bf16.mxu0 %v9708_v33  ;;  %4923 = vmatprep.mubr.bf16.mxu1 %v9708_v33 }
 0x1c2   :  { %4638 = vmatpush1.bf16.msra.mxu0 %v8314_v7  ;;  %4896 = vmatpush1.bf16.msra.mxu1 %v8317_v8  ;;  %v8368_v7 = vld [vmem:[#allocation8 + $0x510] ss:$24 sps:$4 sm:$0xff]  }
 0x1c3   :  { %4639 = vmatprep.subr.bf16.mxu0 %v8322_v10  ;;  %4897 = vmatprep.subr.bf16.mxu1 %v8325_v11  ;;  %v8371_v8 = vld [vmem:[#allocation8 + $0x518] ss:$24 sps:$4 sm:$0xff]   ;;  %v8376_v10 = vld [vmem:[#allocation8 + $0x544] ss:$24 sps:$4 sm:$0xff]  }
 0x1c4   :  { %v8379_v11 = vld [vmem:[#allocation8 + $0x54c] ss:$24 sps:$4 sm:$0xff]  }
 0x1c6   :  { %4640 = vmatpush1.bf16.msra.mxu0 %v8320_v14  ;;  %4898 = vmatpush1.bf16.msra.mxu1 %v8323_v16 }
 0x1c7   :  { %4641 = vmatprep.subr.bf16.mxu0 %v8328_v19  ;;  %4899 = vmatprep.subr.bf16.mxu1 %v8331_v20  ;;  %v8374_v19 = vld [vmem:[#allocation8 + $0x540] ss:$24 sps:$4 sm:$0xff]  }
 0x1c8   :  { %v8377_v20 = vld [vmem:[#allocation8 + $0x548] ss:$24 sps:$4 sm:$0xff]  }
 0x1ca   :  { %4642 = vmatpush1.bf16.msra.mxu0 %v8326_v27  ;;  %4900 = vmatpush1.bf16.msra.mxu1 %v8329_v28  ;;  %v8380_v28 = vld [vmem:[#allocation8 + $0x570] ss:$24 sps:$4 sm:$0xff]  }
 0x1cb   :  { %4643 = vmatprep.subr.bf16.mxu0 %v8334_v30  ;;  %4901 = vmatprep.subr.bf16.mxu1 %v8337_v31  ;;  %v8388_v31 = vld [vmem:[#allocation8 + $0x5a4] ss:$24 sps:$4 sm:$0xff]  }
 0x1ce   :  { %4644 = vmatpush1.bf16.msra.mxu0 %v8332_v34  ;;  %4902 = vmatpush1.bf16.msra.mxu1 %v8335_v35  ;;  %v8391_v34 = vld [vmem:[#allocation8 + $0x5ac] ss:$24 sps:$4 sm:$0xff]   ;;  %v334_v35 = vsub.s32 6, %v9675_v39 }
 0x1cf   :  { %4645 = vmatprep.subr.bf16.mxu0 %v8340_v36  ;;  %4903 = vmatprep.subr.bf16.mxu1 %v8343_v37  ;;  %v8386_v36 = vld [vmem:[#allocation8 + $0x5a0] ss:$24 sps:$4 sm:$0xff]  }
 0x1d0   :  { %v8389_v37 = vld [vmem:[#allocation8 + $0x5a8] ss:$24 sps:$4 sm:$0xff]  }
 0x1d2   :  { %4646 = vmatpush1.bf16.msra.mxu0 %v8338_v38  ;;  %4904 = vmatpush1.bf16.msra.mxu1 %v8341_v43  ;;  %v338_v38 = vsub.s32 7, %v9675_v39  ;;  %v8394_v43 = vld [vmem:[#allocation8 + $0x5d4] ss:$24 sps:$4 sm:$0xff]  }
 0x1d3   :  { %4647 = vmatprep.subr.bf16.mxu0 %v8346_v44  ;;  %4905 = vmatprep.subr.bf16.mxu1 %v8349_v45  ;;  %v8397_v44 = vld [vmem:[#allocation8 + $0x5dc] ss:$24 sps:$4 sm:$0xff]   ;;  %v335_v45 = vrot.slane %v9677_v40, %v334_v35  ;;  %v8434_v35 = vld [vmem:[#allocation8 + $0x720] ss:$24 sps:$4 sm:$0xff]  }
 0x1d4   :  { %v9144_v39 = vld [vmem:[#allocation11 + $0xe0] ss:$12 sps:$4 sm:$0xff]  }
 0x1d6   :  { %4648 = vmatpush1.bf16.msra.mxu0 %v8344_v46  ;;  %4906 = vmatpush1.bf16.msra.mxu1 %v8347_v47  ;;  %v8392_v46 = vld [vmem:[#allocation8 + $0x5d0] ss:$24 sps:$4 sm:$0xff]  }
 0x1d7   :  { %4649 = vmatprep.subr.bf16.mxu0 %v8352_v48  ;;  %4907 = vmatprep.subr.bf16.mxu1 %v8355_v49  ;;  %v8395_v47 = vld [vmem:[#allocation8 + $0x5d8] ss:$24 sps:$4 sm:$0xff]   ;;  %v339_v48 = vrot.slane %v9677_v40, %v338_v38  ;;  %v8400_v49 = vld [vmem:[#allocation8 + $0x604] ss:$24 sps:$4 sm:$0xff]  }
 0x1d8   :  { %v8445_v38 = vld [vmem:[#allocation8 + $0x75c] ss:$24 sps:$4 sm:$0xff]  }
 0x1da   :  { %4650 = vmatpush1.bf16.msra.mxu0 %v8350_v50  ;;  %4908 = vmatpush1.bf16.msra.mxu1 %v8353_v51  ;;  %v8403_v50 = vld [vmem:[#allocation8 + $0x60c] ss:$24 sps:$4 sm:$0xff]   ;;  %v8398_v51 = vld [vmem:[#allocation8 + $0x600] ss:$24 sps:$4 sm:$0xff]  }
 0x1db   :  { %4651 = vmatprep.subr.bf16.mxu0 %v8358_v53  ;;  %4909 = vmatprep.subr.bf16.mxu1 %v8361_v54  ;;  %v8401_v53 = vld [vmem:[#allocation8 + $0x608] ss:$24 sps:$4 sm:$0xff]  }
 0x1de   :  { %4652 = vmatpush1.bf16.msra.mxu0 %v8356_v55  ;;  %4910 = vmatpush1.bf16.msra.mxu1 %v8359_v56 }
 0x1df   :  { %4653 = vmatprep.subr.bf16.mxu0 %v8364_v57  ;;  %4911 = vmatprep.subr.bf16.mxu1 %v8367_v58 }
 0x1e2   :  { %4654 = vmatpush1.bf16.msra.mxu0 %v8362_v62  ;;  %4912 = vmatpush1.bf16.msra.mxu1 %v8365_v0  ;;  %v1221_v9 = vpop.f32.mrb[4].mxu0  ;;  %v8406_v62 = vld [vmem:[#allocation8 + $0x634] ss:$24 sps:$4 sm:$0xff]  }
 0x1e3   :  { %4655 = vmatprep.subr.bf16.mxu0 %v8370_v1  ;;  %4913 = vmatprep.subr.bf16.mxu1 %v8373_v3  ;;  %v1222_v12 = vadd.f32 %v1221_v9, %v327_v5  ;;  %v1223_v13 = vpop.f32.mrb[5].mxu0  ;;  %v8409_v0 = vld [vmem:[#allocation8 + $0x63c] ss:$24 sps:$4 sm:$0xff]  }
 0x1e4   :  { %v1224_v15 = vadd.f32 %v1223_v13, %v331_v6  ;;  %v1225_v14 = vpop.f32.mrb[6].mxu0 }
 0x1e5   :  { %v1361_v16 = vmax.f32 %v1222_v12, 0.0  ;;  %v1226_v17 = vadd.f32 %v1225_v14, %v327_v5  ;;  %v1227_v18 = vpop.f32.mrb[7].mxu0  ;;  %v8404_v5 = vld [vmem:[#allocation8 + $0x630] ss:$24 sps:$4 sm:$0xff]   ;;  %v8415_v12 = vld [vmem:[#allocation8 + $0x66c] ss:$24 sps:$4 sm:$0xff]  }
 0x1e6   :  { %4656 = vmatpush1.bf16.msra.mxu0 %v8368_v7  ;;  %4914 = vmatpush1.bf16.msra.mxu1 %v8371_v8  ;;  %v1362_v21 = vmax.f32 %v1224_v15, 0.0  ;;  %v1228_v22 = vadd.f32 %v1227_v18, %v331_v6  ;;  %v8407_v6 = vld [vmem:[#allocation8 + $0x638] ss:$24 sps:$4 sm:$0xff]   ;;  %v8413_v14 = vld [vmem:[#allocation8 + $0x668] ss:$24 sps:$4 sm:$0xff]  }
 0x1e7   :  { %4657 = vmatprep.subr.bf16.mxu0 %v8376_v10  ;;  %4915 = vmatprep.subr.bf16.mxu1 %v8379_v11  ;;  %v1372_v25 = vmax.f32 %v1226_v17, 0.0  ;;  %v8412_v11 = vld [vmem:[#allocation8 + $0x664] ss:$24 sps:$4 sm:$0xff]   ;;  %v8410_v15 = vld [vmem:[#allocation8 + $0x660] ss:$24 sps:$4 sm:$0xff]  }
 0x1e8   :  { %v1373_v26 = vmax.f32 %v1228_v22, 0.0  ;;  %v8418_v17 = vld [vmem:[#allocation8 + $0x694] ss:$24 sps:$4 sm:$0xff]  }
 0x1e9   :  { %v9720_v27 = vpack.c.bf16 %v1372_v25, %v1361_v16  ;;  %v1264_v54 = vpop.f32.mrb[4].mxu1  ;;  %v8421_v18 = vld [vmem:[#allocation8 + $0x69c] ss:$24 sps:$4 sm:$0xff]   ;;  %v8427_v22 = vld [vmem:[#allocation8 + $0x6cc] ss:$24 sps:$4 sm:$0xff]  }
 0x1ea   :  { %4658 = vmatpush1.bf16.msra.mxu0 %v8374_v19  ;;  %4916 = vmatpush1.bf16.msra.mxu1 %v8377_v20  ;;  %v9722_v30 = vpack.c.bf16 %v1373_v26, %v1362_v21  ;;  %v1265_v55 = vadd.f32 %v1264_v54, %v335_v45  ;;  %v1266_v56 = vpop.f32.mrb[5].mxu1  ;;  %v8416_v19 = vld [vmem:[#allocation8 + $0x690] ss:$24 sps:$4 sm:$0xff]   ;;  %v8424_v21 = vld [vmem:[#allocation8 + $0x6c4] ss:$24 sps:$4 sm:$0xff]  }
 0x1eb   :  { %4659 = vmatprep.subr.bf16.mxu0 %v8382_v23  ;;  %4917 = vmatprep.subr.bf16.mxu1 %v8385_v24  ;;  %v1267_v57 = vadd.f32 %v1266_v56, %v339_v48  ;;  %v1268_v58 = vpop.f32.mrb[6].mxu1  ;;  %v8419_v20 = vld [vmem:[#allocation8 + $0x698] ss:$24 sps:$4 sm:$0xff]   ;;  %v8425_v24 = vld [vmem:[#allocation8 + $0x6c8] ss:$24 sps:$4 sm:$0xff]  }
 0x1ec   :  { %v1363_v1 = vmax.f32 %v1265_v55, 0.0  ;;  %v1269_v3 = vadd.f32 %v1268_v58, %v335_v45  ;;  %v1270_v40 = vpop.f32.mrb[7].mxu1  ;;  %v8422_v23 = vld [vmem:[#allocation8 + $0x6c0] ss:$24 sps:$4 sm:$0xff]   ;;  %v8430_v25 = vld [vmem:[#allocation8 + $0x6f4] ss:$24 sps:$4 sm:$0xff]  }
 0x1ed   :  { %v1364_v7 = vmax.f32 %v1267_v57, 0.0  ;;  %v1271_v8 = vadd.f32 %v1270_v40, %v339_v48  ;;  %v8433_v26 = vld [vmem:[#allocation8 + $0x6fc] ss:$24 sps:$4 sm:$0xff]   ;;  %v8452_v58 = vld [vmem:[#allocation8 + $0x7b0] ss:$24 sps:$4 sm:$0xff]  }
 0x1ee   :  { %4660 = vmatpush1.bf16.msra.mxu0 %v8380_v28  ;;  %4918 = vmatpush1.bf16.msra.mxu1 %v8383_v29  ;;  %v1374_v9 = vmax.f32 %v1269_v3, 0.0  ;;  %v8428_v28 = vld [vmem:[#allocation8 + $0x6f0] ss:$24 sps:$4 sm:$0xff]   ;;  %v9736_v45 = vld [vmem:[#allocation7 + $0x8] sm:$0x7] }
 0x1ef   :  { %4661 = vmatprep.subr.bf16.mxu0 %v8388_v31  ;;  %4919 = vmatprep.subr.bf16.mxu1 %v8391_v34  ;;  %v1375_v10 = vmax.f32 %v1271_v8, 0.0  ;;  %v8431_v29 = vld [vmem:[#allocation8 + $0x6f8] ss:$24 sps:$4 sm:$0xff]   ;;  %v8436_v31 = vld [vmem:[#allocation8 + $0x724] ss:$24 sps:$4 sm:$0xff]   ;;  %v343_v48 = vrot.slane %v9736_v45, %v9680_v41 }
 0x1f0   :  { %v9730_v13 = vpack.c.bf16 %v1374_v9, %v1363_v1  ;;  %v8439_v34 = vld [vmem:[#allocation8 + $0x72c] ss:$24 sps:$4 sm:$0xff]   ;;  %v8457_v55 = vld [vmem:[#allocation8 + $0x7bc] ss:$24 sps:$4 sm:$0xff]  }
 0x1f1   :  { %v9734_v16 = vpack.c.bf16 %v1375_v10, %v1364_v7  ;;  %v8454_v54 = vld [vmem:[#allocation8 + $0x7b4] ss:$24 sps:$4 sm:$0xff]   ;;  %v8460_v8 = vld [vmem:[#allocation8 + $0x7e4] ss:$24 sps:$4 sm:$0xff]  }
 0x1f2   :  { %4662 = vmatpush1.bf16.msra.mxu0 %v8386_v36  ;;  %4920 = vmatpush1.bf16.msra.mxu1 %v8389_v37  ;;  %v8437_v36 = vld [vmem:[#allocation8 + $0x728] ss:$24 sps:$4 sm:$0xff]   ;;  %v8442_v37 = vld [vmem:[#allocation8 + $0x754] ss:$24 sps:$4 sm:$0xff]  }
 0x1f3   :  { %4663 = vmatprep.subr.bf16.mxu0 %v8394_v43  ;;  %4921 = vmatprep.subr.bf16.mxu1 %v8397_v44  ;;  %v8440_v43 = vld [vmem:[#allocation8 + $0x750] ss:$24 sps:$4 sm:$0xff]   ;;  %v8463_v9 = vld [vmem:[#allocation8 + $0x7ec] ss:$24 sps:$4 sm:$0xff]  }
 0x1f4   :  { %v8443_v44 = vld [vmem:[#allocation8 + $0x758] ss:$24 sps:$4 sm:$0xff]  }
 0x1f6   :  { %4664 = vmatpush1.bf16.msra.mxu0 %v8392_v46  ;;  %4922 = vmatpush1.bf16.msra.mxu1 %v8395_v47  ;;  %v8448_v46 = vld [vmem:[#allocation8 + $0x784] ss:$24 sps:$4 sm:$0xff]  }
 0x1f7   :  { %4676 = vmatprep.subr.bf16.mxu0 %v8400_v49  ;;  %4934 = vmatprep.subr.bf16.mxu1 %v8403_v50  ;;  %v8451_v47 = vld [vmem:[#allocation8 + $0x78c] ss:$24 sps:$4 sm:$0xff]   ;;  %v8446_v49 = vld [vmem:[#allocation8 + $0x780] ss:$24 sps:$4 sm:$0xff]  }
 0x1f8   :  { %v8449_v50 = vld [vmem:[#allocation8 + $0x788] ss:$24 sps:$4 sm:$0xff]  }
 0x1f9   :  { %4666 = vmatmul.mubr.bf16.vlgmr.msra.gmra.mrb[12].mxu0 %v9706_v32  ;;  %4924 = vmatmul.mubr.bf16.vlgmr.msra.gmra.mrb[12].mxu1 %v9706_v32 }
 0x1fa   :  { %4677 = vmatpush1.bf16.msra.mxu0 %v8398_v51  ;;  %4935 = vmatpush1.bf16.msra.mxu1 %v8401_v53  ;;  %v347_v51 = vrot.slane %v9736_v45, %v9683_v42 }
 0x1fb   :  { %4678 = vmatprep.subr.bf16.mxu0 %v8406_v62  ;;  %4936 = vmatprep.subr.bf16.mxu1 %v8409_v0  ;;  %v8455_v62 = vld [vmem:[#allocation8 + $0x7b8] ss:$24 sps:$4 sm:$0xff]  }
 0x1fc   :  { %4708 = vmatprep.mubr.bf16.mxu0 %v9722_v30  ;;  %4966 = vmatprep.mubr.bf16.mxu1 %v9722_v30 }
 0x1fe   :  { %4679 = vmatpush1.bf16.msra.mxu0 %v8404_v5  ;;  %4937 = vmatpush1.bf16.msra.mxu1 %v8407_v6 }
 0x1ff   :  { %4680 = vmatprep.subr.bf16.mxu0 %v8412_v11  ;;  %4938 = vmatprep.subr.bf16.mxu1 %v8415_v12  ;;  %v8458_v11 = vld [vmem:[#allocation8 + $0x7e0] ss:$24 sps:$4 sm:$0xff]  }
 0x200   :  { %v8461_v12 = vld [vmem:[#allocation8 + $0x7e8] ss:$24 sps:$4 sm:$0xff]  }
 0x202   :  { %4681 = vmatpush1.bf16.msra.mxu0 %v8410_v15  ;;  %4939 = vmatpush1.bf16.msra.mxu1 %v8413_v14 }
 0x203   :  { %4682 = vmatprep.subr.bf16.mxu0 %v8418_v17  ;;  %4940 = vmatprep.subr.bf16.mxu1 %v8421_v18  ;;  %v8466_v18 = vld [vmem:[#allocation8 + $0x814] ss:$24 sps:$4 sm:$0xff]  }
 0x206   :  { %4683 = vmatpush1.bf16.msra.mxu0 %v8416_v19  ;;  %4941 = vmatpush1.bf16.msra.mxu1 %v8419_v20  ;;  %v8469_v19 = vld [vmem:[#allocation8 + $0x81c] ss:$24 sps:$4 sm:$0xff]   ;;  %v8464_v20 = vld [vmem:[#allocation8 + $0x810] ss:$24 sps:$4 sm:$0xff]  }
 0x207   :  { %4684 = vmatprep.subr.bf16.mxu0 %v8424_v21  ;;  %4942 = vmatprep.subr.bf16.mxu1 %v8427_v22  ;;  %v8467_v21 = vld [vmem:[#allocation8 + $0x818] ss:$24 sps:$4 sm:$0xff]   ;;  %v8472_v22 = vld [vmem:[#allocation8 + $0x844] ss:$24 sps:$4 sm:$0xff]  }
 0x20a   :  { %4685 = vmatpush1.bf16.msra.mxu0 %v8422_v23  ;;  %4943 = vmatpush1.bf16.msra.mxu1 %v8425_v24  ;;  %v8475_v23 = vld [vmem:[#allocation8 + $0x84c] ss:$24 sps:$4 sm:$0xff]   ;;  %v8470_v24 = vld [vmem:[#allocation8 + $0x840] ss:$24 sps:$4 sm:$0xff]  }
 0x20b   :  { %4686 = vmatprep.subr.bf16.mxu0 %v8430_v25  ;;  %4944 = vmatprep.subr.bf16.mxu1 %v8433_v26  ;;  %v8473_v25 = vld [vmem:[#allocation8 + $0x848] ss:$24 sps:$4 sm:$0xff]   ;;  %v8478_v26 = vld [vmem:[#allocation8 + $0x874] ss:$24 sps:$4 sm:$0xff]  }
 0x20e   :  { %4687 = vmatpush1.bf16.msra.mxu0 %v8428_v28  ;;  %4945 = vmatpush1.bf16.msra.mxu1 %v8431_v29  ;;  %v8481_v28 = vld [vmem:[#allocation8 + $0x87c] ss:$24 sps:$4 sm:$0xff]   ;;  %v8476_v29 = vld [vmem:[#allocation8 + $0x870] ss:$24 sps:$4 sm:$0xff]  }
 0x20f   :  { %4688 = vmatprep.subr.bf16.mxu0 %v8436_v31  ;;  %4946 = vmatprep.subr.bf16.mxu1 %v8439_v34  ;;  %v8479_v31 = vld [vmem:[#allocation8 + $0x878] ss:$24 sps:$4 sm:$0xff]   ;;  %v8484_v34 = vld [vmem:[#allocation8 + $0x8a4] ss:$24 sps:$4 sm:$0xff]  }
 0x212   :  { %4689 = vmatpush1.bf16.msra.mxu0 %v8434_v35  ;;  %4947 = vmatpush1.bf16.msra.mxu1 %v8437_v36  ;;  %v8487_v35 = vld [vmem:[#allocation8 + $0x8ac] ss:$24 sps:$4 sm:$0xff]   ;;  %v8482_v36 = vld [vmem:[#allocation8 + $0x8a0] ss:$24 sps:$4 sm:$0xff]  }
 0x213   :  { %4690 = vmatprep.subr.bf16.mxu0 %v8442_v37  ;;  %4948 = vmatprep.subr.bf16.mxu1 %v8445_v38  ;;  %v8485_v37 = vld [vmem:[#allocation8 + $0x8a8] ss:$24 sps:$4 sm:$0xff]   ;;  %v8490_v38 = vld [vmem:[#allocation8 + $0x8d4] ss:$24 sps:$4 sm:$0xff]  }
 0x216   :  { %4691 = vmatpush1.bf16.msra.mxu0 %v8440_v43  ;;  %4949 = vmatpush1.bf16.msra.mxu1 %v8443_v44  ;;  %v1307_v53 = vpop.f32.mrb[8].mxu0  ;;  %v8493_v43 = vld [vmem:[#allocation8 + $0x8dc] ss:$24 sps:$4 sm:$0xff]   ;;  %v8488_v44 = vld [vmem:[#allocation8 + $0x8d0] ss:$24 sps:$4 sm:$0xff]  }
 0x217   :  { %4692 = vmatprep.subr.bf16.mxu0 %v8448_v46  ;;  %4950 = vmatprep.subr.bf16.mxu1 %v8451_v47  ;;  %v1308_v56 = vadd.f32 %v1307_v53, %v343_v48  ;;  %v1309_v57 = vpop.f32.mrb[9].mxu0  ;;  %v8491_v46 = vld [vmem:[#allocation8 + $0x8d8] ss:$24 sps:$4 sm:$0xff]   ;;  %v8496_v47 = vld [vmem:[#allocation8 + $0x904] ss:$24 sps:$4 sm:$0xff]  }
 0x218   :  { %v1310_v0 = vadd.f32 %v1309_v57, %v347_v51  ;;  %v1311_v1 = vpop.f32.mrb[10].mxu0  ;;  %v8505_v53 = vld [vmem:[#allocation8 + $0x93c] ss:$24 sps:$4 sm:$0xff]   ;;  %v8511_v57 = vld [vmem:[#allocation8 + $0x96c] ss:$24 sps:$4 sm:$0xff]  }
 0x219   :  { %v1365_v3 = vmax.f32 %v1308_v56, 0.0  ;;  %v1312_v40 = vadd.f32 %v1311_v1, %v343_v48  ;;  %v1313_v5 = vpop.f32.mrb[11].mxu0  ;;  %v8499_v48 = vld [vmem:[#allocation8 + $0x90c] ss:$24 sps:$4 sm:$0xff]   ;;  %v8517_v1 = vld [vmem:[#allocation8 + $0x99c] ss:$24 sps:$4 sm:$0xff]  }
 0x21a   :  { %4693 = vmatpush1.bf16.msra.mxu0 %v8446_v49  ;;  %4951 = vmatpush1.bf16.msra.mxu1 %v8449_v50  ;;  %v1366_v6 = vmax.f32 %v1310_v0, 0.0  ;;  %v1314_v7 = vadd.f32 %v1313_v5, %v347_v51  ;;  %v8494_v49 = vld [vmem:[#allocation8 + $0x900] ss:$24 sps:$4 sm:$0xff]   ;;  %v8502_v51 = vld [vmem:[#allocation8 + $0x934] ss:$24 sps:$4 sm:$0xff]  }
 0x21b   :  { %4694 = vmatprep.subr.bf16.mxu0 %v8454_v54  ;;  %4952 = vmatprep.subr.bf16.mxu1 %v8457_v55  ;;  %v1376_v10 = vmax.f32 %v1312_v40, 0.0  ;;  %v8497_v50 = vld [vmem:[#allocation8 + $0x908] ss:$24 sps:$4 sm:$0xff]   ;;  %v8503_v55 = vld [vmem:[#allocation8 + $0x938] ss:$24 sps:$4 sm:$0xff]  }
 0x21c   :  { %v1377_v15 = vmax.f32 %v1314_v7, 0.0  ;;  %v8500_v54 = vld [vmem:[#allocation8 + $0x930] ss:$24 sps:$4 sm:$0xff]   ;;  %v8508_v56 = vld [vmem:[#allocation8 + $0x964] ss:$24 sps:$4 sm:$0xff]  }
 0x21d   :  { %v9742_v14 = vpack.c.bf16 %v1376_v10, %v1365_v3  ;;  %v8514_v0 = vld [vmem:[#allocation8 + $0x994] ss:$24 sps:$4 sm:$0xff]   ;;  %v8512_v3 = vld [vmem:[#allocation8 + $0x990] ss:$24 sps:$4 sm:$0xff]   ;;  %v8520_v5 = vld [vmem:[#allocation8 + $0x9c4] ss:$24 sps:$4 sm:$0xff]  }
 0x21e   :  { %4695 = vmatpush1.bf16.msra.mxu0 %v8452_v58  ;;  %4953 = vmatpush1.bf16.msra.mxu1 %v8455_v62  ;;  %v9744_v17 = vpack.c.bf16 %v1377_v15, %v1366_v6  ;;  %v8506_v58 = vld [vmem:[#allocation8 + $0x960] ss:$24 sps:$4 sm:$0xff]   ;;  %v8523_v6 = vld [vmem:[#allocation8 + $0x9cc] ss:$24 sps:$4 sm:$0xff]   ;;  %v8529_v10 = vld [vmem:[#allocation8 + $0x9fc] ss:$24 sps:$4 sm:$0xff]  }
 0x21f   :  { %4696 = vmatprep.subr.bf16.mxu0 %v8460_v8  ;;  %4954 = vmatprep.subr.bf16.mxu1 %v8463_v9  ;;  %v8509_v62 = vld [vmem:[#allocation8 + $0x968] ss:$24 sps:$4 sm:$0xff]   ;;  %v8515_v40 = vld [vmem:[#allocation8 + $0x998] ss:$24 sps:$4 sm:$0xff]   ;;  %v8526_v9 = vld [vmem:[#allocation8 + $0x9f4] ss:$24 sps:$4 sm:$0xff]  }
 0x220   :  { %v8518_v7 = vld [vmem:[#allocation8 + $0x9c0] ss:$24 sps:$4 sm:$0xff]   ;;  %v8532_v15 = vld [vmem:[#allocation8 + $0xa24] ss:$24 sps:$4 sm:$0xff]  }
 0x221   :  { %v8521_v8 = vld [vmem:[#allocation8 + $0x9c8] ss:$24 sps:$4 sm:$0xff]  }
 0x222   :  { %4697 = vmatpush1.bf16.msra.mxu0 %v8458_v11  ;;  %4955 = vmatpush1.bf16.msra.mxu1 %v8461_v12  ;;  %v8524_v11 = vld [vmem:[#allocation8 + $0x9f0] ss:$24 sps:$4 sm:$0xff]  }
 0x223   :  { %4698 = vmatprep.subr.bf16.mxu0 %v8466_v18  ;;  %4956 = vmatprep.subr.bf16.mxu1 %v8469_v19  ;;  %v8527_v12 = vld [vmem:[#allocation8 + $0x9f8] ss:$24 sps:$4 sm:$0xff]   ;;  %v8535_v18 = vld [vmem:[#allocation8 + $0xa2c] ss:$24 sps:$4 sm:$0xff]  }
 0x224   :  { %v8530_v19 = vld [vmem:[#allocation8 + $0xa20] ss:$24 sps:$4 sm:$0xff]  }
 0x226   :  { %4699 = vmatpush1.bf16.msra.mxu0 %v8464_v20  ;;  %4957 = vmatpush1.bf16.msra.mxu1 %v8467_v21  ;;  %v8533_v20 = vld [vmem:[#allocation8 + $0xa28] ss:$24 sps:$4 sm:$0xff]   ;;  %v351_v21 = vrot.slane %v9736_v45, %v9698_v63  ;;  %v8544_v45 = vld [vmem:[#allocation8 + $0xa84] ss:$24 sps:$4 sm:$0xff]  }
 0x227   :  { %4700 = vmatprep.subr.bf16.mxu0 %v8472_v22  ;;  %4958 = vmatprep.subr.bf16.mxu1 %v8475_v23  ;;  %v1350_v22 = vpop.f32.mrb[8].mxu1 }
 0x228   :  { %v1352_v23 = vpop.f32.mrb[9].mxu1 }
 0x229   :  { %v8590_v23 = vld [vmem:[#allocation8 + $0xc00] ss:$24 sps:$4 sm:$0xff]  }
 0x22a   :  { %4701 = vmatpush1.bf16.msra.mxu0 %v8470_v24  ;;  %4959 = vmatpush1.bf16.msra.mxu1 %v8473_v25  ;;  %v1351_v24 = vadd.f32 %v1350_v22, %v351_v21  ;;  %v8538_v25 = vld [vmem:[#allocation8 + $0xa54] ss:$24 sps:$4 sm:$0xff]  }
 0x22b   :  { %4702 = vmatprep.subr.bf16.mxu0 %v8478_v26  ;;  %4960 = vmatprep.subr.bf16.mxu1 %v8481_v28  ;;  %v8541_v26 = vld [vmem:[#allocation8 + $0xa5c] ss:$24 sps:$4 sm:$0xff]   ;;  %v1353_v28 = vpop.f32.mrb[10].mxu1  ;;  %v8595_v22 = vld [vmem:[#allocation8 + $0xc0c] ss:$24 sps:$4 sm:$0xff]  }
 0x22e   :  { %4703 = vmatpush1.bf16.msra.mxu0 %v8476_v29  ;;  %4961 = vmatpush1.bf16.msra.mxu1 %v8479_v31  ;;  %v8536_v29 = vld [vmem:[#allocation8 + $0xa50] ss:$24 sps:$4 sm:$0xff]  }
 0x22f   :  { %4704 = vmatprep.subr.bf16.mxu0 %v8484_v34  ;;  %4962 = vmatprep.subr.bf16.mxu1 %v8487_v35  ;;  %v8539_v31 = vld [vmem:[#allocation8 + $0xa58] ss:$24 sps:$4 sm:$0xff]   ;;  %v1367_v34 = vmax.f32 %v1351_v24, 0.0  ;;  %v1354_v35 = vadd.f32 %v1353_v28, %v351_v21  ;;  %v8592_v21 = vld [vmem:[#allocation8 + $0xc04] ss:$24 sps:$4 sm:$0xff]  }
 0x230   :  { %v8593_v24 = vld [vmem:[#allocation8 + $0xc08] ss:$24 sps:$4 sm:$0xff]  }
 0x231   :  { %v8596_v28 = vld [vmem:[#allocation8 + $0xc30] ss:$24 sps:$4 sm:$0xff]  }
 0x232   :  { %4705 = vmatpush1.bf16.msra.mxu0 %v8482_v36  ;;  %4963 = vmatpush1.bf16.msra.mxu1 %v8485_v37  ;;  %v1355_v36 = vpop.f32.mrb[11].mxu1  ;;  %v1378_v37 = vmax.f32 %v1354_v35, 0.0  ;;  %v8602_v35 = vld [vmem:[#allocation8 + $0xc60] ss:$24 sps:$4 sm:$0xff]  }
 0x233   :  { %4706 = vmatprep.subr.bf16.mxu0 %v8490_v38  ;;  %4964 = vmatprep.subr.bf16.mxu1 %v8493_v43  ;;  %v8547_v38 = vld [vmem:[#allocation8 + $0xa8c] ss:$24 sps:$4 sm:$0xff]   ;;  %v8542_v43 = vld [vmem:[#allocation8 + $0xa80] ss:$24 sps:$4 sm:$0xff]  }
 0x234   :  { %v8605_v36 = vld [vmem:[#allocation8 + $0xc68] ss:$24 sps:$4 sm:$0xff]  }
 0x236   :  { %4707 = vmatpush1.bf16.msra.mxu0 %v8488_v44  ;;  %4965 = vmatpush1.bf16.msra.mxu1 %v8491_v46  ;;  %v8545_v44 = vld [vmem:[#allocation8 + $0xa88] ss:$24 sps:$4 sm:$0xff]   ;;  %v9752_v46 = vpack.c.bf16 %v1378_v37, %v1367_v34  ;;  %v8607_v34 = vld [vmem:[#allocation8 + $0xc6c] ss:$24 sps:$4 sm:$0xff]  }
 0x237   :  { %4719 = vmatprep.subr.bf16.mxu0 %v8496_v47  ;;  %4977 = vmatprep.subr.bf16.mxu1 %v8499_v48  ;;  %v8550_v47 = vld [vmem:[#allocation8 + $0xab4] ss:$24 sps:$4 sm:$0xff]  }
 0x238   :  { %v8553_v48 = vld [vmem:[#allocation8 + $0xabc] ss:$24 sps:$4 sm:$0xff]  }
 0x239   :  { %4709 = vmatmul.mubr.bf16.vlgmr.msra.gmra.mrb[12].mxu0 %v9720_v27  ;;  %4967 = vmatmul.mubr.bf16.vlgmr.msra.gmra.mrb[12].mxu1 %v9720_v27  ;;  %v8610_v37 = vld [vmem:[#allocation8 + $0xc94] ss:$24 sps:$4 sm:$0xff]  }
 0x23a   :  { %4720 = vmatpush1.bf16.msra.mxu0 %v8494_v49  ;;  %4978 = vmatpush1.bf16.msra.mxu1 %v8497_v50  ;;  %v8548_v49 = vld [vmem:[#allocation8 + $0xab0] ss:$24 sps:$4 sm:$0xff]  }
 0x23b   :  { %4721 = vmatprep.subr.bf16.mxu0 %v8502_v51  ;;  %4979 = vmatprep.subr.bf16.mxu1 %v8505_v53  ;;  %v8551_v50 = vld [vmem:[#allocation8 + $0xab8] ss:$24 sps:$4 sm:$0xff]   ;;  %v8556_v51 = vld [vmem:[#allocation8 + $0xae4] ss:$24 sps:$4 sm:$0xff]  }
 0x23c   :  { %4751 = vmatprep.mubr.bf16.mxu0 %v9734_v16  ;;  %5009 = vmatprep.mubr.bf16.mxu1 %v9734_v16  ;;  %v8559_v53 = vld [vmem:[#allocation8 + $0xaec] ss:$24 sps:$4 sm:$0xff]  }
 0x23e   :  { %4722 = vmatpush1.bf16.msra.mxu0 %v8500_v54  ;;  %4980 = vmatpush1.bf16.msra.mxu1 %v8503_v55  ;;  %v8554_v54 = vld [vmem:[#allocation8 + $0xae0] ss:$24 sps:$4 sm:$0xff]  }
 0x23f   :  { %4723 = vmatprep.subr.bf16.mxu0 %v8508_v56  ;;  %4981 = vmatprep.subr.bf16.mxu1 %v8511_v57  ;;  %v8557_v55 = vld [vmem:[#allocation8 + $0xae8] ss:$24 sps:$4 sm:$0xff]   ;;  %v8562_v56 = vld [vmem:[#allocation8 + $0xb14] ss:$24 sps:$4 sm:$0xff]  }
 0x240   :  { %v8565_v57 = vld [vmem:[#allocation8 + $0xb1c] ss:$24 sps:$4 sm:$0xff]  }
 0x242   :  { %4724 = vmatpush1.bf16.msra.mxu0 %v8506_v58  ;;  %4982 = vmatpush1.bf16.msra.mxu1 %v8509_v62  ;;  %v8560_v58 = vld [vmem:[#allocation8 + $0xb10] ss:$24 sps:$4 sm:$0xff]  }
 0x243   :  { %4725 = vmatprep.subr.bf16.mxu0 %v8514_v0  ;;  %4983 = vmatprep.subr.bf16.mxu1 %v8517_v1  ;;  %v8563_v62 = vld [vmem:[#allocation8 + $0xb18] ss:$24 sps:$4 sm:$0xff]   ;;  %v8568_v0 = vld [vmem:[#allocation8 + $0xb44] ss:$24 sps:$4 sm:$0xff]  }
 0x244   :  { %v8571_v1 = vld [vmem:[#allocation8 + $0xb4c] ss:$24 sps:$4 sm:$0xff]  }
 0x246   :  { %4726 = vmatpush1.bf16.msra.mxu0 %v8512_v3  ;;  %4984 = vmatpush1.bf16.msra.mxu1 %v8515_v40  ;;  %v8566_v3 = vld [vmem:[#allocation8 + $0xb40] ss:$24 sps:$4 sm:$0xff]  }
 0x247   :  { %4727 = vmatprep.subr.bf16.mxu0 %v8520_v5  ;;  %4985 = vmatprep.subr.bf16.mxu1 %v8523_v6  ;;  %v8569_v40 = vld [vmem:[#allocation8 + $0xb48] ss:$24 sps:$4 sm:$0xff]   ;;  %v8574_v5 = vld [vmem:[#allocation8 + $0xb74] ss:$24 sps:$4 sm:$0xff]  }
 0x248   :  { %v8577_v6 = vld [vmem:[#allocation8 + $0xb7c] ss:$24 sps:$4 sm:$0xff]  }
 0x24a   :  { %4728 = vmatpush1.bf16.msra.mxu0 %v8518_v7  ;;  %4986 = vmatpush1.bf16.msra.mxu1 %v8521_v8  ;;  %v8572_v7 = vld [vmem:[#allocation8 + $0xb70] ss:$24 sps:$4 sm:$0xff]  }
 0x24b   :  { %4729 = vmatprep.subr.bf16.mxu0 %v8526_v9  ;;  %4987 = vmatprep.subr.bf16.mxu1 %v8529_v10  ;;  %v8575_v8 = vld [vmem:[#allocation8 + $0xb78] ss:$24 sps:$4 sm:$0xff]   ;;  %v8580_v9 = vld [vmem:[#allocation8 + $0xba4] ss:$24 sps:$4 sm:$0xff]  }
 0x24c   :  { %v8583_v10 = vld [vmem:[#allocation8 + $0xbac] ss:$24 sps:$4 sm:$0xff]  }
 0x24e   :  { %4730 = vmatpush1.bf16.msra.mxu0 %v8524_v11  ;;  %4988 = vmatpush1.bf16.msra.mxu1 %v8527_v12  ;;  %v8578_v11 = vld [vmem:[#allocation8 + $0xba0] ss:$24 sps:$4 sm:$0xff]  }
 0x24f   :  { %4731 = vmatprep.subr.bf16.mxu0 %v8532_v15  ;;  %4989 = vmatprep.subr.bf16.mxu1 %v8535_v18  ;;  %v8581_v12 = vld [vmem:[#allocation8 + $0xba8] ss:$24 sps:$4 sm:$0xff]   ;;  %v8586_v15 = vld [vmem:[#allocation8 + $0xbd4] ss:$24 sps:$4 sm:$0xff]  }
 0x250   :  { %v8589_v18 = vld [vmem:[#allocation8 + $0xbdc] ss:$24 sps:$4 sm:$0xff]  }
 0x252   :  { %4732 = vmatpush1.bf16.msra.mxu0 %v8530_v19  ;;  %4990 = vmatpush1.bf16.msra.mxu1 %v8533_v20  ;;  %v8584_v19 = vld [vmem:[#allocation8 + $0xbd0] ss:$24 sps:$4 sm:$0xff]  }
 0x253   :  { %4733 = vmatprep.subr.bf16.mxu0 %v8538_v25  ;;  %4991 = vmatprep.subr.bf16.mxu1 %v8541_v26  ;;  %v8587_v20 = vld [vmem:[#allocation8 + $0xbd8] ss:$24 sps:$4 sm:$0xff]   ;;  %v8598_v25 = vld [vmem:[#allocation8 + $0xc34] ss:$24 sps:$4 sm:$0xff]  }
 0x254   :  { %v8601_v26 = vld [vmem:[#allocation8 + $0xc3c] ss:$24 sps:$4 sm:$0xff]  }
 0x256   :  { %4734 = vmatpush1.bf16.msra.mxu0 %v8536_v29  ;;  %4992 = vmatpush1.bf16.msra.mxu1 %v8539_v31  ;;  %v8599_v29 = vld [vmem:[#allocation8 + $0xc38] ss:$24 sps:$4 sm:$0xff]   ;;  %v8604_v31 = vld [vmem:[#allocation8 + $0xc64] ss:$24 sps:$4 sm:$0xff]  }
 0x257   :  { %4735 = vmatprep.subr.bf16.mxu0 %v8544_v45  ;;  %4993 = vmatprep.subr.bf16.mxu1 %v8547_v38  ;;  %v8613_v45 = vld [vmem:[#allocation8 + $0xc9c] ss:$24 sps:$4 sm:$0xff]   ;;  %v8608_v38 = vld [vmem:[#allocation8 + $0xc90] ss:$24 sps:$4 sm:$0xff]  }
 0x25a   :  { %4736 = vmatpush1.bf16.msra.mxu0 %v8542_v43  ;;  %4994 = vmatpush1.bf16.msra.mxu1 %v8545_v44  ;;  %v8611_v43 = vld [vmem:[#allocation8 + $0xc98] ss:$24 sps:$4 sm:$0xff]   ;;  %v8616_v44 = vld [vmem:[#allocation8 + $0xcc4] ss:$24 sps:$4 sm:$0xff]  }
 0x25b   :  { %4737 = vmatprep.subr.bf16.mxu0 %v8550_v47  ;;  %4995 = vmatprep.subr.bf16.mxu1 %v8553_v48  ;;  %v8619_v47 = vld [vmem:[#allocation8 + $0xccc] ss:$24 sps:$4 sm:$0xff]   ;;  %v8614_v48 = vld [vmem:[#allocation8 + $0xcc0] ss:$24 sps:$4 sm:$0xff]  }
 0x25e   :  { %4738 = vmatpush1.bf16.msra.mxu0 %v8548_v49  ;;  %4996 = vmatpush1.bf16.msra.mxu1 %v8551_v50  ;;  %v8617_v49 = vld [vmem:[#allocation8 + $0xcc8] ss:$24 sps:$4 sm:$0xff]   ;;  %v8622_v50 = vld [vmem:[#allocation8 + $0xcf4] ss:$24 sps:$4 sm:$0xff]  }
 0x25f   :  { %4739 = vmatprep.subr.bf16.mxu0 %v8556_v51  ;;  %4997 = vmatprep.subr.bf16.mxu1 %v8559_v53  ;;  %v8625_v51 = vld [vmem:[#allocation8 + $0xcfc] ss:$24 sps:$4 sm:$0xff]   ;;  %v8620_v53 = vld [vmem:[#allocation8 + $0xcf0] ss:$24 sps:$4 sm:$0xff]  }
 0x262   :  { %4740 = vmatpush1.bf16.msra.mxu0 %v8554_v54  ;;  %4998 = vmatpush1.bf16.msra.mxu1 %v8557_v55  ;;  %v8623_v54 = vld [vmem:[#allocation8 + $0xcf8] ss:$24 sps:$4 sm:$0xff]   ;;  %v8628_v55 = vld [vmem:[#allocation8 + $0xd24] ss:$24 sps:$4 sm:$0xff]  }
 0x263   :  { %4741 = vmatprep.subr.bf16.mxu0 %v8562_v56  ;;  %4999 = vmatprep.subr.bf16.mxu1 %v8565_v57  ;;  %v8631_v56 = vld [vmem:[#allocation8 + $0xd2c] ss:$24 sps:$4 sm:$0xff]   ;;  %v8626_v57 = vld [vmem:[#allocation8 + $0xd20] ss:$24 sps:$4 sm:$0xff]  }
 0x266   :  { %4742 = vmatpush1.bf16.msra.mxu0 %v8560_v58  ;;  %5000 = vmatpush1.bf16.msra.mxu1 %v8563_v62  ;;  %v8629_v58 = vld [vmem:[#allocation8 + $0xd28] ss:$24 sps:$4 sm:$0xff]   ;;  %v8634_v62 = vld [vmem:[#allocation8 + $0xd54] ss:$24 sps:$4 sm:$0xff]  }
 0x267   :  { %4743 = vmatprep.subr.bf16.mxu0 %v8568_v0  ;;  %5001 = vmatprep.subr.bf16.mxu1 %v8571_v1  ;;  %v8637_v0 = vld [vmem:[#allocation8 + $0xd5c] ss:$24 sps:$4 sm:$0xff]   ;;  %v8632_v1 = vld [vmem:[#allocation8 + $0xd50] ss:$24 sps:$4 sm:$0xff]  }
 0x26a   :  { %4744 = vmatpush1.bf16.msra.mxu0 %v8566_v3  ;;  %5002 = vmatpush1.bf16.msra.mxu1 %v8569_v40  ;;  %v8635_v3 = vld [vmem:[#allocation8 + $0xd58] ss:$24 sps:$4 sm:$0xff]   ;;  %v8640_v40 = vld [vmem:[#allocation8 + $0xd84] ss:$24 sps:$4 sm:$0xff]  }
 0x26b   :  { %4745 = vmatprep.subr.bf16.mxu0 %v8574_v5  ;;  %5003 = vmatprep.subr.bf16.mxu1 %v8577_v6  ;;  %v8643_v5 = vld [vmem:[#allocation8 + $0xd8c] ss:$24 sps:$4 sm:$0xff]   ;;  %v8638_v6 = vld [vmem:[#allocation8 + $0xd80] ss:$24 sps:$4 sm:$0xff]  }
 0x26e   :  { %4746 = vmatpush1.bf16.msra.mxu0 %v8572_v7  ;;  %5004 = vmatpush1.bf16.msra.mxu1 %v8575_v8  ;;  %v8641_v7 = vld [vmem:[#allocation8 + $0xd88] ss:$24 sps:$4 sm:$0xff]   ;;  %v8646_v8 = vld [vmem:[#allocation8 + $0xdb4] ss:$24 sps:$4 sm:$0xff]  }
 0x26f   :  { %4747 = vmatprep.subr.bf16.mxu0 %v8580_v9  ;;  %5005 = vmatprep.subr.bf16.mxu1 %v8583_v10  ;;  %v8649_v9 = vld [vmem:[#allocation8 + $0xdbc] ss:$24 sps:$4 sm:$0xff]   ;;  %v8644_v10 = vld [vmem:[#allocation8 + $0xdb0] ss:$24 sps:$4 sm:$0xff]  }
 0x272   :  { %4748 = vmatpush1.bf16.msra.mxu0 %v8578_v11  ;;  %5006 = vmatpush1.bf16.msra.mxu1 %v8581_v12  ;;  %v8647_v11 = vld [vmem:[#allocation8 + $0xdb8] ss:$24 sps:$4 sm:$0xff]   ;;  %v8652_v12 = vld [vmem:[#allocation8 + $0xde4] ss:$24 sps:$4 sm:$0xff]  }
 0x273   :  { %4749 = vmatprep.subr.bf16.mxu0 %v8586_v15  ;;  %5007 = vmatprep.subr.bf16.mxu1 %v8589_v18  ;;  %v8655_v15 = vld [vmem:[#allocation8 + $0xdec] ss:$24 sps:$4 sm:$0xff]   ;;  %v8650_v18 = vld [vmem:[#allocation8 + $0xde0] ss:$24 sps:$4 sm:$0xff]  }
 0x276   :  { %4750 = vmatpush1.bf16.msra.mxu0 %v8584_v19  ;;  %5008 = vmatpush1.bf16.msra.mxu1 %v8587_v20  ;;  %v8653_v19 = vld [vmem:[#allocation8 + $0xde8] ss:$24 sps:$4 sm:$0xff]   ;;  %v8658_v20 = vld [vmem:[#allocation8 + $0xe14] ss:$24 sps:$4 sm:$0xff]  }
 0x277   :  { %4762 = vmatprep.subr.bf16.mxu0 %v8592_v21  ;;  %5020 = vmatprep.subr.bf16.mxu1 %v8595_v22  ;;  %v8661_v21 = vld [vmem:[#allocation8 + $0xe1c] ss:$24 sps:$4 sm:$0xff]   ;;  %v8656_v22 = vld [vmem:[#allocation8 + $0xe10] ss:$24 sps:$4 sm:$0xff]  }
 0x279   :  { %4752 = vmatmul.mubr.bf16.vlgmr.msra.gmra.mrb[12].mxu0 %v9730_v13  ;;  %5010 = vmatmul.mubr.bf16.vlgmr.msra.gmra.mrb[12].mxu1 %v9730_v13 }
 0x27a   :  { %4763 = vmatpush1.bf16.msra.mxu0 %v8590_v23  ;;  %4794 = vmatprep.mubr.bf16.mxu0 %v9744_v17  ;;  %v8659_v23 = vld [vmem:[#allocation8 + $0xe18] ss:$24 sps:$4 sm:$0xff]  }
 0x27b   :  { %5021 = vmatpush1.bf16.msra.mxu1 %v8593_v24  ;;  %5052 = vmatprep.mubr.bf16.mxu1 %v9744_v17  ;;  %v8664_v24 = vld [vmem:[#allocation8 + $0xe44] ss:$24 sps:$4 sm:$0xff]  }
 0x27c   :  { %4764 = vmatprep.subr.bf16.mxu0 %v8598_v25  ;;  %5022 = vmatprep.subr.bf16.mxu1 %v8601_v26  ;;  %v8667_v25 = vld [vmem:[#allocation8 + $0xe4c] ss:$24 sps:$4 sm:$0xff]   ;;  %v8662_v26 = vld [vmem:[#allocation8 + $0xe40] ss:$24 sps:$4 sm:$0xff]  }
 0x27e   :  { %4765 = vmatpush1.bf16.msra.mxu0 %v8596_v28  ;;  %v8665_v28 = vld [vmem:[#allocation8 + $0xe48] ss:$24 sps:$4 sm:$0xff]  }
 0x27f   :  { %5023 = vmatpush1.bf16.msra.mxu1 %v8599_v29  ;;  %4766 = vmatprep.subr.bf16.mxu0 %v8604_v31  ;;  %v8670_v29 = vld [vmem:[#allocation8 + $0xe74] ss:$24 sps:$4 sm:$0xff]  }
 0x280   :  { %5024 = vmatprep.subr.bf16.mxu1 %v8607_v34  ;;  %v8673_v31 = vld [vmem:[#allocation8 + $0xe7c] ss:$24 sps:$4 sm:$0xff]   ;;  %v8668_v34 = vld [vmem:[#allocation8 + $0xe70] ss:$24 sps:$4 sm:$0xff]  }
 0x282   :  { %4767 = vmatpush1.bf16.msra.mxu0 %v8602_v35  ;;  %v8671_v35 = vld [vmem:[#allocation8 + $0xe78] ss:$24 sps:$4 sm:$0xff]  }
 0x283   :  { %5025 = vmatpush1.bf16.msra.mxu1 %v8605_v36  ;;  %4768 = vmatprep.subr.bf16.mxu0 %v8610_v37  ;;  %v8676_v36 = vld [vmem:[#allocation8 + $0xea4] ss:$24 sps:$4 sm:$0xff]  }
 0x284   :  { %5026 = vmatprep.subr.bf16.mxu1 %v8613_v45  ;;  %v8679_v37 = vld [vmem:[#allocation8 + $0xeac] ss:$24 sps:$4 sm:$0xff]   ;;  %v8674_v45 = vld [vmem:[#allocation8 + $0xea0] ss:$24 sps:$4 sm:$0xff]  }
 0x286   :  { %4769 = vmatpush1.bf16.msra.mxu0 %v8608_v38  ;;  %v8677_v38 = vld [vmem:[#allocation8 + $0xea8] ss:$24 sps:$4 sm:$0xff]  }
 0x287   :  { %5027 = vmatpush1.bf16.msra.mxu1 %v8611_v43  ;;  %4770 = vmatprep.subr.bf16.mxu0 %v8616_v44  ;;  %v8682_v43 = vld [vmem:[#allocation8 + $0xed4] ss:$24 sps:$4 sm:$0xff]  }
 0x288   :  { %5028 = vmatprep.subr.bf16.mxu1 %v8619_v47  ;;  %v8685_v44 = vld [vmem:[#allocation8 + $0xedc] ss:$24 sps:$4 sm:$0xff]   ;;  %v8680_v47 = vld [vmem:[#allocation8 + $0xed0] ss:$24 sps:$4 sm:$0xff]  }
 0x28a   :  { %4771 = vmatpush1.bf16.msra.mxu0 %v8614_v48  ;;  %v8683_v48 = vld [vmem:[#allocation8 + $0xed8] ss:$24 sps:$4 sm:$0xff]  }
 0x28b   :  { %5029 = vmatpush1.bf16.msra.mxu1 %v8617_v49  ;;  %4772 = vmatprep.subr.bf16.mxu0 %v8622_v50  ;;  %v8688_v49 = vld [vmem:[#allocation8 + $0xf04] ss:$24 sps:$4 sm:$0xff]  }
 0x28c   :  { %5030 = vmatprep.subr.bf16.mxu1 %v8625_v51  ;;  %v8691_v50 = vld [vmem:[#allocation8 + $0xf0c] ss:$24 sps:$4 sm:$0xff]   ;;  %v8686_v51 = vld [vmem:[#allocation8 + $0xf00] ss:$24 sps:$4 sm:$0xff]  }
 0x28e   :  { %4773 = vmatpush1.bf16.msra.mxu0 %v8620_v53  ;;  %v8689_v53 = vld [vmem:[#allocation8 + $0xf08] ss:$24 sps:$4 sm:$0xff]  }
 0x28f   :  { %5031 = vmatpush1.bf16.msra.mxu1 %v8623_v54  ;;  %4774 = vmatprep.subr.bf16.mxu0 %v8628_v55  ;;  %v8694_v54 = vld [vmem:[#allocation8 + $0xf34] ss:$24 sps:$4 sm:$0xff]  }
 0x290   :  { %5032 = vmatprep.subr.bf16.mxu1 %v8631_v56  ;;  %v8697_v55 = vld [vmem:[#allocation8 + $0xf3c] ss:$24 sps:$4 sm:$0xff]   ;;  %v8692_v56 = vld [vmem:[#allocation8 + $0xf30] ss:$24 sps:$4 sm:$0xff]  }
 0x292   :  { %4775 = vmatpush1.bf16.msra.mxu0 %v8626_v57  ;;  %v8695_v57 = vld [vmem:[#allocation8 + $0xf38] ss:$24 sps:$4 sm:$0xff]  }
 0x293   :  { %5033 = vmatpush1.bf16.msra.mxu1 %v8629_v58  ;;  %4776 = vmatprep.subr.bf16.mxu0 %v8634_v62  ;;  %v8700_v58 = vld [vmem:[#allocation8 + $0xf64] ss:$24 sps:$4 sm:$0xff]  }
 0x294   :  { %5034 = vmatprep.subr.bf16.mxu1 %v8637_v0  ;;  %v8703_v62 = vld [vmem:[#allocation8 + $0xf6c] ss:$24 sps:$4 sm:$0xff]   ;;  %v8698_v0 = vld [vmem:[#allocation8 + $0xf60] ss:$24 sps:$4 sm:$0xff]  }
 0x296   :  { %4777 = vmatpush1.bf16.msra.mxu0 %v8632_v1  ;;  %v8701_v1 = vld [vmem:[#allocation8 + $0xf68] ss:$24 sps:$4 sm:$0xff]  }
 0x297   :  { %5035 = vmatpush1.bf16.msra.mxu1 %v8635_v3  ;;  %4778 = vmatprep.subr.bf16.mxu0 %v8640_v40  ;;  %v8706_v3 = vld [vmem:[#allocation8 + $0xf94] ss:$24 sps:$4 sm:$0xff]  }
 0x298   :  { %5036 = vmatprep.subr.bf16.mxu1 %v8643_v5  ;;  %v8709_v40 = vld [vmem:[#allocation8 + $0xf9c] ss:$24 sps:$4 sm:$0xff]   ;;  %v8704_v5 = vld [vmem:[#allocation8 + $0xf90] ss:$24 sps:$4 sm:$0xff]  }
 0x29a   :  { %4779 = vmatpush1.bf16.msra.mxu0 %v8638_v6  ;;  %v8707_v6 = vld [vmem:[#allocation8 + $0xf98] ss:$24 sps:$4 sm:$0xff]  }
 0x29b   :  { %5037 = vmatpush1.bf16.msra.mxu1 %v8641_v7  ;;  %4780 = vmatprep.subr.bf16.mxu0 %v8646_v8  ;;  %v8712_v7 = vld [vmem:[#allocation8 + $0xfc4] ss:$24 sps:$4 sm:$0xff]  }
 0x29c   :  { %5038 = vmatprep.subr.bf16.mxu1 %v8649_v9  ;;  %v8715_v8 = vld [vmem:[#allocation8 + $0xfcc] ss:$24 sps:$4 sm:$0xff]   ;;  %v8710_v9 = vld [vmem:[#allocation8 + $0xfc0] ss:$24 sps:$4 sm:$0xff]  }
 0x29e   :  { %4781 = vmatpush1.bf16.msra.mxu0 %v8644_v10  ;;  %v8713_v10 = vld [vmem:[#allocation8 + $0xfc8] ss:$24 sps:$4 sm:$0xff]  }
 0x29f   :  { %5039 = vmatpush1.bf16.msra.mxu1 %v8647_v11  ;;  %4782 = vmatprep.subr.bf16.mxu0 %v8652_v12  ;;  %v8718_v11 = vld [vmem:[#allocation8 + $0xff4] ss:$24 sps:$4 sm:$0xff]  }
 0x2a0   :  { %5040 = vmatprep.subr.bf16.mxu1 %v8655_v15  ;;  %v8721_v12 = vld [vmem:[#allocation8 + $0xffc] ss:$24 sps:$4 sm:$0xff]   ;;  %v8716_v15 = vld [vmem:[#allocation8 + $0xff0] ss:$24 sps:$4 sm:$0xff]  }
 0x2a2   :  { %4783 = vmatpush1.bf16.msra.mxu0 %v8650_v18  ;;  %v8719_v18 = vld [vmem:[#allocation8 + $0xff8] ss:$24 sps:$4 sm:$0xff]  }
 0x2a3   :  { %5041 = vmatpush1.bf16.msra.mxu1 %v8653_v19  ;;  %4784 = vmatprep.subr.bf16.mxu0 %v8658_v20  ;;  %v8724_v19 = vld [vmem:[#allocation8 + $0x1024] ss:$24 sps:$4 sm:$0xff]  }
 0x2a4   :  { %5042 = vmatprep.subr.bf16.mxu1 %v8661_v21  ;;  %v8727_v20 = vld [vmem:[#allocation8 + $0x102c] ss:$24 sps:$4 sm:$0xff]   ;;  %v8722_v21 = vld [vmem:[#allocation8 + $0x1020] ss:$24 sps:$4 sm:$0xff]  }
 0x2a6   :  { %4785 = vmatpush1.bf16.msra.mxu0 %v8656_v22  ;;  %v8725_v22 = vld [vmem:[#allocation8 + $0x1028] ss:$24 sps:$4 sm:$0xff]  }
 0x2a7   :  { %5043 = vmatpush1.bf16.msra.mxu1 %v8659_v23  ;;  %4786 = vmatprep.subr.bf16.mxu0 %v8664_v24  ;;  %v8730_v23 = vld [vmem:[#allocation8 + $0x1054] ss:$24 sps:$4 sm:$0xff]  }
 0x2a8   :  { %5044 = vmatprep.subr.bf16.mxu1 %v8667_v25  ;;  %v8733_v24 = vld [vmem:[#allocation8 + $0x105c] ss:$24 sps:$4 sm:$0xff]   ;;  %v8728_v25 = vld [vmem:[#allocation8 + $0x1050] ss:$24 sps:$4 sm:$0xff]  }
 0x2aa   :  { %4787 = vmatpush1.bf16.msra.mxu0 %v8662_v26  ;;  %v8731_v26 = vld [vmem:[#allocation8 + $0x1058] ss:$24 sps:$4 sm:$0xff]  }
 0x2ab   :  { %5045 = vmatpush1.bf16.msra.mxu1 %v8665_v28  ;;  %4788 = vmatprep.subr.bf16.mxu0 %v8670_v29  ;;  %v8736_v28 = vld [vmem:[#allocation8 + $0x14] ss:$24 sps:$4 sm:$0xff]   ;;  %v8734_v29 = vld [vmem:[#allocation8 + $0x10] ss:$24 sps:$4 sm:$0xff]  }
 0x2ac   :  { %5046 = vmatprep.subr.bf16.mxu1 %v8673_v31  ;;  %v8739_v31 = vld [vmem:[#allocation8 + $0x44] ss:$24 sps:$4 sm:$0xff]  }
 0x2ae   :  { %4789 = vmatpush1.bf16.msra.mxu0 %v8668_v34  ;;  %v8737_v34 = vld [vmem:[#allocation8 + $0x40] ss:$24 sps:$4 sm:$0xff]  }
 0x2af   :  { %5047 = vmatpush1.bf16.msra.mxu1 %v8671_v35  ;;  %4790 = vmatprep.subr.bf16.mxu0 %v8676_v36  ;;  %v8742_v35 = vld [vmem:[#allocation8 + $0x74] ss:$24 sps:$4 sm:$0xff]   ;;  %v8740_v36 = vld [vmem:[#allocation8 + $0x70] ss:$24 sps:$4 sm:$0xff]  }
 0x2b0   :  { %5048 = vmatprep.subr.bf16.mxu1 %v8679_v37  ;;  %v8745_v37 = vld [vmem:[#allocation8 + $0xa4] ss:$24 sps:$4 sm:$0xff]  }
 0x2b2   :  { %4791 = vmatpush1.bf16.msra.mxu0 %v8674_v45  ;;  %v8743_v45 = vld [vmem:[#allocation8 + $0xa0] ss:$24 sps:$4 sm:$0xff]  }
 0x2b3   :  { %5049 = vmatpush1.bf16.msra.mxu1 %v8677_v38  ;;  %4792 = vmatprep.subr.bf16.mxu0 %v8682_v43  ;;  %v8748_v38 = vld [vmem:[#allocation8 + $0xd4] ss:$24 sps:$4 sm:$0xff]   ;;  %v8746_v43 = vld [vmem:[#allocation8 + $0xd0] ss:$24 sps:$4 sm:$0xff]  }
 0x2b4   :  { %5050 = vmatprep.subr.bf16.mxu1 %v8685_v44  ;;  %v8751_v44 = vld [vmem:[#allocation8 + $0x104] ss:$24 sps:$4 sm:$0xff]  }
 0x2b6   :  { %4793 = vmatpush1.bf16.msra.mxu0 %v8680_v47  ;;  %v8749_v47 = vld [vmem:[#allocation8 + $0x100] ss:$24 sps:$4 sm:$0xff]  }
 0x2b7   :  { %5051 = vmatpush1.bf16.msra.mxu1 %v8683_v48  ;;  %4805 = vmatprep.subr.bf16.mxu0 %v8688_v49  ;;  %v8754_v48 = vld [vmem:[#allocation8 + $0x134] ss:$24 sps:$4 sm:$0xff]   ;;  %v8757_v49 = vld [vmem:[#allocation8 + $0x164] ss:$24 sps:$4 sm:$0xff]  }
 0x2b8   :  { %5063 = vmatprep.subr.bf16.mxu1 %v8691_v50  ;;  %v8755_v50 = vld [vmem:[#allocation8 + $0x160] ss:$24 sps:$4 sm:$0xff]  }
 0x2b9   :  { %4795 = vmatmul.mubr.bf16.vlgmr.msra.gmra.mrb[12].mxu0 %v9742_v14 }
 0x2ba   :  { %5053 = vmatmul.mubr.bf16.vlgmr.msra.gmra.mrb[12].mxu1 %v9742_v14  ;;  %4806 = vmatpush1.bf16.msra.mxu0 %v8686_v51  ;;  %v8760_v51 = vld [vmem:[#allocation8 + $0x194] ss:$24 sps:$4 sm:$0xff]  }
 0x2bb   :  { %5064 = vmatpush1.bf16.msra.mxu1 %v8689_v53  ;;  %4807 = vmatprep.subr.bf16.mxu0 %v8694_v54  ;;  %v8856_v53 = vld [vmem:[#allocation11 + $0x4] ss:$12 sps:$4 sm:$0xff]  }
 0x2bc   :  { %5065 = vmatprep.subr.bf16.mxu1 %v8697_v55  ;;  %4837 = vmatprep.mubr.bf16.mxu0 %v9465_v4  ;;  %v8758_v54 = vld [vmem:[#allocation8 + $0x190] ss:$24 sps:$4 sm:$0xff]  }
 0x2bd   :  { %5095 = vmatprep.mubr.bf16.mxu1 %v9465_v4  ;;  %v8854_v55 = vld [vmem:[#allocation11] ss:$12 sps:$4 sm:$0xff]  }
 0x2be   :  { %4808 = vmatpush1.bf16.msra.mxu0 %v8692_v56  ;;  %v8763_v56 = vld [vmem:[#allocation8 + $0x1c4] ss:$24 sps:$4 sm:$0xff]  }
 0x2bf   :  { %5066 = vmatpush1.bf16.msra.mxu1 %v8695_v57  ;;  %4809 = vmatprep.subr.bf16.mxu0 %v8700_v58  ;;  %v8862_v57 = vld [vmem:[#allocation11 + $0x1c] ss:$12 sps:$4 sm:$0xff]  }
 0x2c0   :  { %5067 = vmatprep.subr.bf16.mxu1 %v8703_v62  ;;  %v8761_v58 = vld [vmem:[#allocation8 + $0x1c0] ss:$24 sps:$4 sm:$0xff]  }
 0x2c1   :  { %v8860_v62 = vld [vmem:[#allocation11 + $0x18] ss:$12 sps:$4 sm:$0xff]  }
 0x2c2   :  { %4810 = vmatpush1.bf16.msra.mxu0 %v8698_v0  ;;  %v8766_v0 = vld [vmem:[#allocation8 + $0x1f4] ss:$24 sps:$4 sm:$0xff]  }
 0x2c3   :  { %5068 = vmatpush1.bf16.msra.mxu1 %v8701_v1  ;;  %4811 = vmatprep.subr.bf16.mxu0 %v8706_v3  ;;  %v8868_v1 = vld [vmem:[#allocation11 + $0x34] ss:$12 sps:$4 sm:$0xff]  }
 0x2c4   :  { %5069 = vmatprep.subr.bf16.mxu1 %v8709_v40  ;;  %v8764_v3 = vld [vmem:[#allocation8 + $0x1f0] ss:$24 sps:$4 sm:$0xff]   ;;  %v8866_v40 = vld [vmem:[#allocation11 + $0x30] ss:$12 sps:$4 sm:$0xff]  }
 0x2c6   :  { %4812 = vmatpush1.bf16.msra.mxu0 %v8704_v5  ;;  %v8769_v5 = vld [vmem:[#allocation8 + $0x224] ss:$24 sps:$4 sm:$0xff]  }
 0x2c7   :  { %5070 = vmatpush1.bf16.msra.mxu1 %v8707_v6  ;;  %4813 = vmatprep.subr.bf16.mxu0 %v8712_v7  ;;  %v8874_v6 = vld [vmem:[#allocation11 + $0x4c] ss:$12 sps:$4 sm:$0xff]  }
 0x2c8   :  { %5071 = vmatprep.subr.bf16.mxu1 %v8715_v8  ;;  %v8767_v7 = vld [vmem:[#allocation8 + $0x220] ss:$24 sps:$4 sm:$0xff]  }
 0x2c9   :  { %v8872_v8 = vld [vmem:[#allocation11 + $0x48] ss:$12 sps:$4 sm:$0xff]  }
 0x2ca   :  { %4814 = vmatpush1.bf16.msra.mxu0 %v8710_v9  ;;  %v8772_v9 = vld [vmem:[#allocation8 + $0x254] ss:$24 sps:$4 sm:$0xff]  }
 0x2cb   :  { %5072 = vmatpush1.bf16.msra.mxu1 %v8713_v10  ;;  %4815 = vmatprep.subr.bf16.mxu0 %v8718_v11  ;;  %v8880_v10 = vld [vmem:[#allocation11 + $0x64] ss:$12 sps:$4 sm:$0xff]  }
 0x2cc   :  { %5073 = vmatprep.subr.bf16.mxu1 %v8721_v12  ;;  %v8770_v11 = vld [vmem:[#allocation8 + $0x250] ss:$24 sps:$4 sm:$0xff]  }
 0x2cd   :  { %v8878_v12 = vld [vmem:[#allocation11 + $0x60] ss:$12 sps:$4 sm:$0xff]  }
 0x2ce   :  { %4816 = vmatpush1.bf16.msra.mxu0 %v8716_v15  ;;  %v8775_v15 = vld [vmem:[#allocation8 + $0x284] ss:$24 sps:$4 sm:$0xff]  }
 0x2cf   :  { %5074 = vmatpush1.bf16.msra.mxu1 %v8719_v18  ;;  %4817 = vmatprep.subr.bf16.mxu0 %v8724_v19  ;;  %v8886_v18 = vld [vmem:[#allocation11 + $0x7c] ss:$12 sps:$4 sm:$0xff]  }
 0x2d0   :  { %5075 = vmatprep.subr.bf16.mxu1 %v8727_v20  ;;  %v8773_v19 = vld [vmem:[#allocation8 + $0x280] ss:$24 sps:$4 sm:$0xff]  }
 0x2d1   :  { %v8884_v20 = vld [vmem:[#allocation11 + $0x78] ss:$12 sps:$4 sm:$0xff]  }
 0x2d2   :  { %4818 = vmatpush1.bf16.msra.mxu0 %v8722_v21  ;;  %v8778_v21 = vld [vmem:[#allocation8 + $0x2b4] ss:$24 sps:$4 sm:$0xff]  }
 0x2d3   :  { %5076 = vmatpush1.bf16.msra.mxu1 %v8725_v22  ;;  %4819 = vmatprep.subr.bf16.mxu0 %v8730_v23  ;;  %v8892_v22 = vld [vmem:[#allocation11 + $0x94] ss:$12 sps:$4 sm:$0xff]  }
 0x2d4   :  { %5077 = vmatprep.subr.bf16.mxu1 %v8733_v24  ;;  %v8776_v23 = vld [vmem:[#allocation8 + $0x2b0] ss:$24 sps:$4 sm:$0xff]   ;;  %v8890_v24 = vld [vmem:[#allocation11 + $0x90] ss:$12 sps:$4 sm:$0xff]  }
 0x2d6   :  { %4820 = vmatpush1.bf16.msra.mxu0 %v8728_v25  ;;  %v8781_v25 = vld [vmem:[#allocation8 + $0x2e4] ss:$24 sps:$4 sm:$0xff]  }
 0x2d7   :  { %5078 = vmatpush1.bf16.msra.mxu1 %v8731_v26  ;;  %5106 = vmatprep.subr.bf16.mxu0 %v8736_v28  ;;  %v8898_v26 = vld [vmem:[#allocation11 + $0xac] ss:$12 sps:$4 sm:$0xff]  }
 0x2d8   :  { %6359 = vmatprep.subr.bf16.mxu1 %v8856_v53  ;;  %v8779_v28 = vld [vmem:[#allocation8 + $0x2e0] ss:$24 sps:$4 sm:$0xff]  }
 0x2d9   :  { %4838 = vmatmul.mubr.bf16.vlgmr.msra.gmra.mrb[12].mxu0 %v9752_v46  ;;  %v8928_v53 = vld [vmem:[#allocation11 + $0x124] ss:$12 sps:$4 sm:$0xff]  }
 0x2da   :  { %5096 = vmatmul.mubr.bf16.vlgmr.msra.gmra.mrb[12].mxu1 %v9752_v46  ;;  %5107 = vmatpush1.bf16.msra.mxu0 %v8734_v29  ;;  %v8896_v29 = vld [vmem:[#allocation11 + $0xa8] ss:$12 sps:$4 sm:$0xff]  }
 0x2db   :  { %5138 = vmatprep.mubr.bf16.mxu0 %v9691_v52  ;;  %5108 = vmatprep.subr.bf16.mxu0 %v8739_v31  ;;  %v8752_v52 = vld [vmem:[#allocation8 + $0x130] ss:$24 sps:$4 sm:$0xff]   ;;  %v8784_v31 = vld [vmem:[#allocation8 + $0x314] ss:$24 sps:$4 sm:$0xff]  }
 0x2dc   :  { %6360 = vmatpush1.bf16.msra.mxu1 %v8854_v55  ;;  %v8926_v55 = vld [vmem:[#allocation11 + $0x120] ss:$12 sps:$4 sm:$0xff]  }
 0x2dd   :  { %6361 = vmatprep.subr.bf16.mxu1 %v8862_v57  ;;  %v8934_v57 = vld [vmem:[#allocation11 + $0x13c] ss:$12 sps:$4 sm:$0xff]  }
 0x2de   :  { %5109 = vmatpush1.bf16.msra.mxu0 %v8737_v34  ;;  %v8904_v34 = vld [vmem:[#allocation11 + $0xc4] ss:$12 sps:$4 sm:$0xff]  }
 0x2df   :  { %5110 = vmatprep.subr.bf16.mxu0 %v8742_v35  ;;  %v8782_v35 = vld [vmem:[#allocation8 + $0x310] ss:$24 sps:$4 sm:$0xff]  }
 0x2e0   :  { %6362 = vmatpush1.bf16.msra.mxu1 %v8860_v62  ;;  %v8932_v62 = vld [vmem:[#allocation11 + $0x138] ss:$12 sps:$4 sm:$0xff]  }
 0x2e1   :  { %6363 = vmatprep.subr.bf16.mxu1 %v8868_v1  ;;  %v8940_v1 = vld [vmem:[#allocation11 + $0x154] ss:$12 sps:$4 sm:$0xff]  }
 0x2e2   :  { %5111 = vmatpush1.bf16.msra.mxu0 %v8740_v36  ;;  %v8902_v36 = vld [vmem:[#allocation11 + $0xc0] ss:$12 sps:$4 sm:$0xff]  }
 0x2e3   :  { %5112 = vmatprep.subr.bf16.mxu0 %v8745_v37  ;;  %v8787_v37 = vld [vmem:[#allocation8 + $0x344] ss:$24 sps:$4 sm:$0xff]  }
 0x2e4   :  { %6364 = vmatpush1.bf16.msra.mxu1 %v8866_v40  ;;  %v8938_v40 = vld [vmem:[#allocation11 + $0x150] ss:$12 sps:$4 sm:$0xff]  }
 0x2e5   :  { %6365 = vmatprep.subr.bf16.mxu1 %v8874_v6  ;;  %v8946_v6 = vld [vmem:[#allocation11 + $0x16c] ss:$12 sps:$4 sm:$0xff]  }
 0x2e6   :  { %5113 = vmatpush1.bf16.msra.mxu0 %v8743_v45  ;;  %v8910_v45 = vld [vmem:[#allocation11 + $0xdc] ss:$12 sps:$4 sm:$0xff]  }
 0x2e7   :  { %5114 = vmatprep.subr.bf16.mxu0 %v8748_v38  ;;  %v8785_v38 = vld [vmem:[#allocation8 + $0x340] ss:$24 sps:$4 sm:$0xff]  }
 0x2e8   :  { %6366 = vmatpush1.bf16.msra.mxu1 %v8872_v8  ;;  %v8944_v8 = vld [vmem:[#allocation11 + $0x168] ss:$12 sps:$4 sm:$0xff]  }
 0x2e9   :  { %6367 = vmatprep.subr.bf16.mxu1 %v8880_v10  ;;  %v8952_v10 = vld [vmem:[#allocation11 + $0x184] ss:$12 sps:$4 sm:$0xff]  }
 0x2ea   :  { %5115 = vmatpush1.bf16.msra.mxu0 %v8746_v43  ;;  %v8908_v43 = vld [vmem:[#allocation11 + $0xd8] ss:$12 sps:$4 sm:$0xff]  }
 0x2eb   :  { %5116 = vmatprep.subr.bf16.mxu0 %v8751_v44  ;;  %v8790_v44 = vld [vmem:[#allocation8 + $0x374] ss:$24 sps:$4 sm:$0xff]  }
 0x2ec   :  { %6368 = vmatpush1.bf16.msra.mxu1 %v8878_v12  ;;  %v8811_v12 = vld [vmem:[#allocation8 + $0x4c4] ss:$24 sps:$4 sm:$0xff]  }
 0x2ed   :  { %6369 = vmatprep.subr.bf16.mxu1 %v8886_v18  ;;  %v8814_v18 = vld [vmem:[#allocation8 + $0x4f4] ss:$24 sps:$4 sm:$0xff]  }
 0x2ee   :  { %5117 = vmatpush1.bf16.msra.mxu0 %v8749_v47  ;;  %v8916_v47 = vld [vmem:[#allocation11 + $0xf4] ss:$12 sps:$4 sm:$0xff]  }
 0x2ef   :  { %5118 = vmatprep.subr.bf16.mxu0 %v8754_v48  ;;  %v8788_v48 = vld [vmem:[#allocation8 + $0x370] ss:$24 sps:$4 sm:$0xff]  }
 0x2f0   :  { %6370 = vmatpush1.bf16.msra.mxu1 %v8884_v20  ;;  %v8817_v20 = vld [vmem:[#allocation8 + $0x524] ss:$24 sps:$4 sm:$0xff]  }
 0x2f1   :  { %6371 = vmatprep.subr.bf16.mxu1 %v8892_v22  ;;  %v8820_v22 = vld [vmem:[#allocation8 + $0x554] ss:$24 sps:$4 sm:$0xff]  }
 0x2f2   :  { %5119 = vmatpush1.bf16.msra.mxu0 %v8752_v52  ;;  %v8914_v52 = vld [vmem:[#allocation11 + $0xf0] ss:$12 sps:$4 sm:$0xff]  }
 0x2f3   :  { %5120 = vmatprep.subr.bf16.mxu0 %v8757_v49  ;;  %v8793_v49 = vld [vmem:[#allocation8 + $0x3a4] ss:$24 sps:$4 sm:$0xff]  }
 0x2f4   :  { %6372 = vmatpush1.bf16.msra.mxu1 %v8890_v24  ;;  %v8823_v24 = vld [vmem:[#allocation8 + $0x584] ss:$24 sps:$4 sm:$0xff]  }
 0x2f5   :  { %6373 = vmatprep.subr.bf16.mxu1 %v8898_v26  ;;  %v8826_v26 = vld [vmem:[#allocation8 + $0x5b4] ss:$24 sps:$4 sm:$0xff]  }
 0x2f6   :  { %5121 = vmatpush1.bf16.msra.mxu0 %v8755_v50  ;;  %v8922_v50 = vld [vmem:[#allocation11 + $0x10c] ss:$12 sps:$4 sm:$0xff]  }
 0x2f7   :  { %5122 = vmatprep.subr.bf16.mxu0 %v8760_v51  ;;  %v8920_v51 = vld [vmem:[#allocation11 + $0x108] ss:$12 sps:$4 sm:$0xff]  }
 0x2f8   :  { %6374 = vmatpush1.bf16.msra.mxu1 %v8896_v29  ;;  %v8829_v29 = vld [vmem:[#allocation8 + $0x5e4] ss:$24 sps:$4 sm:$0xff]  }
 0x2f9   :  { %6375 = vmatprep.subr.bf16.mxu1 %v8904_v34  ;;  %v8832_v34 = vld [vmem:[#allocation8 + $0x614] ss:$24 sps:$4 sm:$0xff]  }
 0x2fa   :  { %5123 = vmatpush1.bf16.msra.mxu0 %v8758_v54  ;;  %v8794_v54 = vld [vmem:[#allocation8 + $0x3d0] ss:$24 sps:$4 sm:$0xff]  }
 0x2fb   :  { %5124 = vmatprep.subr.bf16.mxu0 %v8763_v56  ;;  %v8799_v56 = vld [vmem:[#allocation8 + $0x404] ss:$24 sps:$4 sm:$0xff]  }
 0x2fc   :  { %6376 = vmatpush1.bf16.msra.mxu1 %v8902_v36  ;;  %v8835_v36 = vld [vmem:[#allocation8 + $0x644] ss:$24 sps:$4 sm:$0xff]  }
 0x2fd   :  { %6377 = vmatprep.subr.bf16.mxu1 %v8910_v45  ;;  %v8838_v45 = vld [vmem:[#allocation8 + $0x674] ss:$24 sps:$4 sm:$0xff]  }
 0x2fe   :  { %5125 = vmatpush1.bf16.msra.mxu0 %v8761_v58  ;;  %v8797_v58 = vld [vmem:[#allocation8 + $0x400] ss:$24 sps:$4 sm:$0xff]  }
 0x2ff   :  { %5126 = vmatprep.subr.bf16.mxu0 %v8766_v0  ;;  %v8802_v0 = vld [vmem:[#allocation8 + $0x434] ss:$24 sps:$4 sm:$0xff]  }
 0x300   :  { %6378 = vmatpush1.bf16.msra.mxu1 %v8908_v43  ;;  %v8841_v43 = vld [vmem:[#allocation8 + $0x6a4] ss:$24 sps:$4 sm:$0xff]  }
 0x301   :  { %6379 = vmatprep.subr.bf16.mxu1 %v8916_v47  ;;  %v8844_v47 = vld [vmem:[#allocation8 + $0x6d4] ss:$24 sps:$4 sm:$0xff]  }
 0x302   :  { %5127 = vmatpush1.bf16.msra.mxu0 %v8764_v3  ;;  %v8800_v3 = vld [vmem:[#allocation8 + $0x430] ss:$24 sps:$4 sm:$0xff]  }
 0x303   :  { %5128 = vmatprep.subr.bf16.mxu0 %v8769_v5  ;;  %v8805_v5 = vld [vmem:[#allocation8 + $0x464] ss:$24 sps:$4 sm:$0xff]  }
 0x304   :  { %6380 = vmatpush1.bf16.msra.mxu1 %v8914_v52  ;;  %v8847_v52 = vld [vmem:[#allocation8 + $0x704] ss:$24 sps:$4 sm:$0xff]  }
 0x305   :  { %6381 = vmatprep.subr.bf16.mxu1 %v8922_v50  ;;  %v8853_v50 = vld [vmem:[#allocation8 + $0x764] ss:$24 sps:$4 sm:$0xff]  }
 0x306   :  { %5129 = vmatpush1.bf16.msra.mxu0 %v8767_v7  ;;  %v8803_v7 = vld [vmem:[#allocation8 + $0x460] ss:$24 sps:$4 sm:$0xff]  }
 0x307   :  { %5130 = vmatprep.subr.bf16.mxu0 %v8772_v9  ;;  %v8808_v9 = vld [vmem:[#allocation8 + $0x494] ss:$24 sps:$4 sm:$0xff]  }
 0x308   :  { %6382 = vmatpush1.bf16.msra.mxu1 %v8920_v51  ;;  %v8859_v51 = vld [vmem:[#allocation8 + $0x794] ss:$24 sps:$4 sm:$0xff]  }
 0x309   :  { %6383 = vmatprep.subr.bf16.mxu1 %v8928_v53  ;;  %v8865_v53 = vld [vmem:[#allocation8 + $0x7c4] ss:$24 sps:$4 sm:$0xff]  }
 0x30a   :  { %5131 = vmatpush1.bf16.msra.mxu0 %v8770_v11  ;;  %v8806_v11 = vld [vmem:[#allocation8 + $0x490] ss:$24 sps:$4 sm:$0xff]  }
 0x30b   :  { %5132 = vmatprep.subr.bf16.mxu0 %v8775_v15  ;;  %v8809_v15 = vld [vmem:[#allocation8 + $0x4c0] ss:$24 sps:$4 sm:$0xff]  }
 0x30c   :  { %6384 = vmatpush1.bf16.msra.mxu1 %v8926_v55  ;;  %v8871_v55 = vld [vmem:[#allocation8 + $0x7f4] ss:$24 sps:$4 sm:$0xff]  }
 0x30d   :  { %6385 = vmatprep.subr.bf16.mxu1 %v8934_v57  ;;  %v8877_v57 = vld [vmem:[#allocation8 + $0x824] ss:$24 sps:$4 sm:$0xff]  }
 0x30e   :  { %5133 = vmatpush1.bf16.msra.mxu0 %v8773_v19  ;;  %v8812_v19 = vld [vmem:[#allocation8 + $0x4f0] ss:$24 sps:$4 sm:$0xff]  }
 0x30f   :  { %5134 = vmatprep.subr.bf16.mxu0 %v8778_v21  ;;  %v8815_v21 = vld [vmem:[#allocation8 + $0x520] ss:$24 sps:$4 sm:$0xff]  }
 0x310   :  { %6386 = vmatpush1.bf16.msra.mxu1 %v8932_v62  ;;  %v8883_v62 = vld [vmem:[#allocation8 + $0x854] ss:$24 sps:$4 sm:$0xff]  }
 0x311   :  { %6387 = vmatprep.subr.bf16.mxu1 %v8940_v1  ;;  %v8889_v1 = vld [vmem:[#allocation8 + $0x884] ss:$24 sps:$4 sm:$0xff]  }
 0x312   :  { %5135 = vmatpush1.bf16.msra.mxu0 %v8776_v23  ;;  %v8818_v23 = vld [vmem:[#allocation8 + $0x550] ss:$24 sps:$4 sm:$0xff]  }
 0x313   :  { %5136 = vmatprep.subr.bf16.mxu0 %v8781_v25  ;;  %v8821_v25 = vld [vmem:[#allocation8 + $0x580] ss:$24 sps:$4 sm:$0xff]  }
 0x314   :  { %6388 = vmatpush1.bf16.msra.mxu1 %v8938_v40  ;;  %v8895_v40 = vld [vmem:[#allocation8 + $0x8b4] ss:$24 sps:$4 sm:$0xff]  }
 0x315   :  { %6389 = vmatprep.subr.bf16.mxu1 %v8946_v6  ;;  %v8901_v6 = vld [vmem:[#allocation8 + $0x8e4] ss:$24 sps:$4 sm:$0xff]  }
 0x316   :  { %5137 = vmatpush1.bf16.msra.mxu0 %v8779_v28  ;;  %v8824_v28 = vld [vmem:[#allocation8 + $0x5b0] ss:$24 sps:$4 sm:$0xff]  }
 0x317   :  { %5149 = vmatprep.subr.bf16.mxu0 %v8784_v31  ;;  %v8827_v31 = vld [vmem:[#allocation8 + $0x5e0] ss:$24 sps:$4 sm:$0xff]  }
 0x318   :  { %6390 = vmatpush1.bf16.msra.mxu1 %v8944_v8  ;;  %v8907_v8 = vld [vmem:[#allocation8 + $0x914] ss:$24 sps:$4 sm:$0xff]  }
 0x319   :  { %5139 = vmatmul.mubr.bf16.vlgmr.msra.gmra.mrb[16].mxu0 %v9689_v60  ;;  %v8791_v60 = vld [vmem:[#allocation8 + $0x3a0] ss:$24 sps:$4 sm:$0xff]   ;;  %6402 = vmatprep.subr.bf16.mxu1 %v8952_v10  ;;  %v8913_v10 = vld [vmem:[#allocation8 + $0x944] ss:$24 sps:$4 sm:$0xff]  }
 0x31a   :  { %5150 = vmatpush1.bf16.msra.mxu0 %v8782_v35  ;;  %5181 = vmatprep.mubr.bf16.mxu0 %v9708_v33  ;;  %v8796_v33 = vld [vmem:[#allocation8 + $0x3d4] ss:$24 sps:$4 sm:$0xff]   ;;  %v8830_v35 = vld [vmem:[#allocation8 + $0x610] ss:$24 sps:$4 sm:$0xff]  }
 0x31b   :  { %5151 = vmatprep.subr.bf16.mxu0 %v8787_v37  ;;  %v8833_v37 = vld [vmem:[#allocation8 + $0x640] ss:$24 sps:$4 sm:$0xff]  }
 0x31e   :  { %5152 = vmatpush1.bf16.msra.mxu0 %v8785_v38  ;;  %v8836_v38 = vld [vmem:[#allocation8 + $0x670] ss:$24 sps:$4 sm:$0xff]  }
 0x31f   :  { %5153 = vmatprep.subr.bf16.mxu0 %v8790_v44  ;;  %v8839_v44 = vld [vmem:[#allocation8 + $0x6a0] ss:$24 sps:$4 sm:$0xff]  }
 0x322   :  { %5154 = vmatpush1.bf16.msra.mxu0 %v8788_v48  ;;  %v8842_v48 = vld [vmem:[#allocation8 + $0x6d0] ss:$24 sps:$4 sm:$0xff]  }
 0x323   :  { %5155 = vmatprep.subr.bf16.mxu0 %v8793_v49  ;;  %v8850_v49 = vld [vmem:[#allocation8 + $0x734] ss:$24 sps:$4 sm:$0xff]  }
 0x326   :  { %5156 = vmatpush1.bf16.msra.mxu0 %v8791_v60  ;;  %v8851_v60 = vld [vmem:[#allocation8 + $0x760] ss:$24 sps:$4 sm:$0xff]  }
 0x327   :  { %5157 = vmatprep.subr.bf16.mxu0 %v8796_v33  ;;  %v8857_v33 = vld [vmem:[#allocation8 + $0x790] ss:$24 sps:$4 sm:$0xff]  }
 0x32a   :  { %5158 = vmatpush1.bf16.msra.mxu0 %v8794_v54  ;;  %v8863_v54 = vld [vmem:[#allocation8 + $0x7c0] ss:$24 sps:$4 sm:$0xff]  }
 0x32b   :  { %5159 = vmatprep.subr.bf16.mxu0 %v8799_v56  ;;  %v8869_v56 = vld [vmem:[#allocation8 + $0x7f0] ss:$24 sps:$4 sm:$0xff]  }
 0x32e   :  { %5160 = vmatpush1.bf16.msra.mxu0 %v8797_v58  ;;  %v8875_v58 = vld [vmem:[#allocation8 + $0x820] ss:$24 sps:$4 sm:$0xff]  }
 0x32f   :  { %5161 = vmatprep.subr.bf16.mxu0 %v8802_v0  ;;  %v8881_v0 = vld [vmem:[#allocation8 + $0x850] ss:$24 sps:$4 sm:$0xff]  }
 0x332   :  { %5162 = vmatpush1.bf16.msra.mxu0 %v8800_v3  ;;  %v8887_v3 = vld [vmem:[#allocation8 + $0x880] ss:$24 sps:$4 sm:$0xff]  }
 0x333   :  { %5163 = vmatprep.subr.bf16.mxu0 %v8805_v5  ;;  %v8893_v5 = vld [vmem:[#allocation8 + $0x8b0] ss:$24 sps:$4 sm:$0xff]  }
 0x336   :  { %5164 = vmatpush1.bf16.msra.mxu0 %v8803_v7  ;;  %v8899_v7 = vld [vmem:[#allocation8 + $0x8e0] ss:$24 sps:$4 sm:$0xff]  }
 0x337   :  { %5165 = vmatprep.subr.bf16.mxu0 %v8808_v9  ;;  %v8905_v9 = vld [vmem:[#allocation8 + $0x910] ss:$24 sps:$4 sm:$0xff]  }
 0x33a   :  { %5166 = vmatpush1.bf16.msra.mxu0 %v8806_v11  ;;  %v8911_v11 = vld [vmem:[#allocation8 + $0x940] ss:$24 sps:$4 sm:$0xff]  }
 0x33b   :  { %5167 = vmatprep.subr.bf16.mxu0 %v8811_v12  ;;  %v8919_v12 = vld [vmem:[#allocation8 + $0x974] ss:$24 sps:$4 sm:$0xff]  }
 0x33e   :  { %5168 = vmatpush1.bf16.msra.mxu0 %v8809_v15  ;;  %v8917_v15 = vld [vmem:[#allocation8 + $0x970] ss:$24 sps:$4 sm:$0xff]  }
 0x33f   :  { %5169 = vmatprep.subr.bf16.mxu0 %v8814_v18  ;;  %v8925_v18 = vld [vmem:[#allocation8 + $0x9a4] ss:$24 sps:$4 sm:$0xff]  }
 0x342   :  { %5170 = vmatpush1.bf16.msra.mxu0 %v8812_v19  ;;  %v8923_v19 = vld [vmem:[#allocation8 + $0x9a0] ss:$24 sps:$4 sm:$0xff]  }
 0x343   :  { %5171 = vmatprep.subr.bf16.mxu0 %v8817_v20  ;;  %v8931_v20 = vld [vmem:[#allocation8 + $0x9d4] ss:$24 sps:$4 sm:$0xff]  }
 0x346   :  { %5172 = vmatpush1.bf16.msra.mxu0 %v8815_v21  ;;  %v8929_v21 = vld [vmem:[#allocation8 + $0x9d0] ss:$24 sps:$4 sm:$0xff]  }
 0x347   :  { %5173 = vmatprep.subr.bf16.mxu0 %v8820_v22  ;;  %v9771_v22 = vld [vmem:[#allocation10] sm:$0x3f] }
 0x34a   :  { %5174 = vmatpush1.bf16.msra.mxu0 %v8818_v23  ;;  %v1931_v23 = vrot.slane %v9771_v22, %v9698_v63 }
 0x34b   :  { %5175 = vmatprep.subr.bf16.mxu0 %v8823_v24  ;;  %v1927_v24 = vrot.slane %v9771_v22, %v9683_v42 }
 0x34e   :  { %5176 = vmatpush1.bf16.msra.mxu0 %v8821_v25  ;;  %v8935_v25 = vld [vmem:[#allocation8 + $0xa00] ss:$24 sps:$4 sm:$0xff]  }
 0x34f   :  { %5177 = vmatprep.subr.bf16.mxu0 %v8826_v26  ;;  %v1935_v26 = vrot.slane %v9771_v22, %v322_v2 }
 0x352   :  { %5178 = vmatpush1.bf16.msra.mxu0 %v8824_v28  ;;  %v8943_v28 = vld [vmem:[#allocation8 + $0xa34] ss:$24 sps:$4 sm:$0xff]  }
 0x353   :  { %5179 = vmatprep.subr.bf16.mxu0 %v8829_v29 }
 0x356   :  { %5180 = vmatpush1.bf16.msra.mxu0 %v8827_v31 }
 0x357   :  { %5192 = vmatprep.subr.bf16.mxu0 %v8832_v34 }
 0x359   :  { %5182 = vmatmul.mubr.bf16.vlgmr.msra.gmra.mrb[16].mxu0 %v9706_v32  ;;  %v8845_v32 = vld [vmem:[#allocation8 + $0x700] ss:$24 sps:$4 sm:$0xff]  }
 0x35a   :  { %5193 = vmatpush1.bf16.msra.mxu0 %v8830_v35  ;;  %5224 = vmatprep.mubr.bf16.mxu0 %v9722_v30  ;;  %v8848_v30 = vld [vmem:[#allocation8 + $0x730] ss:$24 sps:$4 sm:$0xff]  }
 0x35b   :  { %5194 = vmatprep.subr.bf16.mxu0 %v8835_v36 }
 0x35e   :  { %5195 = vmatpush1.bf16.msra.mxu0 %v8833_v37 }
 0x35f   :  { %5196 = vmatprep.subr.bf16.mxu0 %v8838_v45 }
 0x362   :  { %5197 = vmatpush1.bf16.msra.mxu0 %v8836_v38 }
 0x363   :  { %5198 = vmatprep.subr.bf16.mxu0 %v8841_v43  ;;  %v8941_v43 = vld [vmem:[#allocation8 + $0xa30] ss:$24 sps:$4 sm:$0xff]  }
 0x366   :  { %5199 = vmatpush1.bf16.msra.mxu0 %v8839_v44 }
 0x367   :  { %5200 = vmatprep.subr.bf16.mxu0 %v8844_v47 }
 0x36a   :  { %5201 = vmatpush1.bf16.msra.mxu0 %v8842_v48 }
 0x36b   :  { %5202 = vmatprep.subr.bf16.mxu0 %v8847_v52 }
 0x36e   :  { %5203 = vmatpush1.bf16.msra.mxu0 %v8845_v32  ;;  %v8949_v32 = vld [vmem:[#allocation8 + $0xa64] ss:$24 sps:$4 sm:$0xff]  }
 0x36f   :  { %5204 = vmatprep.subr.bf16.mxu0 %v8850_v49 }
 0x372   :  { %5205 = vmatpush1.bf16.msra.mxu0 %v8848_v30 }
 0x373   :  { %5206 = vmatprep.subr.bf16.mxu0 %v8853_v50 }
 0x376   :  { %5207 = vmatpush1.bf16.msra.mxu0 %v8851_v60 }
 0x377   :  { %5208 = vmatprep.subr.bf16.mxu0 %v8859_v51 }
 0x37a   :  { %5209 = vmatpush1.bf16.msra.mxu0 %v8857_v33 }
 0x37b   :  { %5210 = vmatprep.subr.bf16.mxu0 %v8865_v53 }
 0x37e   :  { %5211 = vmatpush1.bf16.msra.mxu0 %v8863_v54 }
 0x37f   :  { %5212 = vmatprep.subr.bf16.mxu0 %v8871_v55 }
 0x382   :  { %5213 = vmatpush1.bf16.msra.mxu0 %v8869_v56  ;;  %v8947_v56 = vld [vmem:[#allocation8 + $0xa60] ss:$24 sps:$4 sm:$0xff]  }
 0x383   :  { %5214 = vmatprep.subr.bf16.mxu0 %v8877_v57 }
 0x386   :  { %5215 = vmatpush1.bf16.msra.mxu0 %v8875_v58 }
 0x387   :  { %5216 = vmatprep.subr.bf16.mxu0 %v8883_v62 }
 0x38a   :  { %5217 = vmatpush1.bf16.msra.mxu0 %v8881_v0  ;;  %v8955_v0 = vld [vmem:[#allocation8 + $0xa94] ss:$24 sps:$4 sm:$0xff]  }
 0x38b   :  { %5218 = vmatprep.subr.bf16.mxu0 %v8889_v1 }
 0x38e   :  { %5219 = vmatpush1.bf16.msra.mxu0 %v8887_v3 }
 0x38f   :  { %5220 = vmatprep.subr.bf16.mxu0 %v8895_v40  ;;  %v8950_v40 = vld [vmem:[#allocation11 + $0x180] ss:$12 sps:$4 sm:$0xff]  }
 0x392   :  { %5221 = vmatpush1.bf16.msra.mxu0 %v8893_v5 }
 0x393   :  { %5222 = vmatprep.subr.bf16.mxu0 %v8901_v6  ;;  %v8958_v6 = vld [vmem:[#allocation11 + $0x19c] ss:$12 sps:$4 sm:$0xff]  }
 0x396   :  { %5223 = vmatpush1.bf16.msra.mxu0 %v8899_v7  ;;  %v8953_v7 = vld [vmem:[#allocation8 + $0xa90] ss:$24 sps:$4 sm:$0xff]  }
 0x397   :  { %5235 = vmatprep.subr.bf16.mxu0 %v8907_v8  ;;  %v8961_v8 = vld [vmem:[#allocation8 + $0xac4] ss:$24 sps:$4 sm:$0xff]  }
 0x399   :  { %5225 = vmatmul.mubr.bf16.vlgmr.msra.gmra.mrb[16].mxu0 %v9720_v27  ;;  %v8937_v27 = vld [vmem:[#allocation8 + $0xa04] ss:$24 sps:$4 sm:$0xff]  }
 0x39a   :  { %5236 = vmatpush1.bf16.msra.mxu0 %v8905_v9  ;;  %5267 = vmatprep.mubr.bf16.mxu0 %v9734_v16  ;;  %v1923_v16 = vrot.slane %v9771_v22, %v9680_v41  ;;  %v8956_v9 = vld [vmem:[#allocation11 + $0x198] ss:$12 sps:$4 sm:$0xff]  }
 0x39b   :  { %5237 = vmatprep.subr.bf16.mxu0 %v8913_v10  ;;  %v8964_v10 = vld [vmem:[#allocation11 + $0x1b4] ss:$12 sps:$4 sm:$0xff]  }
 0x39e   :  { %5238 = vmatpush1.bf16.msra.mxu0 %v8911_v11  ;;  %v8959_v11 = vld [vmem:[#allocation8 + $0xac0] ss:$24 sps:$4 sm:$0xff]  }
 0x39f   :  { %5239 = vmatprep.subr.bf16.mxu0 %v8919_v12  ;;  %v8967_v12 = vld [vmem:[#allocation8 + $0xaf4] ss:$24 sps:$4 sm:$0xff]  }
 0x3a2   :  { %5240 = vmatpush1.bf16.msra.mxu0 %v8917_v15  ;;  %v8962_v15 = vld [vmem:[#allocation11 + $0x1b0] ss:$12 sps:$4 sm:$0xff]  }
 0x3a3   :  { %5241 = vmatprep.subr.bf16.mxu0 %v8925_v18  ;;  %v8970_v18 = vld [vmem:[#allocation11 + $0x1cc] ss:$12 sps:$4 sm:$0xff]  }
 0x3a6   :  { %5242 = vmatpush1.bf16.msra.mxu0 %v8923_v19  ;;  %v8965_v19 = vld [vmem:[#allocation8 + $0xaf0] ss:$24 sps:$4 sm:$0xff]  }
 0x3a7   :  { %5243 = vmatprep.subr.bf16.mxu0 %v8931_v20  ;;  %v8973_v20 = vld [vmem:[#allocation8 + $0xb24] ss:$24 sps:$4 sm:$0xff]  }
 0x3aa   :  { %5244 = vmatpush1.bf16.msra.mxu0 %v8929_v21  ;;  %v8968_v21 = vld [vmem:[#allocation11 + $0x1c8] ss:$12 sps:$4 sm:$0xff]  }
 0x3ab   :  { %5245 = vmatprep.subr.bf16.mxu0 %v8937_v27  ;;  %v8976_v27 = vld [vmem:[#allocation11 + $0x1e4] ss:$12 sps:$4 sm:$0xff]  }
 0x3ac   :  { %v4839_v29 = vpop.f32.mrb[12].mxu0 }
 0x3ad   :  { %v7894_v31 = vadd.f32 %v4839_v29, %v1923_v16  ;;  %v5097_v34 = vpop.f32.mrb[12].mxu1  ;;  %v4841_v35 = vpop.f32.mrb[13].mxu0  ;;  %v8980_v29 = vld [vmem:[#allocation11 + $0x1f8] ss:$12 sps:$4 sm:$0xff]  }
 0x3ae   :  { %v7898_v36 = vadd.f32 %v5097_v34, %v1931_v23  ;;  %v7895_v37 = vadd.f32 %v4841_v35, %v1927_v24  ;;  %v5099_v45 = vpop.f32.mrb[13].mxu1  ;;  %v4843_v38 = vpop.f32.mrb[14].mxu0  ;;  %5246 = vmatpush1.bf16.msra.mxu0 %v8935_v25  ;;  %v8982_v25 = vld [vmem:[#allocation11 + $0x1fc] ss:$12 sps:$4 sm:$0xff]  }
 0x3af   :  { %v7899_v44 = vadd.f32 %v5099_v45, %v1935_v26  ;;  %v7896_v47 = vadd.f32 %v4843_v38, %v1923_v16  ;;  %v5101_v48 = vpop.f32.mrb[14].mxu1  ;;  %v4845_v52 = vpop.f32.mrb[15].mxu0  ;;  %5247 = vmatprep.subr.bf16.mxu0 %v8943_v28  ;;  %v5364_v50 = vmax.f32 %v7894_v31, 0.0  ;;  %v8971_v16 = vld [vmem:[#allocation8 + $0xb20] ss:$24 sps:$4 sm:$0xff]  }
 0x3b0   :  { %v7900_v49 = vadd.f32 %v5101_v48, %v1931_v23  ;;  %v7897_v2 = vadd.f32 %v4845_v52, %v1927_v24  ;;  %v5103_v30 = vpop.f32.mrb[15].mxu1  ;;  %v5366_v33 = vmax.f32 %v7898_v36, 0.0  ;;  %v5365_v53 = vmax.f32 %v7895_v37, 0.0  ;;  %v8979_v23 = vld [vmem:[#allocation8 + $0xb54] ss:$24 sps:$4 sm:$0xff]  }
 0x3b1   :  { %v5370_v60 = vmax.f32 %v7896_v47, 0.0  ;;  %v7901_v51 = vadd.f32 %v5103_v30, %v1935_v26  ;;  %v5367_v57 = vmax.f32 %v7899_v44, 0.0  ;;  %v8974_v24 = vld [vmem:[#allocation11 + $0x1e0] ss:$12 sps:$4 sm:$0xff]   ;;  %v8983_v34 = vld [vmem:[#allocation8 + $0xb80] ss:$24 sps:$4 sm:$0xff]  }
 0x3b2   :  { %v5372_v54 = vmax.f32 %v7900_v49, 0.0  ;;  %v5371_v55 = vmax.f32 %v7897_v2, 0.0  ;;  %5248 = vmatpush1.bf16.msra.mxu0 %v8941_v43  ;;  %v8977_v26 = vld [vmem:[#allocation8 + $0xb50] ss:$24 sps:$4 sm:$0xff]   ;;  %v8985_v28 = vld [vmem:[#allocation8 + $0xb84] ss:$24 sps:$4 sm:$0xff]  }
 0x3b3   :  { %v9782_v58 = vpack.c.bf16 %v5370_v60, %v5364_v50  ;;  %v5373_v62 = vmax.f32 %v7901_v51, 0.0  ;;  %5249 = vmatprep.subr.bf16.mxu0 %v8949_v32  ;;  %v8988_v31 = vld [vmem:[#allocation11 + $0x214] ss:$12 sps:$4 sm:$0xff]   ;;  %v8991_v35 = vld [vmem:[#allocation8 + $0xbb4] ss:$24 sps:$4 sm:$0xff]  }
 0x3b4   :  { %v9784_v1 = vpack.c.bf16 %v5372_v54, %v5366_v33  ;;  %v9786_v3 = vpack.c.bf16 %v5371_v55, %v5365_v53  ;;  %v8986_v36 = vld [vmem:[#allocation11 + $0x210] ss:$12 sps:$4 sm:$0xff]   ;;  %v8994_v37 = vld [vmem:[#allocation11 + $0x22c] ss:$12 sps:$4 sm:$0xff]   ;;  %v8992_v43 = vld [vmem:[#allocation11 + $0x228] ss:$12 sps:$4 sm:$0xff]  }
 0x3b5   :  { %v9788_v5 = vpack.c.bf16 %v5373_v62, %v5367_v57  ;;  %v8989_v45 = vld [vmem:[#allocation8 + $0xbb0] ss:$24 sps:$4 sm:$0xff]   ;;  %v8997_v38 = vld [vmem:[#allocation8 + $0xbe4] ss:$24 sps:$4 sm:$0xff]   ;;  %v8995_v47 = vld [vmem:[#allocation8 + $0xbe0] ss:$24 sps:$4 sm:$0xff]  }
 0x3b6   :  { %5250 = vmatpush1.bf16.msra.mxu0 %v8947_v56  ;;  %6391 = vmatprep.mubr.bf16.mxu1 %v9786_v3  ;;  %v9000_v44 = vld [vmem:[#allocation11 + $0x244] ss:$12 sps:$4 sm:$0xff]   ;;  %v8998_v52 = vld [vmem:[#allocation11 + $0x240] ss:$12 sps:$4 sm:$0xff]   ;;  %v9006_v32 = vld [vmem:[#allocation11 + $0x25c] ss:$12 sps:$4 sm:$0xff]  }
 0x3b7   :  { %6392 = vmatmul.mubr.bf16.vlgmr.msra.gmra.mrb[16].mxu1 %v9782_v58  ;;  %5251 = vmatprep.subr.bf16.mxu0 %v8955_v0  ;;  %v9003_v48 = vld [vmem:[#allocation8 + $0xc14] ss:$24 sps:$4 sm:$0xff]   ;;  %v9001_v49 = vld [vmem:[#allocation8 + $0xc10] ss:$24 sps:$4 sm:$0xff]   ;;  %v9009_v2 = vld [vmem:[#allocation8 + $0xc44] ss:$24 sps:$4 sm:$0xff]  }
 0x3b8   :  { %6403 = vmatpush1.bf16.msra.mxu1 %v8950_v40  ;;  %6434 = vmatprep.mubr.bf16.mxu1 %v9788_v5  ;;  %v9004_v30 = vld [vmem:[#allocation11 + $0x258] ss:$12 sps:$4 sm:$0xff]   ;;  %v9012_v50 = vld [vmem:[#allocation11 + $0x274] ss:$12 sps:$4 sm:$0xff]   ;;  %v9010_v33 = vld [vmem:[#allocation11 + $0x270] ss:$12 sps:$4 sm:$0xff]  }
 0x3b9   :  { %6404 = vmatprep.subr.bf16.mxu1 %v8958_v6  ;;  %v9007_v60 = vld [vmem:[#allocation8 + $0xc40] ss:$24 sps:$4 sm:$0xff]   ;;  %v9015_v51 = vld [vmem:[#allocation8 + $0xc74] ss:$24 sps:$4 sm:$0xff]   ;;  %v9013_v54 = vld [vmem:[#allocation8 + $0xc70] ss:$24 sps:$4 sm:$0xff]  }
 0x3ba   :  { %5252 = vmatpush1.bf16.msra.mxu0 %v8953_v7  ;;  %v9018_v53 = vld [vmem:[#allocation11 + $0x28c] ss:$12 sps:$4 sm:$0xff]   ;;  %v9016_v56 = vld [vmem:[#allocation11 + $0x288] ss:$12 sps:$4 sm:$0xff]  }
 0x3bb   :  { %5253 = vmatprep.subr.bf16.mxu0 %v8961_v8  ;;  %v9021_v55 = vld [vmem:[#allocation8 + $0xca4] ss:$24 sps:$4 sm:$0xff]   ;;  %v9019_v57 = vld [vmem:[#allocation8 + $0xca0] ss:$24 sps:$4 sm:$0xff]   ;;  %v9027_v62 = vld [vmem:[#allocation8 + $0xcd4] ss:$24 sps:$4 sm:$0xff]  }
 0x3bc   :  { %6405 = vmatpush1.bf16.msra.mxu1 %v8956_v9  ;;  %v9030_v0 = vld [vmem:[#allocation11 + $0x2bc] ss:$12 sps:$4 sm:$0xff]   ;;  %v9028_v7 = vld [vmem:[#allocation11 + $0x2b8] ss:$12 sps:$4 sm:$0xff]   ;;  %v9036_v8 = vld [vmem:[#allocation11 + $0x2d4] ss:$12 sps:$4 sm:$0xff]  }
 0x3bd   :  { %6406 = vmatprep.subr.bf16.mxu1 %v8964_v10  ;;  %v9025_v40 = vld [vmem:[#allocation8 + $0xcd0] ss:$24 sps:$4 sm:$0xff]   ;;  %v9033_v6 = vld [vmem:[#allocation8 + $0xd04] ss:$24 sps:$4 sm:$0xff]   ;;  %v9031_v9 = vld [vmem:[#allocation8 + $0xd00] ss:$24 sps:$4 sm:$0xff]  }
 0x3be   :  { %5254 = vmatpush1.bf16.msra.mxu0 %v8959_v11  ;;  %v9039_v10 = vld [vmem:[#allocation8 + $0xd34] ss:$24 sps:$4 sm:$0xff]  }
 0x3bf   :  { %5255 = vmatprep.subr.bf16.mxu0 %v8967_v12  ;;  %v9034_v11 = vld [vmem:[#allocation11 + $0x2d0] ss:$12 sps:$4 sm:$0xff]   ;;  %v9042_v12 = vld [vmem:[#allocation11 + $0x2ec] ss:$12 sps:$4 sm:$0xff]  }
 0x3c0   :  { %6407 = vmatpush1.bf16.msra.mxu1 %v8962_v15  ;;  %v9037_v15 = vld [vmem:[#allocation8 + $0xd30] ss:$24 sps:$4 sm:$0xff]  }
 0x3c1   :  { %6408 = vmatprep.subr.bf16.mxu1 %v8970_v18  ;;  %v9045_v18 = vld [vmem:[#allocation8 + $0xd64] ss:$24 sps:$4 sm:$0xff]  }
 0x3c2   :  { %5256 = vmatpush1.bf16.msra.mxu0 %v8965_v19  ;;  %v9040_v19 = vld [vmem:[#allocation11 + $0x2e8] ss:$12 sps:$4 sm:$0xff]  }
 0x3c3   :  { %5257 = vmatprep.subr.bf16.mxu0 %v8973_v20  ;;  %v9096_v20 = vld [vmem:[#allocation11 + $0x304] ss:$12 sps:$4 sm:$0xff]  }
 0x3c4   :  { %6409 = vmatpush1.bf16.msra.mxu1 %v8968_v21  ;;  %v9043_v21 = vld [vmem:[#allocation8 + $0xd60] ss:$24 sps:$4 sm:$0xff]  }
 0x3c5   :  { %6410 = vmatprep.subr.bf16.mxu1 %v8976_v27  ;;  %v9048_v27 = vld [vmem:[#allocation8 + $0xd94] ss:$24 sps:$4 sm:$0xff]  }
 0x3c6   :  { %5258 = vmatpush1.bf16.msra.mxu0 %v8971_v16  ;;  %v9094_v16 = vld [vmem:[#allocation11 + $0x300] ss:$12 sps:$4 sm:$0xff]  }
 0x3c7   :  { %5259 = vmatprep.subr.bf16.mxu0 %v8979_v23  ;;  %v9099_v23 = vld [vmem:[#allocation11 + $0x31c] ss:$12 sps:$4 sm:$0xff]  }
 0x3c8   :  { %6411 = vmatpush1.bf16.msra.mxu1 %v8974_v24  ;;  %v9046_v24 = vld [vmem:[#allocation8 + $0xd90] ss:$24 sps:$4 sm:$0xff]  }
 0x3c9   :  { %6412 = vmatprep.subr.bf16.mxu1 %v8982_v25  ;;  %v9051_v25 = vld [vmem:[#allocation8 + $0xdc4] ss:$24 sps:$4 sm:$0xff]  }
 0x3ca   :  { %5260 = vmatpush1.bf16.msra.mxu0 %v8977_v26  ;;  %v9097_v26 = vld [vmem:[#allocation11 + $0x318] ss:$12 sps:$4 sm:$0xff]  }
 0x3cb   :  { %5261 = vmatprep.subr.bf16.mxu0 %v8985_v28  ;;  %v9102_v28 = vld [vmem:[#allocation11 + $0x334] ss:$12 sps:$4 sm:$0xff]  }
 0x3cc   :  { %6413 = vmatpush1.bf16.msra.mxu1 %v8980_v29  ;;  %v9049_v29 = vld [vmem:[#allocation8 + $0xdc0] ss:$24 sps:$4 sm:$0xff]  }
 0x3cd   :  { %6414 = vmatprep.subr.bf16.mxu1 %v8988_v31  ;;  %v9054_v31 = vld [vmem:[#allocation8 + $0xdf4] ss:$24 sps:$4 sm:$0xff]  }
 0x3ce   :  { %5262 = vmatpush1.bf16.msra.mxu0 %v8983_v34  ;;  %v9100_v34 = vld [vmem:[#allocation11 + $0x330] ss:$12 sps:$4 sm:$0xff]  }
 0x3cf   :  { %5263 = vmatprep.subr.bf16.mxu0 %v8991_v35  ;;  %v9105_v35 = vld [vmem:[#allocation11 + $0x34c] ss:$12 sps:$4 sm:$0xff]  }
 0x3d0   :  { %6415 = vmatpush1.bf16.msra.mxu1 %v8986_v36  ;;  %v9052_v36 = vld [vmem:[#allocation8 + $0xdf0] ss:$24 sps:$4 sm:$0xff]  }
 0x3d1   :  { %6416 = vmatprep.subr.bf16.mxu1 %v8994_v37  ;;  %v9057_v37 = vld [vmem:[#allocation8 + $0xe24] ss:$24 sps:$4 sm:$0xff]  }
 0x3d2   :  { %5264 = vmatpush1.bf16.msra.mxu0 %v8989_v45  ;;  %v9103_v45 = vld [vmem:[#allocation11 + $0x348] ss:$12 sps:$4 sm:$0xff]  }
 0x3d3   :  { %5265 = vmatprep.subr.bf16.mxu0 %v8997_v38  ;;  %v9108_v38 = vld [vmem:[#allocation11 + $0x364] ss:$12 sps:$4 sm:$0xff]  }
 0x3d4   :  { %6417 = vmatpush1.bf16.msra.mxu1 %v8992_v43  ;;  %v9055_v43 = vld [vmem:[#allocation8 + $0xe20] ss:$24 sps:$4 sm:$0xff]  }
 0x3d5   :  { %6418 = vmatprep.subr.bf16.mxu1 %v9000_v44  ;;  %v9060_v44 = vld [vmem:[#allocation8 + $0xe54] ss:$24 sps:$4 sm:$0xff]  }
 0x3d6   :  { %5266 = vmatpush1.bf16.msra.mxu0 %v8995_v47  ;;  %v9106_v47 = vld [vmem:[#allocation11 + $0x360] ss:$12 sps:$4 sm:$0xff]  }
 0x3d7   :  { %5278 = vmatprep.subr.bf16.mxu0 %v9003_v48  ;;  %v9111_v48 = vld [vmem:[#allocation11 + $0x37c] ss:$12 sps:$4 sm:$0xff]  }
 0x3d8   :  { %6419 = vmatpush1.bf16.msra.mxu1 %v8998_v52  ;;  %v9058_v52 = vld [vmem:[#allocation8 + $0xe50] ss:$24 sps:$4 sm:$0xff]  }
 0x3d9   :  { %5268 = vmatmul.mubr.bf16.vlgmr.msra.gmra.mrb[16].mxu0 %v9730_v13  ;;  %6420 = vmatprep.subr.bf16.mxu1 %v9006_v32  ;;  %v9024_v13 = vld [vmem:[#allocation11 + $0x2a4] ss:$12 sps:$4 sm:$0xff]   ;;  %v9063_v32 = vld [vmem:[#allocation8 + $0xe84] ss:$24 sps:$4 sm:$0xff]  }
 0x3da   :  { %5279 = vmatpush1.bf16.msra.mxu0 %v9001_v49  ;;  %5310 = vmatprep.mubr.bf16.mxu0 %v9744_v17  ;;  %v9022_v17 = vld [vmem:[#allocation11 + $0x2a0] ss:$12 sps:$4 sm:$0xff]   ;;  %v9109_v49 = vld [vmem:[#allocation11 + $0x378] ss:$12 sps:$4 sm:$0xff]  }
 0x3db   :  { %5280 = vmatprep.subr.bf16.mxu0 %v9009_v2  ;;  %v9114_v2 = vld [vmem:[#allocation11 + $0x394] ss:$12 sps:$4 sm:$0xff]  }
 0x3dc   :  { %6421 = vmatpush1.bf16.msra.mxu1 %v9004_v30  ;;  %v9061_v30 = vld [vmem:[#allocation8 + $0xe80] ss:$24 sps:$4 sm:$0xff]  }
 0x3dd   :  { %6422 = vmatprep.subr.bf16.mxu1 %v9012_v50  ;;  %v9066_v50 = vld [vmem:[#allocation8 + $0xeb4] ss:$24 sps:$4 sm:$0xff]  }
 0x3de   :  { %5281 = vmatpush1.bf16.msra.mxu0 %v9007_v60  ;;  %v9112_v60 = vld [vmem:[#allocation11 + $0x390] ss:$12 sps:$4 sm:$0xff]  }
 0x3df   :  { %5282 = vmatprep.subr.bf16.mxu0 %v9015_v51  ;;  %v9117_v51 = vld [vmem:[#allocation11 + $0x3ac] ss:$12 sps:$4 sm:$0xff]  }
 0x3e0   :  { %6423 = vmatpush1.bf16.msra.mxu1 %v9010_v33  ;;  %v9064_v33 = vld [vmem:[#allocation8 + $0xeb0] ss:$24 sps:$4 sm:$0xff]  }
 0x3e1   :  { %6424 = vmatprep.subr.bf16.mxu1 %v9018_v53  ;;  %v9069_v53 = vld [vmem:[#allocation8 + $0xee4] ss:$24 sps:$4 sm:$0xff]  }
 0x3e2   :  { %5283 = vmatpush1.bf16.msra.mxu0 %v9013_v54  ;;  %v9115_v54 = vld [vmem:[#allocation11 + $0x3a8] ss:$12 sps:$4 sm:$0xff]  }
 0x3e3   :  { %5284 = vmatprep.subr.bf16.mxu0 %v9021_v55  ;;  %v9120_v55 = vld [vmem:[#allocation11 + $0x3c4] ss:$12 sps:$4 sm:$0xff]  }
 0x3e4   :  { %6425 = vmatpush1.bf16.msra.mxu1 %v9016_v56  ;;  %v9067_v56 = vld [vmem:[#allocation8 + $0xee0] ss:$24 sps:$4 sm:$0xff]  }
 0x3e5   :  { %6426 = vmatprep.subr.bf16.mxu1 %v9024_v13  ;;  %v9072_v13 = vld [vmem:[#allocation8 + $0xf14] ss:$24 sps:$4 sm:$0xff]  }
 0x3e6   :  { %5285 = vmatpush1.bf16.msra.mxu0 %v9019_v57  ;;  %v9118_v57 = vld [vmem:[#allocation11 + $0x3c0] ss:$12 sps:$4 sm:$0xff]  }
 0x3e7   :  { %5286 = vmatprep.subr.bf16.mxu0 %v9027_v62  ;;  %v9123_v62 = vld [vmem:[#allocation11 + $0x3dc] ss:$12 sps:$4 sm:$0xff]  }
 0x3e8   :  { %6427 = vmatpush1.bf16.msra.mxu1 %v9022_v17  ;;  %v9070_v17 = vld [vmem:[#allocation8 + $0xf10] ss:$24 sps:$4 sm:$0xff]  }
 0x3e9   :  { %6428 = vmatprep.subr.bf16.mxu1 %v9030_v0  ;;  %v9075_v0 = vld [vmem:[#allocation8 + $0xf44] ss:$24 sps:$4 sm:$0xff]  }
 0x3ea   :  { %5287 = vmatpush1.bf16.msra.mxu0 %v9025_v40  ;;  %v9121_v40 = vld [vmem:[#allocation11 + $0x3d8] ss:$12 sps:$4 sm:$0xff]  }
 0x3eb   :  { %5288 = vmatprep.subr.bf16.mxu0 %v9033_v6  ;;  %v9126_v6 = vld [vmem:[#allocation11 + $0x3f4] ss:$12 sps:$4 sm:$0xff]  }
 0x3ec   :  { %6429 = vmatpush1.bf16.msra.mxu1 %v9028_v7  ;;  %v9073_v7 = vld [vmem:[#allocation8 + $0xf40] ss:$24 sps:$4 sm:$0xff]  }
 0x3ed   :  { %6430 = vmatprep.subr.bf16.mxu1 %v9036_v8  ;;  %v9078_v8 = vld [vmem:[#allocation8 + $0xf74] ss:$24 sps:$4 sm:$0xff]  }
 0x3ee   :  { %5289 = vmatpush1.bf16.msra.mxu0 %v9031_v9  ;;  %v9124_v9 = vld [vmem:[#allocation11 + $0x3f0] ss:$12 sps:$4 sm:$0xff]  }
 0x3ef   :  { %5290 = vmatprep.subr.bf16.mxu0 %v9039_v10  ;;  %v9129_v10 = vld [vmem:[#allocation11 + $0x40c] ss:$12 sps:$4 sm:$0xff]  }
 0x3f0   :  { %6431 = vmatpush1.bf16.msra.mxu1 %v9034_v11  ;;  %v9076_v11 = vld [vmem:[#allocation8 + $0xf70] ss:$24 sps:$4 sm:$0xff]  }
 0x3f1   :  { %6432 = vmatprep.subr.bf16.mxu1 %v9042_v12  ;;  %v9081_v12 = vld [vmem:[#allocation8 + $0xfa4] ss:$24 sps:$4 sm:$0xff]  }
 0x3f2   :  { %5291 = vmatpush1.bf16.msra.mxu0 %v9037_v15  ;;  %v9127_v15 = vld [vmem:[#allocation11 + $0x408] ss:$12 sps:$4 sm:$0xff]  }
 0x3f3   :  { %5292 = vmatprep.subr.bf16.mxu0 %v9045_v18  ;;  %v9079_v18 = vld [vmem:[#allocation8 + $0xfa0] ss:$24 sps:$4 sm:$0xff]  }
 0x3f4   :  { %6433 = vmatpush1.bf16.msra.mxu1 %v9040_v19  ;;  %v9084_v19 = vld [vmem:[#allocation8 + $0xfd4] ss:$24 sps:$4 sm:$0xff]  }
 0x3f5   :  { %6445 = vmatprep.subr.bf16.mxu1 %v9096_v20  ;;  %v9135_v20 = vld [vmem:[#allocation11 + $0x43c] ss:$12 sps:$4 sm:$0xff]  }
 0x3f6   :  { %5293 = vmatpush1.bf16.msra.mxu0 %v9043_v21  ;;  %v9082_v21 = vld [vmem:[#allocation8 + $0xfd0] ss:$24 sps:$4 sm:$0xff]  }
 0x3f7   :  { %6435 = vmatmul.mubr.bf16.vlgmr.msra.gmra.mrb[16].mxu1 %v9784_v1  ;;  %5294 = vmatprep.subr.bf16.mxu0 %v9048_v27  ;;  %v9087_v27 = vld [vmem:[#allocation8 + $0x1004] ss:$24 sps:$4 sm:$0xff]  }
 0x3f8   :  { %6446 = vmatpush1.bf16.msra.mxu1 %v9094_v16  ;;  %v9133_v16 = vld [vmem:[#allocation11 + $0x438] ss:$12 sps:$4 sm:$0xff]  }
 0x3f9   :  { %6447 = vmatprep.subr.bf16.mxu1 %v9099_v23  ;;  %v9085_v23 = vld [vmem:[#allocation8 + $0x1000] ss:$24 sps:$4 sm:$0xff]  }
 0x3fa   :  { %5295 = vmatpush1.bf16.msra.mxu0 %v9046_v24  ;;  %v9090_v24 = vld [vmem:[#allocation8 + $0x1034] ss:$24 sps:$4 sm:$0xff]  }
 0x3fb   :  { %5296 = vmatprep.subr.bf16.mxu0 %v9051_v25  ;;  %v9088_v25 = vld [vmem:[#allocation8 + $0x1030] ss:$24 sps:$4 sm:$0xff]  }
 0x3fc   :  { %6448 = vmatpush1.bf16.msra.mxu1 %v9097_v26  ;;  %v9093_v26 = vld [vmem:[#allocation8 + $0x1064] ss:$24 sps:$4 sm:$0xff]  }
 0x3fd   :  { %6449 = vmatprep.subr.bf16.mxu1 %v9102_v28  ;;  %v9091_v28 = vld [vmem:[#allocation8 + $0x1060] ss:$24 sps:$4 sm:$0xff]  }
 0x3fe   :  { %5297 = vmatpush1.bf16.msra.mxu0 %v9049_v29  ;;  %v9138_v29 = vld [vmem:[#allocation11 + $0x454] ss:$12 sps:$4 sm:$0xff]  }
 0x3ff   :  { %5298 = vmatprep.subr.bf16.mxu0 %v9054_v31  ;;  %v9136_v31 = vld [vmem:[#allocation11 + $0x450] ss:$12 sps:$4 sm:$0xff]  }
 0x400   :  { %6450 = vmatpush1.bf16.msra.mxu1 %v9100_v34  ;;  %v9141_v34 = vld [vmem:[#allocation11 + $0x46c] ss:$12 sps:$4 sm:$0xff]  }
 0x401   :  { %6451 = vmatprep.subr.bf16.mxu1 %v9105_v35  ;;  %v9139_v35 = vld [vmem:[#allocation11 + $0x468] ss:$12 sps:$4 sm:$0xff]  }
 0x402   :  { %5299 = vmatpush1.bf16.msra.mxu0 %v9052_v36  ;;  %v9142_v36 = vld [vmem:[#allocation11 + $0xc8] ss:$12 sps:$4 sm:$0xff]  }
 0x403   :  { %5300 = vmatprep.subr.bf16.mxu0 %v9057_v37  ;;  %v1939_v37 = vrot.slane %v9771_v22, %v326_v59  ;;  %v9143_v59 = vld [vmem:[#allocation11 + $0x8] ss:$12 sps:$4 sm:$0xff]  }
 0x404   :  { %6452 = vmatpush1.bf16.msra.mxu1 %v9103_v45  ;;  %v1943_v45 = vrot.slane %v9771_v22, %v330_v61  ;;  %v9145_v61 = vld [vmem:[#allocation11 + $0x20] ss:$12 sps:$4 sm:$0xff]   ;;  %v9146_v22 = vld [vmem:[#allocation11 + $0xf8] ss:$12 sps:$4 sm:$0xff]  }
 0x405   :  { %6453 = vmatprep.subr.bf16.mxu1 %v9108_v38 }
 0x406   :  { %5301 = vmatpush1.bf16.msra.mxu0 %v9055_v43 }
 0x407   :  { %5302 = vmatprep.subr.bf16.mxu0 %v9060_v44 }
 0x408   :  { %6454 = vmatpush1.bf16.msra.mxu1 %v9106_v47 }
 0x409   :  { %6455 = vmatprep.subr.bf16.mxu1 %v9111_v48 }
 0x40a   :  { %5303 = vmatpush1.bf16.msra.mxu0 %v9058_v52 }
 0x40b   :  { %5304 = vmatprep.subr.bf16.mxu0 %v9063_v32 }
 0x40c   :  { %6456 = vmatpush1.bf16.msra.mxu1 %v9109_v49 }
 0x40d   :  { %6457 = vmatprep.subr.bf16.mxu1 %v9114_v2 }
 0x40e   :  { %5305 = vmatpush1.bf16.msra.mxu0 %v9061_v30 }
 0x40f   :  { %5306 = vmatprep.subr.bf16.mxu0 %v9066_v50 }
 0x410   :  { %6458 = vmatpush1.bf16.msra.mxu1 %v9112_v60 }
 0x411   :  { %6459 = vmatprep.subr.bf16.mxu1 %v9117_v51 }
 0x412   :  { %5307 = vmatpush1.bf16.msra.mxu0 %v9064_v33  ;;  %v9147_v33 = vld [vmem:[#allocation11 + $0x38] ss:$12 sps:$4 sm:$0xff]  }
 0x413   :  { %5308 = vmatprep.subr.bf16.mxu0 %v9069_v53  ;;  %v9148_v53 = vld [vmem:[#allocation11 + $0x110] ss:$12 sps:$4 sm:$0xff]  }
 0x414   :  { %6460 = vmatpush1.bf16.msra.mxu1 %v9115_v54  ;;  %v9149_v54 = vld [vmem:[#allocation11 + $0x50] ss:$12 sps:$4 sm:$0xff]  }
 0x415   :  { %6461 = vmatprep.subr.bf16.mxu1 %v9120_v55  ;;  %v9150_v55 = vld [vmem:[#allocation11 + $0x128] ss:$12 sps:$4 sm:$0xff]  }
 0x416   :  { %5309 = vmatpush1.bf16.msra.mxu0 %v9067_v56  ;;  %v9151_v56 = vld [vmem:[#allocation11 + $0x68] ss:$12 sps:$4 sm:$0xff]  }
 0x417   :  { %5321 = vmatprep.subr.bf16.mxu0 %v9072_v13  ;;  %v9152_v13 = vld [vmem:[#allocation11 + $0x140] ss:$12 sps:$4 sm:$0xff]  }
 0x418   :  { %6462 = vmatpush1.bf16.msra.mxu1 %v9118_v57  ;;  %v9153_v57 = vld [vmem:[#allocation11 + $0x80] ss:$12 sps:$4 sm:$0xff]  }
 0x419   :  { %5311 = vmatmul.mubr.bf16.vlgmr.msra.gmra.mrb[16].mxu0 %v9742_v14  ;;  %6463 = vmatprep.subr.bf16.mxu1 %v9123_v62  ;;  %v9132_v14 = vld [vmem:[#allocation11 + $0x424] ss:$12 sps:$4 sm:$0xff]  }
 0x41a   :  { %5322 = vmatpush1.bf16.msra.mxu0 %v9070_v17  ;;  %5353 = vmatprep.mubr.bf16.mxu0 %v9465_v4  ;;  %v9130_v4 = vld [vmem:[#allocation11 + $0x420] ss:$12 sps:$4 sm:$0xff]   ;;  %v9154_v62 = vld [vmem:[#allocation11 + $0x158] ss:$12 sps:$4 sm:$0xff]   ;;  %v9156_v17 = vld [vmem:[#allocation11 + $0x170] ss:$12 sps:$4 sm:$0xff]  }
 0x41b   :  { %5323 = vmatprep.subr.bf16.mxu0 %v9075_v0  ;;  %v9157_v0 = vld [vmem:[#allocation11 + $0xb0] ss:$12 sps:$4 sm:$0xff]  }
 0x41c   :  { %6464 = vmatpush1.bf16.msra.mxu1 %v9121_v40  ;;  %v9158_v40 = vld [vmem:[#allocation11 + $0x248] ss:$12 sps:$4 sm:$0xff]  }
 0x41d   :  { %6465 = vmatprep.subr.bf16.mxu1 %v9126_v6  ;;  %v9159_v6 = vld [vmem:[#allocation11 + $0x188] ss:$12 sps:$4 sm:$0xff]  }
 0x41e   :  { %5324 = vmatpush1.bf16.msra.mxu0 %v9073_v7  ;;  %v9160_v7 = vld [vmem:[#allocation11 + $0x260] ss:$12 sps:$4 sm:$0xff]  }
 0x41f   :  { %5325 = vmatprep.subr.bf16.mxu0 %v9078_v8  ;;  %v9161_v8 = vld [vmem:[#allocation11 + $0x1a0] ss:$12 sps:$4 sm:$0xff]  }
 0x420   :  { %6466 = vmatpush1.bf16.msra.mxu1 %v9124_v9  ;;  %v9162_v9 = vld [vmem:[#allocation11 + $0x278] ss:$12 sps:$4 sm:$0xff]  }
 0x421   :  { %6467 = vmatprep.subr.bf16.mxu1 %v9129_v10  ;;  %v9163_v10 = vld [vmem:[#allocation11 + $0x1b8] ss:$12 sps:$4 sm:$0xff]  }
 0x422   :  { %5326 = vmatpush1.bf16.msra.mxu0 %v9076_v11  ;;  %v9164_v11 = vld [vmem:[#allocation11 + $0x290] ss:$12 sps:$4 sm:$0xff]  }
 0x423   :  { %5327 = vmatprep.subr.bf16.mxu0 %v9081_v12  ;;  %v9165_v12 = vld [vmem:[#allocation11 + $0x1d0] ss:$12 sps:$4 sm:$0xff]  }
 0x424   :  { %6468 = vmatpush1.bf16.msra.mxu1 %v9127_v15  ;;  %v9166_v15 = vld [vmem:[#allocation11 + $0x2a8] ss:$12 sps:$4 sm:$0xff]  }
 0x425   :  { %6469 = vmatprep.subr.bf16.mxu1 %v9132_v14  ;;  %v9167_v14 = vld [vmem:[#allocation11 + $0x1e8] ss:$12 sps:$4 sm:$0xff]  }
 0x426   :  { %5328 = vmatpush1.bf16.msra.mxu0 %v9079_v18  ;;  %v9168_v18 = vld [vmem:[#allocation11 + $0x2c0] ss:$12 sps:$4 sm:$0xff]  }
 0x427   :  { %5329 = vmatprep.subr.bf16.mxu0 %v9084_v19  ;;  %v9170_v19 = vld [vmem:[#allocation11 + $0x2d8] ss:$12 sps:$4 sm:$0xff]  }
 0x428   :  { %6470 = vmatpush1.bf16.msra.mxu1 %v9130_v4  ;;  %v9172_v4 = vld [vmem:[#allocation11 + $0x2f0] ss:$12 sps:$4 sm:$0xff]  }
 0x429   :  { %6471 = vmatprep.subr.bf16.mxu1 %v9135_v20  ;;  %v9173_v20 = vld [vmem:[#allocation11 + $0x230] ss:$12 sps:$4 sm:$0xff]  }
 0x42a   :  { %5330 = vmatpush1.bf16.msra.mxu0 %v9082_v21  ;;  %v9174_v21 = vld [vmem:[#allocation11 + $0x3c8] ss:$12 sps:$4 sm:$0xff]  }
 0x42b   :  { %5331 = vmatprep.subr.bf16.mxu0 %v9087_v27  ;;  %v9175_v27 = vld [vmem:[#allocation11 + $0x308] ss:$12 sps:$4 sm:$0xff]  }
 0x42c   :  { %6472 = vmatpush1.bf16.msra.mxu1 %v9133_v16  ;;  %v9176_v16 = vld [vmem:[#allocation11 + $0x3e0] ss:$12 sps:$4 sm:$0xff]  }
 0x42d   :  { %6473 = vmatprep.subr.bf16.mxu1 %v9138_v29  ;;  %v9182_v29 = vld [vmem:[#allocation11 + $0x428] ss:$12 sps:$4 sm:$0xff]  }
 0x42e   :  { %5332 = vmatpush1.bf16.msra.mxu0 %v9085_v23  ;;  %v9177_v23 = vld [vmem:[#allocation11 + $0x320] ss:$12 sps:$4 sm:$0xff]  }
 0x42f   :  { %5333 = vmatprep.subr.bf16.mxu0 %v9090_v24  ;;  %v9178_v24 = vld [vmem:[#allocation11 + $0x3f8] ss:$12 sps:$4 sm:$0xff]  }
 0x430   :  { %6474 = vmatpush1.bf16.msra.mxu1 %v9136_v31  ;;  %v9183_v31 = vld [vmem:[#allocation11 + $0x368] ss:$12 sps:$4 sm:$0xff]  }
 0x431   :  { %6475 = vmatprep.subr.bf16.mxu1 %v9141_v34  ;;  %v9184_v34 = vld [vmem:[#allocation11 + $0x440] ss:$12 sps:$4 sm:$0xff]  }
 0x432   :  { %5334 = vmatpush1.bf16.msra.mxu0 %v9088_v25  ;;  %v9179_v25 = vld [vmem:[#allocation11 + $0x338] ss:$12 sps:$4 sm:$0xff]  }
 0x433   :  { %5335 = vmatprep.subr.bf16.mxu0 %v9093_v26  ;;  %v9180_v26 = vld [vmem:[#allocation11 + $0x410] ss:$12 sps:$4 sm:$0xff]  }
 0x434   :  { %6476 = vmatpush1.bf16.msra.mxu1 %v9139_v35  ;;  %v9186_v35 = vld [vmem:[#allocation11 + $0x458] ss:$12 sps:$4 sm:$0xff]  }
 0x435   :  { %7777 = vmatprep.subr.bf16.mxu1 %v9142_v36  ;;  %v9187_v36 = vld [vmem:[#allocation11 + $0x398] ss:$12 sps:$4 sm:$0xff]  }
 0x436   :  { %5336 = vmatpush1.bf16.msra.mxu0 %v9091_v28  ;;  %v9181_v28 = vld [vmem:[#allocation11 + $0x350] ss:$12 sps:$4 sm:$0xff]  }
 0x439   :  { %5354 = vmatmul.mubr.bf16.vlgmr.msra.gmra.mrb[16].mxu0 %v9752_v46 }
 0x50c   :  { %v5355_v38 = vpop.f32.mrb[16].mxu0 }
 0x50d   :  { %v7902_v46 = vadd.f32 %v5355_v38, %v1939_v37  ;;  %v5357_v43 = vpop.f32.mrb[17].mxu0  ;;  %v9190_v38 = vld [vmem:[#allocation14 + $0x40] sm:$0xff]  }
 0x50e   :  { %v7903_v44 = vadd.f32 %v5357_v43, %v1943_v45  ;;  %v5359_v47 = vpop.f32.mrb[18].mxu0  ;;  %v9192_v43 = vld [vmem:[#allocation14 + $0x48] sm:$0xff]  }
 0x50f   :  { %v7904_v48 = vadd.f32 %v5359_v47, %v1939_v37  ;;  %v5361_v52 = vpop.f32.mrb[19].mxu0  ;;  %v5368_v49 = vmax.f32 %v7902_v46, 0.0  ;;  %v9188_v37 = vld [vmem:[#allocation11 + $0x470] ss:$12 sps:$4 sm:$0xff]   ;;  %v9191_v46 = vld [vmem:[#allocation14] sm:$0xff]   ;;  %v9194_v47 = vld [vmem:[#allocation14 + $0x50] sm:$0xff]  }
 0x510   :  { %v7905_v32 = vadd.f32 %v5361_v52, %v1943_v45  ;;  %v5369_v30 = vmax.f32 %v7903_v44, 0.0  ;;  %v9189_v45 = vld [vmem:[#allocation11 + $0x3b0] ss:$12 sps:$4 sm:$0xff]  }
 0x511   :  { %v5374_v2 = vmax.f32 %v7904_v48, 0.0  ;;  %v9193_v44 = vld [vmem:[#allocation14 + $0x8] sm:$0xff]   ;;  %v9195_v48 = vld [vmem:[#allocation14 + $0x10] sm:$0xff]   ;;  %v9196_v52 = vld [vmem:[#allocation14 + $0x58] sm:$0xff]  }
 0x512   :  { %v5375_v50 = vmax.f32 %v7905_v32, 0.0  ;;  %v9197_v32 = vld [vmem:[#allocation14 + $0x18] sm:$0xff]  }
 0x513   :  { %v9805_v60 = vpack.c.bf16 %v5374_v2, %v5368_v49  ;;  %v9198_v49 = vld [vmem:[#allocation14 + $0x60] sm:$0xff]  }
 0x514   :  { %v9807_v51 = vpack.c.bf16 %v5375_v50, %v5369_v30  ;;  %v9199_v2 = vld [vmem:[#allocation14 + $0x20] sm:$0xff]   ;;  %v9200_v30 = vld [vmem:[#allocation14 + $0x68] sm:$0xff]  }
 0x515   :  { %v9201_v50 = vld [vmem:[#allocation14 + $0x28] sm:$0xff]  }
 0x516   :  { %6477 = vmatprep.mubr.bf16.mxu1 %v9807_v51 }
 0x517   :  { %6478 = vmatmul.mubr.bf16.vlgmr.msra.gmra.mrb[16].mxu1 %v9805_v60 }
 0x518   :  { %7778 = vmatpush3.bf16.msra.mxu1 %v9143_v59  ;;  %6520 = vmatprep.mubr.bf16.mxu1 %v9786_v3  ;;  %v9155_v3 = vld [vmem:[#allocation11 + $0x98] ss:$12 sps:$4 sm:$0xff]   ;;  %v9204_v59 = vld [vmem:[#allocation14 + $0x78] sm:$0xff]  }
 0x519   :  { %7779 = vmatprep.subr.bf16.mxu1 %v9144_v39  ;;  %v9205_v39 = vld [vmem:[#allocation14 + $0x38] sm:$0xff]  }
 0x51c   :  { %7780 = vmatpush3.bf16.msra.mxu1 %v9145_v61  ;;  %v9466_v61 = vmov 0.0  }
 0x51d   :  { %7781 = vmatprep.subr.bf16.mxu1 %v9146_v22  ;;  %v5574_v22 = vld [vmem:[#allocation13] sm:$0x7] }
 0x520   :  { %7782 = vmatpush3.bf16.msra.mxu1 %v9147_v33  ;;  %v5579_v33 = vrot.slane %v5574_v22, %v9680_v41  ;;  %v9207_v41 = vld [vmem:[#allocation14 + $0x88] sm:$0xff]  }
 0x521   :  { %7783 = vmatprep.subr.bf16.mxu1 %v9148_v53  ;;  %v5583_v53 = vrot.slane %v5574_v22, %v9683_v42  ;;  %v9208_v42 = vld [vmem:[#allocation14 + $0x90] sm:$0xff]  }
 0x524   :  { %7784 = vmatpush3.bf16.msra.mxu1 %v9149_v54 }
 0x525   :  { %7785 = vmatprep.subr.bf16.mxu1 %v9150_v55 }
 0x528   :  { %7786 = vmatpush3.bf16.msra.mxu1 %v9151_v56 }
 0x529   :  { %7787 = vmatprep.subr.bf16.mxu1 %v9152_v13 }
 0x52c   :  { %7788 = vmatpush3.bf16.msra.mxu1 %v9153_v57 }
 0x52d   :  { %7789 = vmatprep.subr.bf16.mxu1 %v9154_v62 }
 0x530   :  { %7790 = vmatpush3.bf16.msra.mxu1 %v9155_v3 }
 0x531   :  { %7791 = vmatprep.subr.bf16.mxu1 %v9156_v17 }
 0x534   :  { %7792 = vmatpush3.bf16.msra.mxu1 %v9157_v0 }
 0x535   :  { %7799 = vmatprep.subr.bf16.mxu1 %v9158_v40 }
 0x537   :  { %6521 = vmatmul.mubr.bf16.vlgmr.msra.gmra.mrb[20].mxu1 %v9782_v58  ;;  %v9169_v58 = vld [vmem:[#allocation11 + $0x200] ss:$12 sps:$4 sm:$0xff]  }
 0x538   :  { %7800 = vmatpush3.bf16.msra.mxu1 %v9159_v6  ;;  %6561 = vmatprep.mubr.bf16.mxu1 %v9788_v5  ;;  %v9171_v5 = vld [vmem:[#allocation11 + $0x218] ss:$12 sps:$4 sm:$0xff]  }
 0x539   :  { %7801 = vmatprep.subr.bf16.mxu1 %v9160_v7 }
 0x53c   :  { %7802 = vmatpush3.bf16.msra.mxu1 %v9161_v8 }
 0x53d   :  { %7803 = vmatprep.subr.bf16.mxu1 %v9162_v9 }
 0x540   :  { %7804 = vmatpush3.bf16.msra.mxu1 %v9163_v10  ;;  %v9206_v10 = vld [vmem:[#allocation14 + $0x80] sm:$0xff]  }
 0x541   :  { %7805 = vmatprep.subr.bf16.mxu1 %v9164_v11  ;;  %v9209_v11 = vld [vmem:[#allocation14 + $0x98] sm:$0xff]  }
 0x544   :  { %7806 = vmatpush3.bf16.msra.mxu1 %v9165_v12  ;;  %v9210_v12 = vld [vmem:[#allocation14 + $0xa0] sm:$0xff]  }
 0x545   :  { %7807 = vmatprep.subr.bf16.mxu1 %v9166_v15  ;;  %v9211_v15 = vld [vmem:[#allocation14 + $0xa8] sm:$0xff]  }
 0x548   :  { %7808 = vmatpush3.bf16.msra.mxu1 %v9167_v14 }
 0x549   :  { %7809 = vmatprep.subr.bf16.mxu1 %v9168_v18  ;;  %v9212_v18 = vld [vmem:[#allocation14 + $0xb0] sm:$0xff]  }
 0x54c   :  { %7810 = vmatpush3.bf16.msra.mxu1 %v9169_v58 }
 0x54d   :  { %7811 = vmatprep.subr.bf16.mxu1 %v9170_v19 }
 0x550   :  { %7812 = vmatpush3.bf16.msra.mxu1 %v9171_v5 }
 0x551   :  { %7813 = vmatprep.subr.bf16.mxu1 %v9172_v4 }
 0x554   :  { %7814 = vmatpush3.bf16.msra.mxu1 %v9173_v20 }
 0x555   :  { %7821 = vmatprep.subr.bf16.mxu1 %v9174_v21  ;;  %v9213_v21 = vld [vmem:[#allocation14 + $0xb8] sm:$0xff]  }
 0x557   :  { %6562 = vmatmul.mubr.bf16.vlgmr.msra.gmra.mrb[24].mxu1 %v9784_v1  ;;  %v9185_v1 = vld [vmem:[#allocation11 + $0x380] ss:$12 sps:$4 sm:$0xff]  }
 0x558   :  { %7822 = vmatpush3.bf16.msra.mxu1 %v9175_v27  ;;  %6602 = vmatprep.mubr.bf16.mxu1 %v9807_v51  ;;  %v9203_v51 = vld [vmem:[#allocation14 + $0x30] sm:$0xff]   ;;  %v5587_v27 = vrot.slane %v5574_v22, %v9698_v63 }
 0x559   :  { %7823 = vmatprep.subr.bf16.mxu1 %v9176_v16 }
 0x55c   :  { %7824 = vmatpush3.bf16.msra.mxu1 %v9177_v23 }
 0x55d   :  { %7825 = vmatprep.subr.bf16.mxu1 %v9178_v24 }
 0x560   :  { %7826 = vmatpush3.bf16.msra.mxu1 %v9179_v25 }
 0x561   :  { %7827 = vmatprep.subr.bf16.mxu1 %v9180_v26 }
 0x564   :  { %7828 = vmatpush3.bf16.msra.mxu1 %v9181_v28 }
 0x565   :  { %7829 = vmatprep.subr.bf16.mxu1 %v9182_v29 }
 0x568   :  { %7830 = vmatpush3.bf16.msra.mxu1 %v9183_v31 }
 0x569   :  { %7831 = vmatprep.subr.bf16.mxu1 %v9184_v34 }
 0x56c   :  { %7832 = vmatpush3.bf16.msra.mxu1 %v9185_v1 }
 0x56d   :  { %7833 = vmatprep.subr.bf16.mxu1 %v9186_v35 }
 0x570   :  { %7834 = vmatpush3.bf16.msra.mxu1 %v9187_v36 }
 0x571   :  { %7835 = vmatprep.subr.bf16.mxu1 %v9188_v37 }
 0x574   :  { %7836 = vmatpush3.bf16.msra.mxu1 %v9189_v45 }
 0x575   :  { %7843 = vmatprep.subr.bf16.mxu1 %v9190_v38 }
 0x577   :  { %6603 = vmatmul.mubr.bf16.vlgmr.msra.gmra.mrb[28].mxu1 %v9805_v60  ;;  %v9202_v60 = vld [vmem:[#allocation14 + $0x70] sm:$0xff]  }
 0x578   :  { %7844 = vmatpush3.bf16.msra.mxu1 %v9191_v46 }
 0x579   :  { %7845 = vmatprep.subr.bf16.mxu1 %v9192_v43 }
 0x57c   :  { %7846 = vmatpush3.bf16.msra.mxu1 %v9193_v44 }
 0x57d   :  { %7847 = vmatprep.subr.bf16.mxu1 %v9194_v47 }
 0x580   :  { %7848 = vmatpush3.bf16.msra.mxu1 %v9195_v48 }
 0x581   :  { %7849 = vmatprep.subr.bf16.mxu1 %v9196_v52 }
 0x584   :  { %7850 = vmatpush3.bf16.msra.mxu1 %v9197_v32 }
 0x585   :  { %7851 = vmatprep.subr.bf16.mxu1 %v9198_v49 }
 0x588   :  { %7852 = vmatpush3.bf16.msra.mxu1 %v9199_v2 }
 0x589   :  { %7853 = vmatprep.subr.bf16.mxu1 %v9200_v30 }
 0x58c   :  { %7854 = vmatpush3.bf16.msra.mxu1 %v9201_v50 }
 0x58d   :  { %7855 = vmatprep.subr.bf16.mxu1 %v9202_v60  ;;  %v7752_v60 = vld [vmem:[#allocation16] ss:$0 sm:$0xff] }
 0x590   :  { %7856 = vmatpush3.bf16.msra.mxu1 %v9203_v51 }
 0x591   :  { %7857 = vmatprep.subr.bf16.mxu1 %v9204_v59 }
 0x594   :  { %7858 = vmatpush3.bf16.msra.mxu1 %v9205_v39 }
 0x595   :  { %7874 = vmatprep.subr.bf16.mxu1 %v9466_v61 }
 0x5ea   :  { %v6479_v54 = vpop.f32.mrb[16].mxu1 }
 0x5eb   :  { %v7906_v55 = vadd.f32 %v6479_v54, %v5579_v33  ;;  %v6481_v56 = vpop.f32.mrb[17].mxu1 }
 0x5ec   :  { %v7907_v13 = vadd.f32 %v6481_v56, %v5583_v53  ;;  %v6483_v57 = vpop.f32.mrb[18].mxu1 }
 0x5ed   :  { %v7908_v62 = vadd.f32 %v6483_v57, %v5579_v33  ;;  %v6485_v3 = vpop.f32.mrb[19].mxu1  ;;  %v6611_v0 = vmax.f32 %v7906_v55, 0.0 }
 0x5ee   :  { %v7909_v17 = vadd.f32 %v6485_v3, %v5583_v53  ;;  %v6612_v6 = vmax.f32 %v7907_v13, 0.0 }
 0x5ef   :  { %v6614_v40 = vmax.f32 %v7908_v62, 0.0 }
 0x5f0   :  { %v6615_v7 = vmax.f32 %v7909_v17, 0.0 }
 0x5f1   :  { %v6617_v8 = vpack.c.bf16 %v6614_v40, %v6611_v0 }
 0x5f2   :  { %v6618_v9 = vpack.c.bf16 %v6615_v7, %v6612_v6 }
 0x5f4   :  { %6851 = vmatprep.mubr.bf16.mxu1 %v6618_v9 }
 0x5f5   :  { %6852 = vmatmul.mubr.bf16.vlgmr.msra.gmra.mrb[32].mxu1 %v6617_v8 }
 0x5f6   :  { %7875 = vmatpush3.bf16.msra.mxu1 %v9206_v10  ;;  %7890 = vmatprep.mubr.msk.bf16.mxu1 %vm9467_vm2, %v9466_v61 }
 0x5f7   :  { %7876 = vmatprep.subr.bf16.mxu1 %v9466_v61 }
 0x5fa   :  { %7877 = vmatpush3.bf16.msra.mxu1 %v9207_v41 }
 0x5fb   :  { %7878 = vmatprep.subr.bf16.mxu1 %v9466_v61 }
 0x5fe   :  { %7879 = vmatpush3.bf16.msra.mxu1 %v9208_v42 }
 0x5ff   :  { %7880 = vmatprep.subr.bf16.mxu1 %v9466_v61 }
 0x602   :  { %7881 = vmatpush3.bf16.msra.mxu1 %v9209_v11 }
 0x603   :  { %7882 = vmatprep.subr.bf16.mxu1 %v9466_v61 }
 0x606   :  { %7883 = vmatpush3.bf16.msra.mxu1 %v9210_v12 }
 0x607   :  { %7884 = vmatprep.subr.bf16.mxu1 %v9466_v61 }
 0x60a   :  { %v7793_v14 = vpop.f32.mrb[20].mxu1  ;;  %7885 = vmatpush3.bf16.msra.mxu1 %v9211_v15 }
 0x60b   :  { %v7794_v58 = vpop.f32.mrb[21].mxu1  ;;  %7886 = vmatprep.subr.bf16.mxu1 %v9466_v61 }
 0x60c   :  { %v7795_v19 = vadd.f32 %v7794_v58, %v7793_v14  ;;  %v7796_v5 = vpop.f32.mrb[22].mxu1 }
 0x60d   :  { %v7797_v4 = vpop.f32.mrb[23].mxu1 }
 0x60e   :  { %v7798_v20 = vadd.f32 %v7797_v4, %v7796_v5  ;;  %7887 = vmatpush3.bf16.msra.mxu1 %v9212_v18  ;;  %v6523_v24 = vadd.f32 %v7795_v19, %v5587_v27 }
 0x60f   :  { %7888 = vmatprep.subr.bf16.mxu1 %v9466_v61 }
 0x610   :  { %v6526_v29 = vadd.f32 %v7798_v20, %v5587_v27 }
 0x612   :  { %7889 = vmatpush3.bf16.msra.mxu1 %v9213_v21 }
 0x62a   :  { %v7815_v16 = vpop.f32.mrb[24].mxu1 }
 0x62b   :  { %v7816_v23 = vpop.f32.mrb[25].mxu1 }
 0x62c   :  { %v7817_v25 = vadd.f32 %v7816_v23, %v7815_v16  ;;  %v7818_v26 = vpop.f32.mrb[26].mxu1 }
 0x62d   :  { %v7819_v28 = vpop.f32.mrb[27].mxu1 }
 0x62e   :  { %v6564_v31 = vadd.f32 %v7817_v25, %v6523_v24  ;;  %v7820_v34 = vadd.f32 %v7819_v28, %v7818_v26 }
 0x630   :  { %v6567_v1 = vadd.f32 %v7820_v34, %v6526_v29 }
 0x64a   :  { %v7837_v35 = vpop.f32.mrb[28].mxu1 }
 0x64b   :  { %v7838_v36 = vpop.f32.mrb[29].mxu1 }
 0x64c   :  { %v7839_v37 = vadd.f32 %v7838_v36, %v7837_v35  ;;  %v7840_v45 = vpop.f32.mrb[30].mxu1 }
 0x64d   :  { %v7841_v38 = vpop.f32.mrb[31].mxu1 }
 0x64e   :  { %v6605_v46 = vadd.f32 %v7839_v37, %v6564_v31  ;;  %v7842_v43 = vadd.f32 %v7841_v38, %v7840_v45 }
 0x650   :  { %v6608_v44 = vadd.f32 %v7842_v43, %v6567_v1  ;;  %v6613_v47 = vmax.f32 %v6605_v46, 0.0 }
 0x652   :  { %v6616_v63 = vmax.f32 %v6608_v44, 0.0 }
 0x654   :  { %v6619_v48 = vpack.c.bf16 %v6616_v63, %v6613_v47 }
 0x656   :  { %7891 = vmatmul.mubr.bf16.vlgmr.msra.gmra.mrb[36].mxu1 %v6619_v48 }
 0x6c8   :  { %v7859_v52 = vpop.f32.mrb[32].mxu1 }
 0x6c9   :  { %v7860_v32 = vpop.f32.mrb[33].mxu1 }
 0x6ca   :  { %v7861_v49 = vadd.f32 %v7860_v32, %v7859_v52  ;;  %v7862_v2 = vpop.f32.mrb[34].mxu1 }
 0x6cb   :  { %v7863_v30 = vpop.f32.mrb[35].mxu1 }
 0x6cc   :  { %v7864_v50 = vadd.f32 %v7863_v30, %v7862_v2  ;;  %v6854_v51 = vadd.f32 %v7861_v49, %v7752_v60 }
 0x6ce   :  { %v6857_v22 = vadd.f32 %v7864_v50, %v7752_v60 }
 0x729   :  { %v6894_v59 = vpop.f32.mrb[36].mxu1 }
 0x72a   :  { %v6895_v39 = vadd.f32 %v6894_v59, %v6854_v51  ;;  %v7892_v61 = vpop.f32.mrb[37].mxu1 }
 0x72b   :  { %v6897_v33 = vpop.f32.mrb[38].mxu1 }
 0x72c   :  { %v6901_v53 = vmax.f32 %v6895_v39, 0.0  ;;  %v6898_v54 = vadd.f32 %v6897_v33, %v6857_v22  ;;  %v7893_v55 = vpop.f32.mrb[39].mxu1 }
 0x72e   :  { %6903 = vst [vmem:[#allocation17] sm:$0xff] %v6901_v53  ;;  %v6902_v56 = vmax.f32 %v6898_v54, 0.0 }
 0x730   :  { %6904 = vst [vmem:[#allocation17 + $0x8] sm:$0xff] %v6902_v56 }
 0x731   :  { %9423 = shalt.err (!%p9420_p6)
}
 0x732   :  { %s9424_s30 = scalar_lea.hbm %s9841_s9, 256 }
 0x733   :  { %p9425_p7 = scmp.ne.s32.totalorder %s9841_s9, %s9424_s30  ;;  %p9428_p8 = scmp.lt.u32.totalorder %s9424_s30, %s9841_s9 }
 0x735   :  { %p9430_p9 = pnand %p9428_p8, %p9425_p7 }
 0x737   :  { %9433 = shalt.err (!%p9430_p9)
}
 0x738   :  { %s9469_s14 = smov 128   ;;  %s9470_s15 = smov 8  }
 0x739   :  { %6916 = dma.vmem_to_hbm [thread:$0]  %s6911_s7, 256, %s9841_s9, [#allocation4], %s9469_s14, %s9469_s14, %s9470_s15  }
 0x73a   :  { %9444 = dma.done.wait [#allocation4], 256  }
 0x73b   :  { %9445 = vsyncadd [#allocation4], 4294967040 }
 0x73c   :  { %6920 = vsyncpa [#allocation3], 1 }
 0x73d   :  { %6921 = vsyncpa [#allocation6], 1 }
 0x73e   :  { %6922 = vsyncpa [#allocation9], 1 }
 0x73f   :  { %6923 = vsyncpa [#allocation12], 1 }
 0x740   :  { %6924 = vsyncpa [#allocation15], 1 }
 0x741   :  { %6925 = vsyncpa [#allocation4], 1 }

// kernel: tpu_custom_call.1
= control target key start
LH: loop header
LB: loop body
LE: loop exit
PB: predicated region body
PF: predicated region fallthrough
CT: control target
= control target key end

     0   :  { %14 = vsyncpa [#allocation3], 0  ;;  %s9832_s0 = inlined_call_operand.hbm [shape: f32[16,200], index: 0, kind: input, shape index: {}]   ;;  %s9833_s1 = inlined_call_operand.hbm [shape: bf16[200,1408], index: 1, kind: input, shape index: {}]   ;;  %s9834_s2 = inlined_call_operand.hbm [shape: f32[1,1408], index: 2, kind: input, shape index: {}]   ;;  %s9835_s3 = inlined_call_operand.hbm [shape: bf16[1408,768], index: 3, kind: input, shape index: {}]   ;;  %s9836_s4 = inlined_call_operand.hbm [shape: f32[1,768], index: 4, kind: input, shape index: {}]   ;;  %s9837_s5 = inlined_call_operand.hbm [shape: bf16[768,384], index: 5, kind: input, shape index: {}]   ;;  %s9838_s6 = inlined_call_operand.hbm [shape: f32[1,384], index: 6, kind: input, shape index: {}]   ;;  %s9839_s7 = inlined_call_operand.hbm [shape: bf16[384,128], index: 7, kind: input, shape index: {}]   ;;  %s9840_s8 = inlined_call_operand.hbm [shape: f32[1,128], index: 8, kind: input, shape index: {}]   ;;  %s9841_s9 = inlined_call_operand.hbm [shape: f32[16,128], index: 9, kind: output, shape index: {}]  }
   0x1   :  { %15 = vsyncpa [#allocation6], 0 }
   0x2   :  { %16 = vsyncpa [#allocation9], 0 }
   0x3   :  { %17 = vsyncpa [#allocation12], 0 }
   0x4   :  { %18 = vsyncpa [#allocation15], 0 }
   0x5   :  { %19 = vsyncpa [#allocation4], 0  ;;  %s9446_s30 = smov [#allocation5]   ;;  %s9214_s13 = scalar_lea.hbm %s9833_s1, 17600 }
   0x6   :  { %s37_s10 = sshll.u32 %s9446_s30, 4  ;;  %p9215_p0 = scmp.ne.s32.totalorder %s9833_s1, %s9214_s13  ;;  %s38_s10 = int_to_ptr.vmem [resolvable:$true] %s37_s10 }
   0x7   :  { %p9218_p1 = scmp.lt.u32.totalorder %s9214_s13, %s9833_s1 }
   0x9   :  { %p9220_p2 = pnand %p9218_p1, %p9215_p0 }
   0xb   :  { %9223 = shalt.err (!%p9220_p2)
}
   0xc   :  { %s9224_s18 = scalar_lea.vmem %s38_s10, 17600  ;;  %p9229_p4 = scmp.lt.s32.totalorder %s38_s10, %s38_s10 }
   0xd   :  { %p9225_p3 = scmp.ne.s32.totalorder %s38_s10, %s9224_s18  ;;  %p9230_p5 = scmp.lt.s32.totalorder %s9224_s18, %s9224_s18 }
   0xf   :  { %p9231_p6 = por %p9230_p5, %p9229_p4 }
  0x11   :  { %p9232_p7 = pnand %p9231_p6, %p9225_p3 }
  0x13   :  { %9235 = shalt.err (!%p9232_p7)
}
  0x14   :  { %s9447_s19 = smov 704   ;;  %s9448_s20 = smov 44  }
  0x15   :  { %43 = dma.hbm_to_vmem [thread:$0]  %s9833_s1, 17600, %s38_s10, [#allocation6], %s9447_s19, %s9447_s19, %s9448_s20  }
  0x16   :  { %s9449_s23 = smov [#allocation8]   ;;  %s9236_s27 = scalar_lea.hbm %s9835_s3, 67584 }
  0x17   :  { %s59_s24 = sshll.u32 %s9449_s23, 4  ;;  %p9237_p8 = scmp.ne.s32.totalorder %s9835_s3, %s9236_s27  ;;  %s60_s24 = int_to_ptr.vmem [resolvable:$true] %s59_s24 }
  0x18   :  { %p9240_p9 = scmp.lt.u32.totalorder %s9236_s27, %s9835_s3 }
  0x1a   :  { %p9242_p10 = pnand %p9240_p9, %p9237_p8 }
  0x1c   :  { %9245 = shalt.err (!%p9242_p10)
}
  0x1d   :  { %s9246_s12 = scalar_lea.vmem %s60_s24, 67584  ;;  %p9251_p12 = scmp.lt.s32.totalorder %s60_s24, %s60_s24 }
  0x1e   :  { %p9247_p11 = scmp.ne.s32.totalorder %s60_s24, %s9246_s12  ;;  %p9252_p13 = scmp.lt.s32.totalorder %s9246_s12, %s9246_s12 }
  0x20   :  { %p9253_p0 = por %p9252_p13, %p9251_p12 }
  0x22   :  { %p9254_p1 = pnand %p9253_p0, %p9247_p11 }
  0x24   :  { %9257 = shalt.err (!%p9254_p1)
}
  0x25   :  { %s9450_s1 = smov 384   ;;  %s9451_s10 = smov 24  }
  0x26   :  { %65 = dma.hbm_to_vmem [thread:$0]  %s9835_s3, 67584, %s60_s24, [#allocation9], %s9450_s1, %s9450_s1, %s9451_s10  }
  0x27   :  { %s9452_s15 = smov [#allocation11]   ;;  %s9258_s19 = scalar_lea.hbm %s9837_s5, 18432 }
  0x28   :  { %s81_s16 = sshll.u32 %s9452_s15, 4  ;;  %p9259_p2 = scmp.ne.s32.totalorder %s9837_s5, %s9258_s19  ;;  %s82_s16 = int_to_ptr.vmem [resolvable:$true] %s81_s16 }
  0x29   :  { %p9262_p3 = scmp.lt.u32.totalorder %s9258_s19, %s9837_s5 }
  0x2b   :  { %p9264_p4 = pnand %p9262_p3, %p9259_p2 }
  0x2d   :  { %9267 = shalt.err (!%p9264_p4)
}
  0x2e   :  { %s9268_s25 = scalar_lea.vmem %s82_s16, 18432  ;;  %p9273_p6 = scmp.lt.s32.totalorder %s82_s16, %s82_s16 }
  0x2f   :  { %p9269_p5 = scmp.ne.s32.totalorder %s82_s16, %s9268_s25  ;;  %p9274_p7 = scmp.lt.s32.totalorder %s9268_s25, %s9268_s25 }
  0x31   :  { %p9275_p8 = por %p9274_p7, %p9273_p6 }
  0x33   :  { %p9276_p9 = pnand %p9275_p8, %p9269_p5 }
  0x35   :  { %9279 = shalt.err (!%p9276_p9)
}
  0x36   :  { %s9453_s3 = smov 192   ;;  %s9454_s24 = smov 12  }
  0x37   :  { %87 = dma.hbm_to_vmem [thread:$0]  %s9837_s5, 18432, %s82_s16, [#allocation12], %s9453_s3, %s9453_s3, %s9454_s24  }
  0x38   :  { %s9455_s28 = smov [#allocation14]   ;;  %s9280_s12 = scalar_lea.hbm %s9839_s7, 3072 }
  0x39   :  { %s103_s29 = sshll.u32 %s9455_s28, 4  ;;  %p9281_p10 = scmp.ne.s32.totalorder %s9839_s7, %s9280_s12  ;;  %s104_s29 = int_to_ptr.vmem [resolvable:$true] %s103_s29 }
  0x3a   :  { %p9284_p11 = scmp.lt.u32.totalorder %s9280_s12, %s9839_s7 }
  0x3c   :  { %p9286_p12 = pnand %p9284_p11, %p9281_p10 }
  0x3e   :  { %9289 = shalt.err (!%p9286_p12)
}
  0x3f   :  { %s9290_s15 = scalar_lea.vmem %s104_s29, 3072  ;;  %p9295_p0 = scmp.lt.s32.totalorder %s104_s29, %s104_s29 }
  0x40   :  { %p9291_p13 = scmp.ne.s32.totalorder %s104_s29, %s9290_s15  ;;  %p9296_p1 = scmp.lt.s32.totalorder %s9290_s15, %s9290_s15 }
  0x42   :  { %p9297_p2 = por %p9296_p1, %p9295_p0 }
  0x44   :  { %p9298_p3 = pnand %p9297_p2, %p9291_p13 }
  0x46   :  { %9301 = shalt.err (!%p9298_p3)
}
  0x47   :  { %s9456_s5 = smov 64   ;;  %s9457_s16 = smov 4  }
  0x48   :  { %109 = dma.hbm_to_vmem [thread:$0]  %s9839_s7, 3072, %s104_s29, [#allocation15], %s9456_s5, %s9456_s5, %s9457_s16  }
  0x49   :  { %s9458_s19 = smov [#allocation2]   ;;  %s9302_s23 = scalar_lea.hbm %s9832_s0, 512 }
  0x4a   :  { %s25_s20 = sshll.u32 %s9458_s19, 4  ;;  %p9303_p4 = scmp.ne.s32.totalorder %s9832_s0, %s9302_s23  ;;  %s26_s20 = int_to_ptr.vmem [resolvable:$true] %s25_s20 }
  0x4b   :  { %p9306_p5 = scmp.lt.u32.totalorder %s9302_s23, %s9832_s0 }
  0x4d   :  { %p9308_p6 = pnand %p9306_p5, %p9303_p4 }
  0x4f   :  { %9311 = shalt.err (!%p9308_p6)
}
  0x50   :  { %s9312_s27 = scalar_lea.vmem %s26_s20, 512  ;;  %p9317_p8 = scmp.lt.s32.totalorder %s26_s20, %s26_s20 }
  0x51   :  { %p9313_p7 = scmp.ne.s32.totalorder %s26_s20, %s9312_s27  ;;  %p9318_p9 = scmp.lt.s32.totalorder %s9312_s27, %s9312_s27 }
  0x53   :  { %p9319_p10 = por %p9318_p9, %p9317_p8 }
  0x55   :  { %p9320_p11 = pnand %p9319_p10, %p9313_p7 }
  0x57   :  { %9323 = shalt.err (!%p9320_p11)
}
  0x58   :  { %s9459_s7 = smov 256   ;;  %s9460_s28 = smov 16  }
  0x59   :  { %31 = dma.hbm_to_vmem [thread:$0]  %s9832_s0, 512, %s26_s20, [#allocation3], %s9459_s7, %s9459_s7, %s9460_s28  }
  0x5a   :  { %s9461_s11 = smov [#allocation7]   ;;  %s9462_s1 = smov [#allocation10]  }
  0x5b   :  { %s50_s12 = sshll.u32 %s9461_s11, 4  ;;  %s72_s10 = sshll.u32 %s9462_s1, 4  ;;  %s51_s12 = int_to_ptr.vmem [resolvable:$true] %s50_s12  ;;  %s73_s10 = int_to_ptr.vmem [resolvable:$true] %s72_s10 }
  0x5c   :  { %s9324_s15 = scalar_lea.hbm %s9834_s2, 176 }
  0x5d   :  { %p9325_p12 = scmp.ne.s32.totalorder %s9834_s2, %s9324_s15  ;;  %p9328_p13 = scmp.lt.u32.totalorder %s9324_s15, %s9834_s2 }
  0x5f   :  { %p9330_p0 = pnand %p9328_p13, %p9325_p12 }
  0x61   :  { %9333 = shalt.err (!%p9330_p0)
}
  0x62   :  { %s9334_s0 = scalar_lea.vmem %s51_s12, 176  ;;  %s9338_s19 = scalar_lea.vmem %s51_s12, 192 }
  0x63   :  { %p9335_p1 = scmp.ne.s32.totalorder %s51_s12, %s9334_s0  ;;  %p9339_p2 = scmp.lt.s32.totalorder %s51_s12, %s51_s12 }
  0x64   :  { %p9340_p3 = scmp.lt.s32.totalorder %s9338_s19, %s9334_s0 }
  0x66   :  { %p9341_p4 = por %p9340_p3, %p9339_p2 }
  0x68   :  { %p9342_p5 = pnand %p9341_p4, %p9335_p1 }
  0x6a   :  { %9345 = shalt.err (!%p9342_p5)
}
  0x6b   :  { %53 = dma.hbm_to_vmem [thread:$0]  %s9834_s2, 176, %s51_s12, [#allocation6]  }
  0x6c   :  { %s9346_s25 = scalar_lea.hbm %s9836_s4, 96 }
  0x6d   :  { %p9347_p6 = scmp.ne.s32.totalorder %s9836_s4, %s9346_s25  ;;  %p9350_p7 = scmp.lt.u32.totalorder %s9346_s25, %s9836_s4 }
  0x6f   :  { %p9352_p8 = pnand %p9350_p7, %p9347_p6 }
  0x71   :  { %9355 = shalt.err (!%p9352_p8)
}
  0x72   :  { %s9356_s7 = scalar_lea.vmem %s73_s10, 96  ;;  %p9361_p10 = scmp.lt.s32.totalorder %s73_s10, %s73_s10 }
  0x73   :  { %p9357_p9 = scmp.ne.s32.totalorder %s73_s10, %s9356_s7  ;;  %p9362_p11 = scmp.lt.s32.totalorder %s9356_s7, %s9356_s7 }
  0x75   :  { %p9363_p12 = por %p9362_p11, %p9361_p10 }
  0x77   :  { %p9364_p13 = pnand %p9363_p12, %p9357_p9 }
  0x79   :  { %9367 = shalt.err (!%p9364_p13)
}
  0x7a   :  { %75 = dma.hbm_to_vmem [thread:$0]  %s9836_s4, 96, %s73_s10, [#allocation9]  }
  0x7b   :  { %s9463_s29 = smov [#allocation13]   ;;  %s9464_s11 = smov [#allocation16]  }
  0x7c   :  { %s94_s30 = sshll.u32 %s9463_s29, 4  ;;  %s116_s12 = sshll.u32 %s9464_s11, 4  ;;  %s95_s30 = int_to_ptr.vmem [resolvable:$true] %s94_s30  ;;  %s117_s12 = int_to_ptr.vmem [resolvable:$true] %s116_s12 }
  0x7d   :  { %s9368_s14 = scalar_lea.hbm %s9838_s6, 48 }
  0x7e   :  { %p9369_p0 = scmp.ne.s32.totalorder %s9838_s6, %s9368_s14  ;;  %p9372_p1 = scmp.lt.u32.totalorder %s9368_s14, %s9838_s6 }
  0x80   :  { %p9374_p2 = pnand %p9372_p1, %p9369_p0 }
  0x82   :  { %9377 = shalt.err (!%p9374_p2)
}
  0x83   :  { %s9378_s4 = scalar_lea.vmem %s95_s30, 48  ;;  %s9382_s10 = scalar_lea.vmem %s95_s30, 64 }
  0x84   :  { %p9379_p3 = scmp.ne.s32.totalorder %s95_s30, %s9378_s4  ;;  %p9383_p4 = scmp.lt.s32.totalorder %s95_s30, %s95_s30 }
  0x85   :  { %p9384_p5 = scmp.lt.s32.totalorder %s9382_s10, %s9378_s4 }
  0x87   :  { %p9385_p6 = por %p9384_p5, %p9383_p4 }
  0x89   :  { %p9386_p7 = pnand %p9385_p6, %p9379_p3 }
  0x8b   :  { %9389 = shalt.err (!%p9386_p7)
}
  0x8c   :  { %97 = dma.hbm_to_vmem [thread:$0]  %s9838_s6, 48, %s95_s30, [#allocation12]  }
  0x8d   :  { %s9390_s21 = scalar_lea.hbm %s9840_s8, 16 }
  0x8e   :  { %p9391_p8 = scmp.ne.s32.totalorder %s9840_s8, %s9390_s21  ;;  %p9394_p9 = scmp.lt.u32.totalorder %s9390_s21, %s9840_s8 }
  0x90   :  { %p9396_p10 = pnand %p9394_p9, %p9391_p8 }
  0x92   :  { %9399 = shalt.err (!%p9396_p10)
}
  0x93   :  { %s9400_s24 = scalar_lea.vmem %s117_s12, 16  ;;  %s9404_s26 = scalar_lea.vmem %s117_s12, 32 }
  0x94   :  { %p9401_p11 = scmp.ne.s32.totalorder %s117_s12, %s9400_s24  ;;  %p9405_p12 = scmp.lt.s32.totalorder %s117_s12, %s117_s12 }
  0x95   :  { %p9406_p13 = scmp.lt.s32.totalorder %s9404_s26, %s9400_s24 }
  0x97   :  { %p9407_p0 = por %p9406_p13, %p9405_p12 }
  0x99   :  { %p9408_p1 = pnand %p9407_p0, %p9401_p11 }
  0x9b   :  { %9411 = shalt.err (!%p9408_p1)
}
  0x9c   :  { %119 = dma.hbm_to_vmem [thread:$0]  %s9840_s8, 16, %s117_s12, [#allocation15]  }
  0x9d   :  { %9434 = dma.done.wait [#allocation3], 512  }
  0x9e   :  { %9435 = vsyncadd [#allocation3], 4294966784 }
  0x9f   :  { %9436 = dma.done.wait [#allocation6], 17776  }
  0xa0   :  { %9437 = vsyncadd [#allocation6], 4294949520 }
  0xa1   :  { %9438 = dma.done.wait [#allocation9], 67680  }
  0xa2   :  { %9439 = vsyncadd [#allocation9], 4294899616 }
  0xa3   :  { %9440 = dma.done.wait [#allocation12], 18480  }
  0xa4   :  { %9441 = vsyncadd [#allocation12], 4294948816 }
  0xa5   :  { %9442 = dma.done.wait [#allocation15], 3088  }
  0xa6   :  { %9443 = vsyncadd [#allocation15], 4294964208  ;;  %v8003_v0 = vld [vmem:[#allocation5 + $0x4] ss:$44 sps:$4 sm:$0xff]   ;;  %v8005_v1 = vld [vmem:[#allocation5] ss:$44 sps:$4 sm:$0xff]  }
  0xa7   :  { %1101 = vmatprep.subr.bf16.mxu0 %v8003_v0  ;;  %v8006_v2 = vld [vmem:[#allocation5 + $0x5c] ss:$44 sps:$4 sm:$0xff]   ;;  %v8008_v3 = vld [vmem:[#allocation5 + $0x58] ss:$44 sps:$4 sm:$0xff]   ;;  %v8009_v4 = vld [vmem:[#allocation5 + $0xb4] ss:$44 sps:$4 sm:$0xff]  }
  0xa8   :  { %1102 = vmatpush1.bf16.msra.mxu0 %v8005_v1  ;;  %v8011_v5 = vld [vmem:[#allocation5 + $0xb0] ss:$44 sps:$4 sm:$0xff]   ;;  %v8012_v6 = vld [vmem:[#allocation5 + $0x10c] ss:$44 sps:$4 sm:$0xff]   ;;  %v8014_v7 = vld [vmem:[#allocation5 + $0x108] ss:$44 sps:$4 sm:$0xff]  }
  0xa9   :  { %1103 = vmatprep.subr.bf16.mxu0 %v8006_v2  ;;  %v8015_v8 = vld [vmem:[#allocation5 + $0x164] ss:$44 sps:$4 sm:$0xff]   ;;  %v8017_v9 = vld [vmem:[#allocation5 + $0x160] ss:$44 sps:$4 sm:$0xff]   ;;  %v8018_v10 = vld [vmem:[#allocation5 + $0x1bc] ss:$44 sps:$4 sm:$0xff]  }
  0xaa   :  { %v149_v11 = vld [vmem:[#allocation2 + $0x8] sm:$0xff]  ;;  %v151_v12 = vld [vmem:[#allocation2 + $0x18] sm:$0xff]  ;;  %vm1063_vm0 = vcmask 588800   ;;  %v8044_v17 = vld [vmem:[#allocation5 + $0x64] ss:$44 sps:$4 sm:$0xff]   ;;  %vm1067_vm1 = vcmask 1043456  }
  0xab   :  { %v8020_v13 = vld [vmem:[#allocation5 + $0x1b8] ss:$44 sps:$4 sm:$0xff]   ;;  %v9629_v14 = vpack.c.bf16 %v151_v12, %v149_v11  ;;  %v8043_v16 = vld [vmem:[#allocation5 + $0x8] ss:$44 sps:$4 sm:$0xff]   ;;  %v8046_v19 = vld [vmem:[#allocation5 + $0x60] ss:$44 sps:$4 sm:$0xff]  }
  0xac   :  { %1104 = vmatpush1.bf16.msra.mxu0 %v8008_v3  ;;  %v8041_v15 = vld [vmem:[#allocation5 + $0xc] ss:$44 sps:$4 sm:$0xff]   ;;  %v8021_v18 = vld [vmem:[#allocation5 + $0x214] ss:$44 sps:$4 sm:$0xff]   ;;  %v8047_v20 = vld [vmem:[#allocation5 + $0xbc] ss:$44 sps:$4 sm:$0xff]  }
  0xad   :  { %1105 = vmatprep.subr.bf16.mxu0 %v8009_v4  ;;  %7070 = vmatprep.mubr.msk.bf16.mxu0 %vm1063_vm0, %v9629_v14  ;;  %v8023_v21 = vld [vmem:[#allocation5 + $0x210] ss:$44 sps:$4 sm:$0xff]   ;;  %v8024_v22 = vld [vmem:[#allocation5 + $0x26c] ss:$44 sps:$4 sm:$0xff]   ;;  %v8050_v24 = vld [vmem:[#allocation5 + $0x114] ss:$44 sps:$4 sm:$0xff]  }
  0xae   :  { %1144 = vmatprep.subr.bf16.mxu1 %v8041_v15  ;;  %7072 = vmatprep.mubr.msk.bf16.mxu1 %vm1063_vm0, %v9629_v14  ;;  %v8049_v23 = vld [vmem:[#allocation5 + $0xb8] ss:$44 sps:$4 sm:$0xff]   ;;  %v8026_v25 = vld [vmem:[#allocation5 + $0x268] ss:$44 sps:$4 sm:$0xff]   ;;  %v8052_v27 = vld [vmem:[#allocation5 + $0x110] ss:$44 sps:$4 sm:$0xff]  }
  0xaf   :  { %1145 = vmatpush1.bf16.msra.mxu1 %v8043_v16  ;;  %v8027_v26 = vld [vmem:[#allocation5 + $0x2c4] ss:$44 sps:$4 sm:$0xff]   ;;  %v8053_v28 = vld [vmem:[#allocation5 + $0x16c] ss:$44 sps:$4 sm:$0xff]   ;;  %v8030_v30 = vld [vmem:[#allocation5 + $0x31c] ss:$44 sps:$4 sm:$0xff]  }
  0xb0   :  { %1106 = vmatpush1.bf16.msra.mxu0 %v8011_v5  ;;  %1146 = vmatprep.subr.bf16.mxu1 %v8044_v17  ;;  %v8029_v29 = vld [vmem:[#allocation5 + $0x2c0] ss:$44 sps:$4 sm:$0xff]   ;;  %v8055_v31 = vld [vmem:[#allocation5 + $0x168] ss:$44 sps:$4 sm:$0xff]   ;;  %v8056_v32 = vld [vmem:[#allocation5 + $0x1c4] ss:$44 sps:$4 sm:$0xff]  }
  0xb1   :  { %1107 = vmatprep.subr.bf16.mxu0 %v8012_v6  ;;  %v8032_v33 = vld [vmem:[#allocation5 + $0x318] ss:$44 sps:$4 sm:$0xff]   ;;  %v8033_v34 = vld [vmem:[#allocation5 + $0x374] ss:$44 sps:$4 sm:$0xff]   ;;  %v8059_v36 = vld [vmem:[#allocation5 + $0x21c] ss:$44 sps:$4 sm:$0xff]  }
  0xb2   :  { %v8058_v35 = vld [vmem:[#allocation5 + $0x1c0] ss:$44 sps:$4 sm:$0xff]   ;;  %v8035_v37 = vld [vmem:[#allocation5 + $0x370] ss:$44 sps:$4 sm:$0xff]   ;;  %v8061_v40 = vld [vmem:[#allocation5 + $0x218] ss:$44 sps:$4 sm:$0xff]  }
  0xb3   :  { %1147 = vmatpush1.bf16.msra.mxu1 %v8046_v19  ;;  %v8036_v38 = vld [vmem:[#allocation5 + $0x3cc] ss:$44 sps:$4 sm:$0xff]   ;;  %v298_v39 = vld [vmem:[#allocation5 + $0x420] sm:$0xff]  ;;  %v8038_v42 = vld [vmem:[#allocation5 + $0x3c8] ss:$44 sps:$4 sm:$0xff]   ;;  %vm9467_vm2 = vmmov 0  }
  0xb4   :  { %1108 = vmatpush1.bf16.msra.mxu0 %v8014_v7  ;;  %1148 = vmatprep.subr.bf16.mxu1 %v8047_v20  ;;  %v8062_v41 = vld [vmem:[#allocation5 + $0x274] ss:$44 sps:$4 sm:$0xff]   ;;  %v7059_v43 = vcombine.high %v298_v39, %v298_v39  ;;  %v7058_v44 = vcombine.low %v298_v39, %v298_v39  ;;  %v8064_v46 = vld [vmem:[#allocation5 + $0x270] ss:$44 sps:$4 sm:$0xff]   ;;  %v8065_v47 = vld [vmem:[#allocation5 + $0x2cc] ss:$44 sps:$4 sm:$0xff]  }
  0xb5   :  { %1109 = vmatprep.subr.bf16.mxu0 %v8015_v8  ;;  %v148_v45 = vld [vmem:[#allocation2] sm:$0xff]  ;;  %v150_v48 = vld [vmem:[#allocation2 + $0x10] sm:$0xff]  ;;  %v8087_v55 = vld [vmem:[#allocation5 + $0x6c] ss:$44 sps:$4 sm:$0xff]   ;;  %s9468_s8 = smov [#allocation17]  }
  0xb6   :  { %v1069_v49 = vsel %vm1067_vm1, %v7058_v44, 0  ;;  %v8081_v50 = vld [vmem:[#allocation5 + $0x14] ss:$44 sps:$4 sm:$0xff]   ;;  %v9637_v52 = vpack.c.bf16 %v150_v48, %v148_v45  ;;  %v8068_v53 = vld [vmem:[#allocation5 + $0x324] ss:$44 sps:$4 sm:$0xff]   ;;  %v299_v62 = vld [vmem:[#allocation5 + $0x428] sm:$0xff] }
  0xb7   :  { %1149 = vmatpush1.bf16.msra.mxu1 %v8049_v23  ;;  %v8067_v51 = vld [vmem:[#allocation5 + $0x2c8] ss:$44 sps:$4 sm:$0xff]   ;;  %v8079_v54 = vld [vmem:[#allocation5 + $0x10] ss:$44 sps:$4 sm:$0xff]   ;;  %v8070_v56 = vld [vmem:[#allocation5 + $0x320] ss:$44 sps:$4 sm:$0xff]   ;;  %v7061_v2 = vcombine.high %v299_v62, %v299_v62  ;;  %v7060_v3 = vcombine.low %v299_v62, %v299_v62 }
  0xb8   :  { %1110 = vmatpush1.bf16.msra.mxu0 %v8017_v9  ;;  %1150 = vmatprep.subr.bf16.mxu1 %v8050_v24  ;;  %v8071_v57 = vld [vmem:[#allocation5 + $0x37c] ss:$44 sps:$4 sm:$0xff]   ;;  %v8093_v59 = vld [vmem:[#allocation5 + $0xc4] ss:$44 sps:$4 sm:$0xff]   ;;  %v8074_v61 = vld [vmem:[#allocation5 + $0x3d4] ss:$44 sps:$4 sm:$0xff]  }
  0xb9   :  { %1111 = vmatprep.subr.bf16.mxu0 %v8018_v10  ;;  %v8085_v58 = vld [vmem:[#allocation5 + $0x68] ss:$44 sps:$4 sm:$0xff]   ;;  %v8073_v60 = vld [vmem:[#allocation5 + $0x378] ss:$44 sps:$4 sm:$0xff]   ;;  %v8091_v63 = vld [vmem:[#allocation5 + $0xc0] ss:$44 sps:$4 sm:$0xff]  }
  0xba   :  { %v8099_v0 = vld [vmem:[#allocation5 + $0x11c] ss:$44 sps:$4 sm:$0xff]   ;;  %v8097_v4 = vld [vmem:[#allocation5 + $0x118] ss:$44 sps:$4 sm:$0xff]   ;;  %v8105_v5 = vld [vmem:[#allocation5 + $0x174] ss:$44 sps:$4 sm:$0xff]  }
  0xbb   :  { %1151 = vmatpush1.bf16.msra.mxu1 %v8052_v27  ;;  %v8076_v1 = vld [vmem:[#allocation5 + $0x3d0] ss:$44 sps:$4 sm:$0xff]   ;;  %v1075_v6 = vsel %vm1067_vm1, %v7060_v3, 0  ;;  %v8111_v9 = vld [vmem:[#allocation5 + $0x1cc] ss:$44 sps:$4 sm:$0xff]   ;;  %s6910_s7 = sshll.u32 %s9468_s8, 4  ;;  %s6911_s7 = int_to_ptr.vmem [resolvable:$true] %s6910_s7 }
  0xbc   :  { %1112 = vmatpush1.bf16.msra.mxu0 %v8020_v13  ;;  %1152 = vmatprep.subr.bf16.mxu1 %v8053_v28  ;;  %v8084_v7 = vld [vmem:[#allocation5 + $0x1c] ss:$44 sps:$4 sm:$0xff]   ;;  %v8082_v10 = vld [vmem:[#allocation5 + $0x18] ss:$44 sps:$4 sm:$0xff]   ;;  %v8090_v11 = vld [vmem:[#allocation5 + $0x74] ss:$44 sps:$4 sm:$0xff]   ;;  %p9417_p3 = scmp.lt.s32.totalorder %s6911_s7, %s6911_s7 }
  0xbd   :  { %1113 = vmatprep.subr.bf16.mxu0 %v8021_v18  ;;  %v8103_v8 = vld [vmem:[#allocation5 + $0x170] ss:$44 sps:$4 sm:$0xff]   ;;  %v8109_v12 = vld [vmem:[#allocation5 + $0x1c8] ss:$44 sps:$4 sm:$0xff]   ;;  %v8096_v16 = vld [vmem:[#allocation5 + $0xcc] ss:$44 sps:$4 sm:$0xff]  }
  0xbe   :  { %v8117_v13 = vld [vmem:[#allocation5 + $0x224] ss:$44 sps:$4 sm:$0xff]   ;;  %v8115_v17 = vld [vmem:[#allocation5 + $0x220] ss:$44 sps:$4 sm:$0xff]   ;;  %v8123_v18 = vld [vmem:[#allocation5 + $0x27c] ss:$44 sps:$4 sm:$0xff]  }
  0xbf   :  { %1153 = vmatpush1.bf16.msra.mxu1 %v8055_v31  ;;  %v8088_v15 = vld [vmem:[#allocation5 + $0x70] ss:$44 sps:$4 sm:$0xff]   ;;  %v8094_v19 = vld [vmem:[#allocation5 + $0xc8] ss:$44 sps:$4 sm:$0xff]   ;;  %v8100_v23 = vld [vmem:[#allocation5 + $0x120] ss:$44 sps:$4 sm:$0xff]  }
  0xc0   :  { %1114 = vmatpush1.bf16.msra.mxu0 %v8023_v21  ;;  %1154 = vmatprep.subr.bf16.mxu1 %v8056_v32  ;;  %v8102_v20 = vld [vmem:[#allocation5 + $0x124] ss:$44 sps:$4 sm:$0xff]   ;;  %v8108_v24 = vld [vmem:[#allocation5 + $0x17c] ss:$44 sps:$4 sm:$0xff]   ;;  %v8114_v28 = vld [vmem:[#allocation5 + $0x1d4] ss:$44 sps:$4 sm:$0xff]  }
  0xc1   :  { %1115 = vmatprep.subr.bf16.mxu0 %v8024_v22  ;;  %v8121_v21 = vld [vmem:[#allocation5 + $0x278] ss:$44 sps:$4 sm:$0xff]   ;;  %v8129_v22 = vld [vmem:[#allocation5 + $0x2d4] ss:$44 sps:$4 sm:$0xff]   ;;  %v8112_v31 = vld [vmem:[#allocation5 + $0x1d0] ss:$44 sps:$4 sm:$0xff]  }
  0xc2   :  { %v8106_v27 = vld [vmem:[#allocation5 + $0x178] ss:$44 sps:$4 sm:$0xff]   ;;  %v8161_v48 = vld [vmem:[#allocation5 + $0x7c] ss:$44 sps:$4 sm:$0xff]   ;;  %s9412_s2 = scalar_lea.vmem %s6911_s7, 256 }
  0xc3   :  { %1155 = vmatpush1.bf16.msra.mxu1 %v8058_v35  ;;  %v8120_v32 = vld [vmem:[#allocation5 + $0x22c] ss:$44 sps:$4 sm:$0xff]   ;;  %v8118_v35 = vld [vmem:[#allocation5 + $0x228] ss:$44 sps:$4 sm:$0xff]   ;;  %v8157_v44 = vld [vmem:[#allocation5 + $0x24] ss:$44 sps:$4 sm:$0xff]   ;;  %p9413_p2 = scmp.ne.s32.totalorder %s6911_s7, %s9412_s2  ;;  %p9418_p4 = scmp.lt.s32.totalorder %s9412_s2, %s9412_s2 }
  0xc4   :  { %1116 = vmatpush1.bf16.msra.mxu0 %v8026_v25  ;;  %1156 = vmatprep.subr.bf16.mxu1 %v8059_v36  ;;  %v8127_v25 = vld [vmem:[#allocation5 + $0x2d0] ss:$44 sps:$4 sm:$0xff]   ;;  %v8130_v45 = vld [vmem:[#allocation5 + $0x2d8] ss:$44 sps:$4 sm:$0xff]   ;;  %v8167_v62 = vld [vmem:[#allocation5 + $0x128] ss:$44 sps:$4 sm:$0xff]  }
  0xc5   :  { %1117 = vmatprep.subr.bf16.mxu0 %v8027_v26  ;;  %v8135_v26 = vld [vmem:[#allocation5 + $0x32c] ss:$44 sps:$4 sm:$0xff]   ;;  %v300_v36 = vld [vmem:[#allocation5 + $0x430] sm:$0xff]  ;;  %p9419_p5 = por %p9418_p4, %p9417_p3 }
  0xc6   :  { %v7063_v39 = vcombine.high %v300_v36, %v300_v36  ;;  %v8158_v3 = vld [vmem:[#allocation5 + $0x28] ss:$44 sps:$4 sm:$0xff]  }
  0xc7   :  { %1157 = vmatpush1.bf16.msra.mxu1 %v8061_v40  ;;  %v7062_v40 = vcombine.low %v300_v36, %v300_v36  ;;  %v8198_v36 = vld [vmem:[#allocation5 + $0x398] ss:$44 sps:$4 sm:$0xff]   ;;  %p9420_p6 = pnand %p9419_p5, %p9413_p2 }
  0xc8   :  { %1118 = vmatpush1.bf16.msra.mxu0 %v8029_v29  ;;  %1158 = vmatprep.subr.bf16.mxu1 %v8062_v41  ;;  %v8133_v29 = vld [vmem:[#allocation5 + $0x328] ss:$44 sps:$4 sm:$0xff]   ;;  %v8124_v41 = vld [vmem:[#allocation5 + $0x280] ss:$44 sps:$4 sm:$0xff]  }
  0xc9   :  { %1119 = vmatprep.subr.bf16.mxu0 %v8030_v30  ;;  %v8141_v30 = vld [vmem:[#allocation5 + $0x384] ss:$44 sps:$4 sm:$0xff]  }
  0xcb   :  { %1159 = vmatpush1.bf16.msra.mxu1 %v8064_v46  ;;  %v8138_v46 = vld [vmem:[#allocation5 + $0x334] ss:$44 sps:$4 sm:$0xff]  }
  0xcc   :  { %1120 = vmatpush1.bf16.msra.mxu0 %v8032_v33  ;;  %1160 = vmatprep.subr.bf16.mxu1 %v8065_v47  ;;  %v8139_v33 = vld [vmem:[#allocation5 + $0x380] ss:$44 sps:$4 sm:$0xff]  }
  0xcd   :  { %1121 = vmatprep.subr.bf16.mxu0 %v8033_v34  ;;  %v8147_v34 = vld [vmem:[#allocation5 + $0x3dc] ss:$44 sps:$4 sm:$0xff]   ;;  %v8155_v47 = vld [vmem:[#allocation5 + $0x20] ss:$44 sps:$4 sm:$0xff]  }
  0xcf   :  { %1161 = vmatpush1.bf16.msra.mxu1 %v8067_v51  ;;  %v8159_v51 = vld [vmem:[#allocation5 + $0x78] ss:$44 sps:$4 sm:$0xff]  }
  0xd0   :  { %1122 = vmatpush1.bf16.msra.mxu0 %v8035_v37  ;;  %1162 = vmatprep.subr.bf16.mxu1 %v8068_v53  ;;  %v8126_v37 = vld [vmem:[#allocation5 + $0x284] ss:$44 sps:$4 sm:$0xff]   ;;  %v8165_v53 = vld [vmem:[#allocation5 + $0xd4] ss:$44 sps:$4 sm:$0xff]  }
  0xd1   :  { %1123 = vmatprep.subr.bf16.mxu0 %v8036_v38  ;;  %v8145_v38 = vld [vmem:[#allocation5 + $0x3d8] ss:$44 sps:$4 sm:$0xff]  }
  0xd3   :  { %1163 = vmatpush1.bf16.msra.mxu1 %v8070_v56  ;;  %v301_v56 = vld [vmem:[#allocation5 + $0x438] sm:$0xff] }
  0xd4   :  { %1124 = vmatpush1.bf16.msra.mxu0 %v8038_v42  ;;  %1164 = vmatprep.subr.bf16.mxu1 %v8071_v57  ;;  %v8132_v42 = vld [vmem:[#allocation5 + $0x2dc] ss:$44 sps:$4 sm:$0xff]  }
  0xd5   :  { %7069 = vmatprep.subr.msk.bf16.mxu0 %vm1067_vm1, %v7059_v43  ;;  %v1081_v43 = vsel %vm1067_vm1, %v7062_v40, 0  ;;  %v8163_v57 = vld [vmem:[#allocation5 + $0xd0] ss:$44 sps:$4 sm:$0xff]   ;;  %v8205_v40 = vld [vmem:[#allocation5 + $0x448] ss:$0 sps:$4 sm:$0xff]  }
  0xd7   :  { %1165 = vmatpush1.bf16.msra.mxu1 %v8073_v60  ;;  %v7065_v60 = vcombine.high %v301_v56, %v301_v56 }
  0xd8   :  { %1126 = vmatpush1.bf16.msra.mxu0 %v1069_v49  ;;  %1166 = vmatprep.subr.bf16.mxu1 %v8074_v61  ;;  %v8136_v49 = vld [vmem:[#allocation5 + $0x330] ss:$44 sps:$4 sm:$0xff]   ;;  %v7064_v61 = vcombine.low %v301_v56, %v301_v56  ;;  %v8221_v56 = vld [vmem:[#allocation8 + $0x68] ss:$24 sps:$4 sm:$0xff]  }
  0xd9   :  { %1187 = vmatprep.subr.bf16.mxu0 %v8081_v50  ;;  %v8144_v50 = vld [vmem:[#allocation5 + $0x38c] ss:$44 sps:$4 sm:$0xff]  }
  0xdb   :  { %1134 = vmatmul.mubr.bf16.vlgmr.msra.gmra.mrb[0].mxu0 %v9637_v52  ;;  %1167 = vmatpush1.bf16.msra.mxu1 %v8076_v1  ;;  %v8171_v1 = vld [vmem:[#allocation5 + $0x180] ss:$44 sps:$4 sm:$0xff]  }
  0xdc   :  { %1188 = vmatpush1.bf16.msra.mxu0 %v8079_v54  ;;  %7074 = vmatprep.mubr.msk.bf16.mxu0 %vm1063_vm0, %v9629_v14  ;;  %v8142_v54 = vld [vmem:[#allocation5 + $0x388] ss:$44 sps:$4 sm:$0xff]  }
  0xdd   :  { %1189 = vmatprep.subr.bf16.mxu0 %v8087_v55  ;;  %7071 = vmatprep.subr.msk.bf16.mxu1 %vm1067_vm1, %v7061_v2  ;;  %v8150_v55 = vld [vmem:[#allocation5 + $0x3e4] ss:$44 sps:$4 sm:$0xff]   ;;  %v8177_v2 = vld [vmem:[#allocation5 + $0x1dc] ss:$44 sps:$4 sm:$0xff]  }
  0xdf   :  { %1169 = vmatpush1.bf16.msra.mxu1 %v1075_v6  ;;  %v8181_v6 = vld [vmem:[#allocation5 + $0x234] ss:$44 sps:$4 sm:$0xff]  }
  0xe0   :  { %1190 = vmatpush1.bf16.msra.mxu0 %v8085_v58  ;;  %1230 = vmatprep.subr.bf16.mxu1 %v8084_v7  ;;  %v8169_v58 = vld [vmem:[#allocation5 + $0x12c] ss:$44 sps:$4 sm:$0xff]  }
  0xe1   :  { %1191 = vmatprep.subr.bf16.mxu0 %v8093_v59  ;;  %v8148_v59 = vld [vmem:[#allocation5 + $0x3e0] ss:$44 sps:$4 sm:$0xff]  }
  0xe2   :  { %1177 = vmatmul.mubr.bf16.vlgmr.msra.gmra.mrb[0].mxu1 %v9637_v52  ;;  %v8162_v7 = vld [vmem:[#allocation5 + $0x80] ss:$44 sps:$4 sm:$0xff]  }
  0xe3   :  { %1231 = vmatpush1.bf16.msra.mxu1 %v8082_v10  ;;  %7076 = vmatprep.mubr.msk.bf16.mxu1 %vm1063_vm0, %v9629_v14  ;;  %v8166_v10 = vld [vmem:[#allocation5 + $0xd8] ss:$44 sps:$4 sm:$0xff]  }
  0xe4   :  { %1192 = vmatpush1.bf16.msra.mxu0 %v8091_v63  ;;  %1232 = vmatprep.subr.bf16.mxu1 %v8090_v11  ;;  %v8173_v63 = vld [vmem:[#allocation5 + $0x184] ss:$44 sps:$4 sm:$0xff]   ;;  %v8183_v11 = vld [vmem:[#allocation5 + $0x288] ss:$44 sps:$4 sm:$0xff]  }
  0xe5   :  { %1193 = vmatprep.subr.bf16.mxu0 %v8099_v0  ;;  %v1087_v0 = vsel %vm1067_vm1, %v7064_v61, 0  ;;  %v8254_v61 = vld [vmem:[#allocation8 + $0x180] ss:$24 sps:$4 sm:$0xff]  }
  0xe7   :  { %1233 = vmatpush1.bf16.msra.mxu1 %v8088_v15  ;;  %v8187_v15 = vld [vmem:[#allocation5 + $0x2e0] ss:$44 sps:$4 sm:$0xff]  }
  0xe8   :  { %1194 = vmatpush1.bf16.msra.mxu0 %v8097_v4  ;;  %1234 = vmatprep.subr.bf16.mxu1 %v8096_v16  ;;  %v9465_v4 = vmov 0   ;;  %v8174_v16 = vld [vmem:[#allocation5 + $0x188] ss:$44 sps:$4 sm:$0xff]  }
  0xe9   :  { %1195 = vmatprep.subr.bf16.mxu0 %v8105_v5  ;;  %v8175_v5 = vld [vmem:[#allocation5 + $0x1d8] ss:$44 sps:$4 sm:$0xff]  }
  0xeb   :  { %1235 = vmatpush1.bf16.msra.mxu1 %v8094_v19  ;;  %v8178_v19 = vld [vmem:[#allocation5 + $0x1e0] ss:$44 sps:$4 sm:$0xff]  }
  0xec   :  { %1196 = vmatpush1.bf16.msra.mxu0 %v8103_v8  ;;  %1236 = vmatprep.subr.bf16.mxu1 %v8102_v20  ;;  %v8179_v8 = vld [vmem:[#allocation5 + $0x230] ss:$44 sps:$4 sm:$0xff]  }
  0xed   :  { %1197 = vmatprep.subr.bf16.mxu0 %v8111_v9  ;;  %v8185_v9 = vld [vmem:[#allocation5 + $0x28c] ss:$44 sps:$4 sm:$0xff]   ;;  %v8195_v20 = vld [vmem:[#allocation5 + $0x390] ss:$44 sps:$4 sm:$0xff]  }
  0xef   :  { %1237 = vmatpush1.bf16.msra.mxu1 %v8100_v23  ;;  %v302_v23 = vld [vmem:[#allocation5 + $0x440] sm:$0xff] }
  0xf0   :  { %1198 = vmatpush1.bf16.msra.mxu0 %v8109_v12  ;;  %1238 = vmatprep.subr.bf16.mxu1 %v8108_v24  ;;  %v8170_v12 = vld [vmem:[#allocation5 + $0x130] ss:$44 sps:$4 sm:$0xff]   ;;  %v8199_v24 = vld [vmem:[#allocation5 + $0x3e8] ss:$44 sps:$4 sm:$0xff]  }
  0xf1   :  { %1199 = vmatprep.subr.bf16.mxu0 %v8117_v13  ;;  %v8189_v13 = vld [vmem:[#allocation5 + $0x2e4] ss:$44 sps:$4 sm:$0xff]  }
  0xf3   :  { %1239 = vmatpush1.bf16.msra.mxu1 %v8106_v27  ;;  %v8186_v27 = vld [vmem:[#allocation5 + $0x290] ss:$44 sps:$4 sm:$0xff]  }
  0xf4   :  { %1200 = vmatpush1.bf16.msra.mxu0 %v8115_v17  ;;  %1240 = vmatprep.subr.bf16.mxu1 %v8114_v28  ;;  %v8191_v17 = vld [vmem:[#allocation5 + $0x338] ss:$44 sps:$4 sm:$0xff]   ;;  %v8208_v28 = vld [vmem:[#allocation8 + $0x4] ss:$24 sps:$4 sm:$0xff]  }
  0xf5   :  { %1201 = vmatprep.subr.bf16.mxu0 %v8123_v18  ;;  %v8197_v18 = vld [vmem:[#allocation5 + $0x394] ss:$44 sps:$4 sm:$0xff]  }
  0xf7   :  { %1241 = vmatpush1.bf16.msra.mxu1 %v8112_v31  ;;  %v8206_v31 = vld [vmem:[#allocation8] ss:$24 sps:$4 sm:$0xff]  }
  0xf8   :  { %1202 = vmatpush1.bf16.msra.mxu0 %v8121_v21  ;;  %1242 = vmatprep.subr.bf16.mxu1 %v8120_v32  ;;  %v8201_v21 = vld [vmem:[#allocation5 + $0x3ec] ss:$44 sps:$4 sm:$0xff]  }
  0xf9   :  { %1203 = vmatprep.subr.bf16.mxu0 %v8129_v22  ;;  %v8182_v22 = vld [vmem:[#allocation5 + $0x238] ss:$44 sps:$4 sm:$0xff]  }
  0xfa   :  { %v8214_v32 = vld [vmem:[#allocation8 + $0x34] ss:$24 sps:$4 sm:$0xff]  }
  0xfb   :  { %1243 = vmatpush1.bf16.msra.mxu1 %v8118_v35  ;;  %v8220_v35 = vld [vmem:[#allocation8 + $0x64] ss:$24 sps:$4 sm:$0xff]  }
  0xfc   :  { %1204 = vmatpush1.bf16.msra.mxu0 %v8127_v25  ;;  %1244 = vmatprep.subr.bf16.mxu1 %v8126_v37  ;;  %v7067_v25 = vcombine.high %v302_v23, %v302_v23  ;;  %v8218_v37 = vld [vmem:[#allocation8 + $0x60] ss:$24 sps:$4 sm:$0xff]  }
  0xfd   :  { %1205 = vmatprep.subr.bf16.mxu0 %v8135_v26  ;;  %v7066_v26 = vcombine.low %v302_v23, %v302_v23  ;;  %v8298_v23 = vld [vmem:[#allocation8 + $0x2d4] ss:$24 sps:$4 sm:$0xff]  }
  0xff   :  { %1245 = vmatpush1.bf16.msra.mxu1 %v8124_v41  ;;  %v8224_v41 = vld [vmem:[#allocation8 + $0x90] ss:$24 sps:$4 sm:$0xff]  }
 0x100   :  { %1206 = vmatpush1.bf16.msra.mxu0 %v8133_v29  ;;  %1246 = vmatprep.subr.bf16.mxu1 %v8132_v42  ;;  %v1093_v29 = vsel %vm1067_vm1, %v7066_v26, 0  ;;  %v8232_v42 = vld [vmem:[#allocation8 + $0xc4] ss:$24 sps:$4 sm:$0xff]   ;;  %v8296_v26 = vld [vmem:[#allocation8 + $0x2d0] ss:$24 sps:$4 sm:$0xff]  }
 0x101   :  { %1207 = vmatprep.subr.bf16.mxu0 %v8141_v30  ;;  %v8190_v30 = vld [vmem:[#allocation5 + $0x2e8] ss:$44 sps:$4 sm:$0xff]  }
 0x103   :  { %1247 = vmatpush1.bf16.msra.mxu1 %v8130_v45  ;;  %v8230_v45 = vld [vmem:[#allocation8 + $0xc0] ss:$24 sps:$4 sm:$0xff]  }
 0x104   :  { %1208 = vmatpush1.bf16.msra.mxu0 %v8139_v33  ;;  %1248 = vmatprep.subr.bf16.mxu1 %v8138_v46  ;;  %v8194_v33 = vld [vmem:[#allocation5 + $0x340] ss:$44 sps:$4 sm:$0xff]  }
 0x105   :  { %1209 = vmatprep.subr.bf16.mxu0 %v8147_v34  ;;  %v8212_v34 = vld [vmem:[#allocation8 + $0x30] ss:$24 sps:$4 sm:$0xff]   ;;  %v8238_v46 = vld [vmem:[#allocation8 + $0xf4] ss:$24 sps:$4 sm:$0xff]  }
 0x107   :  { %1249 = vmatpush1.bf16.msra.mxu1 %v8136_v49  ;;  %v8236_v49 = vld [vmem:[#allocation8 + $0xf0] ss:$24 sps:$4 sm:$0xff]  }
 0x108   :  { %1210 = vmatpush1.bf16.msra.mxu0 %v8145_v38  ;;  %1250 = vmatprep.subr.bf16.mxu1 %v8144_v50  ;;  %v8226_v38 = vld [vmem:[#allocation8 + $0x94] ss:$24 sps:$4 sm:$0xff]   ;;  %v8244_v50 = vld [vmem:[#allocation8 + $0x124] ss:$24 sps:$4 sm:$0xff]  }
 0x109   :  { %7073 = vmatprep.subr.msk.bf16.mxu0 %vm1067_vm1, %v7063_v39  ;;  %v8202_v39 = vld [vmem:[#allocation5 + $0x3f0] ss:$44 sps:$4 sm:$0xff]  }
 0x10b   :  { %1251 = vmatpush1.bf16.msra.mxu1 %v8142_v54  ;;  %v8242_v54 = vld [vmem:[#allocation8 + $0x120] ss:$24 sps:$4 sm:$0xff]  }
 0x10c   :  { %1212 = vmatpush1.bf16.msra.mxu0 %v1081_v43  ;;  %1252 = vmatprep.subr.bf16.mxu1 %v8150_v55  ;;  %v8211_v43 = vld [vmem:[#allocation8 + $0xc] ss:$24 sps:$4 sm:$0xff]  }
 0x10d   :  { %1273 = vmatprep.subr.bf16.mxu0 %v8157_v44  ;;  %v1099_v44 = vsel %vm1067_vm1, %v8205_v40, 0  ;;  %v8250_v55 = vld [vmem:[#allocation8 + $0x154] ss:$24 sps:$4 sm:$0xff]  }
 0x10e   :  { %v9677_v40 = vld [vmem:[#allocation7] sm:$0xff] }
 0x10f   :  { %1220 = vmatmul.mubr.bf16.vlgmr.msra.gmra.mrb[4].mxu0 %v9637_v52  ;;  %1253 = vmatpush1.bf16.msra.mxu1 %v8148_v59  ;;  %v8256_v59 = vld [vmem:[#allocation8 + $0x184] ss:$24 sps:$4 sm:$0xff]  }
 0x110   :  { %1274 = vmatpush1.bf16.msra.mxu0 %v8155_v47  ;;  %7078 = vmatprep.mubr.msk.bf16.mxu0 %vm1063_vm0, %v9629_v14  ;;  %v8209_v47 = vld [vmem:[#allocation8 + $0x8] ss:$24 sps:$4 sm:$0xff]  }
 0x111   :  { %1275 = vmatprep.subr.bf16.mxu0 %v8161_v48  ;;  %7075 = vmatprep.subr.msk.bf16.mxu1 %vm1067_vm1, %v7065_v60  ;;  %v8217_v48 = vld [vmem:[#allocation8 + $0x3c] ss:$24 sps:$4 sm:$0xff]   ;;  %v8227_v60 = vld [vmem:[#allocation8 + $0x98] ss:$24 sps:$4 sm:$0xff]  }
 0x113   :  { %1255 = vmatpush1.bf16.msra.mxu1 %v1087_v0  ;;  %v8241_v0 = vld [vmem:[#allocation8 + $0xfc] ss:$24 sps:$4 sm:$0xff]  }
 0x114   :  { %1276 = vmatpush1.bf16.msra.mxu0 %v8159_v51  ;;  %1316 = vmatprep.subr.bf16.mxu1 %v9465_v4  ;;  %v8215_v51 = vld [vmem:[#allocation8 + $0x38] ss:$24 sps:$4 sm:$0xff]  }
 0x115   :  { %1277 = vmatprep.subr.bf16.mxu0 %v8165_v53  ;;  %v8223_v53 = vld [vmem:[#allocation8 + $0x6c] ss:$24 sps:$4 sm:$0xff]  }
 0x116   :  { %1263 = vmatmul.mubr.bf16.vlgmr.msra.gmra.mrb[4].mxu1 %v9637_v52 }
 0x117   :  { %1317 = vmatpush1.bf16.msra.mxu1 %v8158_v3  ;;  %7079 = vmatprep.mubr.msk.bf16.mxu1 %vm1063_vm0, %v9629_v14  ;;  %v8193_v14 = vld [vmem:[#allocation5 + $0x33c] ss:$44 sps:$4 sm:$0xff]  }
 0x118   :  { %1278 = vmatpush1.bf16.msra.mxu0 %v8163_v57  ;;  %1318 = vmatprep.subr.bf16.mxu1 %v9465_v4  ;;  %v8229_v57 = vld [vmem:[#allocation8 + $0x9c] ss:$24 sps:$4 sm:$0xff]   ;;  %v8239_v3 = vld [vmem:[#allocation8 + $0xf8] ss:$24 sps:$4 sm:$0xff]  }
 0x119   :  { %1279 = vmatprep.subr.bf16.mxu0 %v8169_v58  ;;  %v8248_v58 = vld [vmem:[#allocation8 + $0x150] ss:$24 sps:$4 sm:$0xff]  }
 0x11b   :  { %1319 = vmatpush1.bf16.msra.mxu1 %v8162_v7  ;;  %v8274_v7 = vld [vmem:[#allocation8 + $0x214] ss:$24 sps:$4 sm:$0xff]  }
 0x11c   :  { %1280 = vmatpush1.bf16.msra.mxu0 %v8167_v62  ;;  %1320 = vmatprep.subr.bf16.mxu1 %v9465_v4  ;;  %v8262_v62 = vld [vmem:[#allocation8 + $0x1b4] ss:$24 sps:$4 sm:$0xff]  }
 0x11d   :  { %1281 = vmatprep.subr.bf16.mxu0 %v8173_v63  ;;  %v8233_v63 = vld [vmem:[#allocation8 + $0xc8] ss:$24 sps:$4 sm:$0xff]  }
 0x11f   :  { %1321 = vmatpush1.bf16.msra.mxu1 %v8166_v10  ;;  %v8272_v10 = vld [vmem:[#allocation8 + $0x210] ss:$24 sps:$4 sm:$0xff]  }
 0x120   :  { %1282 = vmatpush1.bf16.msra.mxu0 %v8171_v1  ;;  %1322 = vmatprep.subr.bf16.mxu1 %v9465_v4  ;;  %v8260_v1 = vld [vmem:[#allocation8 + $0x1b0] ss:$24 sps:$4 sm:$0xff]  }
 0x121   :  { %1283 = vmatprep.subr.bf16.mxu0 %v8177_v2  ;;  %v8268_v2 = vld [vmem:[#allocation8 + $0x1e4] ss:$24 sps:$4 sm:$0xff]  }
 0x123   :  { %1323 = vmatpush1.bf16.msra.mxu1 %v8170_v12  ;;  %v8251_v12 = vld [vmem:[#allocation8 + $0x158] ss:$24 sps:$4 sm:$0xff]  }
 0x124   :  { %1284 = vmatpush1.bf16.msra.mxu0 %v8175_v5  ;;  %1324 = vmatprep.subr.bf16.mxu1 %v9465_v4  ;;  %v8247_v5 = vld [vmem:[#allocation8 + $0x12c] ss:$24 sps:$4 sm:$0xff]  }
 0x125   :  { %1285 = vmatprep.subr.bf16.mxu0 %v8181_v6  ;;  %v8266_v6 = vld [vmem:[#allocation8 + $0x1e0] ss:$24 sps:$4 sm:$0xff]  }
 0x127   :  { %1325 = vmatpush1.bf16.msra.mxu1 %v8174_v16  ;;  %v8257_v16 = vld [vmem:[#allocation8 + $0x188] ss:$24 sps:$4 sm:$0xff]  }
 0x128   :  { %1286 = vmatpush1.bf16.msra.mxu0 %v8179_v8  ;;  %1326 = vmatprep.subr.bf16.mxu1 %v9465_v4  ;;  %v8245_v8 = vld [vmem:[#allocation8 + $0x128] ss:$24 sps:$4 sm:$0xff]  }
 0x129   :  { %1287 = vmatprep.subr.bf16.mxu0 %v8185_v9  ;;  %v8253_v9 = vld [vmem:[#allocation8 + $0x15c] ss:$24 sps:$4 sm:$0xff]  }
 0x12b   :  { %1327 = vmatpush1.bf16.msra.mxu1 %v8178_v19  ;;  %v8292_v19 = vld [vmem:[#allocation8 + $0x2a4] ss:$24 sps:$4 sm:$0xff]  }
 0x12c   :  { %1288 = vmatpush1.bf16.msra.mxu0 %v8183_v11  ;;  %1328 = vmatprep.subr.bf16.mxu1 %v9465_v4  ;;  %v8280_v11 = vld [vmem:[#allocation8 + $0x244] ss:$24 sps:$4 sm:$0xff]  }
 0x12d   :  { %1289 = vmatprep.subr.bf16.mxu0 %v8189_v13  ;;  %v8259_v13 = vld [vmem:[#allocation8 + $0x18c] ss:$24 sps:$4 sm:$0xff]  }
 0x12f   :  { %1329 = vmatpush1.bf16.msra.mxu1 %v8182_v22  ;;  %v8290_v22 = vld [vmem:[#allocation8 + $0x2a0] ss:$24 sps:$4 sm:$0xff]  }
 0x130   :  { %1290 = vmatpush1.bf16.msra.mxu0 %v8187_v15  ;;  %1330 = vmatprep.subr.bf16.mxu1 %v9465_v4  ;;  %v8278_v15 = vld [vmem:[#allocation8 + $0x240] ss:$24 sps:$4 sm:$0xff]  }
 0x131   :  { %1291 = vmatprep.subr.bf16.mxu0 %v8193_v14  ;;  %v8286_v14 = vld [vmem:[#allocation8 + $0x274] ss:$24 sps:$4 sm:$0xff]  }
 0x133   :  { %1331 = vmatpush1.bf16.msra.mxu1 %v8186_v27  ;;  %v8304_v27 = vld [vmem:[#allocation8 + $0x304] ss:$24 sps:$4 sm:$0xff]  }
 0x134   :  { %1292 = vmatpush1.bf16.msra.mxu0 %v8191_v17  ;;  %1332 = vmatprep.subr.bf16.mxu1 %v9465_v4  ;;  %v8265_v17 = vld [vmem:[#allocation8 + $0x1bc] ss:$24 sps:$4 sm:$0xff]  }
 0x135   :  { %1293 = vmatprep.subr.bf16.mxu0 %v8197_v18  ;;  %v8284_v18 = vld [vmem:[#allocation8 + $0x270] ss:$24 sps:$4 sm:$0xff]  }
 0x137   :  { %1333 = vmatpush1.bf16.msra.mxu1 %v8190_v30  ;;  %v8281_v30 = vld [vmem:[#allocation8 + $0x248] ss:$24 sps:$4 sm:$0xff]  }
 0x138   :  { %1294 = vmatpush1.bf16.msra.mxu0 %v8195_v20  ;;  %1334 = vmatprep.subr.bf16.mxu1 %v9465_v4  ;;  %v8263_v20 = vld [vmem:[#allocation8 + $0x1b8] ss:$24 sps:$4 sm:$0xff]  }
 0x139   :  { %1295 = vmatprep.subr.bf16.mxu0 %v8201_v21  ;;  %v8271_v21 = vld [vmem:[#allocation8 + $0x1ec] ss:$24 sps:$4 sm:$0xff]  }
 0x13b   :  { %1335 = vmatpush1.bf16.msra.mxu1 %v8194_v33  ;;  %v8295_v33 = vld [vmem:[#allocation8 + $0x2ac] ss:$24 sps:$4 sm:$0xff]  }
 0x13c   :  { %1296 = vmatpush1.bf16.msra.mxu0 %v8199_v24  ;;  %1336 = vmatprep.subr.bf16.mxu1 %v9465_v4  ;;  %v8269_v24 = vld [vmem:[#allocation8 + $0x1e8] ss:$24 sps:$4 sm:$0xff]  }
 0x13d   :  { %7077 = vmatprep.subr.msk.bf16.mxu0 %vm1067_vm1, %v7067_v25  ;;  %v8277_v25 = vld [vmem:[#allocation8 + $0x21c] ss:$24 sps:$4 sm:$0xff]  }
 0x13f   :  { %1337 = vmatpush1.bf16.msra.mxu1 %v8198_v36  ;;  %v8299_v36 = vld [vmem:[#allocation8 + $0x2d8] ss:$24 sps:$4 sm:$0xff]  }
 0x140   :  { %1298 = vmatpush1.bf16.msra.mxu0 %v1093_v29  ;;  %1338 = vmatprep.subr.bf16.mxu1 %v9465_v4  ;;  %v8283_v29 = vld [vmem:[#allocation8 + $0x24c] ss:$24 sps:$4 sm:$0xff]  }
 0x141   :  { %4590 = vmatprep.subr.bf16.mxu0 %v8208_v28  ;;  %v8275_v28 = vld [vmem:[#allocation8 + $0x218] ss:$24 sps:$4 sm:$0xff]  }
 0x143   :  { %1306 = vmatmul.mubr.bf16.vlgmr.msra.gmra.mrb[8].mxu0 %v9637_v52  ;;  %1339 = vmatpush1.bf16.msra.mxu1 %v8202_v39 }
 0x144   :  { %4591 = vmatpush1.bf16.msra.mxu0 %v8206_v31  ;;  %1340 = vmatprep.subr.bf16.mxu1 %v9465_v4  ;;  %v8289_v31 = vld [vmem:[#allocation8 + $0x27c] ss:$24 sps:$4 sm:$0xff]  }
 0x145   :  { %4592 = vmatprep.subr.bf16.mxu0 %v8214_v32  ;;  %v8287_v32 = vld [vmem:[#allocation8 + $0x278] ss:$24 sps:$4 sm:$0xff]  }
 0x147   :  { %1341 = vmatpush1.bf16.msra.mxu1 %v1099_v44 }
 0x148   :  { %4593 = vmatpush1.bf16.msra.mxu0 %v8212_v34  ;;  %4848 = vmatprep.subr.bf16.mxu1 %v8211_v43  ;;  %v8293_v34 = vld [vmem:[#allocation8 + $0x2a8] ss:$24 sps:$4 sm:$0xff]  }
 0x149   :  { %4594 = vmatprep.subr.bf16.mxu0 %v8220_v35  ;;  %v8301_v35 = vld [vmem:[#allocation8 + $0x2dc] ss:$24 sps:$4 sm:$0xff]  }
 0x14a   :  { %1349 = vmatmul.mubr.bf16.vlgmr.msra.gmra.mrb[8].mxu1 %v9637_v52  ;;  %v8235_v52 = vld [vmem:[#allocation8 + $0xcc] ss:$24 sps:$4 sm:$0xff]  }
 0x14b   :  { %4849 = vmatpush1.bf16.msra.mxu1 %v8209_v47 }
 0x14c   :  { %4595 = vmatpush1.bf16.msra.mxu0 %v8218_v37  ;;  %4850 = vmatprep.subr.bf16.mxu1 %v8217_v48  ;;  %v8307_v37 = vld [vmem:[#allocation8 + $0x30c] ss:$24 sps:$4 sm:$0xff]  }
 0x14d   :  { %4596 = vmatprep.subr.bf16.mxu0 %v8226_v38  ;;  %v308_v38 = vlaneseq }
 0x14f   :  { %4851 = vmatpush1.bf16.msra.mxu1 %v8215_v51  ;;  %v9675_v39 = vshrl.u32 %v308_v38, 7  ;;  %v8338_v38 = vld [vmem:[#allocation8 + $0x420] ss:$24 sps:$4 sm:$0xff]  }
 0x150   :  { %4597 = vmatpush1.bf16.msra.mxu0 %v8224_v41  ;;  %4852 = vmatprep.subr.bf16.mxu1 %v8223_v53 }
 0x151   :  { %4598 = vmatprep.subr.bf16.mxu0 %v8232_v42  ;;  %v9680_v41 = vsub.s32 0, %v9675_v39  ;;  %v9683_v42 = vsub.s32 1, %v9675_v39 }
 0x153   :  { %4853 = vmatpush1.bf16.msra.mxu1 %v8221_v56  ;;  %v311_v43 = vrot.slane %v9677_v40, %v9680_v41  ;;  %v315_v44 = vrot.slane %v9677_v40, %v9683_v42 }
 0x154   :  { %4599 = vmatpush1.bf16.msra.mxu0 %v8230_v45  ;;  %4854 = vmatprep.subr.bf16.mxu1 %v8229_v57 }
 0x155   :  { %4600 = vmatprep.subr.bf16.mxu0 %v8238_v46 }
 0x157   :  { %4855 = vmatpush1.bf16.msra.mxu1 %v8227_v60 }
 0x158   :  { %4601 = vmatpush1.bf16.msra.mxu0 %v8236_v49  ;;  %4856 = vmatprep.subr.bf16.mxu1 %v8235_v52 }
 0x159   :  { %4602 = vmatprep.subr.bf16.mxu0 %v8244_v50 }
 0x15b   :  { %4857 = vmatpush1.bf16.msra.mxu1 %v8233_v63  ;;  %v9698_v63 = vsub.s32 2, %v9675_v39 }
 0x15c   :  { %4603 = vmatpush1.bf16.msra.mxu0 %v8242_v54  ;;  %4858 = vmatprep.subr.bf16.mxu1 %v8241_v0  ;;  %v8308_v0 = vld [vmem:[#allocation8 + $0x330] ss:$24 sps:$4 sm:$0xff]  }
 0x15d   :  { %4604 = vmatprep.subr.bf16.mxu0 %v8250_v55 }
 0x15f   :  { %4859 = vmatpush1.bf16.msra.mxu1 %v8239_v3  ;;  %v8316_v3 = vld [vmem:[#allocation8 + $0x364] ss:$24 sps:$4 sm:$0xff]  }
 0x160   :  { %4605 = vmatpush1.bf16.msra.mxu0 %v8248_v58  ;;  %4860 = vmatprep.subr.bf16.mxu1 %v8247_v5  ;;  %v8302_v58 = vld [vmem:[#allocation8 + $0x300] ss:$24 sps:$4 sm:$0xff]   ;;  %v8319_v5 = vld [vmem:[#allocation8 + $0x36c] ss:$24 sps:$4 sm:$0xff]  }
 0x161   :  { %4606 = vmatprep.subr.bf16.mxu0 %v8256_v59  ;;  %v8305_v59 = vld [vmem:[#allocation8 + $0x308] ss:$24 sps:$4 sm:$0xff]  }
 0x163   :  { %4861 = vmatpush1.bf16.msra.mxu1 %v8245_v8  ;;  %v8317_v8 = vld [vmem:[#allocation8 + $0x368] ss:$24 sps:$4 sm:$0xff]  }
 0x164   :  { %4607 = vmatpush1.bf16.msra.mxu0 %v8254_v61  ;;  %4862 = vmatprep.subr.bf16.mxu1 %v8253_v9  ;;  %v8310_v61 = vld [vmem:[#allocation8 + $0x334] ss:$24 sps:$4 sm:$0xff]  }
 0x165   :  { %4608 = vmatprep.subr.bf16.mxu0 %v8262_v62  ;;  %v8313_v62 = vld [vmem:[#allocation8 + $0x33c] ss:$24 sps:$4 sm:$0xff]  }
 0x167   :  { %4863 = vmatpush1.bf16.msra.mxu1 %v8251_v12 }
 0x168   :  { %4609 = vmatpush1.bf16.msra.mxu0 %v8260_v1  ;;  %4864 = vmatprep.subr.bf16.mxu1 %v8259_v13  ;;  %v8311_v1 = vld [vmem:[#allocation8 + $0x338] ss:$24 sps:$4 sm:$0xff]  }
 0x169   :  { %4610 = vmatprep.subr.bf16.mxu0 %v8268_v2  ;;  %v322_v2 = vsub.s32 3, %v9675_v39 }
 0x16b   :  { %4865 = vmatpush1.bf16.msra.mxu1 %v8257_v16  ;;  %v323_v9 = vrot.slane %v9677_v40, %v322_v2  ;;  %v8323_v16 = vld [vmem:[#allocation8 + $0x398] ss:$24 sps:$4 sm:$0xff]  }
 0x16c   :  { %4611 = vmatpush1.bf16.msra.mxu0 %v8266_v6  ;;  %4866 = vmatprep.subr.bf16.mxu1 %v8265_v17  ;;  %v319_v6 = vrot.slane %v9677_v40, %v9698_v63 }
 0x16d   :  { %4612 = vmatprep.subr.bf16.mxu0 %v8274_v7  ;;  %v8314_v7 = vld [vmem:[#allocation8 + $0x360] ss:$24 sps:$4 sm:$0xff]  }
 0x16f   :  { %4867 = vmatpush1.bf16.msra.mxu1 %v8263_v20  ;;  %v8331_v20 = vld [vmem:[#allocation8 + $0x3cc] ss:$24 sps:$4 sm:$0xff]  }
 0x170   :  { %4613 = vmatpush1.bf16.msra.mxu0 %v8272_v10  ;;  %4868 = vmatprep.subr.bf16.mxu1 %v8271_v21  ;;  %v8322_v10 = vld [vmem:[#allocation8 + $0x394] ss:$24 sps:$4 sm:$0xff]  }
 0x171   :  { %4614 = vmatprep.subr.bf16.mxu0 %v8280_v11  ;;  %v8325_v11 = vld [vmem:[#allocation8 + $0x39c] ss:$24 sps:$4 sm:$0xff]  }
 0x173   :  { %4869 = vmatpush1.bf16.msra.mxu1 %v8269_v24 }
 0x174   :  { %4615 = vmatpush1.bf16.msra.mxu0 %v8278_v15  ;;  %4870 = vmatprep.subr.bf16.mxu1 %v8277_v25 }
 0x175   :  { %4616 = vmatprep.subr.bf16.mxu0 %v8286_v14  ;;  %v8320_v14 = vld [vmem:[#allocation8 + $0x390] ss:$24 sps:$4 sm:$0xff]  }
 0x177   :  { %4871 = vmatpush1.bf16.msra.mxu1 %v8275_v28  ;;  %v8329_v28 = vld [vmem:[#allocation8 + $0x3c8] ss:$24 sps:$4 sm:$0xff]  }
 0x178   :  { %4617 = vmatpush1.bf16.msra.mxu0 %v8284_v18  ;;  %4872 = vmatprep.subr.bf16.mxu1 %v8283_v29 }
 0x179   :  { %4618 = vmatprep.subr.bf16.mxu0 %v8292_v19  ;;  %v8328_v19 = vld [vmem:[#allocation8 + $0x3c4] ss:$24 sps:$4 sm:$0xff]  }
 0x17b   :  { %4873 = vmatpush1.bf16.msra.mxu1 %v8281_v30  ;;  %v8334_v30 = vld [vmem:[#allocation8 + $0x3f4] ss:$24 sps:$4 sm:$0xff]  }
 0x17c   :  { %4619 = vmatpush1.bf16.msra.mxu0 %v8290_v22  ;;  %4874 = vmatprep.subr.bf16.mxu1 %v8289_v31  ;;  %v8337_v31 = vld [vmem:[#allocation8 + $0x3fc] ss:$24 sps:$4 sm:$0xff]  }
 0x17d   :  { %4620 = vmatprep.subr.bf16.mxu0 %v8298_v23 }
 0x17f   :  { %4875 = vmatpush1.bf16.msra.mxu1 %v8287_v32 }
 0x180   :  { %4621 = vmatpush1.bf16.msra.mxu0 %v8296_v26  ;;  %4876 = vmatprep.subr.bf16.mxu1 %v8295_v33 }
 0x181   :  { %4633 = vmatprep.subr.bf16.mxu0 %v8304_v27  ;;  %v8326_v27 = vld [vmem:[#allocation8 + $0x3c0] ss:$24 sps:$4 sm:$0xff]  }
 0x183   :  { %4877 = vmatpush1.bf16.msra.mxu1 %v8293_v34  ;;  %v8332_v34 = vld [vmem:[#allocation8 + $0x3f0] ss:$24 sps:$4 sm:$0xff]  }
 0x184   :  { %4878 = vmatprep.subr.bf16.mxu1 %v8301_v35  ;;  %v8335_v35 = vld [vmem:[#allocation8 + $0x3f8] ss:$24 sps:$4 sm:$0xff]  }
 0x187   :  { %4879 = vmatpush1.bf16.msra.mxu1 %v8299_v36  ;;  %v8340_v36 = vld [vmem:[#allocation8 + $0x424] ss:$24 sps:$4 sm:$0xff]  }
 0x188   :  { %4891 = vmatprep.subr.bf16.mxu1 %v8307_v37  ;;  %v8343_v37 = vld [vmem:[#allocation8 + $0x42c] ss:$24 sps:$4 sm:$0xff]  }
 0x1ae   :  { %v1135_v45 = vpop.f32.mrb[0].mxu0 }
 0x1af   :  { %v1136_v46 = vadd.f32 %v1135_v45, %v311_v43  ;;  %v1137_v47 = vpop.f32.mrb[1].mxu0  ;;  %v8349_v45 = vld [vmem:[#allocation8 + $0x45c] ss:$24 sps:$4 sm:$0xff]  }
 0x1b0   :  { %v1138_v48 = vadd.f32 %v1137_v47, %v315_v44  ;;  %v1139_v49 = vpop.f32.mrb[2].mxu0  ;;  %v8347_v47 = vld [vmem:[#allocation8 + $0x458] ss:$24 sps:$4 sm:$0xff]  }
 0x1b1   :  { %v1140_v50 = vadd.f32 %v1139_v49, %v311_v43  ;;  %v1141_v51 = vpop.f32.mrb[3].mxu0  ;;  %v1357_v54 = vmax.f32 %v1136_v46, 0.0  ;;  %v8341_v43 = vld [vmem:[#allocation8 + $0x428] ss:$24 sps:$4 sm:$0xff]   ;;  %v8355_v49 = vld [vmem:[#allocation8 + $0x48c] ss:$24 sps:$4 sm:$0xff]  }
 0x1b2   :  { %v1142_v53 = vadd.f32 %v1141_v51, %v315_v44  ;;  %v1358_v56 = vmax.f32 %v1138_v48, 0.0  ;;  %v8346_v44 = vld [vmem:[#allocation8 + $0x454] ss:$24 sps:$4 sm:$0xff]   ;;  %v8344_v46 = vld [vmem:[#allocation8 + $0x450] ss:$24 sps:$4 sm:$0xff]  }
 0x1b3   :  { %v1368_v55 = vmax.f32 %v1140_v50, 0.0  ;;  %v8352_v48 = vld [vmem:[#allocation8 + $0x484] ss:$24 sps:$4 sm:$0xff]   ;;  %v8350_v50 = vld [vmem:[#allocation8 + $0x480] ss:$24 sps:$4 sm:$0xff]  }
 0x1b4   :  { %v1369_v57 = vmax.f32 %v1142_v53, 0.0  ;;  %v8353_v51 = vld [vmem:[#allocation8 + $0x488] ss:$24 sps:$4 sm:$0xff]   ;;  %v8358_v53 = vld [vmem:[#allocation8 + $0x4b4] ss:$24 sps:$4 sm:$0xff]  }
 0x1b5   :  { %v9689_v60 = vpack.c.bf16 %v1368_v55, %v1357_v54  ;;  %v1178_v12 = vpop.f32.mrb[0].mxu1  ;;  %v8361_v54 = vld [vmem:[#allocation8 + $0x4bc] ss:$24 sps:$4 sm:$0xff]   ;;  %v8356_v55 = vld [vmem:[#allocation8 + $0x4b0] ss:$24 sps:$4 sm:$0xff]  }
 0x1b6   :  { %v9691_v52 = vpack.c.bf16 %v1369_v57, %v1358_v56  ;;  %v1179_v13 = vadd.f32 %v1178_v12, %v319_v6  ;;  %v1180_v15 = vpop.f32.mrb[1].mxu1  ;;  %v8359_v56 = vld [vmem:[#allocation8 + $0x4b8] ss:$24 sps:$4 sm:$0xff]   ;;  %v8364_v57 = vld [vmem:[#allocation8 + $0x4e4] ss:$24 sps:$4 sm:$0xff]  }
 0x1b7   :  { %v1181_v17 = vadd.f32 %v1180_v15, %v323_v9  ;;  %v1182_v18 = vpop.f32.mrb[2].mxu1 }
 0x1b8   :  { %4622 = vmatprep.mubr.bf16.mxu0 %v9691_v52  ;;  %4880 = vmatprep.mubr.bf16.mxu1 %v9691_v52  ;;  %v1359_v21 = vmax.f32 %v1179_v13, 0.0  ;;  %v1183_v22 = vadd.f32 %v1182_v18, %v319_v6  ;;  %v1184_v23 = vpop.f32.mrb[3].mxu1 }
 0x1b9   :  { %4623 = vmatmul.mubr.bf16.vlgmr.msra.gmra.mrb[12].mxu0 %v9689_v60  ;;  %4881 = vmatmul.mubr.bf16.vlgmr.msra.gmra.mrb[12].mxu1 %v9689_v60  ;;  %v1360_v24 = vmax.f32 %v1181_v17, 0.0  ;;  %v1185_v25 = vadd.f32 %v1184_v23, %v323_v9  ;;  %v8382_v23 = vld [vmem:[#allocation8 + $0x574] ss:$24 sps:$4 sm:$0xff]  }
 0x1ba   :  { %4634 = vmatpush1.bf16.msra.mxu0 %v8302_v58  ;;  %4892 = vmatpush1.bf16.msra.mxu1 %v8305_v59  ;;  %v1370_v26 = vmax.f32 %v1183_v22, 0.0  ;;  %v8367_v58 = vld [vmem:[#allocation8 + $0x4ec] ss:$24 sps:$4 sm:$0xff]   ;;  %v326_v59 = vsub.s32 4, %v9675_v39 }
 0x1bb   :  { %4635 = vmatprep.subr.bf16.mxu0 %v8310_v61  ;;  %4893 = vmatprep.subr.bf16.mxu1 %v8313_v62  ;;  %v1371_v29 = vmax.f32 %v1185_v25, 0.0  ;;  %v330_v61 = vsub.s32 5, %v9675_v39  ;;  %v8362_v62 = vld [vmem:[#allocation8 + $0x4e0] ss:$24 sps:$4 sm:$0xff]  }
 0x1bc   :  { %v9706_v32 = vpack.c.bf16 %v1370_v26, %v1359_v21 }
 0x1bd   :  { %v9708_v33 = vpack.c.bf16 %v1371_v29, %v1360_v24  ;;  %v331_v6 = vrot.slane %v9677_v40, %v330_v61  ;;  %v8385_v24 = vld [vmem:[#allocation8 + $0x57c] ss:$24 sps:$4 sm:$0xff]   ;;  %v8383_v29 = vld [vmem:[#allocation8 + $0x578] ss:$24 sps:$4 sm:$0xff]  }
 0x1be   :  { %4636 = vmatpush1.bf16.msra.mxu0 %v8308_v0  ;;  %4894 = vmatpush1.bf16.msra.mxu1 %v8311_v1  ;;  %v8365_v0 = vld [vmem:[#allocation8 + $0x4e8] ss:$24 sps:$4 sm:$0xff]   ;;  %v8370_v1 = vld [vmem:[#allocation8 + $0x514] ss:$24 sps:$4 sm:$0xff]  }
 0x1bf   :  { %4637 = vmatprep.subr.bf16.mxu0 %v8316_v3  ;;  %4895 = vmatprep.subr.bf16.mxu1 %v8319_v5  ;;  %v8373_v3 = vld [vmem:[#allocation8 + $0x51c] ss:$24 sps:$4 sm:$0xff]   ;;  %v327_v5 = vrot.slane %v9677_v40, %v326_v59 }
 0x1c0   :  { %4665 = vmatprep.mubr.bf16.mxu0 %v9708_v33  ;;  %4923 = vmatprep.mubr.bf16.mxu1 %v9708_v33 }
 0x1c2   :  { %4638 = vmatpush1.bf16.msra.mxu0 %v8314_v7  ;;  %4896 = vmatpush1.bf16.msra.mxu1 %v8317_v8  ;;  %v8368_v7 = vld [vmem:[#allocation8 + $0x510] ss:$24 sps:$4 sm:$0xff]  }
 0x1c3   :  { %4639 = vmatprep.subr.bf16.mxu0 %v8322_v10  ;;  %4897 = vmatprep.subr.bf16.mxu1 %v8325_v11  ;;  %v8371_v8 = vld [vmem:[#allocation8 + $0x518] ss:$24 sps:$4 sm:$0xff]   ;;  %v8376_v10 = vld [vmem:[#allocation8 + $0x544] ss:$24 sps:$4 sm:$0xff]  }
 0x1c4   :  { %v8379_v11 = vld [vmem:[#allocation8 + $0x54c] ss:$24 sps:$4 sm:$0xff]  }
 0x1c6   :  { %4640 = vmatpush1.bf16.msra.mxu0 %v8320_v14  ;;  %4898 = vmatpush1.bf16.msra.mxu1 %v8323_v16 }
 0x1c7   :  { %4641 = vmatprep.subr.bf16.mxu0 %v8328_v19  ;;  %4899 = vmatprep.subr.bf16.mxu1 %v8331_v20  ;;  %v8374_v19 = vld [vmem:[#allocation8 + $0x540] ss:$24 sps:$4 sm:$0xff]  }
 0x1c8   :  { %v8377_v20 = vld [vmem:[#allocation8 + $0x548] ss:$24 sps:$4 sm:$0xff]  }
 0x1ca   :  { %4642 = vmatpush1.bf16.msra.mxu0 %v8326_v27  ;;  %4900 = vmatpush1.bf16.msra.mxu1 %v8329_v28  ;;  %v8380_v28 = vld [vmem:[#allocation8 + $0x570] ss:$24 sps:$4 sm:$0xff]  }
 0x1cb   :  { %4643 = vmatprep.subr.bf16.mxu0 %v8334_v30  ;;  %4901 = vmatprep.subr.bf16.mxu1 %v8337_v31  ;;  %v8388_v31 = vld [vmem:[#allocation8 + $0x5a4] ss:$24 sps:$4 sm:$0xff]  }
 0x1ce   :  { %4644 = vmatpush1.bf16.msra.mxu0 %v8332_v34  ;;  %4902 = vmatpush1.bf16.msra.mxu1 %v8335_v35  ;;  %v8391_v34 = vld [vmem:[#allocation8 + $0x5ac] ss:$24 sps:$4 sm:$0xff]   ;;  %v334_v35 = vsub.s32 6, %v9675_v39 }
 0x1cf   :  { %4645 = vmatprep.subr.bf16.mxu0 %v8340_v36  ;;  %4903 = vmatprep.subr.bf16.mxu1 %v8343_v37  ;;  %v8386_v36 = vld [vmem:[#allocation8 + $0x5a0] ss:$24 sps:$4 sm:$0xff]  }
 0x1d0   :  { %v8389_v37 = vld [vmem:[#allocation8 + $0x5a8] ss:$24 sps:$4 sm:$0xff]  }
 0x1d2   :  { %4646 = vmatpush1.bf16.msra.mxu0 %v8338_v38  ;;  %4904 = vmatpush1.bf16.msra.mxu1 %v8341_v43  ;;  %v338_v38 = vsub.s32 7, %v9675_v39  ;;  %v8394_v43 = vld [vmem:[#allocation8 + $0x5d4] ss:$24 sps:$4 sm:$0xff]  }
 0x1d3   :  { %4647 = vmatprep.subr.bf16.mxu0 %v8346_v44  ;;  %4905 = vmatprep.subr.bf16.mxu1 %v8349_v45  ;;  %v8397_v44 = vld [vmem:[#allocation8 + $0x5dc] ss:$24 sps:$4 sm:$0xff]   ;;  %v335_v45 = vrot.slane %v9677_v40, %v334_v35  ;;  %v8434_v35 = vld [vmem:[#allocation8 + $0x720] ss:$24 sps:$4 sm:$0xff]  }
 0x1d4   :  { %v9144_v39 = vld [vmem:[#allocation11 + $0xe0] ss:$12 sps:$4 sm:$0xff]  }
 0x1d6   :  { %4648 = vmatpush1.bf16.msra.mxu0 %v8344_v46  ;;  %4906 = vmatpush1.bf16.msra.mxu1 %v8347_v47  ;;  %v8392_v46 = vld [vmem:[#allocation8 + $0x5d0] ss:$24 sps:$4 sm:$0xff]  }
 0x1d7   :  { %4649 = vmatprep.subr.bf16.mxu0 %v8352_v48  ;;  %4907 = vmatprep.subr.bf16.mxu1 %v8355_v49  ;;  %v8395_v47 = vld [vmem:[#allocation8 + $0x5d8] ss:$24 sps:$4 sm:$0xff]   ;;  %v339_v48 = vrot.slane %v9677_v40, %v338_v38  ;;  %v8400_v49 = vld [vmem:[#allocation8 + $0x604] ss:$24 sps:$4 sm:$0xff]  }
 0x1d8   :  { %v8445_v38 = vld [vmem:[#allocation8 + $0x75c] ss:$24 sps:$4 sm:$0xff]  }
 0x1da   :  { %4650 = vmatpush1.bf16.msra.mxu0 %v8350_v50  ;;  %4908 = vmatpush1.bf16.msra.mxu1 %v8353_v51  ;;  %v8403_v50 = vld [vmem:[#allocation8 + $0x60c] ss:$24 sps:$4 sm:$0xff]   ;;  %v8398_v51 = vld [vmem:[#allocation8 + $0x600] ss:$24 sps:$4 sm:$0xff]  }
 0x1db   :  { %4651 = vmatprep.subr.bf16.mxu0 %v8358_v53  ;;  %4909 = vmatprep.subr.bf16.mxu1 %v8361_v54  ;;  %v8401_v53 = vld [vmem:[#allocation8 + $0x608] ss:$24 sps:$4 sm:$0xff]  }
 0x1de   :  { %4652 = vmatpush1.bf16.msra.mxu0 %v8356_v55  ;;  %4910 = vmatpush1.bf16.msra.mxu1 %v8359_v56 }
 0x1df   :  { %4653 = vmatprep.subr.bf16.mxu0 %v8364_v57  ;;  %4911 = vmatprep.subr.bf16.mxu1 %v8367_v58 }
 0x1e2   :  { %4654 = vmatpush1.bf16.msra.mxu0 %v8362_v62  ;;  %4912 = vmatpush1.bf16.msra.mxu1 %v8365_v0  ;;  %v1221_v9 = vpop.f32.mrb[4].mxu0  ;;  %v8406_v62 = vld [vmem:[#allocation8 + $0x634] ss:$24 sps:$4 sm:$0xff]  }
 0x1e3   :  { %4655 = vmatprep.subr.bf16.mxu0 %v8370_v1  ;;  %4913 = vmatprep.subr.bf16.mxu1 %v8373_v3  ;;  %v1222_v12 = vadd.f32 %v1221_v9, %v327_v5  ;;  %v1223_v13 = vpop.f32.mrb[5].mxu0  ;;  %v8409_v0 = vld [vmem:[#allocation8 + $0x63c] ss:$24 sps:$4 sm:$0xff]  }
 0x1e4   :  { %v1224_v15 = vadd.f32 %v1223_v13, %v331_v6  ;;  %v1225_v14 = vpop.f32.mrb[6].mxu0 }
 0x1e5   :  { %v1361_v16 = vmax.f32 %v1222_v12, 0.0  ;;  %v1226_v17 = vadd.f32 %v1225_v14, %v327_v5  ;;  %v1227_v18 = vpop.f32.mrb[7].mxu0  ;;  %v8404_v5 = vld [vmem:[#allocation8 + $0x630] ss:$24 sps:$4 sm:$0xff]   ;;  %v8415_v12 = vld [vmem:[#allocation8 + $0x66c] ss:$24 sps:$4 sm:$0xff]  }
 0x1e6   :  { %4656 = vmatpush1.bf16.msra.mxu0 %v8368_v7  ;;  %4914 = vmatpush1.bf16.msra.mxu1 %v8371_v8  ;;  %v1362_v21 = vmax.f32 %v1224_v15, 0.0  ;;  %v1228_v22 = vadd.f32 %v1227_v18, %v331_v6  ;;  %v8407_v6 = vld [vmem:[#allocation8 + $0x638] ss:$24 sps:$4 sm:$0xff]   ;;  %v8413_v14 = vld [vmem:[#allocation8 + $0x668] ss:$24 sps:$4 sm:$0xff]  }
 0x1e7   :  { %4657 = vmatprep.subr.bf16.mxu0 %v8376_v10  ;;  %4915 = vmatprep.subr.bf16.mxu1 %v8379_v11  ;;  %v1372_v25 = vmax.f32 %v1226_v17, 0.0  ;;  %v8412_v11 = vld [vmem:[#allocation8 + $0x664] ss:$24 sps:$4 sm:$0xff]   ;;  %v8410_v15 = vld [vmem:[#allocation8 + $0x660] ss:$24 sps:$4 sm:$0xff]  }
 0x1e8   :  { %v1373_v26 = vmax.f32 %v1228_v22, 0.0  ;;  %v8418_v17 = vld [vmem:[#allocation8 + $0x694] ss:$24 sps:$4 sm:$0xff]  }
 0x1e9   :  { %v9720_v27 = vpack.c.bf16 %v1372_v25, %v1361_v16  ;;  %v1264_v54 = vpop.f32.mrb[4].mxu1  ;;  %v8421_v18 = vld [vmem:[#allocation8 + $0x69c] ss:$24 sps:$4 sm:$0xff]   ;;  %v8427_v22 = vld [vmem:[#allocation8 + $0x6cc] ss:$24 sps:$4 sm:$0xff]  }
 0x1ea   :  { %4658 = vmatpush1.bf16.msra.mxu0 %v8374_v19  ;;  %4916 = vmatpush1.bf16.msra.mxu1 %v8377_v20  ;;  %v9722_v30 = vpack.c.bf16 %v1373_v26, %v1362_v21  ;;  %v1265_v55 = vadd.f32 %v1264_v54, %v335_v45  ;;  %v1266_v56 = vpop.f32.mrb[5].mxu1  ;;  %v8416_v19 = vld [vmem:[#allocation8 + $0x690] ss:$24 sps:$4 sm:$0xff]   ;;  %v8424_v21 = vld [vmem:[#allocation8 + $0x6c4] ss:$24 sps:$4 sm:$0xff]  }
 0x1eb   :  { %4659 = vmatprep.subr.bf16.mxu0 %v8382_v23  ;;  %4917 = vmatprep.subr.bf16.mxu1 %v8385_v24  ;;  %v1267_v57 = vadd.f32 %v1266_v56, %v339_v48  ;;  %v1268_v58 = vpop.f32.mrb[6].mxu1  ;;  %v8419_v20 = vld [vmem:[#allocation8 + $0x698] ss:$24 sps:$4 sm:$0xff]   ;;  %v8425_v24 = vld [vmem:[#allocation8 + $0x6c8] ss:$24 sps:$4 sm:$0xff]  }
 0x1ec   :  { %v1363_v1 = vmax.f32 %v1265_v55, 0.0  ;;  %v1269_v3 = vadd.f32 %v1268_v58, %v335_v45  ;;  %v1270_v40 = vpop.f32.mrb[7].mxu1  ;;  %v8422_v23 = vld [vmem:[#allocation8 + $0x6c0] ss:$24 sps:$4 sm:$0xff]   ;;  %v8430_v25 = vld [vmem:[#allocation8 + $0x6f4] ss:$24 sps:$4 sm:$0xff]  }
 0x1ed   :  { %v1364_v7 = vmax.f32 %v1267_v57, 0.0  ;;  %v1271_v8 = vadd.f32 %v1270_v40, %v339_v48  ;;  %v8433_v26 = vld [vmem:[#allocation8 + $0x6fc] ss:$24 sps:$4 sm:$0xff]   ;;  %v8452_v58 = vld [vmem:[#allocation8 + $0x7b0] ss:$24 sps:$4 sm:$0xff]  }
 0x1ee   :  { %4660 = vmatpush1.bf16.msra.mxu0 %v8380_v28  ;;  %4918 = vmatpush1.bf16.msra.mxu1 %v8383_v29  ;;  %v1374_v9 = vmax.f32 %v1269_v3, 0.0  ;;  %v8428_v28 = vld [vmem:[#allocation8 + $0x6f0] ss:$24 sps:$4 sm:$0xff]   ;;  %v9736_v45 = vld [vmem:[#allocation7 + $0x8] sm:$0x7] }
 0x1ef   :  { %4661 = vmatprep.subr.bf16.mxu0 %v8388_v31  ;;  %4919 = vmatprep.subr.bf16.mxu1 %v8391_v34  ;;  %v1375_v10 = vmax.f32 %v1271_v8, 0.0  ;;  %v8431_v29 = vld [vmem:[#allocation8 + $0x6f8] ss:$24 sps:$4 sm:$0xff]   ;;  %v8436_v31 = vld [vmem:[#allocation8 + $0x724] ss:$24 sps:$4 sm:$0xff]   ;;  %v343_v48 = vrot.slane %v9736_v45, %v9680_v41 }
 0x1f0   :  { %v9730_v13 = vpack.c.bf16 %v1374_v9, %v1363_v1  ;;  %v8439_v34 = vld [vmem:[#allocation8 + $0x72c] ss:$24 sps:$4 sm:$0xff]   ;;  %v8457_v55 = vld [vmem:[#allocation8 + $0x7bc] ss:$24 sps:$4 sm:$0xff]  }
 0x1f1   :  { %v9734_v16 = vpack.c.bf16 %v1375_v10, %v1364_v7  ;;  %v8454_v54 = vld [vmem:[#allocation8 + $0x7b4] ss:$24 sps:$4 sm:$0xff]   ;;  %v8460_v8 = vld [vmem:[#allocation8 + $0x7e4] ss:$24 sps:$4 sm:$0xff]  }
 0x1f2   :  { %4662 = vmatpush1.bf16.msra.mxu0 %v8386_v36  ;;  %4920 = vmatpush1.bf16.msra.mxu1 %v8389_v37  ;;  %v8437_v36 = vld [vmem:[#allocation8 + $0x728] ss:$24 sps:$4 sm:$0xff]   ;;  %v8442_v37 = vld [vmem:[#allocation8 + $0x754] ss:$24 sps:$4 sm:$0xff]  }
 0x1f3   :  { %4663 = vmatprep.subr.bf16.mxu0 %v8394_v43  ;;  %4921 = vmatprep.subr.bf16.mxu1 %v8397_v44  ;;  %v8440_v43 = vld [vmem:[#allocation8 + $0x750] ss:$24 sps:$4 sm:$0xff]   ;;  %v8463_v9 = vld [vmem:[#allocation8 + $0x7ec] ss:$24 sps:$4 sm:$0xff]  }
 0x1f4   :  { %v8443_v44 = vld [vmem:[#allocation8 + $0x758] ss:$24 sps:$4 sm:$0xff]  }
 0x1f6   :  { %4664 = vmatpush1.bf16.msra.mxu0 %v8392_v46  ;;  %4922 = vmatpush1.bf16.msra.mxu1 %v8395_v47  ;;  %v8448_v46 = vld [vmem:[#allocation8 + $0x784] ss:$24 sps:$4 sm:$0xff]  }
 0x1f7   :  { %4676 = vmatprep.subr.bf16.mxu0 %v8400_v49  ;;  %4934 = vmatprep.subr.bf16.mxu1 %v8403_v50  ;;  %v8451_v47 = vld [vmem:[#allocation8 + $0x78c] ss:$24 sps:$4 sm:$0xff]   ;;  %v8446_v49 = vld [vmem:[#allocation8 + $0x780] ss:$24 sps:$4 sm:$0xff]  }
 0x1f8   :  { %v8449_v50 = vld [vmem:[#allocation8 + $0x788] ss:$24 sps:$4 sm:$0xff]  }
 0x1f9   :  { %4666 = vmatmul.mubr.bf16.vlgmr.msra.gmra.mrb[12].mxu0 %v9706_v32  ;;  %4924 = vmatmul.mubr.bf16.vlgmr.msra.gmra.mrb[12].mxu1 %v9706_v32 }
 0x1fa   :  { %4677 = vmatpush1.bf16.msra.mxu0 %v8398_v51  ;;  %4935 = vmatpush1.bf16.msra.mxu1 %v8401_v53  ;;  %v347_v51 = vrot.slane %v9736_v45, %v9683_v42 }
 0x1fb   :  { %4678 = vmatprep.subr.bf16.mxu0 %v8406_v62  ;;  %4936 = vmatprep.subr.bf16.mxu1 %v8409_v0  ;;  %v8455_v62 = vld [vmem:[#allocation8 + $0x7b8] ss:$24 sps:$4 sm:$0xff]  }
 0x1fc   :  { %4708 = vmatprep.mubr.bf16.mxu0 %v9722_v30  ;;  %4966 = vmatprep.mubr.bf16.mxu1 %v9722_v30 }
 0x1fe   :  { %4679 = vmatpush1.bf16.msra.mxu0 %v8404_v5  ;;  %4937 = vmatpush1.bf16.msra.mxu1 %v8407_v6 }
 0x1ff   :  { %4680 = vmatprep.subr.bf16.mxu0 %v8412_v11  ;;  %4938 = vmatprep.subr.bf16.mxu1 %v8415_v12  ;;  %v8458_v11 = vld [vmem:[#allocation8 + $0x7e0] ss:$24 sps:$4 sm:$0xff]  }
 0x200   :  { %v8461_v12 = vld [vmem:[#allocation8 + $0x7e8] ss:$24 sps:$4 sm:$0xff]  }
 0x202   :  { %4681 = vmatpush1.bf16.msra.mxu0 %v8410_v15  ;;  %4939 = vmatpush1.bf16.msra.mxu1 %v8413_v14 }
 0x203   :  { %4682 = vmatprep.subr.bf16.mxu0 %v8418_v17  ;;  %4940 = vmatprep.subr.bf16.mxu1 %v8421_v18  ;;  %v8466_v18 = vld [vmem:[#allocation8 + $0x814] ss:$24 sps:$4 sm:$0xff]  }
 0x206   :  { %4683 = vmatpush1.bf16.msra.mxu0 %v8416_v19  ;;  %4941 = vmatpush1.bf16.msra.mxu1 %v8419_v20  ;;  %v8469_v19 = vld [vmem:[#allocation8 + $0x81c] ss:$24 sps:$4 sm:$0xff]   ;;  %v8464_v20 = vld [vmem:[#allocation8 + $0x810] ss:$24 sps:$4 sm:$0xff]  }
 0x207   :  { %4684 = vmatprep.subr.bf16.mxu0 %v8424_v21  ;;  %4942 = vmatprep.subr.bf16.mxu1 %v8427_v22  ;;  %v8467_v21 = vld [vmem:[#allocation8 + $0x818] ss:$24 sps:$4 sm:$0xff]   ;;  %v8472_v22 = vld [vmem:[#allocation8 + $0x844] ss:$24 sps:$4 sm:$0xff]  }
 0x20a   :  { %4685 = vmatpush1.bf16.msra.mxu0 %v8422_v23  ;;  %4943 = vmatpush1.bf16.msra.mxu1 %v8425_v24  ;;  %v8475_v23 = vld [vmem:[#allocation8 + $0x84c] ss:$24 sps:$4 sm:$0xff]   ;;  %v8470_v24 = vld [vmem:[#allocation8 + $0x840] ss:$24 sps:$4 sm:$0xff]  }
 0x20b   :  { %4686 = vmatprep.subr.bf16.mxu0 %v8430_v25  ;;  %4944 = vmatprep.subr.bf16.mxu1 %v8433_v26  ;;  %v8473_v25 = vld [vmem:[#allocation8 + $0x848] ss:$24 sps:$4 sm:$0xff]   ;;  %v8478_v26 = vld [vmem:[#allocation8 + $0x874] ss:$24 sps:$4 sm:$0xff]  }
 0x20e   :  { %4687 = vmatpush1.bf16.msra.mxu0 %v8428_v28  ;;  %4945 = vmatpush1.bf16.msra.mxu1 %v8431_v29  ;;  %v8481_v28 = vld [vmem:[#allocation8 + $0x87c] ss:$24 sps:$4 sm:$0xff]   ;;  %v8476_v29 = vld [vmem:[#allocation8 + $0x870] ss:$24 sps:$4 sm:$0xff]  }
 0x20f   :  { %4688 = vmatprep.subr.bf16.mxu0 %v8436_v31  ;;  %4946 = vmatprep.subr.bf16.mxu1 %v8439_v34  ;;  %v8479_v31 = vld [vmem:[#allocation8 + $0x878] ss:$24 sps:$4 sm:$0xff]   ;;  %v8484_v34 = vld [vmem:[#allocation8 + $0x8a4] ss:$24 sps:$4 sm:$0xff]  }
 0x212   :  { %4689 = vmatpush1.bf16.msra.mxu0 %v8434_v35  ;;  %4947 = vmatpush1.bf16.msra.mxu1 %v8437_v36  ;;  %v8487_v35 = vld [vmem:[#allocation8 + $0x8ac] ss:$24 sps:$4 sm:$0xff]   ;;  %v8482_v36 = vld [vmem:[#allocation8 + $0x8a0] ss:$24 sps:$4 sm:$0xff]  }
 0x213   :  { %4690 = vmatprep.subr.bf16.mxu0 %v8442_v37  ;;  %4948 = vmatprep.subr.bf16.mxu1 %v8445_v38  ;;  %v8485_v37 = vld [vmem:[#allocation8 + $0x8a8] ss:$24 sps:$4 sm:$0xff]   ;;  %v8490_v38 = vld [vmem:[#allocation8 + $0x8d4] ss:$24 sps:$4 sm:$0xff]  }
 0x216   :  { %4691 = vmatpush1.bf16.msra.mxu0 %v8440_v43  ;;  %4949 = vmatpush1.bf16.msra.mxu1 %v8443_v44  ;;  %v1307_v53 = vpop.f32.mrb[8].mxu0  ;;  %v8493_v43 = vld [vmem:[#allocation8 + $0x8dc] ss:$24 sps:$4 sm:$0xff]   ;;  %v8488_v44 = vld [vmem:[#allocation8 + $0x8d0] ss:$24 sps:$4 sm:$0xff]  }
 0x217   :  { %4692 = vmatprep.subr.bf16.mxu0 %v8448_v46  ;;  %4950 = vmatprep.subr.bf16.mxu1 %v8451_v47  ;;  %v1308_v56 = vadd.f32 %v1307_v53, %v343_v48  ;;  %v1309_v57 = vpop.f32.mrb[9].mxu0  ;;  %v8491_v46 = vld [vmem:[#allocation8 + $0x8d8] ss:$24 sps:$4 sm:$0xff]   ;;  %v8496_v47 = vld [vmem:[#allocation8 + $0x904] ss:$24 sps:$4 sm:$0xff]  }
 0x218   :  { %v1310_v0 = vadd.f32 %v1309_v57, %v347_v51  ;;  %v1311_v1 = vpop.f32.mrb[10].mxu0  ;;  %v8505_v53 = vld [vmem:[#allocation8 + $0x93c] ss:$24 sps:$4 sm:$0xff]   ;;  %v8511_v57 = vld [vmem:[#allocation8 + $0x96c] ss:$24 sps:$4 sm:$0xff]  }
 0x219   :  { %v1365_v3 = vmax.f32 %v1308_v56, 0.0  ;;  %v1312_v40 = vadd.f32 %v1311_v1, %v343_v48  ;;  %v1313_v5 = vpop.f32.mrb[11].mxu0  ;;  %v8499_v48 = vld [vmem:[#allocation8 + $0x90c] ss:$24 sps:$4 sm:$0xff]   ;;  %v8517_v1 = vld [vmem:[#allocation8 + $0x99c] ss:$24 sps:$4 sm:$0xff]  }
 0x21a   :  { %4693 = vmatpush1.bf16.msra.mxu0 %v8446_v49  ;;  %4951 = vmatpush1.bf16.msra.mxu1 %v8449_v50  ;;  %v1366_v6 = vmax.f32 %v1310_v0, 0.0  ;;  %v1314_v7 = vadd.f32 %v1313_v5, %v347_v51  ;;  %v8494_v49 = vld [vmem:[#allocation8 + $0x900] ss:$24 sps:$4 sm:$0xff]   ;;  %v8502_v51 = vld [vmem:[#allocation8 + $0x934] ss:$24 sps:$4 sm:$0xff]  }
 0x21b   :  { %4694 = vmatprep.subr.bf16.mxu0 %v8454_v54  ;;  %4952 = vmatprep.subr.bf16.mxu1 %v8457_v55  ;;  %v1376_v10 = vmax.f32 %v1312_v40, 0.0  ;;  %v8497_v50 = vld [vmem:[#allocation8 + $0x908] ss:$24 sps:$4 sm:$0xff]   ;;  %v8503_v55 = vld [vmem:[#allocation8 + $0x938] ss:$24 sps:$4 sm:$0xff]  }
 0x21c   :  { %v1377_v15 = vmax.f32 %v1314_v7, 0.0  ;;  %v8500_v54 = vld [vmem:[#allocation8 + $0x930] ss:$24 sps:$4 sm:$0xff]   ;;  %v8508_v56 = vld [vmem:[#allocation8 + $0x964] ss:$24 sps:$4 sm:$0xff]  }
 0x21d   :  { %v9742_v14 = vpack.c.bf16 %v1376_v10, %v1365_v3  ;;  %v8514_v0 = vld [vmem:[#allocation8 + $0x994] ss:$24 sps:$4 sm:$0xff]   ;;  %v8512_v3 = vld [vmem:[#allocation8 + $0x990] ss:$24 sps:$4 sm:$0xff]   ;;  %v8520_v5 = vld [vmem:[#allocation8 + $0x9c4] ss:$24 sps:$4 sm:$0xff]  }
 0x21e   :  { %4695 = vmatpush1.bf16.msra.mxu0 %v8452_v58  ;;  %4953 = vmatpush1.bf16.msra.mxu1 %v8455_v62  ;;  %v9744_v17 = vpack.c.bf16 %v1377_v15, %v1366_v6  ;;  %v8506_v58 = vld [vmem:[#allocation8 + $0x960] ss:$24 sps:$4 sm:$0xff]   ;;  %v8523_v6 = vld [vmem:[#allocation8 + $0x9cc] ss:$24 sps:$4 sm:$0xff]   ;;  %v8529_v10 = vld [vmem:[#allocation8 + $0x9fc] ss:$24 sps:$4 sm:$0xff]  }
 0x21f   :  { %4696 = vmatprep.subr.bf16.mxu0 %v8460_v8  ;;  %4954 = vmatprep.subr.bf16.mxu1 %v8463_v9  ;;  %v8509_v62 = vld [vmem:[#allocation8 + $0x968] ss:$24 sps:$4 sm:$0xff]   ;;  %v8515_v40 = vld [vmem:[#allocation8 + $0x998] ss:$24 sps:$4 sm:$0xff]   ;;  %v8526_v9 = vld [vmem:[#allocation8 + $0x9f4] ss:$24 sps:$4 sm:$0xff]  }
 0x220   :  { %v8518_v7 = vld [vmem:[#allocation8 + $0x9c0] ss:$24 sps:$4 sm:$0xff]   ;;  %v8532_v15 = vld [vmem:[#allocation8 + $0xa24] ss:$24 sps:$4 sm:$0xff]  }
 0x221   :  { %v8521_v8 = vld [vmem:[#allocation8 + $0x9c8] ss:$24 sps:$4 sm:$0xff]  }
 0x222   :  { %4697 = vmatpush1.bf16.msra.mxu0 %v8458_v11  ;;  %4955 = vmatpush1.bf16.msra.mxu1 %v8461_v12  ;;  %v8524_v11 = vld [vmem:[#allocation8 + $0x9f0] ss:$24 sps:$4 sm:$0xff]  }
 0x223   :  { %4698 = vmatprep.subr.bf16.mxu0 %v8466_v18  ;;  %4956 = vmatprep.subr.bf16.mxu1 %v8469_v19  ;;  %v8527_v12 = vld [vmem:[#allocation8 + $0x9f8] ss:$24 sps:$4 sm:$0xff]   ;;  %v8535_v18 = vld [vmem:[#allocation8 + $0xa2c] ss:$24 sps:$4 sm:$0xff]  }
 0x224   :  { %v8530_v19 = vld [vmem:[#allocation8 + $0xa20] ss:$24 sps:$4 sm:$0xff]  }
 0x226   :  { %4699 = vmatpush1.bf16.msra.mxu0 %v8464_v20  ;;  %4957 = vmatpush1.bf16.msra.mxu1 %v8467_v21  ;;  %v8533_v20 = vld [vmem:[#allocation8 + $0xa28] ss:$24 sps:$4 sm:$0xff]   ;;  %v351_v21 = vrot.slane %v9736_v45, %v9698_v63  ;;  %v8544_v45 = vld [vmem:[#allocation8 + $0xa84] ss:$24 sps:$4 sm:$0xff]  }
 0x227   :  { %4700 = vmatprep.subr.bf16.mxu0 %v8472_v22  ;;  %4958 = vmatprep.subr.bf16.mxu1 %v8475_v23  ;;  %v1350_v22 = vpop.f32.mrb[8].mxu1 }
 0x228   :  { %v1352_v23 = vpop.f32.mrb[9].mxu1 }
 0x229   :  { %v8590_v23 = vld [vmem:[#allocation8 + $0xc00] ss:$24 sps:$4 sm:$0xff]  }
 0x22a   :  { %4701 = vmatpush1.bf16.msra.mxu0 %v8470_v24  ;;  %4959 = vmatpush1.bf16.msra.mxu1 %v8473_v25  ;;  %v1351_v24 = vadd.f32 %v1350_v22, %v351_v21  ;;  %v8538_v25 = vld [vmem:[#allocation8 + $0xa54] ss:$24 sps:$4 sm:$0xff]  }
 0x22b   :  { %4702 = vmatprep.subr.bf16.mxu0 %v8478_v26  ;;  %4960 = vmatprep.subr.bf16.mxu1 %v8481_v28  ;;  %v8541_v26 = vld [vmem:[#allocation8 + $0xa5c] ss:$24 sps:$4 sm:$0xff]   ;;  %v1353_v28 = vpop.f32.mrb[10].mxu1  ;;  %v8595_v22 = vld [vmem:[#allocation8 + $0xc0c] ss:$24 sps:$4 sm:$0xff]  }
 0x22e   :  { %4703 = vmatpush1.bf16.msra.mxu0 %v8476_v29  ;;  %4961 = vmatpush1.bf16.msra.mxu1 %v8479_v31  ;;  %v8536_v29 = vld [vmem:[#allocation8 + $0xa50] ss:$24 sps:$4 sm:$0xff]  }
 0x22f   :  { %4704 = vmatprep.subr.bf16.mxu0 %v8484_v34  ;;  %4962 = vmatprep.subr.bf16.mxu1 %v8487_v35  ;;  %v8539_v31 = vld [vmem:[#allocation8 + $0xa58] ss:$24 sps:$4 sm:$0xff]   ;;  %v1367_v34 = vmax.f32 %v1351_v24, 0.0  ;;  %v1354_v35 = vadd.f32 %v1353_v28, %v351_v21  ;;  %v8592_v21 = vld [vmem:[#allocation8 + $0xc04] ss:$24 sps:$4 sm:$0xff]  }
 0x230   :  { %v8593_v24 = vld [vmem:[#allocation8 + $0xc08] ss:$24 sps:$4 sm:$0xff]  }
 0x231   :  { %v8596_v28 = vld [vmem:[#allocation8 + $0xc30] ss:$24 sps:$4 sm:$0xff]  }
 0x232   :  { %4705 = vmatpush1.bf16.msra.mxu0 %v8482_v36  ;;  %4963 = vmatpush1.bf16.msra.mxu1 %v8485_v37  ;;  %v1355_v36 = vpop.f32.mrb[11].mxu1  ;;  %v1378_v37 = vmax.f32 %v1354_v35, 0.0  ;;  %v8602_v35 = vld [vmem:[#allocation8 + $0xc60] ss:$24 sps:$4 sm:$0xff]  }
 0x233   :  { %4706 = vmatprep.subr.bf16.mxu0 %v8490_v38  ;;  %4964 = vmatprep.subr.bf16.mxu1 %v8493_v43  ;;  %v8547_v38 = vld [vmem:[#allocation8 + $0xa8c] ss:$24 sps:$4 sm:$0xff]   ;;  %v8542_v43 = vld [vmem:[#allocation8 + $0xa80] ss:$24 sps:$4 sm:$0xff]  }
 0x234   :  { %v8605_v36 = vld [vmem:[#allocation8 + $0xc68] ss:$24 sps:$4 sm:$0xff]  }
 0x236   :  { %4707 = vmatpush1.bf16.msra.mxu0 %v8488_v44  ;;  %4965 = vmatpush1.bf16.msra.mxu1 %v8491_v46  ;;  %v8545_v44 = vld [vmem:[#allocation8 + $0xa88] ss:$24 sps:$4 sm:$0xff]   ;;  %v9752_v46 = vpack.c.bf16 %v1378_v37, %v1367_v34  ;;  %v8607_v34 = vld [vmem:[#allocation8 + $0xc6c] ss:$24 sps:$4 sm:$0xff]  }
 0x237   :  { %4719 = vmatprep.subr.bf16.mxu0 %v8496_v47  ;;  %4977 = vmatprep.subr.bf16.mxu1 %v8499_v48  ;;  %v8550_v47 = vld [vmem:[#allocation8 + $0xab4] ss:$24 sps:$4 sm:$0xff]  }
 0x238   :  { %v8553_v48 = vld [vmem:[#allocation8 + $0xabc] ss:$24 sps:$4 sm:$0xff]  }
 0x239   :  { %4709 = vmatmul.mubr.bf16.vlgmr.msra.gmra.mrb[12].mxu0 %v9720_v27  ;;  %4967 = vmatmul.mubr.bf16.vlgmr.msra.gmra.mrb[12].mxu1 %v9720_v27  ;;  %v8610_v37 = vld [vmem:[#allocation8 + $0xc94] ss:$24 sps:$4 sm:$0xff]  }
 0x23a   :  { %4720 = vmatpush1.bf16.msra.mxu0 %v8494_v49  ;;  %4978 = vmatpush1.bf16.msra.mxu1 %v8497_v50  ;;  %v8548_v49 = vld [vmem:[#allocation8 + $0xab0] ss:$24 sps:$4 sm:$0xff]  }
 0x23b   :  { %4721 = vmatprep.subr.bf16.mxu0 %v8502_v51  ;;  %4979 = vmatprep.subr.bf16.mxu1 %v8505_v53  ;;  %v8551_v50 = vld [vmem:[#allocation8 + $0xab8] ss:$24 sps:$4 sm:$0xff]   ;;  %v8556_v51 = vld [vmem:[#allocation8 + $0xae4] ss:$24 sps:$4 sm:$0xff]  }
 0x23c   :  { %4751 = vmatprep.mubr.bf16.mxu0 %v9734_v16  ;;  %5009 = vmatprep.mubr.bf16.mxu1 %v9734_v16  ;;  %v8559_v53 = vld [vmem:[#allocation8 + $0xaec] ss:$24 sps:$4 sm:$0xff]  }
 0x23e   :  { %4722 = vmatpush1.bf16.msra.mxu0 %v8500_v54  ;;  %4980 = vmatpush1.bf16.msra.mxu1 %v8503_v55  ;;  %v8554_v54 = vld [vmem:[#allocation8 + $0xae0] ss:$24 sps:$4 sm:$0xff]  }
 0x23f   :  { %4723 = vmatprep.subr.bf16.mxu0 %v8508_v56  ;;  %4981 = vmatprep.subr.bf16.mxu1 %v8511_v57  ;;  %v8557_v55 = vld [vmem:[#allocation8 + $0xae8] ss:$24 sps:$4 sm:$0xff]   ;;  %v8562_v56 = vld [vmem:[#allocation8 + $0xb14] ss:$24 sps:$4 sm:$0xff]  }
 0x240   :  { %v8565_v57 = vld [vmem:[#allocation8 + $0xb1c] ss:$24 sps:$4 sm:$0xff]  }
 0x242   :  { %4724 = vmatpush1.bf16.msra.mxu0 %v8506_v58  ;;  %4982 = vmatpush1.bf16.msra.mxu1 %v8509_v62  ;;  %v8560_v58 = vld [vmem:[#allocation8 + $0xb10] ss:$24 sps:$4 sm:$0xff]  }
 0x243   :  { %4725 = vmatprep.subr.bf16.mxu0 %v8514_v0  ;;  %4983 = vmatprep.subr.bf16.mxu1 %v8517_v1  ;;  %v8563_v62 = vld [vmem:[#allocation8 + $0xb18] ss:$24 sps:$4 sm:$0xff]   ;;  %v8568_v0 = vld [vmem:[#allocation8 + $0xb44] ss:$24 sps:$4 sm:$0xff]  }
 0x244   :  { %v8571_v1 = vld [vmem:[#allocation8 + $0xb4c] ss:$24 sps:$4 sm:$0xff]  }
 0x246   :  { %4726 = vmatpush1.bf16.msra.mxu0 %v8512_v3  ;;  %4984 = vmatpush1.bf16.msra.mxu1 %v8515_v40  ;;  %v8566_v3 = vld [vmem:[#allocation8 + $0xb40] ss:$24 sps:$4 sm:$0xff]  }
 0x247   :  { %4727 = vmatprep.subr.bf16.mxu0 %v8520_v5  ;;  %4985 = vmatprep.subr.bf16.mxu1 %v8523_v6  ;;  %v8569_v40 = vld [vmem:[#allocation8 + $0xb48] ss:$24 sps:$4 sm:$0xff]   ;;  %v8574_v5 = vld [vmem:[#allocation8 + $0xb74] ss:$24 sps:$4 sm:$0xff]  }
 0x248   :  { %v8577_v6 = vld [vmem:[#allocation8 + $0xb7c] ss:$24 sps:$4 sm:$0xff]  }
 0x24a   :  { %4728 = vmatpush1.bf16.msra.mxu0 %v8518_v7  ;;  %4986 = vmatpush1.bf16.msra.mxu1 %v8521_v8  ;;  %v8572_v7 = vld [vmem:[#allocation8 + $0xb70] ss:$24 sps:$4 sm:$0xff]  }
 0x24b   :  { %4729 = vmatprep.subr.bf16.mxu0 %v8526_v9  ;;  %4987 = vmatprep.subr.bf16.mxu1 %v8529_v10  ;;  %v8575_v8 = vld [vmem:[#allocation8 + $0xb78] ss:$24 sps:$4 sm:$0xff]   ;;  %v8580_v9 = vld [vmem:[#allocation8 + $0xba4] ss:$24 sps:$4 sm:$0xff]  }
 0x24c   :  { %v8583_v10 = vld [vmem:[#allocation8 + $0xbac] ss:$24 sps:$4 sm:$0xff]  }
 0x24e   :  { %4730 = vmatpush1.bf16.msra.mxu0 %v8524_v11  ;;  %4988 = vmatpush1.bf16.msra.mxu1 %v8527_v12  ;;  %v8578_v11 = vld [vmem:[#allocation8 + $0xba0] ss:$24 sps:$4 sm:$0xff]  }
 0x24f   :  { %4731 = vmatprep.subr.bf16.mxu0 %v8532_v15  ;;  %4989 = vmatprep.subr.bf16.mxu1 %v8535_v18  ;;  %v8581_v12 = vld [vmem:[#allocation8 + $0xba8] ss:$24 sps:$4 sm:$0xff]   ;;  %v8586_v15 = vld [vmem:[#allocation8 + $0xbd4] ss:$24 sps:$4 sm:$0xff]  }
 0x250   :  { %v8589_v18 = vld [vmem:[#allocation8 + $0xbdc] ss:$24 sps:$4 sm:$0xff]  }
 0x252   :  { %4732 = vmatpush1.bf16.msra.mxu0 %v8530_v19  ;;  %4990 = vmatpush1.bf16.msra.mxu1 %v8533_v20  ;;  %v8584_v19 = vld [vmem:[#allocation8 + $0xbd0] ss:$24 sps:$4 sm:$0xff]  }
 0x253   :  { %4733 = vmatprep.subr.bf16.mxu0 %v8538_v25  ;;  %4991 = vmatprep.subr.bf16.mxu1 %v8541_v26  ;;  %v8587_v20 = vld [vmem:[#allocation8 + $0xbd8] ss:$24 sps:$4 sm:$0xff]   ;;  %v8598_v25 = vld [vmem:[#allocation8 + $0xc34] ss:$24 sps:$4 sm:$0xff]  }
 0x254   :  { %v8601_v26 = vld [vmem:[#allocation8 + $0xc3c] ss:$24 sps:$4 sm:$0xff]  }
 0x256   :  { %4734 = vmatpush1.bf16.msra.mxu0 %v8536_v29  ;;  %4992 = vmatpush1.bf16.msra.mxu1 %v8539_v31  ;;  %v8599_v29 = vld [vmem:[#allocation8 + $0xc38] ss:$24 sps:$4 sm:$0xff]   ;;  %v8604_v31 = vld [vmem:[#allocation8 + $0xc64] ss:$24 sps:$4 sm:$0xff]  }
 0x257   :  { %4735 = vmatprep.subr.bf16.mxu0 %v8544_v45  ;;  %4993 = vmatprep.subr.bf16.mxu1 %v8547_v38  ;;  %v8613_v45 = vld [vmem:[#allocation8 + $0xc9c] ss:$24 sps:$4 sm:$0xff]   ;;  %v8608_v38 = vld [vmem:[#allocation8 + $0xc90] ss:$24 sps:$4 sm:$0xff]  }
 0x25a   :  { %4736 = vmatpush1.bf16.msra.mxu0 %v8542_v43  ;;  %4994 = vmatpush1.bf16.msra.mxu1 %v8545_v44  ;;  %v8611_v43 = vld [vmem:[#allocation8 + $0xc98] ss:$24 sps:$4 sm:$0xff]   ;;  %v8616_v44 = vld [vmem:[#allocation8 + $0xcc4] ss:$24 sps:$4 sm:$0xff]  }
 0x25b   :  { %4737 = vmatprep.subr.bf16.mxu0 %v8550_v47  ;;  %4995 = vmatprep.subr.bf16.mxu1 %v8553_v48  ;;  %v8619_v47 = vld [vmem:[#allocation8 + $0xccc] ss:$24 sps:$4 sm:$0xff]   ;;  %v8614_v48 = vld [vmem:[#allocation8 + $0xcc0] ss:$24 sps:$4 sm:$0xff]  }
 0x25e   :  { %4738 = vmatpush1.bf16.msra.mxu0 %v8548_v49  ;;  %4996 = vmatpush1.bf16.msra.mxu1 %v8551_v50  ;;  %v8617_v49 = vld [vmem:[#allocation8 + $0xcc8] ss:$24 sps:$4 sm:$0xff]   ;;  %v8622_v50 = vld [vmem:[#allocation8 + $0xcf4] ss:$24 sps:$4 sm:$0xff]  }
 0x25f   :  { %4739 = vmatprep.subr.bf16.mxu0 %v8556_v51  ;;  %4997 = vmatprep.subr.bf16.mxu1 %v8559_v53  ;;  %v8625_v51 = vld [vmem:[#allocation8 + $0xcfc] ss:$24 sps:$4 sm:$0xff]   ;;  %v8620_v53 = vld [vmem:[#allocation8 + $0xcf0] ss:$24 sps:$4 sm:$0xff]  }
 0x262   :  { %4740 = vmatpush1.bf16.msra.mxu0 %v8554_v54  ;;  %4998 = vmatpush1.bf16.msra.mxu1 %v8557_v55  ;;  %v8623_v54 = vld [vmem:[#allocation8 + $0xcf8] ss:$24 sps:$4 sm:$0xff]   ;;  %v8628_v55 = vld [vmem:[#allocation8 + $0xd24] ss:$24 sps:$4 sm:$0xff]  }
 0x263   :  { %4741 = vmatprep.subr.bf16.mxu0 %v8562_v56  ;;  %4999 = vmatprep.subr.bf16.mxu1 %v8565_v57  ;;  %v8631_v56 = vld [vmem:[#allocation8 + $0xd2c] ss:$24 sps:$4 sm:$0xff]   ;;  %v8626_v57 = vld [vmem:[#allocation8 + $0xd20] ss:$24 sps:$4 sm:$0xff]  }
 0x266   :  { %4742 = vmatpush1.bf16.msra.mxu0 %v8560_v58  ;;  %5000 = vmatpush1.bf16.msra.mxu1 %v8563_v62  ;;  %v8629_v58 = vld [vmem:[#allocation8 + $0xd28] ss:$24 sps:$4 sm:$0xff]   ;;  %v8634_v62 = vld [vmem:[#allocation8 + $0xd54] ss:$24 sps:$4 sm:$0xff]  }
 0x267   :  { %4743 = vmatprep.subr.bf16.mxu0 %v8568_v0  ;;  %5001 = vmatprep.subr.bf16.mxu1 %v8571_v1  ;;  %v8637_v0 = vld [vmem:[#allocation8 + $0xd5c] ss:$24 sps:$4 sm:$0xff]   ;;  %v8632_v1 = vld [vmem:[#allocation8 + $0xd50] ss:$24 sps:$4 sm:$0xff]  }
 0x26a   :  { %4744 = vmatpush1.bf16.msra.mxu0 %v8566_v3  ;;  %5002 = vmatpush1.bf16.msra.mxu1 %v8569_v40  ;;  %v8635_v3 = vld [vmem:[#allocation8 + $0xd58] ss:$24 sps:$4 sm:$0xff]   ;;  %v8640_v40 = vld [vmem:[#allocation8 + $0xd84] ss:$24 sps:$4 sm:$0xff]  }
 0x26b   :  { %4745 = vmatprep.subr.bf16.mxu0 %v8574_v5  ;;  %5003 = vmatprep.subr.bf16.mxu1 %v8577_v6  ;;  %v8643_v5 = vld [vmem:[#allocation8 + $0xd8c] ss:$24 sps:$4 sm:$0xff]   ;;  %v8638_v6 = vld [vmem:[#allocation8 + $0xd80] ss:$24 sps:$4 sm:$0xff]  }
 0x26e   :  { %4746 = vmatpush1.bf16.msra.mxu0 %v8572_v7  ;;  %5004 = vmatpush1.bf16.msra.mxu1 %v8575_v8  ;;  %v8641_v7 = vld [vmem:[#allocation8 + $0xd88] ss:$24 sps:$4 sm:$0xff]   ;;  %v8646_v8 = vld [vmem:[#allocation8 + $0xdb4] ss:$24 sps:$4 sm:$0xff]  }
 0x26f   :  { %4747 = vmatprep.subr.bf16.mxu0 %v8580_v9  ;;  %5005 = vmatprep.subr.bf16.mxu1 %v8583_v10  ;;  %v8649_v9 = vld [vmem:[#allocation8 + $0xdbc] ss:$24 sps:$4 sm:$0xff]   ;;  %v8644_v10 = vld [vmem:[#allocation8 + $0xdb0] ss:$24 sps:$4 sm:$0xff]  }
 0x272   :  { %4748 = vmatpush1.bf16.msra.mxu0 %v8578_v11  ;;  %5006 = vmatpush1.bf16.msra.mxu1 %v8581_v12  ;;  %v8647_v11 = vld [vmem:[#allocation8 + $0xdb8] ss:$24 sps:$4 sm:$0xff]   ;;  %v8652_v12 = vld [vmem:[#allocation8 + $0xde4] ss:$24 sps:$4 sm:$0xff]  }
 0x273   :  { %4749 = vmatprep.subr.bf16.mxu0 %v8586_v15  ;;  %5007 = vmatprep.subr.bf16.mxu1 %v8589_v18  ;;  %v8655_v15 = vld [vmem:[#allocation8 + $0xdec] ss:$24 sps:$4 sm:$0xff]   ;;  %v8650_v18 = vld [vmem:[#allocation8 + $0xde0] ss:$24 sps:$4 sm:$0xff]  }
 0x276   :  { %4750 = vmatpush1.bf16.msra.mxu0 %v8584_v19  ;;  %5008 = vmatpush1.bf16.msra.mxu1 %v8587_v20  ;;  %v8653_v19 = vld [vmem:[#allocation8 + $0xde8] ss:$24 sps:$4 sm:$0xff]   ;;  %v8658_v20 = vld [vmem:[#allocation8 + $0xe14] ss:$24 sps:$4 sm:$0xff]  }
 0x277   :  { %4762 = vmatprep.subr.bf16.mxu0 %v8592_v21  ;;  %5020 = vmatprep.subr.bf16.mxu1 %v8595_v22  ;;  %v8661_v21 = vld [vmem:[#allocation8 + $0xe1c] ss:$24 sps:$4 sm:$0xff]   ;;  %v8656_v22 = vld [vmem:[#allocation8 + $0xe10] ss:$24 sps:$4 sm:$0xff]  }
 0x279   :  { %4752 = vmatmul.mubr.bf16.vlgmr.msra.gmra.mrb[12].mxu0 %v9730_v13  ;;  %5010 = vmatmul.mubr.bf16.vlgmr.msra.gmra.mrb[12].mxu1 %v9730_v13 }
 0x27a   :  { %4763 = vmatpush1.bf16.msra.mxu0 %v8590_v23  ;;  %4794 = vmatprep.mubr.bf16.mxu0 %v9744_v17  ;;  %v8659_v23 = vld [vmem:[#allocation8 + $0xe18] ss:$24 sps:$4 sm:$0xff]  }
 0x27b   :  { %5021 = vmatpush1.bf16.msra.mxu1 %v8593_v24  ;;  %5052 = vmatprep.mubr.bf16.mxu1 %v9744_v17  ;;  %v8664_v24 = vld [vmem:[#allocation8 + $0xe44] ss:$24 sps:$4 sm:$0xff]  }
 0x27c   :  { %4764 = vmatprep.subr.bf16.mxu0 %v8598_v25  ;;  %5022 = vmatprep.subr.bf16.mxu1 %v8601_v26  ;;  %v8667_v25 = vld [vmem:[#allocation8 + $0xe4c] ss:$24 sps:$4 sm:$0xff]   ;;  %v8662_v26 = vld [vmem:[#allocation8 + $0xe40] ss:$24 sps:$4 sm:$0xff]  }
 0x27e   :  { %4765 = vmatpush1.bf16.msra.mxu0 %v8596_v28  ;;  %v8665_v28 = vld [vmem:[#allocation8 + $0xe48] ss:$24 sps:$4 sm:$0xff]  }
 0x27f   :  { %5023 = vmatpush1.bf16.msra.mxu1 %v8599_v29  ;;  %4766 = vmatprep.subr.bf16.mxu0 %v8604_v31  ;;  %v8670_v29 = vld [vmem:[#allocation8 + $0xe74] ss:$24 sps:$4 sm:$0xff]  }
 0x280   :  { %5024 = vmatprep.subr.bf16.mxu1 %v8607_v34  ;;  %v8673_v31 = vld [vmem:[#allocation8 + $0xe7c] ss:$24 sps:$4 sm:$0xff]   ;;  %v8668_v34 = vld [vmem:[#allocation8 + $0xe70] ss:$24 sps:$4 sm:$0xff]  }
 0x282   :  { %4767 = vmatpush1.bf16.msra.mxu0 %v8602_v35  ;;  %v8671_v35 = vld [vmem:[#allocation8 + $0xe78] ss:$24 sps:$4 sm:$0xff]  }
 0x283   :  { %5025 = vmatpush1.bf16.msra.mxu1 %v8605_v36  ;;  %4768 = vmatprep.subr.bf16.mxu0 %v8610_v37  ;;  %v8676_v36 = vld [vmem:[#allocation8 + $0xea4] ss:$24 sps:$4 sm:$0xff]  }
 0x284   :  { %5026 = vmatprep.subr.bf16.mxu1 %v8613_v45  ;;  %v8679_v37 = vld [vmem:[#allocation8 + $0xeac] ss:$24 sps:$4 sm:$0xff]   ;;  %v8674_v45 = vld [vmem:[#allocation8 + $0xea0] ss:$24 sps:$4 sm:$0xff]  }
 0x286   :  { %4769 = vmatpush1.bf16.msra.mxu0 %v8608_v38  ;;  %v8677_v38 = vld [vmem:[#allocation8 + $0xea8] ss:$24 sps:$4 sm:$0xff]  }
 0x287   :  { %5027 = vmatpush1.bf16.msra.mxu1 %v8611_v43  ;;  %4770 = vmatprep.subr.bf16.mxu0 %v8616_v44  ;;  %v8682_v43 = vld [vmem:[#allocation8 + $0xed4] ss:$24 sps:$4 sm:$0xff]  }
 0x288   :  { %5028 = vmatprep.subr.bf16.mxu1 %v8619_v47  ;;  %v8685_v44 = vld [vmem:[#allocation8 + $0xedc] ss:$24 sps:$4 sm:$0xff]   ;;  %v8680_v47 = vld [vmem:[#allocation8 + $0xed0] ss:$24 sps:$4 sm:$0xff]  }
 0x28a   :  { %4771 = vmatpush1.bf16.msra.mxu0 %v8614_v48  ;;  %v8683_v48 = vld [vmem:[#allocation8 + $0xed8] ss:$24 sps:$4 sm:$0xff]  }
 0x28b   :  { %5029 = vmatpush1.bf16.msra.mxu1 %v8617_v49  ;;  %4772 = vmatprep.subr.bf16.mxu0 %v8622_v50  ;;  %v8688_v49 = vld [vmem:[#allocation8 + $0xf04] ss:$24 sps:$4 sm:$0xff]  }
 0x28c   :  { %5030 = vmatprep.subr.bf16.mxu1 %v8625_v51  ;;  %v8691_v50 = vld [vmem:[#allocation8 + $0xf0c] ss:$24 sps:$4 sm:$0xff]   ;;  %v8686_v51 = vld [vmem:[#allocation8 + $0xf00] ss:$24 sps:$4 sm:$0xff]  }
 0x28e   :  { %4773 = vmatpush1.bf16.msra.mxu0 %v8620_v53  ;;  %v8689_v53 = vld [vmem:[#allocation8 + $0xf08] ss:$24 sps:$4 sm:$0xff]  }
 0x28f   :  { %5031 = vmatpush1.bf16.msra.mxu1 %v8623_v54  ;;  %4774 = vmatprep.subr.bf16.mxu0 %v8628_v55  ;;  %v8694_v54 = vld [vmem:[#allocation8 + $0xf34] ss:$24 sps:$4 sm:$0xff]  }
 0x290   :  { %5032 = vmatprep.subr.bf16.mxu1 %v8631_v56  ;;  %v8697_v55 = vld [vmem:[#allocation8 + $0xf3c] ss:$24 sps:$4 sm:$0xff]   ;;  %v8692_v56 = vld [vmem:[#allocation8 + $0xf30] ss:$24 sps:$4 sm:$0xff]  }
 0x292   :  { %4775 = vmatpush1.bf16.msra.mxu0 %v8626_v57  ;;  %v8695_v57 = vld [vmem:[#allocation8 + $0xf38] ss:$24 sps:$4 sm:$0xff]  }
 0x293   :  { %5033 = vmatpush1.bf16.msra.mxu1 %v8629_v58  ;;  %4776 = vmatprep.subr.bf16.mxu0 %v8634_v62  ;;  %v8700_v58 = vld [vmem:[#allocation8 + $0xf64] ss:$24 sps:$4 sm:$0xff]  }
 0x294   :  { %5034 = vmatprep.subr.bf16.mxu1 %v8637_v0  ;;  %v8703_v62 = vld [vmem:[#allocation8 + $0xf6c] ss:$24 sps:$4 sm:$0xff]   ;;  %v8698_v0 = vld [vmem:[#allocation8 + $0xf60] ss:$24 sps:$4 sm:$0xff]  }
 0x296   :  { %4777 = vmatpush1.bf16.msra.mxu0 %v8632_v1  ;;  %v8701_v1 = vld [vmem:[#allocation8 + $0xf68] ss:$24 sps:$4 sm:$0xff]  }
 0x297   :  { %5035 = vmatpush1.bf16.msra.mxu1 %v8635_v3  ;;  %4778 = vmatprep.subr.bf16.mxu0 %v8640_v40  ;;  %v8706_v3 = vld [vmem:[#allocation8 + $0xf94] ss:$24 sps:$4 sm:$0xff]  }
 0x298   :  { %5036 = vmatprep.subr.bf16.mxu1 %v8643_v5  ;;  %v8709_v40 = vld [vmem:[#allocation8 + $0xf9c] ss:$24 sps:$4 sm:$0xff]   ;;  %v8704_v5 = vld [vmem:[#allocation8 + $0xf90] ss:$24 sps:$4 sm:$0xff]  }
 0x29a   :  { %4779 = vmatpush1.bf16.msra.mxu0 %v8638_v6  ;;  %v8707_v6 = vld [vmem:[#allocation8 + $0xf98] ss:$24 sps:$4 sm:$0xff]  }
 0x29b   :  { %5037 = vmatpush1.bf16.msra.mxu1 %v8641_v7  ;;  %4780 = vmatprep.subr.bf16.mxu0 %v8646_v8  ;;  %v8712_v7 = vld [vmem:[#allocation8 + $0xfc4] ss:$24 sps:$4 sm:$0xff]  }
 0x29c   :  { %5038 = vmatprep.subr.bf16.mxu1 %v8649_v9  ;;  %v8715_v8 = vld [vmem:[#allocation8 + $0xfcc] ss:$24 sps:$4 sm:$0xff]   ;;  %v8710_v9 = vld [vmem:[#allocation8 + $0xfc0] ss:$24 sps:$4 sm:$0xff]  }
 0x29e   :  { %4781 = vmatpush1.bf16.msra.mxu0 %v8644_v10  ;;  %v8713_v10 = vld [vmem:[#allocation8 + $0xfc8] ss:$24 sps:$4 sm:$0xff]  }
 0x29f   :  { %5039 = vmatpush1.bf16.msra.mxu1 %v8647_v11  ;;  %4782 = vmatprep.subr.bf16.mxu0 %v8652_v12  ;;  %v8718_v11 = vld [vmem:[#allocation8 + $0xff4] ss:$24 sps:$4 sm:$0xff]  }
 0x2a0   :  { %5040 = vmatprep.subr.bf16.mxu1 %v8655_v15  ;;  %v8721_v12 = vld [vmem:[#allocation8 + $0xffc] ss:$24 sps:$4 sm:$0xff]   ;;  %v8716_v15 = vld [vmem:[#allocation8 + $0xff0] ss:$24 sps:$4 sm:$0xff]  }
 0x2a2   :  { %4783 = vmatpush1.bf16.msra.mxu0 %v8650_v18  ;;  %v8719_v18 = vld [vmem:[#allocation8 + $0xff8] ss:$24 sps:$4 sm:$0xff]  }
 0x2a3   :  { %5041 = vmatpush1.bf16.msra.mxu1 %v8653_v19  ;;  %4784 = vmatprep.subr.bf16.mxu0 %v8658_v20  ;;  %v8724_v19 = vld [vmem:[#allocation8 + $0x1024] ss:$24 sps:$4 sm:$0xff]  }
 0x2a4   :  { %5042 = vmatprep.subr.bf16.mxu1 %v8661_v21  ;;  %v8727_v20 = vld [vmem:[#allocation8 + $0x102c] ss:$24 sps:$4 sm:$0xff]   ;;  %v8722_v21 = vld [vmem:[#allocation8 + $0x1020] ss:$24 sps:$4 sm:$0xff]  }
 0x2a6   :  { %4785 = vmatpush1.bf16.msra.mxu0 %v8656_v22  ;;  %v8725_v22 = vld [vmem:[#allocation8 + $0x1028] ss:$24 sps:$4 sm:$0xff]  }
 0x2a7   :  { %5043 = vmatpush1.bf16.msra.mxu1 %v8659_v23  ;;  %4786 = vmatprep.subr.bf16.mxu0 %v8664_v24  ;;  %v8730_v23 = vld [vmem:[#allocation8 + $0x1054] ss:$24 sps:$4 sm:$0xff]  }
 0x2a8   :  { %5044 = vmatprep.subr.bf16.mxu1 %v8667_v25  ;;  %v8733_v24 = vld [vmem:[#allocation8 + $0x105c] ss:$24 sps:$4 sm:$0xff]   ;;  %v8728_v25 = vld [vmem:[#allocation8 + $0x1050] ss:$24 sps:$4 sm:$0xff]  }
 0x2aa   :  { %4787 = vmatpush1.bf16.msra.mxu0 %v8662_v26  ;;  %v8731_v26 = vld [vmem:[#allocation8 + $0x1058] ss:$24 sps:$4 sm:$0xff]  }
 0x2ab   :  { %5045 = vmatpush1.bf16.msra.mxu1 %v8665_v28  ;;  %4788 = vmatprep.subr.bf16.mxu0 %v8670_v29  ;;  %v8736_v28 = vld [vmem:[#allocation8 + $0x14] ss:$24 sps:$4 sm:$0xff]   ;;  %v8734_v29 = vld [vmem:[#allocation8 + $0x10] ss:$24 sps:$4 sm:$0xff]  }
 0x2ac   :  { %5046 = vmatprep.subr.bf16.mxu1 %v8673_v31  ;;  %v8739_v31 = vld [vmem:[#allocation8 + $0x44] ss:$24 sps:$4 sm:$0xff]  }
 0x2ae   :  { %4789 = vmatpush1.bf16.msra.mxu0 %v8668_v34  ;;  %v8737_v34 = vld [vmem:[#allocation8 + $0x40] ss:$24 sps:$4 sm:$0xff]  }
 0x2af   :  { %5047 = vmatpush1.bf16.msra.mxu1 %v8671_v35  ;;  %4790 = vmatprep.subr.bf16.mxu0 %v8676_v36  ;;  %v8742_v35 = vld [vmem:[#allocation8 + $0x74] ss:$24 sps:$4 sm:$0xff]   ;;  %v8740_v36 = vld [vmem:[#allocation8 + $0x70] ss:$24 sps:$4 sm:$0xff]  }
 0x2b0   :  { %5048 = vmatprep.subr.bf16.mxu1 %v8679_v37  ;;  %v8745_v37 = vld [vmem:[#allocation8 + $0xa4] ss:$24 sps:$4 sm:$0xff]  }
 0x2b2   :  { %4791 = vmatpush1.bf16.msra.mxu0 %v8674_v45  ;;  %v8743_v45 = vld [vmem:[#allocation8 + $0xa0] ss:$24 sps:$4 sm:$0xff]  }
 0x2b3   :  { %5049 = vmatpush1.bf16.msra.mxu1 %v8677_v38  ;;  %4792 = vmatprep.subr.bf16.mxu0 %v8682_v43  ;;  %v8748_v38 = vld [vmem:[#allocation8 + $0xd4] ss:$24 sps:$4 sm:$0xff]   ;;  %v8746_v43 = vld [vmem:[#allocation8 + $0xd0] ss:$24 sps:$4 sm:$0xff]  }
 0x2b4   :  { %5050 = vmatprep.subr.bf16.mxu1 %v8685_v44  ;;  %v8751_v44 = vld [vmem:[#allocation8 + $0x104] ss:$24 sps:$4 sm:$0xff]  }
 0x2b6   :  { %4793 = vmatpush1.bf16.msra.mxu0 %v8680_v47  ;;  %v8749_v47 = vld [vmem:[#allocation8 + $0x100] ss:$24 sps:$4 sm:$0xff]  }
 0x2b7   :  { %5051 = vmatpush1.bf16.msra.mxu1 %v8683_v48  ;;  %4805 = vmatprep.subr.bf16.mxu0 %v8688_v49  ;;  %v8754_v48 = vld [vmem:[#allocation8 + $0x134] ss:$24 sps:$4 sm:$0xff]   ;;  %v8757_v49 = vld [vmem:[#allocation8 + $0x164] ss:$24 sps:$4 sm:$0xff]  }
 0x2b8   :  { %5063 = vmatprep.subr.bf16.mxu1 %v8691_v50  ;;  %v8755_v50 = vld [vmem:[#allocation8 + $0x160] ss:$24 sps:$4 sm:$0xff]  }
 0x2b9   :  { %4795 = vmatmul.mubr.bf16.vlgmr.msra.gmra.mrb[12].mxu0 %v9742_v14 }
 0x2ba   :  { %5053 = vmatmul.mubr.bf16.vlgmr.msra.gmra.mrb[12].mxu1 %v9742_v14  ;;  %4806 = vmatpush1.bf16.msra.mxu0 %v8686_v51  ;;  %v8760_v51 = vld [vmem:[#allocation8 + $0x194] ss:$24 sps:$4 sm:$0xff]  }
 0x2bb   :  { %5064 = vmatpush1.bf16.msra.mxu1 %v8689_v53  ;;  %4807 = vmatprep.subr.bf16.mxu0 %v8694_v54  ;;  %v8856_v53 = vld [vmem:[#allocation11 + $0x4] ss:$12 sps:$4 sm:$0xff]  }
 0x2bc   :  { %5065 = vmatprep.subr.bf16.mxu1 %v8697_v55  ;;  %4837 = vmatprep.mubr.bf16.mxu0 %v9465_v4  ;;  %v8758_v54 = vld [vmem:[#allocation8 + $0x190] ss:$24 sps:$4 sm:$0xff]  }
 0x2bd   :  { %5095 = vmatprep.mubr.bf16.mxu1 %v9465_v4  ;;  %v8854_v55 = vld [vmem:[#allocation11] ss:$12 sps:$4 sm:$0xff]  }
 0x2be   :  { %4808 = vmatpush1.bf16.msra.mxu0 %v8692_v56  ;;  %v8763_v56 = vld [vmem:[#allocation8 + $0x1c4] ss:$24 sps:$4 sm:$0xff]  }
 0x2bf   :  { %5066 = vmatpush1.bf16.msra.mxu1 %v8695_v57  ;;  %4809 = vmatprep.subr.bf16.mxu0 %v8700_v58  ;;  %v8862_v57 = vld [vmem:[#allocation11 + $0x1c] ss:$12 sps:$4 sm:$0xff]  }
 0x2c0   :  { %5067 = vmatprep.subr.bf16.mxu1 %v8703_v62  ;;  %v8761_v58 = vld [vmem:[#allocation8 + $0x1c0] ss:$24 sps:$4 sm:$0xff]  }
 0x2c1   :  { %v8860_v62 = vld [vmem:[#allocation11 + $0x18] ss:$12 sps:$4 sm:$0xff]  }
 0x2c2   :  { %4810 = vmatpush1.bf16.msra.mxu0 %v8698_v0  ;;  %v8766_v0 = vld [vmem:[#allocation8 + $0x1f4] ss:$24 sps:$4 sm:$0xff]  }
 0x2c3   :  { %5068 = vmatpush1.bf16.msra.mxu1 %v8701_v1  ;;  %4811 = vmatprep.subr.bf16.mxu0 %v8706_v3  ;;  %v8868_v1 = vld [vmem:[#allocation11 + $0x34] ss:$12 sps:$4 sm:$0xff]  }
 0x2c4   :  { %5069 = vmatprep.subr.bf16.mxu1 %v8709_v40  ;;  %v8764_v3 = vld [vmem:[#allocation8 + $0x1f0] ss:$24 sps:$4 sm:$0xff]   ;;  %v8866_v40 = vld [vmem:[#allocation11 + $0x30] ss:$12 sps:$4 sm:$0xff]  }
 0x2c6   :  { %4812 = vmatpush1.bf16.msra.mxu0 %v8704_v5  ;;  %v8769_v5 = vld [vmem:[#allocation8 + $0x224] ss:$24 sps:$4 sm:$0xff]  }
 0x2c7   :  { %5070 = vmatpush1.bf16.msra.mxu1 %v8707_v6  ;;  %4813 = vmatprep.subr.bf16.mxu0 %v8712_v7  ;;  %v8874_v6 = vld [vmem:[#allocation11 + $0x4c] ss:$12 sps:$4 sm:$0xff]  }
 0x2c8   :  { %5071 = vmatprep.subr.bf16.mxu1 %v8715_v8  ;;  %v8767_v7 = vld [vmem:[#allocation8 + $0x220] ss:$24 sps:$4 sm:$0xff]  }
 0x2c9   :  { %v8872_v8 = vld [vmem:[#allocation11 + $0x48] ss:$12 sps:$4 sm:$0xff]  }
 0x2ca   :  { %4814 = vmatpush1.bf16.msra.mxu0 %v8710_v9  ;;  %v8772_v9 = vld [vmem:[#allocation8 + $0x254] ss:$24 sps:$4 sm:$0xff]  }
 0x2cb   :  { %5072 = vmatpush1.bf16.msra.mxu1 %v8713_v10  ;;  %4815 = vmatprep.subr.bf16.mxu0 %v8718_v11  ;;  %v8880_v10 = vld [vmem:[#allocation11 + $0x64] ss:$12 sps:$4 sm:$0xff]  }
 0x2cc   :  { %5073 = vmatprep.subr.bf16.mxu1 %v8721_v12  ;;  %v8770_v11 = vld [vmem:[#allocation8 + $0x250] ss:$24 sps:$4 sm:$0xff]  }
 0x2cd   :  { %v8878_v12 = vld [vmem:[#allocation11 + $0x60] ss:$12 sps:$4 sm:$0xff]  }
 0x2ce   :  { %4816 = vmatpush1.bf16.msra.mxu0 %v8716_v15  ;;  %v8775_v15 = vld [vmem:[#allocation8 + $0x284] ss:$24 sps:$4 sm:$0xff]  }
 0x2cf   :  { %5074 = vmatpush1.bf16.msra.mxu1 %v8719_v18  ;;  %4817 = vmatprep.subr.bf16.mxu0 %v8724_v19  ;;  %v8886_v18 = vld [vmem:[#allocation11 + $0x7c] ss:$12 sps:$4 sm:$0xff]  }
 0x2d0   :  { %5075 = vmatprep.subr.bf16.mxu1 %v8727_v20  ;;  %v8773_v19 = vld [vmem:[#allocation8 + $0x280] ss:$24 sps:$4 sm:$0xff]  }
 0x2d1   :  { %v8884_v20 = vld [vmem:[#allocation11 + $0x78] ss:$12 sps:$4 sm:$0xff]  }
 0x2d2   :  { %4818 = vmatpush1.bf16.msra.mxu0 %v8722_v21  ;;  %v8778_v21 = vld [vmem:[#allocation8 + $0x2b4] ss:$24 sps:$4 sm:$0xff]  }
 0x2d3   :  { %5076 = vmatpush1.bf16.msra.mxu1 %v8725_v22  ;;  %4819 = vmatprep.subr.bf16.mxu0 %v8730_v23  ;;  %v8892_v22 = vld [vmem:[#allocation11 + $0x94] ss:$12 sps:$4 sm:$0xff]  }
 0x2d4   :  { %5077 = vmatprep.subr.bf16.mxu1 %v8733_v24  ;;  %v8776_v23 = vld [vmem:[#allocation8 + $0x2b0] ss:$24 sps:$4 sm:$0xff]   ;;  %v8890_v24 = vld [vmem:[#allocation11 + $0x90] ss:$12 sps:$4 sm:$0xff]  }
 0x2d6   :  { %4820 = vmatpush1.bf16.msra.mxu0 %v8728_v25  ;;  %v8781_v25 = vld [vmem:[#allocation8 + $0x2e4] ss:$24 sps:$4 sm:$0xff]  }
 0x2d7   :  { %5078 = vmatpush1.bf16.msra.mxu1 %v8731_v26  ;;  %5106 = vmatprep.subr.bf16.mxu0 %v8736_v28  ;;  %v8898_v26 = vld [vmem:[#allocation11 + $0xac] ss:$12 sps:$4 sm:$0xff]  }
 0x2d8   :  { %6359 = vmatprep.subr.bf16.mxu1 %v8856_v53  ;;  %v8779_v28 = vld [vmem:[#allocation8 + $0x2e0] ss:$24 sps:$4 sm:$0xff]  }
 0x2d9   :  { %4838 = vmatmul.mubr.bf16.vlgmr.msra.gmra.mrb[12].mxu0 %v9752_v46  ;;  %v8928_v53 = vld [vmem:[#allocation11 + $0x124] ss:$12 sps:$4 sm:$0xff]  }
 0x2da   :  { %5096 = vmatmul.mubr.bf16.vlgmr.msra.gmra.mrb[12].mxu1 %v9752_v46  ;;  %5107 = vmatpush1.bf16.msra.mxu0 %v8734_v29  ;;  %v8896_v29 = vld [vmem:[#allocation11 + $0xa8] ss:$12 sps:$4 sm:$0xff]  }
 0x2db   :  { %5138 = vmatprep.mubr.bf16.mxu0 %v9691_v52  ;;  %5108 = vmatprep.subr.bf16.mxu0 %v8739_v31  ;;  %v8752_v52 = vld [vmem:[#allocation8 + $0x130] ss:$24 sps:$4 sm:$0xff]   ;;  %v8784_v31 = vld [vmem:[#allocation8 + $0x314] ss:$24 sps:$4 sm:$0xff]  }
 0x2dc   :  { %6360 = vmatpush1.bf16.msra.mxu1 %v8854_v55  ;;  %v8926_v55 = vld [vmem:[#allocation11 + $0x120] ss:$12 sps:$4 sm:$0xff]  }
 0x2dd   :  { %6361 = vmatprep.subr.bf16.mxu1 %v8862_v57  ;;  %v8934_v57 = vld [vmem:[#allocation11 + $0x13c] ss:$12 sps:$4 sm:$0xff]  }
 0x2de   :  { %5109 = vmatpush1.bf16.msra.mxu0 %v8737_v34  ;;  %v8904_v34 = vld [vmem:[#allocation11 + $0xc4] ss:$12 sps:$4 sm:$0xff]  }
 0x2df   :  { %5110 = vmatprep.subr.bf16.mxu0 %v8742_v35  ;;  %v8782_v35 = vld [vmem:[#allocation8 + $0x310] ss:$24 sps:$4 sm:$0xff]  }
 0x2e0   :  { %6362 = vmatpush1.bf16.msra.mxu1 %v8860_v62  ;;  %v8932_v62 = vld [vmem:[#allocation11 + $0x138] ss:$12 sps:$4 sm:$0xff]  }
 0x2e1   :  { %6363 = vmatprep.subr.bf16.mxu1 %v8868_v1  ;;  %v8940_v1 = vld [vmem:[#allocation11 + $0x154] ss:$12 sps:$4 sm:$0xff]  }
 0x2e2   :  { %5111 = vmatpush1.bf16.msra.mxu0 %v8740_v36  ;;  %v8902_v36 = vld [vmem:[#allocation11 + $0xc0] ss:$12 sps:$4 sm:$0xff]  }
 0x2e3   :  { %5112 = vmatprep.subr.bf16.mxu0 %v8745_v37  ;;  %v8787_v37 = vld [vmem:[#allocation8 + $0x344] ss:$24 sps:$4 sm:$0xff]  }
 0x2e4   :  { %6364 = vmatpush1.bf16.msra.mxu1 %v8866_v40  ;;  %v8938_v40 = vld [vmem:[#allocation11 + $0x150] ss:$12 sps:$4 sm:$0xff]  }
 0x2e5   :  { %6365 = vmatprep.subr.bf16.mxu1 %v8874_v6  ;;  %v8946_v6 = vld [vmem:[#allocation11 + $0x16c] ss:$12 sps:$4 sm:$0xff]  }
 0x2e6   :  { %5113 = vmatpush1.bf16.msra.mxu0 %v8743_v45  ;;  %v8910_v45 = vld [vmem:[#allocation11 + $0xdc] ss:$12 sps:$4 sm:$0xff]  }
 0x2e7   :  { %5114 = vmatprep.subr.bf16.mxu0 %v8748_v38  ;;  %v8785_v38 = vld [vmem:[#allocation8 + $0x340] ss:$24 sps:$4 sm:$0xff]  }
 0x2e8   :  { %6366 = vmatpush1.bf16.msra.mxu1 %v8872_v8  ;;  %v8944_v8 = vld [vmem:[#allocation11 + $0x168] ss:$12 sps:$4 sm:$0xff]  }
 0x2e9   :  { %6367 = vmatprep.subr.bf16.mxu1 %v8880_v10  ;;  %v8952_v10 = vld [vmem:[#allocation11 + $0x184] ss:$12 sps:$4 sm:$0xff]  }
 0x2ea   :  { %5115 = vmatpush1.bf16.msra.mxu0 %v8746_v43  ;;  %v8908_v43 = vld [vmem:[#allocation11 + $0xd8] ss:$12 sps:$4 sm:$0xff]  }
 0x2eb   :  { %5116 = vmatprep.subr.bf16.mxu0 %v8751_v44  ;;  %v8790_v44 = vld [vmem:[#allocation8 + $0x374] ss:$24 sps:$4 sm:$0xff]  }
 0x2ec   :  { %6368 = vmatpush1.bf16.msra.mxu1 %v8878_v12  ;;  %v8811_v12 = vld [vmem:[#allocation8 + $0x4c4] ss:$24 sps:$4 sm:$0xff]  }
 0x2ed   :  { %6369 = vmatprep.subr.bf16.mxu1 %v8886_v18  ;;  %v8814_v18 = vld [vmem:[#allocation8 + $0x4f4] ss:$24 sps:$4 sm:$0xff]  }
 0x2ee   :  { %5117 = vmatpush1.bf16.msra.mxu0 %v8749_v47  ;;  %v8916_v47 = vld [vmem:[#allocation11 + $0xf4] ss:$12 sps:$4 sm:$0xff]  }
 0x2ef   :  { %5118 = vmatprep.subr.bf16.mxu0 %v8754_v48  ;;  %v8788_v48 = vld [vmem:[#allocation8 + $0x370] ss:$24 sps:$4 sm:$0xff]  }
 0x2f0   :  { %6370 = vmatpush1.bf16.msra.mxu1 %v8884_v20  ;;  %v8817_v20 = vld [vmem:[#allocation8 + $0x524] ss:$24 sps:$4 sm:$0xff]  }
 0x2f1   :  { %6371 = vmatprep.subr.bf16.mxu1 %v8892_v22  ;;  %v8820_v22 = vld [vmem:[#allocation8 + $0x554] ss:$24 sps:$4 sm:$0xff]  }
 0x2f2   :  { %5119 = vmatpush1.bf16.msra.mxu0 %v8752_v52  ;;  %v8914_v52 = vld [vmem:[#allocation11 + $0xf0] ss:$12 sps:$4 sm:$0xff]  }
 0x2f3   :  { %5120 = vmatprep.subr.bf16.mxu0 %v8757_v49  ;;  %v8793_v49 = vld [vmem:[#allocation8 + $0x3a4] ss:$24 sps:$4 sm:$0xff]  }
 0x2f4   :  { %6372 = vmatpush1.bf16.msra.mxu1 %v8890_v24  ;;  %v8823_v24 = vld [vmem:[#allocation8 + $0x584] ss:$24 sps:$4 sm:$0xff]  }
 0x2f5   :  { %6373 = vmatprep.subr.bf16.mxu1 %v8898_v26  ;;  %v8826_v26 = vld [vmem:[#allocation8 + $0x5b4] ss:$24 sps:$4 sm:$0xff]  }
 0x2f6   :  { %5121 = vmatpush1.bf16.msra.mxu0 %v8755_v50  ;;  %v8922_v50 = vld [vmem:[#allocation11 + $0x10c] ss:$12 sps:$4 sm:$0xff]  }
 0x2f7   :  { %5122 = vmatprep.subr.bf16.mxu0 %v8760_v51  ;;  %v8920_v51 = vld [vmem:[#allocation11 + $0x108] ss:$12 sps:$4 sm:$0xff]  }
 0x2f8   :  { %6374 = vmatpush1.bf16.msra.mxu1 %v8896_v29  ;;  %v8829_v29 = vld [vmem:[#allocation8 + $0x5e4] ss:$24 sps:$4 sm:$0xff]  }
 0x2f9   :  { %6375 = vmatprep.subr.bf16.mxu1 %v8904_v34  ;;  %v8832_v34 = vld [vmem:[#allocation8 + $0x614] ss:$24 sps:$4 sm:$0xff]  }
 0x2fa   :  { %5123 = vmatpush1.bf16.msra.mxu0 %v8758_v54  ;;  %v8794_v54 = vld [vmem:[#allocation8 + $0x3d0] ss:$24 sps:$4 sm:$0xff]  }
 0x2fb   :  { %5124 = vmatprep.subr.bf16.mxu0 %v8763_v56  ;;  %v8799_v56 = vld [vmem:[#allocation8 + $0x404] ss:$24 sps:$4 sm:$0xff]  }
 0x2fc   :  { %6376 = vmatpush1.bf16.msra.mxu1 %v8902_v36  ;;  %v8835_v36 = vld [vmem:[#allocation8 + $0x644] ss:$24 sps:$4 sm:$0xff]  }
 0x2fd   :  { %6377 = vmatprep.subr.bf16.mxu1 %v8910_v45  ;;  %v8838_v45 = vld [vmem:[#allocation8 + $0x674] ss:$24 sps:$4 sm:$0xff]  }
 0x2fe   :  { %5125 = vmatpush1.bf16.msra.mxu0 %v8761_v58  ;;  %v8797_v58 = vld [vmem:[#allocation8 + $0x400] ss:$24 sps:$4 sm:$0xff]  }
 0x2ff   :  { %5126 = vmatprep.subr.bf16.mxu0 %v8766_v0  ;;  %v8802_v0 = vld [vmem:[#allocation8 + $0x434] ss:$24 sps:$4 sm:$0xff]  }
 0x300   :  { %6378 = vmatpush1.bf16.msra.mxu1 %v8908_v43  ;;  %v8841_v43 = vld [vmem:[#allocation8 + $0x6a4] ss:$24 sps:$4 sm:$0xff]  }
 0x301   :  { %6379 = vmatprep.subr.bf16.mxu1 %v8916_v47  ;;  %v8844_v47 = vld [vmem:[#allocation8 + $0x6d4] ss:$24 sps:$4 sm:$0xff]  }
 0x302   :  { %5127 = vmatpush1.bf16.msra.mxu0 %v8764_v3  ;;  %v8800_v3 = vld [vmem:[#allocation8 + $0x430] ss:$24 sps:$4 sm:$0xff]  }
 0x303   :  { %5128 = vmatprep.subr.bf16.mxu0 %v8769_v5  ;;  %v8805_v5 = vld [vmem:[#allocation8 + $0x464] ss:$24 sps:$4 sm:$0xff]  }
 0x304   :  { %6380 = vmatpush1.bf16.msra.mxu1 %v8914_v52  ;;  %v8847_v52 = vld [vmem:[#allocation8 + $0x704] ss:$24 sps:$4 sm:$0xff]  }
 0x305   :  { %6381 = vmatprep.subr.bf16.mxu1 %v8922_v50  ;;  %v8853_v50 = vld [vmem:[#allocation8 + $0x764] ss:$24 sps:$4 sm:$0xff]  }
 0x306   :  { %5129 = vmatpush1.bf16.msra.mxu0 %v8767_v7  ;;  %v8803_v7 = vld [vmem:[#allocation8 + $0x460] ss:$24 sps:$4 sm:$0xff]  }
 0x307   :  { %5130 = vmatprep.subr.bf16.mxu0 %v8772_v9  ;;  %v8808_v9 = vld [vmem:[#allocation8 + $0x494] ss:$24 sps:$4 sm:$0xff]  }
 0x308   :  { %6382 = vmatpush1.bf16.msra.mxu1 %v8920_v51  ;;  %v8859_v51 = vld [vmem:[#allocation8 + $0x794] ss:$24 sps:$4 sm:$0xff]  }
 0x309   :  { %6383 = vmatprep.subr.bf16.mxu1 %v8928_v53  ;;  %v8865_v53 = vld [vmem:[#allocation8 + $0x7c4] ss:$24 sps:$4 sm:$0xff]  }
 0x30a   :  { %5131 = vmatpush1.bf16.msra.mxu0 %v8770_v11  ;;  %v8806_v11 = vld [vmem:[#allocation8 + $0x490] ss:$24 sps:$4 sm:$0xff]  }
 0x30b   :  { %5132 = vmatprep.subr.bf16.mxu0 %v8775_v15  ;;  %v8809_v15 = vld [vmem:[#allocation8 + $0x4c0] ss:$24 sps:$4 sm:$0xff]  }
 0x30c   :  { %6384 = vmatpush1.bf16.msra.mxu1 %v8926_v55  ;;  %v8871_v55 = vld [vmem:[#allocation8 + $0x7f4] ss:$24 sps:$4 sm:$0xff]  }
 0x30d   :  { %6385 = vmatprep.subr.bf16.mxu1 %v8934_v57  ;;  %v8877_v57 = vld [vmem:[#allocation8 + $0x824] ss:$24 sps:$4 sm:$0xff]  }
 0x30e   :  { %5133 = vmatpush1.bf16.msra.mxu0 %v8773_v19  ;;  %v8812_v19 = vld [vmem:[#allocation8 + $0x4f0] ss:$24 sps:$4 sm:$0xff]  }
 0x30f   :  { %5134 = vmatprep.subr.bf16.mxu0 %v8778_v21  ;;  %v8815_v21 = vld [vmem:[#allocation8 + $0x520] ss:$24 sps:$4 sm:$0xff]  }
 0x310   :  { %6386 = vmatpush1.bf16.msra.mxu1 %v8932_v62  ;;  %v8883_v62 = vld [vmem:[#allocation8 + $0x854] ss:$24 sps:$4 sm:$0xff]  }
 0x311   :  { %6387 = vmatprep.subr.bf16.mxu1 %v8940_v1  ;;  %v8889_v1 = vld [vmem:[#allocation8 + $0x884] ss:$24 sps:$4 sm:$0xff]  }
 0x312   :  { %5135 = vmatpush1.bf16.msra.mxu0 %v8776_v23  ;;  %v8818_v23 = vld [vmem:[#allocation8 + $0x550] ss:$24 sps:$4 sm:$0xff]  }
 0x313   :  { %5136 = vmatprep.subr.bf16.mxu0 %v8781_v25  ;;  %v8821_v25 = vld [vmem:[#allocation8 + $0x580] ss:$24 sps:$4 sm:$0xff]  }
 0x314   :  { %6388 = vmatpush1.bf16.msra.mxu1 %v8938_v40  ;;  %v8895_v40 = vld [vmem:[#allocation8 + $0x8b4] ss:$24 sps:$4 sm:$0xff]  }
 0x315   :  { %6389 = vmatprep.subr.bf16.mxu1 %v8946_v6  ;;  %v8901_v6 = vld [vmem:[#allocation8 + $0x8e4] ss:$24 sps:$4 sm:$0xff]  }
 0x316   :  { %5137 = vmatpush1.bf16.msra.mxu0 %v8779_v28  ;;  %v8824_v28 = vld [vmem:[#allocation8 + $0x5b0] ss:$24 sps:$4 sm:$0xff]  }
 0x317   :  { %5149 = vmatprep.subr.bf16.mxu0 %v8784_v31  ;;  %v8827_v31 = vld [vmem:[#allocation8 + $0x5e0] ss:$24 sps:$4 sm:$0xff]  }
 0x318   :  { %6390 = vmatpush1.bf16.msra.mxu1 %v8944_v8  ;;  %v8907_v8 = vld [vmem:[#allocation8 + $0x914] ss:$24 sps:$4 sm:$0xff]  }
 0x319   :  { %5139 = vmatmul.mubr.bf16.vlgmr.msra.gmra.mrb[16].mxu0 %v9689_v60  ;;  %v8791_v60 = vld [vmem:[#allocation8 + $0x3a0] ss:$24 sps:$4 sm:$0xff]   ;;  %6402 = vmatprep.subr.bf16.mxu1 %v8952_v10  ;;  %v8913_v10 = vld [vmem:[#allocation8 + $0x944] ss:$24 sps:$4 sm:$0xff]  }
 0x31a   :  { %5150 = vmatpush1.bf16.msra.mxu0 %v8782_v35  ;;  %5181 = vmatprep.mubr.bf16.mxu0 %v9708_v33  ;;  %v8796_v33 = vld [vmem:[#allocation8 + $0x3d4] ss:$24 sps:$4 sm:$0xff]   ;;  %v8830_v35 = vld [vmem:[#allocation8 + $0x610] ss:$24 sps:$4 sm:$0xff]  }
 0x31b   :  { %5151 = vmatprep.subr.bf16.mxu0 %v8787_v37  ;;  %v8833_v37 = vld [vmem:[#allocation8 + $0x640] ss:$24 sps:$4 sm:$0xff]  }
 0x31e   :  { %5152 = vmatpush1.bf16.msra.mxu0 %v8785_v38  ;;  %v8836_v38 = vld [vmem:[#allocation8 + $0x670] ss:$24 sps:$4 sm:$0xff]  }
 0x31f   :  { %5153 = vmatprep.subr.bf16.mxu0 %v8790_v44  ;;  %v8839_v44 = vld [vmem:[#allocation8 + $0x6a0] ss:$24 sps:$4 sm:$0xff]  }
 0x322   :  { %5154 = vmatpush1.bf16.msra.mxu0 %v8788_v48  ;;  %v8842_v48 = vld [vmem:[#allocation8 + $0x6d0] ss:$24 sps:$4 sm:$0xff]  }
 0x323   :  { %5155 = vmatprep.subr.bf16.mxu0 %v8793_v49  ;;  %v8850_v49 = vld [vmem:[#allocation8 + $0x734] ss:$24 sps:$4 sm:$0xff]  }
 0x326   :  { %5156 = vmatpush1.bf16.msra.mxu0 %v8791_v60  ;;  %v8851_v60 = vld [vmem:[#allocation8 + $0x760] ss:$24 sps:$4 sm:$0xff]  }
 0x327   :  { %5157 = vmatprep.subr.bf16.mxu0 %v8796_v33  ;;  %v8857_v33 = vld [vmem:[#allocation8 + $0x790] ss:$24 sps:$4 sm:$0xff]  }
 0x32a   :  { %5158 = vmatpush1.bf16.msra.mxu0 %v8794_v54  ;;  %v8863_v54 = vld [vmem:[#allocation8 + $0x7c0] ss:$24 sps:$4 sm:$0xff]  }
 0x32b   :  { %5159 = vmatprep.subr.bf16.mxu0 %v8799_v56  ;;  %v8869_v56 = vld [vmem:[#allocation8 + $0x7f0] ss:$24 sps:$4 sm:$0xff]  }
 0x32e   :  { %5160 = vmatpush1.bf16.msra.mxu0 %v8797_v58  ;;  %v8875_v58 = vld [vmem:[#allocation8 + $0x820] ss:$24 sps:$4 sm:$0xff]  }
 0x32f   :  { %5161 = vmatprep.subr.bf16.mxu0 %v8802_v0  ;;  %v8881_v0 = vld [vmem:[#allocation8 + $0x850] ss:$24 sps:$4 sm:$0xff]  }
 0x332   :  { %5162 = vmatpush1.bf16.msra.mxu0 %v8800_v3  ;;  %v8887_v3 = vld [vmem:[#allocation8 + $0x880] ss:$24 sps:$4 sm:$0xff]  }
 0x333   :  { %5163 = vmatprep.subr.bf16.mxu0 %v8805_v5  ;;  %v8893_v5 = vld [vmem:[#allocation8 + $0x8b0] ss:$24 sps:$4 sm:$0xff]  }
 0x336   :  { %5164 = vmatpush1.bf16.msra.mxu0 %v8803_v7  ;;  %v8899_v7 = vld [vmem:[#allocation8 + $0x8e0] ss:$24 sps:$4 sm:$0xff]  }
 0x337   :  { %5165 = vmatprep.subr.bf16.mxu0 %v8808_v9  ;;  %v8905_v9 = vld [vmem:[#allocation8 + $0x910] ss:$24 sps:$4 sm:$0xff]  }
 0x33a   :  { %5166 = vmatpush1.bf16.msra.mxu0 %v8806_v11  ;;  %v8911_v11 = vld [vmem:[#allocation8 + $0x940] ss:$24 sps:$4 sm:$0xff]  }
 0x33b   :  { %5167 = vmatprep.subr.bf16.mxu0 %v8811_v12  ;;  %v8919_v12 = vld [vmem:[#allocation8 + $0x974] ss:$24 sps:$4 sm:$0xff]  }
 0x33e   :  { %5168 = vmatpush1.bf16.msra.mxu0 %v8809_v15  ;;  %v8917_v15 = vld [vmem:[#allocation8 + $0x970] ss:$24 sps:$4 sm:$0xff]  }
 0x33f   :  { %5169 = vmatprep.subr.bf16.mxu0 %v8814_v18  ;;  %v8925_v18 = vld [vmem:[#allocation8 + $0x9a4] ss:$24 sps:$4 sm:$0xff]  }
 0x342   :  { %5170 = vmatpush1.bf16.msra.mxu0 %v8812_v19  ;;  %v8923_v19 = vld [vmem:[#allocation8 + $0x9a0] ss:$24 sps:$4 sm:$0xff]  }
 0x343   :  { %5171 = vmatprep.subr.bf16.mxu0 %v8817_v20  ;;  %v8931_v20 = vld [vmem:[#allocation8 + $0x9d4] ss:$24 sps:$4 sm:$0xff]  }
 0x346   :  { %5172 = vmatpush1.bf16.msra.mxu0 %v8815_v21  ;;  %v8929_v21 = vld [vmem:[#allocation8 + $0x9d0] ss:$24 sps:$4 sm:$0xff]  }
 0x347   :  { %5173 = vmatprep.subr.bf16.mxu0 %v8820_v22  ;;  %v9771_v22 = vld [vmem:[#allocation10] sm:$0x3f] }
 0x34a   :  { %5174 = vmatpush1.bf16.msra.mxu0 %v8818_v23  ;;  %v1931_v23 = vrot.slane %v9771_v22, %v9698_v63 }
 0x34b   :  { %5175 = vmatprep.subr.bf16.mxu0 %v8823_v24  ;;  %v1927_v24 = vrot.slane %v9771_v22, %v9683_v42 }
 0x34e   :  { %5176 = vmatpush1.bf16.msra.mxu0 %v8821_v25  ;;  %v8935_v25 = vld [vmem:[#allocation8 + $0xa00] ss:$24 sps:$4 sm:$0xff]  }
 0x34f   :  { %5177 = vmatprep.subr.bf16.mxu0 %v8826_v26  ;;  %v1935_v26 = vrot.slane %v9771_v22, %v322_v2 }
 0x352   :  { %5178 = vmatpush1.bf16.msra.mxu0 %v8824_v28  ;;  %v8943_v28 = vld [vmem:[#allocation8 + $0xa34] ss:$24 sps:$4 sm:$0xff]  }
 0x353   :  { %5179 = vmatprep.subr.bf16.mxu0 %v8829_v29 }
 0x356   :  { %5180 = vmatpush1.bf16.msra.mxu0 %v8827_v31 }
 0x357   :  { %5192 = vmatprep.subr.bf16.mxu0 %v8832_v34 }
 0x359   :  { %5182 = vmatmul.mubr.bf16.vlgmr.msra.gmra.mrb[16].mxu0 %v9706_v32  ;;  %v8845_v32 = vld [vmem:[#allocation8 + $0x700] ss:$24 sps:$4 sm:$0xff]  }
 0x35a   :  { %5193 = vmatpush1.bf16.msra.mxu0 %v8830_v35  ;;  %5224 = vmatprep.mubr.bf16.mxu0 %v9722_v30  ;;  %v8848_v30 = vld [vmem:[#allocation8 + $0x730] ss:$24 sps:$4 sm:$0xff]  }
 0x35b   :  { %5194 = vmatprep.subr.bf16.mxu0 %v8835_v36 }
 0x35e   :  { %5195 = vmatpush1.bf16.msra.mxu0 %v8833_v37 }
 0x35f   :  { %5196 = vmatprep.subr.bf16.mxu0 %v8838_v45 }
 0x362   :  { %5197 = vmatpush1.bf16.msra.mxu0 %v8836_v38 }
 0x363   :  { %5198 = vmatprep.subr.bf16.mxu0 %v8841_v43  ;;  %v8941_v43 = vld [vmem:[#allocation8 + $0xa30] ss:$24 sps:$4 sm:$0xff]  }
 0x366   :  { %5199 = vmatpush1.bf16.msra.mxu0 %v8839_v44 }
 0x367   :  { %5200 = vmatprep.subr.bf16.mxu0 %v8844_v47 }
 0x36a   :  { %5201 = vmatpush1.bf16.msra.mxu0 %v8842_v48 }
 0x36b   :  { %5202 = vmatprep.subr.bf16.mxu0 %v8847_v52 }
 0x36e   :  { %5203 = vmatpush1.bf16.msra.mxu0 %v8845_v32  ;;  %v8949_v32 = vld [vmem:[#allocation8 + $0xa64] ss:$24 sps:$4 sm:$0xff]  }
 0x36f   :  { %5204 = vmatprep.subr.bf16.mxu0 %v8850_v49 }
 0x372   :  { %5205 = vmatpush1.bf16.msra.mxu0 %v8848_v30 }
 0x373   :  { %5206 = vmatprep.subr.bf16.mxu0 %v8853_v50 }
 0x376   :  { %5207 = vmatpush1.bf16.msra.mxu0 %v8851_v60 }
 0x377   :  { %5208 = vmatprep.subr.bf16.mxu0 %v8859_v51 }
 0x37a   :  { %5209 = vmatpush1.bf16.msra.mxu0 %v8857_v33 }
 0x37b   :  { %5210 = vmatprep.subr.bf16.mxu0 %v8865_v53 }
 0x37e   :  { %5211 = vmatpush1.bf16.msra.mxu0 %v8863_v54 }
 0x37f   :  { %5212 = vmatprep.subr.bf16.mxu0 %v8871_v55 }
 0x382   :  { %5213 = vmatpush1.bf16.msra.mxu0 %v8869_v56  ;;  %v8947_v56 = vld [vmem:[#allocation8 + $0xa60] ss:$24 sps:$4 sm:$0xff]  }
 0x383   :  { %5214 = vmatprep.subr.bf16.mxu0 %v8877_v57 }
 0x386   :  { %5215 = vmatpush1.bf16.msra.mxu0 %v8875_v58 }
 0x387   :  { %5216 = vmatprep.subr.bf16.mxu0 %v8883_v62 }
 0x38a   :  { %5217 = vmatpush1.bf16.msra.mxu0 %v8881_v0  ;;  %v8955_v0 = vld [vmem:[#allocation8 + $0xa94] ss:$24 sps:$4 sm:$0xff]  }
 0x38b   :  { %5218 = vmatprep.subr.bf16.mxu0 %v8889_v1 }
 0x38e   :  { %5219 = vmatpush1.bf16.msra.mxu0 %v8887_v3 }
 0x38f   :  { %5220 = vmatprep.subr.bf16.mxu0 %v8895_v40  ;;  %v8950_v40 = vld [vmem:[#allocation11 + $0x180] ss:$12 sps:$4 sm:$0xff]  }
 0x392   :  { %5221 = vmatpush1.bf16.msra.mxu0 %v8893_v5 }
 0x393   :  { %5222 = vmatprep.subr.bf16.mxu0 %v8901_v6  ;;  %v8958_v6 = vld [vmem:[#allocation11 + $0x19c] ss:$12 sps:$4 sm:$0xff]  }
 0x396   :  { %5223 = vmatpush1.bf16.msra.mxu0 %v8899_v7  ;;  %v8953_v7 = vld [vmem:[#allocation8 + $0xa90] ss:$24 sps:$4 sm:$0xff]  }
 0x397   :  { %5235 = vmatprep.subr.bf16.mxu0 %v8907_v8  ;;  %v8961_v8 = vld [vmem:[#allocation8 + $0xac4] ss:$24 sps:$4 sm:$0xff]  }
 0x399   :  { %5225 = vmatmul.mubr.bf16.vlgmr.msra.gmra.mrb[16].mxu0 %v9720_v27  ;;  %v8937_v27 = vld [vmem:[#allocation8 + $0xa04] ss:$24 sps:$4 sm:$0xff]  }
 0x39a   :  { %5236 = vmatpush1.bf16.msra.mxu0 %v8905_v9  ;;  %5267 = vmatprep.mubr.bf16.mxu0 %v9734_v16  ;;  %v1923_v16 = vrot.slane %v9771_v22, %v9680_v41  ;;  %v8956_v9 = vld [vmem:[#allocation11 + $0x198] ss:$12 sps:$4 sm:$0xff]  }
 0x39b   :  { %5237 = vmatprep.subr.bf16.mxu0 %v8913_v10  ;;  %v8964_v10 = vld [vmem:[#allocation11 + $0x1b4] ss:$12 sps:$4 sm:$0xff]  }
 0x39e   :  { %5238 = vmatpush1.bf16.msra.mxu0 %v8911_v11  ;;  %v8959_v11 = vld [vmem:[#allocation8 + $0xac0] ss:$24 sps:$4 sm:$0xff]  }
 0x39f   :  { %5239 = vmatprep.subr.bf16.mxu0 %v8919_v12  ;;  %v8967_v12 = vld [vmem:[#allocation8 + $0xaf4] ss:$24 sps:$4 sm:$0xff]  }
 0x3a2   :  { %5240 = vmatpush1.bf16.msra.mxu0 %v8917_v15  ;;  %v8962_v15 = vld [vmem:[#allocation11 + $0x1b0] ss:$12 sps:$4 sm:$0xff]  }
 0x3a3   :  { %5241 = vmatprep.subr.bf16.mxu0 %v8925_v18  ;;  %v8970_v18 = vld [vmem:[#allocation11 + $0x1cc] ss:$12 sps:$4 sm:$0xff]  }
 0x3a6   :  { %5242 = vmatpush1.bf16.msra.mxu0 %v8923_v19  ;;  %v8965_v19 = vld [vmem:[#allocation8 + $0xaf0] ss:$24 sps:$4 sm:$0xff]  }
 0x3a7   :  { %5243 = vmatprep.subr.bf16.mxu0 %v8931_v20  ;;  %v8973_v20 = vld [vmem:[#allocation8 + $0xb24] ss:$24 sps:$4 sm:$0xff]  }
 0x3aa   :  { %5244 = vmatpush1.bf16.msra.mxu0 %v8929_v21  ;;  %v8968_v21 = vld [vmem:[#allocation11 + $0x1c8] ss:$12 sps:$4 sm:$0xff]  }
 0x3ab   :  { %5245 = vmatprep.subr.bf16.mxu0 %v8937_v27  ;;  %v8976_v27 = vld [vmem:[#allocation11 + $0x1e4] ss:$12 sps:$4 sm:$0xff]  }
 0x3ac   :  { %v4839_v29 = vpop.f32.mrb[12].mxu0 }
 0x3ad   :  { %v7894_v31 = vadd.f32 %v4839_v29, %v1923_v16  ;;  %v5097_v34 = vpop.f32.mrb[12].mxu1  ;;  %v4841_v35 = vpop.f32.mrb[13].mxu0  ;;  %v8980_v29 = vld [vmem:[#allocation11 + $0x1f8] ss:$12 sps:$4 sm:$0xff]  }
 0x3ae   :  { %v7898_v36 = vadd.f32 %v5097_v34, %v1931_v23  ;;  %v7895_v37 = vadd.f32 %v4841_v35, %v1927_v24  ;;  %v5099_v45 = vpop.f32.mrb[13].mxu1  ;;  %v4843_v38 = vpop.f32.mrb[14].mxu0  ;;  %5246 = vmatpush1.bf16.msra.mxu0 %v8935_v25  ;;  %v8982_v25 = vld [vmem:[#allocation11 + $0x1fc] ss:$12 sps:$4 sm:$0xff]  }
 0x3af   :  { %v7899_v44 = vadd.f32 %v5099_v45, %v1935_v26  ;;  %v7896_v47 = vadd.f32 %v4843_v38, %v1923_v16  ;;  %v5101_v48 = vpop.f32.mrb[14].mxu1  ;;  %v4845_v52 = vpop.f32.mrb[15].mxu0  ;;  %5247 = vmatprep.subr.bf16.mxu0 %v8943_v28  ;;  %v5364_v50 = vmax.f32 %v7894_v31, 0.0  ;;  %v8971_v16 = vld [vmem:[#allocation8 + $0xb20] ss:$24 sps:$4 sm:$0xff]  }
 0x3b0   :  { %v7900_v49 = vadd.f32 %v5101_v48, %v1931_v23  ;;  %v7897_v2 = vadd.f32 %v4845_v52, %v1927_v24  ;;  %v5103_v30 = vpop.f32.mrb[15].mxu1  ;;  %v5366_v33 = vmax.f32 %v7898_v36, 0.0  ;;  %v5365_v53 = vmax.f32 %v7895_v37, 0.0  ;;  %v8979_v23 = vld [vmem:[#allocation8 + $0xb54] ss:$24 sps:$4 sm:$0xff]  }
 0x3b1   :  { %v5370_v60 = vmax.f32 %v7896_v47, 0.0  ;;  %v7901_v51 = vadd.f32 %v5103_v30, %v1935_v26  ;;  %v5367_v57 = vmax.f32 %v7899_v44, 0.0  ;;  %v8974_v24 = vld [vmem:[#allocation11 + $0x1e0] ss:$12 sps:$4 sm:$0xff]   ;;  %v8983_v34 = vld [vmem:[#allocation8 + $0xb80] ss:$24 sps:$4 sm:$0xff]  }
 0x3b2   :  { %v5372_v54 = vmax.f32 %v7900_v49, 0.0  ;;  %v5371_v55 = vmax.f32 %v7897_v2, 0.0  ;;  %5248 = vmatpush1.bf16.msra.mxu0 %v8941_v43  ;;  %v8977_v26 = vld [vmem:[#allocation8 + $0xb50] ss:$24 sps:$4 sm:$0xff]   ;;  %v8985_v28 = vld [vmem:[#allocation8 + $0xb84] ss:$24 sps:$4 sm:$0xff]  }
 0x3b3   :  { %v9782_v58 = vpack.c.bf16 %v5370_v60, %v5364_v50  ;;  %v5373_v62 = vmax.f32 %v7901_v51, 0.0  ;;  %5249 = vmatprep.subr.bf16.mxu0 %v8949_v32  ;;  %v8988_v31 = vld [vmem:[#allocation11 + $0x214] ss:$12 sps:$4 sm:$0xff]   ;;  %v8991_v35 = vld [vmem:[#allocation8 + $0xbb4] ss:$24 sps:$4 sm:$0xff]  }
 0x3b4   :  { %v9784_v1 = vpack.c.bf16 %v5372_v54, %v5366_v33  ;;  %v9786_v3 = vpack.c.bf16 %v5371_v55, %v5365_v53  ;;  %v8986_v36 = vld [vmem:[#allocation11 + $0x210] ss:$12 sps:$4 sm:$0xff]   ;;  %v8994_v37 = vld [vmem:[#allocation11 + $0x22c] ss:$12 sps:$4 sm:$0xff]   ;;  %v8992_v43 = vld [vmem:[#allocation11 + $0x228] ss:$12 sps:$4 sm:$0xff]  }
 0x3b5   :  { %v9788_v5 = vpack.c.bf16 %v5373_v62, %v5367_v57  ;;  %v8989_v45 = vld [vmem:[#allocation8 + $0xbb0] ss:$24 sps:$4 sm:$0xff]   ;;  %v8997_v38 = vld [vmem:[#allocation8 + $0xbe4] ss:$24 sps:$4 sm:$0xff]   ;;  %v8995_v47 = vld [vmem:[#allocation8 + $0xbe0] ss:$24 sps:$4 sm:$0xff]  }
 0x3b6   :  { %5250 = vmatpush1.bf16.msra.mxu0 %v8947_v56  ;;  %6391 = vmatprep.mubr.bf16.mxu1 %v9786_v3  ;;  %v9000_v44 = vld [vmem:[#allocation11 + $0x244] ss:$12 sps:$4 sm:$0xff]   ;;  %v8998_v52 = vld [vmem:[#allocation11 + $0x240] ss:$12 sps:$4 sm:$0xff]   ;;  %v9006_v32 = vld [vmem:[#allocation11 + $0x25c] ss:$12 sps:$4 sm:$0xff]  }
 0x3b7   :  { %6392 = vmatmul.mubr.bf16.vlgmr.msra.gmra.mrb[16].mxu1 %v9782_v58  ;;  %5251 = vmatprep.subr.bf16.mxu0 %v8955_v0  ;;  %v9003_v48 = vld [vmem:[#allocation8 + $0xc14] ss:$24 sps:$4 sm:$0xff]   ;;  %v9001_v49 = vld [vmem:[#allocation8 + $0xc10] ss:$24 sps:$4 sm:$0xff]   ;;  %v9009_v2 = vld [vmem:[#allocation8 + $0xc44] ss:$24 sps:$4 sm:$0xff]  }
 0x3b8   :  { %6403 = vmatpush1.bf16.msra.mxu1 %v8950_v40  ;;  %6434 = vmatprep.mubr.bf16.mxu1 %v9788_v5  ;;  %v9004_v30 = vld [vmem:[#allocation11 + $0x258] ss:$12 sps:$4 sm:$0xff]   ;;  %v9012_v50 = vld [vmem:[#allocation11 + $0x274] ss:$12 sps:$4 sm:$0xff]   ;;  %v9010_v33 = vld [vmem:[#allocation11 + $0x270] ss:$12 sps:$4 sm:$0xff]  }
 0x3b9   :  { %6404 = vmatprep.subr.bf16.mxu1 %v8958_v6  ;;  %v9007_v60 = vld [vmem:[#allocation8 + $0xc40] ss:$24 sps:$4 sm:$0xff]   ;;  %v9015_v51 = vld [vmem:[#allocation8 + $0xc74] ss:$24 sps:$4 sm:$0xff]   ;;  %v9013_v54 = vld [vmem:[#allocation8 + $0xc70] ss:$24 sps:$4 sm:$0xff]  }
 0x3ba   :  { %5252 = vmatpush1.bf16.msra.mxu0 %v8953_v7  ;;  %v9018_v53 = vld [vmem:[#allocation11 + $0x28c] ss:$12 sps:$4 sm:$0xff]   ;;  %v9016_v56 = vld [vmem:[#allocation11 + $0x288] ss:$12 sps:$4 sm:$0xff]  }
 0x3bb   :  { %5253 = vmatprep.subr.bf16.mxu0 %v8961_v8  ;;  %v9021_v55 = vld [vmem:[#allocation8 + $0xca4] ss:$24 sps:$4 sm:$0xff]   ;;  %v9019_v57 = vld [vmem:[#allocation8 + $0xca0] ss:$24 sps:$4 sm:$0xff]   ;;  %v9027_v62 = vld [vmem:[#allocation8 + $0xcd4] ss:$24 sps:$4 sm:$0xff]  }
 0x3bc   :  { %6405 = vmatpush1.bf16.msra.mxu1 %v8956_v9  ;;  %v9030_v0 = vld [vmem:[#allocation11 + $0x2bc] ss:$12 sps:$4 sm:$0xff]   ;;  %v9028_v7 = vld [vmem:[#allocation11 + $0x2b8] ss:$12 sps:$4 sm:$0xff]   ;;  %v9036_v8 = vld [vmem:[#allocation11 + $0x2d4] ss:$12 sps:$4 sm:$0xff]  }
 0x3bd   :  { %6406 = vmatprep.subr.bf16.mxu1 %v8964_v10  ;;  %v9025_v40 = vld [vmem:[#allocation8 + $0xcd0] ss:$24 sps:$4 sm:$0xff]   ;;  %v9033_v6 = vld [vmem:[#allocation8 + $0xd04] ss:$24 sps:$4 sm:$0xff]   ;;  %v9031_v9 = vld [vmem:[#allocation8 + $0xd00] ss:$24 sps:$4 sm:$0xff]  }
 0x3be   :  { %5254 = vmatpush1.bf16.msra.mxu0 %v8959_v11  ;;  %v9039_v10 = vld [vmem:[#allocation8 + $0xd34] ss:$24 sps:$4 sm:$0xff]  }
 0x3bf   :  { %5255 = vmatprep.subr.bf16.mxu0 %v8967_v12  ;;  %v9034_v11 = vld [vmem:[#allocation11 + $0x2d0] ss:$12 sps:$4 sm:$0xff]   ;;  %v9042_v12 = vld [vmem:[#allocation11 + $0x2ec] ss:$12 sps:$4 sm:$0xff]  }
 0x3c0   :  { %6407 = vmatpush1.bf16.msra.mxu1 %v8962_v15  ;;  %v9037_v15 = vld [vmem:[#allocation8 + $0xd30] ss:$24 sps:$4 sm:$0xff]  }
 0x3c1   :  { %6408 = vmatprep.subr.bf16.mxu1 %v8970_v18  ;;  %v9045_v18 = vld [vmem:[#allocation8 + $0xd64] ss:$24 sps:$4 sm:$0xff]  }
 0x3c2   :  { %5256 = vmatpush1.bf16.msra.mxu0 %v8965_v19  ;;  %v9040_v19 = vld [vmem:[#allocation11 + $0x2e8] ss:$12 sps:$4 sm:$0xff]  }
 0x3c3   :  { %5257 = vmatprep.subr.bf16.mxu0 %v8973_v20  ;;  %v9096_v20 = vld [vmem:[#allocation11 + $0x304] ss:$12 sps:$4 sm:$0xff]  }
 0x3c4   :  { %6409 = vmatpush1.bf16.msra.mxu1 %v8968_v21  ;;  %v9043_v21 = vld [vmem:[#allocation8 + $0xd60] ss:$24 sps:$4 sm:$0xff]  }
 0x3c5   :  { %6410 = vmatprep.subr.bf16.mxu1 %v8976_v27  ;;  %v9048_v27 = vld [vmem:[#allocation8 + $0xd94] ss:$24 sps:$4 sm:$0xff]  }
 0x3c6   :  { %5258 = vmatpush1.bf16.msra.mxu0 %v8971_v16  ;;  %v9094_v16 = vld [vmem:[#allocation11 + $0x300] ss:$12 sps:$4 sm:$0xff]  }
 0x3c7   :  { %5259 = vmatprep.subr.bf16.mxu0 %v8979_v23  ;;  %v9099_v23 = vld [vmem:[#allocation11 + $0x31c] ss:$12 sps:$4 sm:$0xff]  }
 0x3c8   :  { %6411 = vmatpush1.bf16.msra.mxu1 %v8974_v24  ;;  %v9046_v24 = vld [vmem:[#allocation8 + $0xd90] ss:$24 sps:$4 sm:$0xff]  }
 0x3c9   :  { %6412 = vmatprep.subr.bf16.mxu1 %v8982_v25  ;;  %v9051_v25 = vld [vmem:[#allocation8 + $0xdc4] ss:$24 sps:$4 sm:$0xff]  }
 0x3ca   :  { %5260 = vmatpush1.bf16.msra.mxu0 %v8977_v26  ;;  %v9097_v26 = vld [vmem:[#allocation11 + $0x318] ss:$12 sps:$4 sm:$0xff]  }
 0x3cb   :  { %5261 = vmatprep.subr.bf16.mxu0 %v8985_v28  ;;  %v9102_v28 = vld [vmem:[#allocation11 + $0x334] ss:$12 sps:$4 sm:$0xff]  }
 0x3cc   :  { %6413 = vmatpush1.bf16.msra.mxu1 %v8980_v29  ;;  %v9049_v29 = vld [vmem:[#allocation8 + $0xdc0] ss:$24 sps:$4 sm:$0xff]  }
 0x3cd   :  { %6414 = vmatprep.subr.bf16.mxu1 %v8988_v31  ;;  %v9054_v31 = vld [vmem:[#allocation8 + $0xdf4] ss:$24 sps:$4 sm:$0xff]  }
 0x3ce   :  { %5262 = vmatpush1.bf16.msra.mxu0 %v8983_v34  ;;  %v9100_v34 = vld [vmem:[#allocation11 + $0x330] ss:$12 sps:$4 sm:$0xff]  }
 0x3cf   :  { %5263 = vmatprep.subr.bf16.mxu0 %v8991_v35  ;;  %v9105_v35 = vld [vmem:[#allocation11 + $0x34c] ss:$12 sps:$4 sm:$0xff]  }
 0x3d0   :  { %6415 = vmatpush1.bf16.msra.mxu1 %v8986_v36  ;;  %v9052_v36 = vld [vmem:[#allocation8 + $0xdf0] ss:$24 sps:$4 sm:$0xff]  }
 0x3d1   :  { %6416 = vmatprep.subr.bf16.mxu1 %v8994_v37  ;;  %v9057_v37 = vld [vmem:[#allocation8 + $0xe24] ss:$24 sps:$4 sm:$0xff]  }
 0x3d2   :  { %5264 = vmatpush1.bf16.msra.mxu0 %v8989_v45  ;;  %v9103_v45 = vld [vmem:[#allocation11 + $0x348] ss:$12 sps:$4 sm:$0xff]  }
 0x3d3   :  { %5265 = vmatprep.subr.bf16.mxu0 %v8997_v38  ;;  %v9108_v38 = vld [vmem:[#allocation11 + $0x364] ss:$12 sps:$4 sm:$0xff]  }
 0x3d4   :  { %6417 = vmatpush1.bf16.msra.mxu1 %v8992_v43  ;;  %v9055_v43 = vld [vmem:[#allocation8 + $0xe20] ss:$24 sps:$4 sm:$0xff]  }
 0x3d5   :  { %6418 = vmatprep.subr.bf16.mxu1 %v9000_v44  ;;  %v9060_v44 = vld [vmem:[#allocation8 + $0xe54] ss:$24 sps:$4 sm:$0xff]  }
 0x3d6   :  { %5266 = vmatpush1.bf16.msra.mxu0 %v8995_v47  ;;  %v9106_v47 = vld [vmem:[#allocation11 + $0x360] ss:$12 sps:$4 sm:$0xff]  }
 0x3d7   :  { %5278 = vmatprep.subr.bf16.mxu0 %v9003_v48  ;;  %v9111_v48 = vld [vmem:[#allocation11 + $0x37c] ss:$12 sps:$4 sm:$0xff]  }
 0x3d8   :  { %6419 = vmatpush1.bf16.msra.mxu1 %v8998_v52  ;;  %v9058_v52 = vld [vmem:[#allocation8 + $0xe50] ss:$24 sps:$4 sm:$0xff]  }
 0x3d9   :  { %5268 = vmatmul.mubr.bf16.vlgmr.msra.gmra.mrb[16].mxu0 %v9730_v13  ;;  %6420 = vmatprep.subr.bf16.mxu1 %v9006_v32  ;;  %v9024_v13 = vld [vmem:[#allocation11 + $0x2a4] ss:$12 sps:$4 sm:$0xff]   ;;  %v9063_v32 = vld [vmem:[#allocation8 + $0xe84] ss:$24 sps:$4 sm:$0xff]  }
 0x3da   :  { %5279 = vmatpush1.bf16.msra.mxu0 %v9001_v49  ;;  %5310 = vmatprep.mubr.bf16.mxu0 %v9744_v17  ;;  %v9022_v17 = vld [vmem:[#allocation11 + $0x2a0] ss:$12 sps:$4 sm:$0xff]   ;;  %v9109_v49 = vld [vmem:[#allocation11 + $0x378] ss:$12 sps:$4 sm:$0xff]  }
 0x3db   :  { %5280 = vmatprep.subr.bf16.mxu0 %v9009_v2  ;;  %v9114_v2 = vld [vmem:[#allocation11 + $0x394] ss:$12 sps:$4 sm:$0xff]  }
 0x3dc   :  { %6421 = vmatpush1.bf16.msra.mxu1 %v9004_v30  ;;  %v9061_v30 = vld [vmem:[#allocation8 + $0xe80] ss:$24 sps:$4 sm:$0xff]  }
 0x3dd   :  { %6422 = vmatprep.subr.bf16.mxu1 %v9012_v50  ;;  %v9066_v50 = vld [vmem:[#allocation8 + $0xeb4] ss:$24 sps:$4 sm:$0xff]  }
 0x3de   :  { %5281 = vmatpush1.bf16.msra.mxu0 %v9007_v60  ;;  %v9112_v60 = vld [vmem:[#allocation11 + $0x390] ss:$12 sps:$4 sm:$0xff]  }
 0x3df   :  { %5282 = vmatprep.subr.bf16.mxu0 %v9015_v51  ;;  %v9117_v51 = vld [vmem:[#allocation11 + $0x3ac] ss:$12 sps:$4 sm:$0xff]  }
 0x3e0   :  { %6423 = vmatpush1.bf16.msra.mxu1 %v9010_v33  ;;  %v9064_v33 = vld [vmem:[#allocation8 + $0xeb0] ss:$24 sps:$4 sm:$0xff]  }
 0x3e1   :  { %6424 = vmatprep.subr.bf16.mxu1 %v9018_v53  ;;  %v9069_v53 = vld [vmem:[#allocation8 + $0xee4] ss:$24 sps:$4 sm:$0xff]  }
 0x3e2   :  { %5283 = vmatpush1.bf16.msra.mxu0 %v9013_v54  ;;  %v9115_v54 = vld [vmem:[#allocation11 + $0x3a8] ss:$12 sps:$4 sm:$0xff]  }
 0x3e3   :  { %5284 = vmatprep.subr.bf16.mxu0 %v9021_v55  ;;  %v9120_v55 = vld [vmem:[#allocation11 + $0x3c4] ss:$12 sps:$4 sm:$0xff]  }
 0x3e4   :  { %6425 = vmatpush1.bf16.msra.mxu1 %v9016_v56  ;;  %v9067_v56 = vld [vmem:[#allocation8 + $0xee0] ss:$24 sps:$4 sm:$0xff]  }
 0x3e5   :  { %6426 = vmatprep.subr.bf16.mxu1 %v9024_v13  ;;  %v9072_v13 = vld [vmem:[#allocation8 + $0xf14] ss:$24 sps:$4 sm:$0xff]  }
 0x3e6   :  { %5285 = vmatpush1.bf16.msra.mxu0 %v9019_v57  ;;  %v9118_v57 = vld [vmem:[#allocation11 + $0x3c0] ss:$12 sps:$4 sm:$0xff]  }
 0x3e7   :  { %5286 = vmatprep.subr.bf16.mxu0 %v9027_v62  ;;  %v9123_v62 = vld [vmem:[#allocation11 + $0x3dc] ss:$12 sps:$4 sm:$0xff]  }
 0x3e8   :  { %6427 = vmatpush1.bf16.msra.mxu1 %v9022_v17  ;;  %v9070_v17 = vld [vmem:[#allocation8 + $0xf10] ss:$24 sps:$4 sm:$0xff]  }
 0x3e9   :  { %6428 = vmatprep.subr.bf16.mxu1 %v9030_v0  ;;  %v9075_v0 = vld [vmem:[#allocation8 + $0xf44] ss:$24 sps:$4 sm:$0xff]  }
 0x3ea   :  { %5287 = vmatpush1.bf16.msra.mxu0 %v9025_v40  ;;  %v9121_v40 = vld [vmem:[#allocation11 + $0x3d8] ss:$12 sps:$4 sm:$0xff]  }
 0x3eb   :  { %5288 = vmatprep.subr.bf16.mxu0 %v9033_v6  ;;  %v9126_v6 = vld [vmem:[#allocation11 + $0x3f4] ss:$12 sps:$4 sm:$0xff]  }
 0x3ec   :  { %6429 = vmatpush1.bf16.msra.mxu1 %v9028_v7  ;;  %v9073_v7 = vld [vmem:[#allocation8 + $0xf40] ss:$24 sps:$4 sm:$0xff]  }
 0x3ed   :  { %6430 = vmatprep.subr.bf16.mxu1 %v9036_v8  ;;  %v9078_v8 = vld [vmem:[#allocation8 + $0xf74] ss:$24 sps:$4 sm:$0xff]  }
 0x3ee   :  { %5289 = vmatpush1.bf16.msra.mxu0 %v9031_v9  ;;  %v9124_v9 = vld [vmem:[#allocation11 + $0x3f0] ss:$12 sps:$4 sm:$0xff]  }
 0x3ef   :  { %5290 = vmatprep.subr.bf16.mxu0 %v9039_v10  ;;  %v9129_v10 = vld [vmem:[#allocation11 + $0x40c] ss:$12 sps:$4 sm:$0xff]  }
 0x3f0   :  { %6431 = vmatpush1.bf16.msra.mxu1 %v9034_v11  ;;  %v9076_v11 = vld [vmem:[#allocation8 + $0xf70] ss:$24 sps:$4 sm:$0xff]  }
 0x3f1   :  { %6432 = vmatprep.subr.bf16.mxu1 %v9042_v12  ;;  %v9081_v12 = vld [vmem:[#allocation8 + $0xfa4] ss:$24 sps:$4 sm:$0xff]  }
 0x3f2   :  { %5291 = vmatpush1.bf16.msra.mxu0 %v9037_v15  ;;  %v9127_v15 = vld [vmem:[#allocation11 + $0x408] ss:$12 sps:$4 sm:$0xff]  }
 0x3f3   :  { %5292 = vmatprep.subr.bf16.mxu0 %v9045_v18  ;;  %v9079_v18 = vld [vmem:[#allocation8 + $0xfa0] ss:$24 sps:$4 sm:$0xff]  }
 0x3f4   :  { %6433 = vmatpush1.bf16.msra.mxu1 %v9040_v19  ;;  %v9084_v19 = vld [vmem:[#allocation8 + $0xfd4] ss:$24 sps:$4 sm:$0xff]  }
 0x3f5   :  { %6445 = vmatprep.subr.bf16.mxu1 %v9096_v20  ;;  %v9135_v20 = vld [vmem:[#allocation11 + $0x43c] ss:$12 sps:$4 sm:$0xff]  }
 0x3f6   :  { %5293 = vmatpush1.bf16.msra.mxu0 %v9043_v21  ;;  %v9082_v21 = vld [vmem:[#allocation8 + $0xfd0] ss:$24 sps:$4 sm:$0xff]  }
 0x3f7   :  { %6435 = vmatmul.mubr.bf16.vlgmr.msra.gmra.mrb[16].mxu1 %v9784_v1  ;;  %5294 = vmatprep.subr.bf16.mxu0 %v9048_v27  ;;  %v9087_v27 = vld [vmem:[#allocation8 + $0x1004] ss:$24 sps:$4 sm:$0xff]  }
 0x3f8   :  { %6446 = vmatpush1.bf16.msra.mxu1 %v9094_v16  ;;  %v9133_v16 = vld [vmem:[#allocation11 + $0x438] ss:$12 sps:$4 sm:$0xff]  }
 0x3f9   :  { %6447 = vmatprep.subr.bf16.mxu1 %v9099_v23  ;;  %v9085_v23 = vld [vmem:[#allocation8 + $0x1000] ss:$24 sps:$4 sm:$0xff]  }
 0x3fa   :  { %5295 = vmatpush1.bf16.msra.mxu0 %v9046_v24  ;;  %v9090_v24 = vld [vmem:[#allocation8 + $0x1034] ss:$24 sps:$4 sm:$0xff]  }
 0x3fb   :  { %5296 = vmatprep.subr.bf16.mxu0 %v9051_v25  ;;  %v9088_v25 = vld [vmem:[#allocation8 + $0x1030] ss:$24 sps:$4 sm:$0xff]  }
 0x3fc   :  { %6448 = vmatpush1.bf16.msra.mxu1 %v9097_v26  ;;  %v9093_v26 = vld [vmem:[#allocation8 + $0x1064] ss:$24 sps:$4 sm:$0xff]  }
 0x3fd   :  { %6449 = vmatprep.subr.bf16.mxu1 %v9102_v28  ;;  %v9091_v28 = vld [vmem:[#allocation8 + $0x1060] ss:$24 sps:$4 sm:$0xff]  }
 0x3fe   :  { %5297 = vmatpush1.bf16.msra.mxu0 %v9049_v29  ;;  %v9138_v29 = vld [vmem:[#allocation11 + $0x454] ss:$12 sps:$4 sm:$0xff]  }
 0x3ff   :  { %5298 = vmatprep.subr.bf16.mxu0 %v9054_v31  ;;  %v9136_v31 = vld [vmem:[#allocation11 + $0x450] ss:$12 sps:$4 sm:$0xff]  }
 0x400   :  { %6450 = vmatpush1.bf16.msra.mxu1 %v9100_v34  ;;  %v9141_v34 = vld [vmem:[#allocation11 + $0x46c] ss:$12 sps:$4 sm:$0xff]  }
 0x401   :  { %6451 = vmatprep.subr.bf16.mxu1 %v9105_v35  ;;  %v9139_v35 = vld [vmem:[#allocation11 + $0x468] ss:$12 sps:$4 sm:$0xff]  }
 0x402   :  { %5299 = vmatpush1.bf16.msra.mxu0 %v9052_v36  ;;  %v9142_v36 = vld [vmem:[#allocation11 + $0xc8] ss:$12 sps:$4 sm:$0xff]  }
 0x403   :  { %5300 = vmatprep.subr.bf16.mxu0 %v9057_v37  ;;  %v1939_v37 = vrot.slane %v9771_v22, %v326_v59  ;;  %v9143_v59 = vld [vmem:[#allocation11 + $0x8] ss:$12 sps:$4 sm:$0xff]  }
 0x404   :  { %6452 = vmatpush1.bf16.msra.mxu1 %v9103_v45  ;;  %v1943_v45 = vrot.slane %v9771_v22, %v330_v61  ;;  %v9145_v61 = vld [vmem:[#allocation11 + $0x20] ss:$12 sps:$4 sm:$0xff]   ;;  %v9146_v22 = vld [vmem:[#allocation11 + $0xf8] ss:$12 sps:$4 sm:$0xff]  }
 0x405   :  { %6453 = vmatprep.subr.bf16.mxu1 %v9108_v38 }
 0x406   :  { %5301 = vmatpush1.bf16.msra.mxu0 %v9055_v43 }
 0x407   :  { %5302 = vmatprep.subr.bf16.mxu0 %v9060_v44 }
 0x408   :  { %6454 = vmatpush1.bf16.msra.mxu1 %v9106_v47 }
 0x409   :  { %6455 = vmatprep.subr.bf16.mxu1 %v9111_v48 }
 0x40a   :  { %5303 = vmatpush1.bf16.msra.mxu0 %v9058_v52 }
 0x40b   :  { %5304 = vmatprep.subr.bf16.mxu0 %v9063_v32 }
 0x40c   :  { %6456 = vmatpush1.bf16.msra.mxu1 %v9109_v49 }
 0x40d   :  { %6457 = vmatprep.subr.bf16.mxu1 %v9114_v2 }
 0x40e   :  { %5305 = vmatpush1.bf16.msra.mxu0 %v9061_v30 }
 0x40f   :  { %5306 = vmatprep.subr.bf16.mxu0 %v9066_v50 }
 0x410   :  { %6458 = vmatpush1.bf16.msra.mxu1 %v9112_v60 }
 0x411   :  { %6459 = vmatprep.subr.bf16.mxu1 %v9117_v51 }
 0x412   :  { %5307 = vmatpush1.bf16.msra.mxu0 %v9064_v33  ;;  %v9147_v33 = vld [vmem:[#allocation11 + $0x38] ss:$12 sps:$4 sm:$0xff]  }
 0x413   :  { %5308 = vmatprep.subr.bf16.mxu0 %v9069_v53  ;;  %v9148_v53 = vld [vmem:[#allocation11 + $0x110] ss:$12 sps:$4 sm:$0xff]  }
 0x414   :  { %6460 = vmatpush1.bf16.msra.mxu1 %v9115_v54  ;;  %v9149_v54 = vld [vmem:[#allocation11 + $0x50] ss:$12 sps:$4 sm:$0xff]  }
 0x415   :  { %6461 = vmatprep.subr.bf16.mxu1 %v9120_v55  ;;  %v9150_v55 = vld [vmem:[#allocation11 + $0x128] ss:$12 sps:$4 sm:$0xff]  }
 0x416   :  { %5309 = vmatpush1.bf16.msra.mxu0 %v9067_v56  ;;  %v9151_v56 = vld [vmem:[#allocation11 + $0x68] ss:$12 sps:$4 sm:$0xff]  }
 0x417   :  { %5321 = vmatprep.subr.bf16.mxu0 %v9072_v13  ;;  %v9152_v13 = vld [vmem:[#allocation11 + $0x140] ss:$12 sps:$4 sm:$0xff]  }
 0x418   :  { %6462 = vmatpush1.bf16.msra.mxu1 %v9118_v57  ;;  %v9153_v57 = vld [vmem:[#allocation11 + $0x80] ss:$12 sps:$4 sm:$0xff]  }
 0x419   :  { %5311 = vmatmul.mubr.bf16.vlgmr.msra.gmra.mrb[16].mxu0 %v9742_v14  ;;  %6463 = vmatprep.subr.bf16.mxu1 %v9123_v62  ;;  %v9132_v14 = vld [vmem:[#allocation11 + $0x424] ss:$12 sps:$4 sm:$0xff]  }
 0x41a   :  { %5322 = vmatpush1.bf16.msra.mxu0 %v9070_v17  ;;  %5353 = vmatprep.mubr.bf16.mxu0 %v9465_v4  ;;  %v9130_v4 = vld [vmem:[#allocation11 + $0x420] ss:$12 sps:$4 sm:$0xff]   ;;  %v9154_v62 = vld [vmem:[#allocation11 + $0x158] ss:$12 sps:$4 sm:$0xff]   ;;  %v9156_v17 = vld [vmem:[#allocation11 + $0x170] ss:$12 sps:$4 sm:$0xff]  }
 0x41b   :  { %5323 = vmatprep.subr.bf16.mxu0 %v9075_v0  ;;  %v9157_v0 = vld [vmem:[#allocation11 + $0xb0] ss:$12 sps:$4 sm:$0xff]  }
 0x41c   :  { %6464 = vmatpush1.bf16.msra.mxu1 %v9121_v40  ;;  %v9158_v40 = vld [vmem:[#allocation11 + $0x248] ss:$12 sps:$4 sm:$0xff]  }
 0x41d   :  { %6465 = vmatprep.subr.bf16.mxu1 %v9126_v6  ;;  %v9159_v6 = vld [vmem:[#allocation11 + $0x188] ss:$12 sps:$4 sm:$0xff]  }
 0x41e   :  { %5324 = vmatpush1.bf16.msra.mxu0 %v9073_v7  ;;  %v9160_v7 = vld [vmem:[#allocation11 + $0x260] ss:$12 sps:$4 sm:$0xff]  }
 0x41f   :  { %5325 = vmatprep.subr.bf16.mxu0 %v9078_v8  ;;  %v9161_v8 = vld [vmem:[#allocation11 + $0x1a0] ss:$12 sps:$4 sm:$0xff]  }
 0x420   :  { %6466 = vmatpush1.bf16.msra.mxu1 %v9124_v9  ;;  %v9162_v9 = vld [vmem:[#allocation11 + $0x278] ss:$12 sps:$4 sm:$0xff]  }
 0x421   :  { %6467 = vmatprep.subr.bf16.mxu1 %v9129_v10  ;;  %v9163_v10 = vld [vmem:[#allocation11 + $0x1b8] ss:$12 sps:$4 sm:$0xff]  }
 0x422   :  { %5326 = vmatpush1.bf16.msra.mxu0 %v9076_v11  ;;  %v9164_v11 = vld [vmem:[#allocation11 + $0x290] ss:$12 sps:$4 sm:$0xff]  }
 0x423   :  { %5327 = vmatprep.subr.bf16.mxu0 %v9081_v12  ;;  %v9165_v12 = vld [vmem:[#allocation11 + $0x1d0] ss:$12 sps:$4 sm:$0xff]  }
 0x424   :  { %6468 = vmatpush1.bf16.msra.mxu1 %v9127_v15  ;;  %v9166_v15 = vld [vmem:[#allocation11 + $0x2a8] ss:$12 sps:$4 sm:$0xff]  }
 0x425   :  { %6469 = vmatprep.subr.bf16.mxu1 %v9132_v14  ;;  %v9167_v14 = vld [vmem:[#allocation11 + $0x1e8] ss:$12 sps:$4 sm:$0xff]  }
 0x426   :  { %5328 = vmatpush1.bf16.msra.mxu0 %v9079_v18  ;;  %v9168_v18 = vld [vmem:[#allocation11 + $0x2c0] ss:$12 sps:$4 sm:$0xff]  }
 0x427   :  { %5329 = vmatprep.subr.bf16.mxu0 %v9084_v19  ;;  %v9170_v19 = vld [vmem:[#allocation11 + $0x2d8] ss:$12 sps:$4 sm:$0xff]  }
 0x428   :  { %6470 = vmatpush1.bf16.msra.mxu1 %v9130_v4  ;;  %v9172_v4 = vld [vmem:[#allocation11 + $0x2f0] ss:$12 sps:$4 sm:$0xff]  }
 0x429   :  { %6471 = vmatprep.subr.bf16.mxu1 %v9135_v20  ;;  %v9173_v20 = vld [vmem:[#allocation11 + $0x230] ss:$12 sps:$4 sm:$0xff]  }
 0x42a   :  { %5330 = vmatpush1.bf16.msra.mxu0 %v9082_v21  ;;  %v9174_v21 = vld [vmem:[#allocation11 + $0x3c8] ss:$12 sps:$4 sm:$0xff]  }
 0x42b   :  { %5331 = vmatprep.subr.bf16.mxu0 %v9087_v27  ;;  %v9175_v27 = vld [vmem:[#allocation11 + $0x308] ss:$12 sps:$4 sm:$0xff]  }
 0x42c   :  { %6472 = vmatpush1.bf16.msra.mxu1 %v9133_v16  ;;  %v9176_v16 = vld [vmem:[#allocation11 + $0x3e0] ss:$12 sps:$4 sm:$0xff]  }
 0x42d   :  { %6473 = vmatprep.subr.bf16.mxu1 %v9138_v29  ;;  %v9182_v29 = vld [vmem:[#allocation11 + $0x428] ss:$12 sps:$4 sm:$0xff]  }
 0x42e   :  { %5332 = vmatpush1.bf16.msra.mxu0 %v9085_v23  ;;  %v9177_v23 = vld [vmem:[#allocation11 + $0x320] ss:$12 sps:$4 sm:$0xff]  }
 0x42f   :  { %5333 = vmatprep.subr.bf16.mxu0 %v9090_v24  ;;  %v9178_v24 = vld [vmem:[#allocation11 + $0x3f8] ss:$12 sps:$4 sm:$0xff]  }
 0x430   :  { %6474 = vmatpush1.bf16.msra.mxu1 %v9136_v31  ;;  %v9183_v31 = vld [vmem:[#allocation11 + $0x368] ss:$12 sps:$4 sm:$0xff]  }
 0x431   :  { %6475 = vmatprep.subr.bf16.mxu1 %v9141_v34  ;;  %v9184_v34 = vld [vmem:[#allocation11 + $0x440] ss:$12 sps:$4 sm:$0xff]  }
 0x432   :  { %5334 = vmatpush1.bf16.msra.mxu0 %v9088_v25  ;;  %v9179_v25 = vld [vmem:[#allocation11 + $0x338] ss:$12 sps:$4 sm:$0xff]  }
 0x433   :  { %5335 = vmatprep.subr.bf16.mxu0 %v9093_v26  ;;  %v9180_v26 = vld [vmem:[#allocation11 + $0x410] ss:$12 sps:$4 sm:$0xff]  }
 0x434   :  { %6476 = vmatpush1.bf16.msra.mxu1 %v9139_v35  ;;  %v9186_v35 = vld [vmem:[#allocation11 + $0x458] ss:$12 sps:$4 sm:$0xff]  }
 0x435   :  { %7777 = vmatprep.subr.bf16.mxu1 %v9142_v36  ;;  %v9187_v36 = vld [vmem:[#allocation11 + $0x398] ss:$12 sps:$4 sm:$0xff]  }
 0x436   :  { %5336 = vmatpush1.bf16.msra.mxu0 %v9091_v28  ;;  %v9181_v28 = vld [vmem:[#allocation11 + $0x350] ss:$12 sps:$4 sm:$0xff]  }
 0x439   :  { %5354 = vmatmul.mubr.bf16.vlgmr.msra.gmra.mrb[16].mxu0 %v9752_v46 }
 0x50c   :  { %v5355_v38 = vpop.f32.mrb[16].mxu0 }
 0x50d   :  { %v7902_v46 = vadd.f32 %v5355_v38, %v1939_v37  ;;  %v5357_v43 = vpop.f32.mrb[17].mxu0  ;;  %v9190_v38 = vld [vmem:[#allocation14 + $0x40] sm:$0xff]  }
 0x50e   :  { %v7903_v44 = vadd.f32 %v5357_v43, %v1943_v45  ;;  %v5359_v47 = vpop.f32.mrb[18].mxu0  ;;  %v9192_v43 = vld [vmem:[#allocation14 + $0x48] sm:$0xff]  }
 0x50f   :  { %v7904_v48 = vadd.f32 %v5359_v47, %v1939_v37  ;;  %v5361_v52 = vpop.f32.mrb[19].mxu0  ;;  %v5368_v49 = vmax.f32 %v7902_v46, 0.0  ;;  %v9188_v37 = vld [vmem:[#allocation11 + $0x470] ss:$12 sps:$4 sm:$0xff]   ;;  %v9191_v46 = vld [vmem:[#allocation14] sm:$0xff]   ;;  %v9194_v47 = vld [vmem:[#allocation14 + $0x50] sm:$0xff]  }
 0x510   :  { %v7905_v32 = vadd.f32 %v5361_v52, %v1943_v45  ;;  %v5369_v30 = vmax.f32 %v7903_v44, 0.0  ;;  %v9189_v45 = vld [vmem:[#allocation11 + $0x3b0] ss:$12 sps:$4 sm:$0xff]  }
 0x511   :  { %v5374_v2 = vmax.f32 %v7904_v48, 0.0  ;;  %v9193_v44 = vld [vmem:[#allocation14 + $0x8] sm:$0xff]   ;;  %v9195_v48 = vld [vmem:[#allocation14 + $0x10] sm:$0xff]   ;;  %v9196_v52 = vld [vmem:[#allocation14 + $0x58] sm:$0xff]  }
 0x512   :  { %v5375_v50 = vmax.f32 %v7905_v32, 0.0  ;;  %v9197_v32 = vld [vmem:[#allocation14 + $0x18] sm:$0xff]  }
 0x513   :  { %v9805_v60 = vpack.c.bf16 %v5374_v2, %v5368_v49  ;;  %v9198_v49 = vld [vmem:[#allocation14 + $0x60] sm:$0xff]  }
 0x514   :  { %v9807_v51 = vpack.c.bf16 %v5375_v50, %v5369_v30  ;;  %v9199_v2 = vld [vmem:[#allocation14 + $0x20] sm:$0xff]   ;;  %v9200_v30 = vld [vmem:[#allocation14 + $0x68] sm:$0xff]  }
 0x515   :  { %v9201_v50 = vld [vmem:[#allocation14 + $0x28] sm:$0xff]  }
 0x516   :  { %6477 = vmatprep.mubr.bf16.mxu1 %v9807_v51 }
 0x517   :  { %6478 = vmatmul.mubr.bf16.vlgmr.msra.gmra.mrb[16].mxu1 %v9805_v60 }
 0x518   :  { %7778 = vmatpush3.bf16.msra.mxu1 %v9143_v59  ;;  %6520 = vmatprep.mubr.bf16.mxu1 %v9786_v3  ;;  %v9155_v3 = vld [vmem:[#allocation11 + $0x98] ss:$12 sps:$4 sm:$0xff]   ;;  %v9204_v59 = vld [vmem:[#allocation14 + $0x78] sm:$0xff]  }
 0x519   :  { %7779 = vmatprep.subr.bf16.mxu1 %v9144_v39  ;;  %v9205_v39 = vld [vmem:[#allocation14 + $0x38] sm:$0xff]  }
 0x51c   :  { %7780 = vmatpush3.bf16.msra.mxu1 %v9145_v61  ;;  %v9466_v61 = vmov 0.0  }
 0x51d   :  { %7781 = vmatprep.subr.bf16.mxu1 %v9146_v22  ;;  %v5574_v22 = vld [vmem:[#allocation13] sm:$0x7] }
 0x520   :  { %7782 = vmatpush3.bf16.msra.mxu1 %v9147_v33  ;;  %v5579_v33 = vrot.slane %v5574_v22, %v9680_v41  ;;  %v9207_v41 = vld [vmem:[#allocation14 + $0x88] sm:$0xff]  }
 0x521   :  { %7783 = vmatprep.subr.bf16.mxu1 %v9148_v53  ;;  %v5583_v53 = vrot.slane %v5574_v22, %v9683_v42  ;;  %v9208_v42 = vld [vmem:[#allocation14 + $0x90] sm:$0xff]  }
 0x524   :  { %7784 = vmatpush3.bf16.msra.mxu1 %v9149_v54 }
 0x525   :  { %7785 = vmatprep.subr.bf16.mxu1 %v9150_v55 }
 0x528   :  { %7786 = vmatpush3.bf16.msra.mxu1 %v9151_v56 }
 0x529   :  { %7787 = vmatprep.subr.bf16.mxu1 %v9152_v13 }
 0x52c   :  { %7788 = vmatpush3.bf16.msra.mxu1 %v9153_v57 }
 0x52d   :  { %7789 = vmatprep.subr.bf16.mxu1 %v9154_v62 }
 0x530   :  { %7790 = vmatpush3.bf16.msra.mxu1 %v9155_v3 }
 0x531   :  { %7791 = vmatprep.subr.bf16.mxu1 %v9156_v17 }
 0x534   :  { %7792 = vmatpush3.bf16.msra.mxu1 %v9157_v0 }
 0x535   :  { %7799 = vmatprep.subr.bf16.mxu1 %v9158_v40 }
 0x537   :  { %6521 = vmatmul.mubr.bf16.vlgmr.msra.gmra.mrb[20].mxu1 %v9782_v58  ;;  %v9169_v58 = vld [vmem:[#allocation11 + $0x200] ss:$12 sps:$4 sm:$0xff]  }
 0x538   :  { %7800 = vmatpush3.bf16.msra.mxu1 %v9159_v6  ;;  %6561 = vmatprep.mubr.bf16.mxu1 %v9788_v5  ;;  %v9171_v5 = vld [vmem:[#allocation11 + $0x218] ss:$12 sps:$4 sm:$0xff]  }
 0x539   :  { %7801 = vmatprep.subr.bf16.mxu1 %v9160_v7 }
 0x53c   :  { %7802 = vmatpush3.bf16.msra.mxu1 %v9161_v8 }
 0x53d   :  { %7803 = vmatprep.subr.bf16.mxu1 %v9162_v9 }
 0x540   :  { %7804 = vmatpush3.bf16.msra.mxu1 %v9163_v10  ;;  %v9206_v10 = vld [vmem:[#allocation14 + $0x80] sm:$0xff]  }
 0x541   :  { %7805 = vmatprep.subr.bf16.mxu1 %v9164_v11  ;;  %v9209_v11 = vld [vmem:[#allocation14 + $0x98] sm:$0xff]  }
 0x544   :  { %7806 = vmatpush3.bf16.msra.mxu1 %v9165_v12  ;;  %v9210_v12 = vld [vmem:[#allocation14 + $0xa0] sm:$0xff]  }
 0x545   :  { %7807 = vmatprep.subr.bf16.mxu1 %v9166_v15  ;;  %v9211_v15 = vld [vmem:[#allocation14 + $0xa8] sm:$0xff]  }
 0x548   :  { %7808 = vmatpush3.bf16.msra.mxu1 %v9167_v14 }
 0x549   :  { %7809 = vmatprep.subr.bf16.mxu1 %v9168_v18  ;;  %v9212_v18 = vld [vmem:[#allocation14 + $0xb0] sm:$0xff]  }
 0x54c   :  { %7810 = vmatpush3.bf16.msra.mxu1 %v9169_v58 }
 0x54d   :  { %7811 = vmatprep.subr.bf16.mxu1 %v9170_v19 }
 0x550   :  { %7812 = vmatpush3.bf16.msra.mxu1 %v9171_v5 }
 0x551   :  { %7813 = vmatprep.subr.bf16.mxu1 %v9172_v4 }
 0x554   :  { %7814 = vmatpush3.bf16.msra.mxu1 %v9173_v20 }
 0x555   :  { %7821 = vmatprep.subr.bf16.mxu1 %v9174_v21  ;;  %v9213_v21 = vld [vmem:[#allocation14 + $0xb8] sm:$0xff]  }
 0x557   :  { %6562 = vmatmul.mubr.bf16.vlgmr.msra.gmra.mrb[24].mxu1 %v9784_v1  ;;  %v9185_v1 = vld [vmem:[#allocation11 + $0x380] ss:$12 sps:$4 sm:$0xff]  }
 0x558   :  { %7822 = vmatpush3.bf16.msra.mxu1 %v9175_v27  ;;  %6602 = vmatprep.mubr.bf16.mxu1 %v9807_v51  ;;  %v9203_v51 = vld [vmem:[#allocation14 + $0x30] sm:$0xff]   ;;  %v5587_v27 = vrot.slane %v5574_v22, %v9698_v63 }
 0x559   :  { %7823 = vmatprep.subr.bf16.mxu1 %v9176_v16 }
 0x55c   :  { %7824 = vmatpush3.bf16.msra.mxu1 %v9177_v23 }
 0x55d   :  { %7825 = vmatprep.subr.bf16.mxu1 %v9178_v24 }
 0x560   :  { %7826 = vmatpush3.bf16.msra.mxu1 %v9179_v25 }
 0x561   :  { %7827 = vmatprep.subr.bf16.mxu1 %v9180_v26 }
 0x564   :  { %7828 = vmatpush3.bf16.msra.mxu1 %v9181_v28 }
 0x565   :  { %7829 = vmatprep.subr.bf16.mxu1 %v9182_v29 }
 0x568   :  { %7830 = vmatpush3.bf16.msra.mxu1 %v9183_v31 }
 0x569   :  { %7831 = vmatprep.subr.bf16.mxu1 %v9184_v34 }
 0x56c   :  { %7832 = vmatpush3.bf16.msra.mxu1 %v9185_v1 }
 0x56d   :  { %7833 = vmatprep.subr.bf16.mxu1 %v9186_v35 }
 0x570   :  { %7834 = vmatpush3.bf16.msra.mxu1 %v9187_v36 }
 0x571   :  { %7835 = vmatprep.subr.bf16.mxu1 %v9188_v37 }
 0x574   :  { %7836 = vmatpush3.bf16.msra.mxu1 %v9189_v45 }
 0x575   :  { %7843 = vmatprep.subr.bf16.mxu1 %v9190_v38 }
 0x577   :  { %6603 = vmatmul.mubr.bf16.vlgmr.msra.gmra.mrb[28].mxu1 %v9805_v60  ;;  %v9202_v60 = vld [vmem:[#allocation14 + $0x70] sm:$0xff]  }
 0x578   :  { %7844 = vmatpush3.bf16.msra.mxu1 %v9191_v46 }
 0x579   :  { %7845 = vmatprep.subr.bf16.mxu1 %v9192_v43 }
 0x57c   :  { %7846 = vmatpush3.bf16.msra.mxu1 %v9193_v44 }
 0x57d   :  { %7847 = vmatprep.subr.bf16.mxu1 %v9194_v47 }
 0x580   :  { %7848 = vmatpush3.bf16.msra.mxu1 %v9195_v48 }
 0x581   :  { %7849 = vmatprep.subr.bf16.mxu1 %v9196_v52 }
 0x584   :  { %7850 = vmatpush3.bf16.msra.mxu1 %v9197_v32 }
 0x585   :  { %7851 = vmatprep.subr.bf16.mxu1 %v9198_v49 }
 0x588   :  { %7852 = vmatpush3.bf16.msra.mxu1 %v9199_v2 }
 0x589   :  { %7853 = vmatprep.subr.bf16.mxu1 %v9200_v30 }
 0x58c   :  { %7854 = vmatpush3.bf16.msra.mxu1 %v9201_v50 }
 0x58d   :  { %7855 = vmatprep.subr.bf16.mxu1 %v9202_v60  ;;  %v7752_v60 = vld [vmem:[#allocation16] ss:$0 sm:$0xff] }
 0x590   :  { %7856 = vmatpush3.bf16.msra.mxu1 %v9203_v51 }
 0x591   :  { %7857 = vmatprep.subr.bf16.mxu1 %v9204_v59 }
 0x594   :  { %7858 = vmatpush3.bf16.msra.mxu1 %v9205_v39 }
 0x595   :  { %7874 = vmatprep.subr.bf16.mxu1 %v9466_v61 }
 0x5ea   :  { %v6479_v54 = vpop.f32.mrb[16].mxu1 }
 0x5eb   :  { %v7906_v55 = vadd.f32 %v6479_v54, %v5579_v33  ;;  %v6481_v56 = vpop.f32.mrb[17].mxu1 }
 0x5ec   :  { %v7907_v13 = vadd.f32 %v6481_v56, %v5583_v53  ;;  %v6483_v57 = vpop.f32.mrb[18].mxu1 }
 0x5ed   :  { %v7908_v62 = vadd.f32 %v6483_v57, %v5579_v33  ;;  %v6485_v3 = vpop.f32.mrb[19].mxu1  ;;  %v6611_v0 = vmax.f32 %v7906_v55, 0.0 }
 0x5ee   :  { %v7909_v17 = vadd.f32 %v6485_v3, %v5583_v53  ;;  %v6612_v6 = vmax.f32 %v7907_v13, 0.0 }
 0x5ef   :  { %v6614_v40 = vmax.f32 %v7908_v62, 0.0 }
 0x5f0   :  { %v6615_v7 = vmax.f32 %v7909_v17, 0.0 }
 0x5f1   :  { %v6617_v8 = vpack.c.bf16 %v6614_v40, %v6611_v0 }
 0x5f2   :  { %v6618_v9 = vpack.c.bf16 %v6615_v7, %v6612_v6 }
 0x5f4   :  { %6851 = vmatprep.mubr.bf16.mxu1 %v6618_v9 }
 0x5f5   :  { %6852 = vmatmul.mubr.bf16.vlgmr.msra.gmra.mrb[32].mxu1 %v6617_v8 }
 0x5f6   :  { %7875 = vmatpush3.bf16.msra.mxu1 %v9206_v10  ;;  %7890 = vmatprep.mubr.msk.bf16.mxu1 %vm9467_vm2, %v9466_v61 }
 0x5f7   :  { %7876 = vmatprep.subr.bf16.mxu1 %v9466_v61 }
 0x5fa   :  { %7877 = vmatpush3.bf16.msra.mxu1 %v9207_v41 }
 0x5fb   :  { %7878 = vmatprep.subr.bf16.mxu1 %v9466_v61 }
 0x5fe   :  { %7879 = vmatpush3.bf16.msra.mxu1 %v9208_v42 }
 0x5ff   :  { %7880 = vmatprep.subr.bf16.mxu1 %v9466_v61 }
 0x602   :  { %7881 = vmatpush3.bf16.msra.mxu1 %v9209_v11 }
 0x603   :  { %7882 = vmatprep.subr.bf16.mxu1 %v9466_v61 }
 0x606   :  { %7883 = vmatpush3.bf16.msra.mxu1 %v9210_v12 }
 0x607   :  { %7884 = vmatprep.subr.bf16.mxu1 %v9466_v61 }
 0x60a   :  { %v7793_v14 = vpop.f32.mrb[20].mxu1  ;;  %7885 = vmatpush3.bf16.msra.mxu1 %v9211_v15 }
 0x60b   :  { %v7794_v58 = vpop.f32.mrb[21].mxu1  ;;  %7886 = vmatprep.subr.bf16.mxu1 %v9466_v61 }
 0x60c   :  { %v7795_v19 = vadd.f32 %v7794_v58, %v7793_v14  ;;  %v7796_v5 = vpop.f32.mrb[22].mxu1 }
 0x60d   :  { %v7797_v4 = vpop.f32.mrb[23].mxu1 }
 0x60e   :  { %v7798_v20 = vadd.f32 %v7797_v4, %v7796_v5  ;;  %7887 = vmatpush3.bf16.msra.mxu1 %v9212_v18  ;;  %v6523_v24 = vadd.f32 %v7795_v19, %v5587_v27 }
 0x60f   :  { %7888 = vmatprep.subr.bf16.mxu1 %v9466_v61 }
 0x610   :  { %v6526_v29 = vadd.f32 %v7798_v20, %v5587_v27 }
 0x612   :  { %7889 = vmatpush3.bf16.msra.mxu1 %v9213_v21 }
 0x62a   :  { %v7815_v16 = vpop.f32.mrb[24].mxu1 }
 0x62b   :  { %v7816_v23 = vpop.f32.mrb[25].mxu1 }
 0x62c   :  { %v7817_v25 = vadd.f32 %v7816_v23, %v7815_v16  ;;  %v7818_v26 = vpop.f32.mrb[26].mxu1 }
 0x62d   :  { %v7819_v28 = vpop.f32.mrb[27].mxu1 }
 0x62e   :  { %v6564_v31 = vadd.f32 %v7817_v25, %v6523_v24  ;;  %v7820_v34 = vadd.f32 %v7819_v28, %v7818_v26 }
 0x630   :  { %v6567_v1 = vadd.f32 %v7820_v34, %v6526_v29 }
 0x64a   :  { %v7837_v35 = vpop.f32.mrb[28].mxu1 }
 0x64b   :  { %v7838_v36 = vpop.f32.mrb[29].mxu1 }
 0x64c   :  { %v7839_v37 = vadd.f32 %v7838_v36, %v7837_v35  ;;  %v7840_v45 = vpop.f32.mrb[30].mxu1 }
 0x64d   :  { %v7841_v38 = vpop.f32.mrb[31].mxu1 }
 0x64e   :  { %v6605_v46 = vadd.f32 %v7839_v37, %v6564_v31  ;;  %v7842_v43 = vadd.f32 %v7841_v38, %v7840_v45 }
 0x650   :  { %v6608_v44 = vadd.f32 %v7842_v43, %v6567_v1  ;;  %v6613_v47 = vmax.f32 %v6605_v46, 0.0 }
 0x652   :  { %v6616_v63 = vmax.f32 %v6608_v44, 0.0 }
 0x654   :  { %v6619_v48 = vpack.c.bf16 %v6616_v63, %v6613_v47 }
 0x656   :  { %7891 = vmatmul.mubr.bf16.vlgmr.msra.gmra.mrb[36].mxu1 %v6619_v48 }
 0x6c8   :  { %v7859_v52 = vpop.f32.mrb[32].mxu1 }
 0x6c9   :  { %v7860_v32 = vpop.f32.mrb[33].mxu1 }
 0x6ca   :  { %v7861_v49 = vadd.f32 %v7860_v32, %v7859_v52  ;;  %v7862_v2 = vpop.f32.mrb[34].mxu1 }
 0x6cb   :  { %v7863_v30 = vpop.f32.mrb[35].mxu1 }
 0x6cc   :  { %v7864_v50 = vadd.f32 %v7863_v30, %v7862_v2  ;;  %v6854_v51 = vadd.f32 %v7861_v49, %v7752_v60 }
 0x6ce   :  { %v6857_v22 = vadd.f32 %v7864_v50, %v7752_v60 }
 0x729   :  { %v6894_v59 = vpop.f32.mrb[36].mxu1 }
 0x72a   :  { %v6895_v39 = vadd.f32 %v6894_v59, %v6854_v51  ;;  %v7892_v61 = vpop.f32.mrb[37].mxu1 }
 0x72b   :  { %v6897_v33 = vpop.f32.mrb[38].mxu1 }
 0x72c   :  { %v6901_v53 = vmax.f32 %v6895_v39, 0.0  ;;  %v6898_v54 = vadd.f32 %v6897_v33, %v6857_v22  ;;  %v7893_v55 = vpop.f32.mrb[39].mxu1 }
 0x72e   :  { %6903 = vst [vmem:[#allocation17] sm:$0xff] %v6901_v53  ;;  %v6902_v56 = vmax.f32 %v6898_v54, 0.0 }
 0x730   :  { %6904 = vst [vmem:[#allocation17 + $0x8] sm:$0xff] %v6902_v56 }
 0x731   :  { %9423 = shalt.err (!%p9420_p6)
}
 0x732   :  { %s9424_s30 = scalar_lea.hbm %s9841_s9, 256 }
 0x733   :  { %p9425_p7 = scmp.ne.s32.totalorder %s9841_s9, %s9424_s30  ;;  %p9428_p8 = scmp.lt.u32.totalorder %s9424_s30, %s9841_s9 }
 0x735   :  { %p9430_p9 = pnand %p9428_p8, %p9425_p7 }
 0x737   :  { %9433 = shalt.err (!%p9430_p9)
}
 0x738   :  { %s9469_s14 = smov 128   ;;  %s9470_s15 = smov 8  }
 0x739   :  { %6916 = dma.vmem_to_hbm [thread:$0]  %s6911_s7, 256, %s9841_s9, [#allocation4], %s9469_s14, %s9469_s14, %s9470_s15  }
 0x73a   :  { %9444 = dma.done.wait [#allocation4], 256  }
 0x73b   :  { %9445 = vsyncadd [#allocation4], 4294967040 }
 0x73c   :  { %6920 = vsyncpa [#allocation3], 1 }
 0x73d   :  { %6921 = vsyncpa [#allocation6], 1 }
 0x73e   :  { %6922 = vsyncpa [#allocation9], 1 }
 0x73f   :  { %6923 = vsyncpa [#allocation12], 1 }
 0x740   :  { %6924 = vsyncpa [#allocation15], 1 }
 0x741   :  { %6925 = vsyncpa [#allocation4], 1 }

</bundles_post_ra>
